<compile_context>
chip_gen: v7x
topology: tpu7x:2x2x1
jax: 0.10.0
libtpu: 0.0.40
codegen_flags: <defaults>
</compile_context>

<pallas_src>
import jax
import jax.numpy as jnp
import numpy as np
from jax import lax
from jax.experimental import pallas as pl
from jax.experimental.pallas import tpu as pltpu

EPS = 1e-5


def cnn_classifier_forward(x, params):
    (wc, bc, g2, be2, m2, v2, w1, b1, g1, be1, m1, v1, w2, b2) = params
    N, _, H, W = x.shape
    Ho, Wo = H + 2, W + 2              # Conv2d(k=3, s=1, pad=2) output spatial dims
    Hp, Wp = Ho // 2, Wo // 2          # after MaxPool2d(2)
    S = Hp * Wp                        # pooled spatial positions per sample (276)
    SPAD = ((S + 127) // 128) * 128    # lane-aligned spatial size (384)
    C = wc.shape[0]                    # 32 conv output channels
    G = N * SPAD                       # lanes per pool-offset group (multiple of 128)
    M = 4 * G                          # conv-matmul M dimension
    J = w2.shape[0]                    # 64 hidden units
    O = w2.shape[1]                    # 8 classes

    # ---- fold BatchNorm2d (eval) into conv weight/bias -------------------------------
    s2 = g2 / jnp.sqrt(v2 + EPS)
    wcf = wc.reshape(C, 9) * s2[:, None]                  # (32, 9), tap index = di*3+dj
    bcf = (bc * s2 + (be2 - m2 * s2)).reshape(C, 1)       # (32, 1)

    # ---- fold BatchNorm1d (eval) into Linear1 weight/bias ----------------------------
    s1 = g1 / jnp.sqrt(v1 + EPS)
    w1f = w1 * s1[None, :]                                # (8832, 64)
    b1f = (b1 * s1 + (be1 - m1 * s1)).reshape(1, J)       # (1, 64)
    # NCHW flatten index = c*S + s  ->  (C, S, 64); put S on lanes (lane-dense layout).
    w1rt = w1f.reshape(C, S, J).transpose(0, 2, 1)        # (32, 64, 276)

    # ---- im2col patches: pool-offset major, pooled spatial on lanes (wrapper glue) ---
    xpad = jnp.pad(x[:, 0], ((0, 0), (2, 2), (2, 2)))     # (N, H+4, W+4)
    taps = jnp.stack([xpad[:, di:di + Ho, dj:dj + Wo]
                      for di in range(3) for dj in range(3)], axis=0)      # (9,N,Ho,Wo)
    t6 = taps.reshape(9, N, Hp, 2, Wp, 2).transpose(0, 3, 5, 1, 2, 4)      # (9,ph,pw,N,Hp,Wp)
    pat = t6.reshape(9, 4, N, S)
    pat = jnp.pad(pat, ((0, 0), (0, 0), (0, 0), (0, SPAD - S)))            # zero-pad lanes
    pat = pat.reshape(9, M)                               # (9, 4*N*SPAD)

    def fused_kernel(pat_ref, wc_ref, bc_ref, w1_hbm, b1_ref, w2_ref, b2_ref,
                     o_ref, w1_vmem, w1_sem):
        # Start the dominant HBM read (w1, ~2.26 MB) so it overlaps the conv/pool stage.
        w1_cp = pltpu.make_async_copy(w1_hbm, w1_vmem, w1_sem)
        w1_cp.start()

        # Conv as one matmul: (C, 9) @ (9, 4*N*SPAD); BN2d folded; bias + ReLU.
        z = jnp.dot(wc_ref[...], pat_ref[...], preferred_element_type=jnp.float32)
        z = jnp.maximum(z + bc_ref[...], 0.0)             # (C, M)

        # MaxPool2d(2): lanes ordered (pool_offset, n, spad); each group is 128-aligned.
        zp = jnp.maximum(jnp.maximum(z[:, 0:G], z[:, G:2 * G]),
                         jnp.maximum(z[:, 2 * G:3 * G], z[:, 3 * G:4 * G]))   # (C, N*SPAD)
        feat = zp.reshape(C, N, SPAD)[:, :, :S]           # (C, N, S); drop zero-pad lanes

        # Dense head: h[n,j] = sum_{c,s} feat[c,n,s] * w1rt[c,j,s]   (BN1d folded).
        w1_cp.wait()
        hc = lax.dot_general(feat, w1_vmem[...],
                             dimension_numbers=(((2,), (2,)), ((0,), (0,))),
                             preferred_element_type=jnp.float32)              # (C, N, 64)
        h = jnp.maximum(jnp.sum(hc, axis=0) + b1_ref[...], 0.0)               # ReLU
        # Dropout(0.5) is identity in eval/inference mode.
        logits = jnp.dot(h, w2_ref[...], preferred_element_type=jnp.float32) + b2_ref[...]
        mx = jnp.max(logits, axis=-1, keepdims=True)      # Softmax(dim=1)
        e = jnp.exp(logits - mx)
        o_ref[...] = e * pl.reciprocal(jnp.sum(e, axis=-1, keepdims=True))

    probs = pl.pallas_call(
        fused_kernel,
        out_shape=jax.ShapeDtypeStruct((N, O), jnp.float32),
        in_specs=[
            pl.BlockSpec(memory_space=pltpu.MemorySpace.VMEM),   # patches (9, M)
            pl.BlockSpec(memory_space=pltpu.MemorySpace.VMEM),   # folded conv weight (32, 9)
            pl.BlockSpec(memory_space=pltpu.MemorySpace.VMEM),   # folded conv bias (32, 1)
            pl.BlockSpec(memory_space=pl.ANY),                   # w1rt stays in HBM; manual DMA
            pl.BlockSpec(memory_space=pltpu.MemorySpace.VMEM),   # folded b1 (1, 64)
            pl.BlockSpec(memory_space=pltpu.MemorySpace.VMEM),   # w2 (64, 8)
            pl.BlockSpec(memory_space=pltpu.MemorySpace.VMEM),   # b2 (1, 8)
        ],
        out_specs=pl.BlockSpec(memory_space=pltpu.MemorySpace.VMEM),
        scratch_shapes=[
            pltpu.VMEM((C, J, S), jnp.float32),                  # w1 landing buffer (2.26 MB)
            pltpu.SemaphoreType.DMA,
        ],
    )(pat, wcf, bcf, w1rt, b1f, w2, b2.reshape(1, O))
    return probs


# ------------------------------ pure-JAX reference ------------------------------------

def reference_forward(x, params):
    (wc, bc, g2, be2, m2, v2, w1, b1, g1, be1, m1, v1, w2, b2) = params
    y = jax.lax.conv_general_dilated(x, wc, (1, 1), ((2, 2), (2, 2)),
                                     dimension_numbers=("NCHW", "OIHW", "NCHW"))
    y = y + bc.reshape(1, -1, 1, 1)
    y = (y - m2.reshape(1, -1, 1, 1)) / jnp.sqrt(v2.reshape(1, -1, 1, 1) + EPS)
    y = y * g2.reshape(1, -1, 1, 1) + be2.reshape(1, -1, 1, 1)
    y = jnp.maximum(y, 0.0)
    y = jax.lax.reduce_window(y, -jnp.inf, jax.lax.max, (1, 1, 2, 2), (1, 1, 2, 2), "VALID")
    f = y.reshape(x.shape[0], -1)
    h = f @ w1 + b1
    h = (h - m1) / jnp.sqrt(v1 + EPS) * g1 + be1
    h = jnp.maximum(h, 0.0)
    logits = h @ w2 + b2
    return jax.nn.softmax(logits, axis=1)


# --------------------------------------- main ------------------------------------------

if __name__ == "__main__":
    key = jax.random.PRNGKey(0)
    keys = jax.random.split(key, 16)
    N = 2
    # (N, 1, 22, 44): the spatial size implied by Linear(64*6*23 = 8832) after conv+pool.
    x = jax.random.normal(keys[0], (N, 1, 22, 44), jnp.float32)

    wc = 0.1 * jax.random.normal(keys[1], (32, 1, 3, 3), jnp.float32)   # Conv2d weight
    bc = 0.1 * jax.random.normal(keys[2], (32,), jnp.float32)           # Conv2d bias
    g2 = 1.0 + 0.1 * jax.random.normal(keys[3], (32,), jnp.float32)     # BN2d gamma
    be2 = 0.1 * jax.random.normal(keys[4], (32,), jnp.float32)          # BN2d beta
    m2 = 0.1 * jax.random.normal(keys[5], (32,), jnp.float32)           # BN2d running_mean
    v2 = jax.random.uniform(keys[6], (32,), jnp.float32, 0.5, 1.5)      # BN2d running_var
    w1 = 0.02 * jax.random.normal(keys[7], (8832, 64), jnp.float32)     # Linear1 (x @ W layout)
    b1 = 0.1 * jax.random.normal(keys[8], (64,), jnp.float32)
    g1 = 1.0 + 0.1 * jax.random.normal(keys[9], (64,), jnp.float32)     # BN1d gamma
    be1 = 0.1 * jax.random.normal(keys[10], (64,), jnp.float32)
    m1 = 0.1 * jax.random.normal(keys[11], (64,), jnp.float32)
    v1 = jax.random.uniform(keys[12], (64,), jnp.float32, 0.5, 1.5)
    w2 = 0.1 * jax.random.normal(keys[13], (64, 8), jnp.float32)        # Linear2
    b2 = 0.1 * jax.random.normal(keys[14], (8,), jnp.float32)
    params = (wc, bc, g2, be2, m2, v2, w1, b1, g1, be1, m1, v1, w2, b2)

    out = jax.block_until_ready(jax.jit(cnn_classifier_forward)(x, params))
    ref = jax.block_until_ready(jax.jit(reference_forward)(x, params))

    assert out.shape == (N, 8)
    np.testing.assert_allclose(np.asarray(out), np.asarray(ref), rtol=2e-2, atol=2e-3)
    assert np.allclose(np.asarray(out).sum(axis=1), 1.0, atol=1e-3)
    print("KERNEL_OK")
</pallas_src>

<mosaic_0001>
module attributes {stable_mosaic.version = 11 : i64} {
  func.func @fused_kernel(%arg0: memref<9x3072xf32, #tpu.memory_space<vmem>>, %arg1: memref<32x9xf32, #tpu.memory_space<vmem>>, %arg2: memref<32x1xf32, #tpu.memory_space<vmem>>, %arg3: memref<32x64x276xf32, #tpu.memory_space<any>>, %arg4: memref<1x64xf32, #tpu.memory_space<vmem>>, %arg5: memref<64x8xf32, #tpu.memory_space<vmem>>, %arg6: memref<1x8xf32, #tpu.memory_space<vmem>>, %arg7: memref<2x8xf32, #tpu.memory_space<vmem>>, %arg8: memref<32x64x276xf32, #tpu.memory_space<vmem>>, %arg9: memref<!tpu.dma_semaphore, #tpu.memory_space<semaphore_mem>>) attributes {dimension_semantics = [], scalar_prefetch = 0 : i64, scratch_operands = 2 : i64, tpu.core_type = #tpu.core_type<tc>} {
    tpu.enqueue_dma source(%arg3 : memref<32x64x276xf32, #tpu.memory_space<any>>) target(%arg8 : memref<32x64x276xf32, #tpu.memory_space<vmem>>) target_semaphore(%arg9 : memref<!tpu.dma_semaphore, #tpu.memory_space<semaphore_mem>>)
    %c0 = arith.constant 0 : index
    %c0_0 = arith.constant 0 : index
    %0 = vector.load %arg1[%c0, %c0_0] : memref<32x9xf32, #tpu.memory_space<vmem>>, vector<32x9xf32>
    %c0_1 = arith.constant 0 : index
    %c0_2 = arith.constant 0 : index
    %1 = vector.load %arg0[%c0_1, %c0_2] : memref<9x3072xf32, #tpu.memory_space<vmem>>, vector<9x3072xf32>
    %cst = arith.constant dense<0.000000e+00> : vector<32x3072xf32>
    %2 = tpu.matmul %0, %1, %cst {dimension_numbers = #tpu.dot_dimension_numbers<[1], [0], [0], [1], [0, 0, 1, 1], [], []>} : vector<32x9xf32>, vector<9x3072xf32>, vector<32x3072xf32> -> vector<32x3072xf32>
    %c0_3 = arith.constant 0 : index
    %c0_4 = arith.constant 0 : index
    %3 = vector.load %arg2[%c0_3, %c0_4] : memref<32x1xf32, #tpu.memory_space<vmem>>, vector<32x1xf32>
    %4 = vector.broadcast %3 : vector<32x1xf32> to vector<32x3072xf32>
    %5 = arith.addf %2, %4 : vector<32x3072xf32>
    %cst_5 = arith.constant 0.000000e+00 : f32
    %6 = vector.broadcast %cst_5 : f32 to vector<32x3072xf32>
    %7 = arith.maximumf %5, %6 : vector<32x3072xf32>
    %8 = vector.extract_strided_slice %7 {offsets = [0, 0], sizes = [32, 768], strides = [1, 1]} : vector<32x3072xf32> to vector<32x768xf32>
    %9 = vector.extract_strided_slice %7 {offsets = [0, 768], sizes = [32, 768], strides = [1, 1]} : vector<32x3072xf32> to vector<32x768xf32>
    %10 = arith.maximumf %8, %9 : vector<32x768xf32>
    %11 = vector.extract_strided_slice %7 {offsets = [0, 1536], sizes = [32, 768], strides = [1, 1]} : vector<32x3072xf32> to vector<32x768xf32>
    %12 = vector.extract_strided_slice %7 {offsets = [0, 2304], sizes = [32, 768], strides = [1, 1]} : vector<32x3072xf32> to vector<32x768xf32>
    %13 = arith.maximumf %11, %12 : vector<32x768xf32>
    %14 = arith.maximumf %10, %13 : vector<32x768xf32>
    %15 = vector.shape_cast %14 : vector<32x768xf32> to vector<32x2x384xf32>
    %16 = vector.extract_strided_slice %15 {offsets = [0, 0, 0], sizes = [32, 2, 276], strides = [1, 1, 1]} : vector<32x2x384xf32> to vector<32x2x276xf32>
    tpu.wait_dma2 semaphore(%arg9 : memref<!tpu.dma_semaphore, #tpu.memory_space<semaphore_mem>>) src(%arg3 : memref<32x64x276xf32, #tpu.memory_space<any>>) dst(%arg8 : memref<32x64x276xf32, #tpu.memory_space<vmem>>)
    %c0_6 = arith.constant 0 : index
    %c0_7 = arith.constant 0 : index
    %c0_8 = arith.constant 0 : index
    %17 = vector.load %arg8[%c0_6, %c0_7, %c0_8] : memref<32x64x276xf32, #tpu.memory_space<vmem>>, vector<32x64x276xf32>
    %cst_9 = arith.constant dense<0.000000e+00> : vector<32x2x64xf32>
    %18 = tpu.matmul %16, %17, %cst_9 {dimension_numbers = #tpu.dot_dimension_numbers<[2], [2], [1], [1], [0, 0, 0, 1, 1, 1], [0], [0]>} : vector<32x2x276xf32>, vector<32x64x276xf32>, vector<32x2x64xf32> -> vector<32x2x64xf32>
    %cst_10 = arith.constant dense<0.000000e+00> : vector<2x64xf32>
    %19 = vector.multi_reduction <add>, %18, %cst_10 [0] : vector<32x2x64xf32> to vector<2x64xf32>
    %c0_11 = arith.constant 0 : index
    %c0_12 = arith.constant 0 : index
    %20 = vector.load %arg4[%c0_11, %c0_12] : memref<1x64xf32, #tpu.memory_space<vmem>>, vector<1x64xf32>
    %21 = vector.broadcast %20 : vector<1x64xf32> to vector<2x64xf32>
    %22 = arith.addf %19, %21 : vector<2x64xf32>
    %cst_13 = arith.constant 0.000000e+00 : f32
    %23 = vector.broadcast %cst_13 : f32 to vector<2x64xf32>
    %24 = arith.maximumf %22, %23 : vector<2x64xf32>
    %c0_14 = arith.constant 0 : index
    %c0_15 = arith.constant 0 : index
    %25 = vector.load %arg5[%c0_14, %c0_15] : memref<64x8xf32, #tpu.memory_space<vmem>>, vector<64x8xf32>
    %cst_16 = arith.constant dense<0.000000e+00> : vector<2x8xf32>
    %26 = tpu.matmul %24, %25, %cst_16 {dimension_numbers = #tpu.dot_dimension_numbers<[1], [0], [0], [1], [0, 0, 1, 1], [], []>} : vector<2x64xf32>, vector<64x8xf32>, vector<2x8xf32> -> vector<2x8xf32>
    %c0_17 = arith.constant 0 : index
    %c0_18 = arith.constant 0 : index
    %27 = vector.load %arg6[%c0_17, %c0_18] : memref<1x8xf32, #tpu.memory_space<vmem>>, vector<1x8xf32>
    %28 = vector.broadcast %27 : vector<1x8xf32> to vector<2x8xf32>
    %29 = arith.addf %26, %28 : vector<2x8xf32>
    %cst_19 = arith.constant dense<0xFF800000> : vector<2xf32>
    %30 = vector.multi_reduction <maximumf>, %29, %cst_19 [1] : vector<2x8xf32> to vector<2xf32>
    %31 = vector.shape_cast %30 : vector<2xf32> to vector<2x1xf32>
    %32 = vector.broadcast %31 : vector<2x1xf32> to vector<2x8xf32>
    %33 = arith.subf %29, %32 : vector<2x8xf32>
    %34 = math.exp %33 : vector<2x8xf32>
    %cst_20 = arith.constant dense<0.000000e+00> : vector<2xf32>
    %35 = vector.multi_reduction <add>, %34, %cst_20 [1] : vector<2x8xf32> to vector<2xf32>
    %36 = vector.shape_cast %35 : vector<2xf32> to vector<2x1xf32>
    %37 = tpu.reciprocal %36 : vector<2x1xf32> -> vector<2x1xf32>
    %38 = vector.broadcast %37 : vector<2x1xf32> to vector<2x8xf32>
    %39 = arith.mulf %34, %38 : vector<2x8xf32>
    %c0_21 = arith.constant 0 : index
    %c0_22 = arith.constant 0 : index
    %40 = vector.load %arg7[%c0_21, %c0_22] : memref<2x8xf32, #tpu.memory_space<vmem>>, vector<2x8xf32>
    tpu.vector_store %arg7[%c0_21, %c0_22], %39 {strides = array<i32>} : memref<2x8xf32, #tpu.memory_space<vmem>>, vector<2x8xf32>,
    return
  }
}

</mosaic_0001>

<bundles_post_ra>
// kernel: cnn_classifier_forward.1
= control target key start
LH: loop header
LB: loop body
LE: loop exit
PB: predicated region body
PF: predicated region fallthrough
CT: control target
= control target key end

     0   :  { %12 = vsyncpa [#allocation5], 0  ;;  %s19189_s0 = inlined_call_operand.vmem [shape: f32[9,3072], index: 0, kind: input, shape index: {}]   ;;  %s19190_s1 = inlined_call_operand.vmem [shape: f32[32,9], index: 1, kind: input, shape index: {}]   ;;  %s19191_s2 = inlined_call_operand.vmem [shape: f32[32,1], index: 2, kind: input, shape index: {}]   ;;  %s19192_s3 = inlined_call_operand.vmem [shape: f32[32,64,276], index: 3, kind: input, shape index: {}]   ;;  %s19193_s4 = inlined_call_operand.vmem [shape: f32[1,64], index: 4, kind: input, shape index: {}]   ;;  %s19194_s5 = inlined_call_operand.vmem [shape: f32[64,8], index: 5, kind: input, shape index: {}]   ;;  %s19195_s6 = inlined_call_operand.vmem [shape: f32[1,8], index: 6, kind: input, shape index: {}]   ;;  %s19196_s7 = inlined_call_operand.hbm [shape: f32[2,8], index: 7, kind: output, shape index: {}]  }
   0x1   :  { %v12665_v0 = vld [vmem:[%s19192_s3] sm:$0xff]  ;;  %v12670_v1 = vld [vmem:[%s19192_s3 + $0x8] sm:$0xff]  ;;  %v12675_v2 = vld [vmem:[%s19192_s3 + $0x10] sm:$0xff] }
   0x2   :  { %19227 = vst [vmem:[#allocation9_spill] sm:$0xff] %v12665_v0  ;;  %19228 = vst [vmem:[#allocation10_spill] sm:$0xff] %v12670_v1  ;;  %v12680_v3 = vld [vmem:[%s19192_s3 + $0x18] sm:$0xff]  ;;  %v12685_v4 = vld [vmem:[%s19192_s3 + $0x20] sm:$0xff] }
   0x3   :  { %19229 = vst [vmem:[#allocation11_spill] sm:$0xff] %v12675_v2  ;;  %19230 = vst [vmem:[#allocation12_spill] sm:$0xff] %v12680_v3  ;;  %v12690_v5 = vld [vmem:[%s19192_s3 + $0x28] sm:$0xff]  ;;  %v12695_v6 = vld [vmem:[%s19192_s3 + $0x30] sm:$0xff] }
   0x4   :  { %19231 = vst [vmem:[#allocation13_spill] sm:$0xff] %v12685_v4  ;;  %19232 = vst [vmem:[#allocation14_spill] sm:$0xff] %v12690_v5  ;;  %v12700_v7 = vld [vmem:[%s19192_s3 + $0x38] sm:$0xff]  ;;  %v12705_v8 = vld [vmem:[%s19192_s3 + $0x40] sm:$0xff] }
   0x5   :  { %19233 = vst [vmem:[#allocation15_spill] sm:$0xff] %v12695_v6  ;;  %19234 = vst [vmem:[#allocation16_spill] sm:$0xff] %v12700_v7  ;;  %v12710_v9 = vld [vmem:[%s19192_s3 + $0x48] sm:$0xff]  ;;  %v12715_v10 = vld [vmem:[%s19192_s3 + $0x50] sm:$0xff] }
   0x6   :  { %19235 = vst [vmem:[#allocation17_spill] sm:$0xff] %v12705_v8  ;;  %19236 = vst [vmem:[#allocation18_spill] sm:$0xff] %v12710_v9  ;;  %v12720_v11 = vld [vmem:[%s19192_s3 + $0x58] sm:$0xff]  ;;  %v12725_v12 = vld [vmem:[%s19192_s3 + $0x60] sm:$0xff] }
   0x7   :  { %19237 = vst [vmem:[#allocation19_spill] sm:$0xff] %v12715_v10  ;;  %19238 = vst [vmem:[#allocation20_spill] sm:$0xff] %v12720_v11  ;;  %v12730_v13 = vld [vmem:[%s19192_s3 + $0x68] sm:$0xff]  ;;  %v12735_v14 = vld [vmem:[%s19192_s3 + $0x70] sm:$0xff] }
   0x8   :  { %19239 = vst [vmem:[#allocation21_spill] sm:$0xff] %v12725_v12  ;;  %19240 = vst [vmem:[#allocation22_spill] sm:$0xff] %v12730_v13  ;;  %v12740_v15 = vld [vmem:[%s19192_s3 + $0x78] sm:$0xff]  ;;  %v12745_v16 = vld [vmem:[%s19192_s3 + $0x80] sm:$0xff] }
   0x9   :  { %19241 = vst [vmem:[#allocation23_spill] sm:$0xff] %v12735_v14  ;;  %19242 = vst [vmem:[#allocation24_spill] sm:$0xff] %v12740_v15  ;;  %v12750_v17 = vld [vmem:[%s19192_s3 + $0x88] sm:$0xff]  ;;  %v12755_v18 = vld [vmem:[%s19192_s3 + $0x90] sm:$0xff] }
   0xa   :  { %19243 = vst [vmem:[#allocation25_spill] sm:$0xff] %v12745_v16  ;;  %19244 = vst [vmem:[#allocation26_spill] sm:$0xff] %v12750_v17  ;;  %v12760_v19 = vld [vmem:[%s19192_s3 + $0x98] sm:$0xff]  ;;  %v12765_v20 = vld [vmem:[%s19192_s3 + $0xa0] sm:$0xff] }
   0xb   :  { %19245 = vst [vmem:[#allocation27_spill] sm:$0xff] %v12755_v18  ;;  %19246 = vst [vmem:[#allocation28_spill] sm:$0xff] %v12760_v19  ;;  %v12770_v21 = vld [vmem:[%s19192_s3 + $0xa8] sm:$0xff]  ;;  %v12775_v22 = vld [vmem:[%s19192_s3 + $0xb0] sm:$0xff] }
   0xc   :  { %19247 = vst [vmem:[#allocation29_spill] sm:$0xff] %v12765_v20  ;;  %19248 = vst [vmem:[#allocation30_spill] sm:$0xff] %v12770_v21  ;;  %v12780_v23 = vld [vmem:[%s19192_s3 + $0xb8] sm:$0xff]  ;;  %v12785_v24 = vld [vmem:[%s19192_s3 + $0xc0] sm:$0xff] }
   0xd   :  { %19249 = vst [vmem:[#allocation31_spill] sm:$0xff] %v12775_v22  ;;  %19250 = vst [vmem:[#allocation32_spill] sm:$0xff] %v12780_v23  ;;  %v12790_v25 = vld [vmem:[%s19192_s3 + $0xc8] sm:$0xff]  ;;  %v12795_v26 = vld [vmem:[%s19192_s3 + $0xd0] sm:$0xff] }
   0xe   :  { %19251 = vst [vmem:[#allocation33_spill] sm:$0xff] %v12785_v24  ;;  %19252 = vst [vmem:[#allocation34_spill] sm:$0xff] %v12790_v25  ;;  %v12800_v27 = vld [vmem:[%s19192_s3 + $0xd8] sm:$0xff]  ;;  %v12805_v28 = vld [vmem:[%s19192_s3 + $0xe0] sm:$0xff] }
   0xf   :  { %19253 = vst [vmem:[#allocation35_spill] sm:$0xff] %v12795_v26  ;;  %19254 = vst [vmem:[#allocation36_spill] sm:$0xff] %v12800_v27  ;;  %v12810_v29 = vld [vmem:[%s19192_s3 + $0xe8] sm:$0xff]  ;;  %v12815_v30 = vld [vmem:[%s19192_s3 + $0xf0] sm:$0xff] }
  0x10   :  { %19255 = vst [vmem:[#allocation37_spill] sm:$0xff] %v12805_v28  ;;  %19256 = vst [vmem:[#allocation38_spill] sm:$0xff] %v12810_v29  ;;  %v12820_v31 = vld [vmem:[%s19192_s3 + $0xf8] sm:$0xff]  ;;  %v12825_v32 = vld [vmem:[%s19192_s3 + $0x100] sm:$0xff] }
  0x11   :  { %19257 = vst [vmem:[#allocation39_spill] sm:$0xff] %v12815_v30  ;;  %19258 = vst [vmem:[#allocation40_spill] sm:$0xff] %v12820_v31  ;;  %v12830_v33 = vld [vmem:[%s19192_s3 + $0x108] sm:$0xff]  ;;  %v12835_v34 = vld [vmem:[%s19192_s3 + $0x110] sm:$0xff] }
  0x12   :  { %19259 = vst [vmem:[#allocation41_spill] sm:$0xff] %v12825_v32  ;;  %19260 = vst [vmem:[#allocation42_spill] sm:$0xff] %v12830_v33  ;;  %v12840_v35 = vld [vmem:[%s19192_s3 + $0x118] sm:$0xff]  ;;  %v12845_v36 = vld [vmem:[%s19192_s3 + $0x120] sm:$0xff] }
  0x13   :  { %19261 = vst [vmem:[#allocation43_spill] sm:$0xff] %v12835_v34  ;;  %19262 = vst [vmem:[#allocation44_spill] sm:$0xff] %v12840_v35  ;;  %v12850_v37 = vld [vmem:[%s19192_s3 + $0x128] sm:$0xff]  ;;  %v12855_v38 = vld [vmem:[%s19192_s3 + $0x130] sm:$0xff] }
  0x14   :  { %19263 = vst [vmem:[#allocation45_spill] sm:$0xff] %v12845_v36  ;;  %19264 = vst [vmem:[#allocation46_spill] sm:$0xff] %v12850_v37  ;;  %v12860_v39 = vld [vmem:[%s19192_s3 + $0x138] sm:$0xff]  ;;  %v12865_v40 = vld [vmem:[%s19192_s3 + $0x140] sm:$0xff] }
  0x15   :  { %19265 = vst [vmem:[#allocation47_spill] sm:$0xff] %v12855_v38  ;;  %19266 = vst [vmem:[#allocation48_spill] sm:$0xff] %v12860_v39  ;;  %v12870_v41 = vld [vmem:[%s19192_s3 + $0x148] sm:$0xff]  ;;  %v12875_v42 = vld [vmem:[%s19192_s3 + $0x150] sm:$0xff] }
  0x16   :  { %19267 = vst [vmem:[#allocation49_spill] sm:$0xff] %v12865_v40  ;;  %19268 = vst [vmem:[#allocation50_spill] sm:$0xff] %v12870_v41  ;;  %v12880_v43 = vld [vmem:[%s19192_s3 + $0x158] sm:$0xff]  ;;  %v12885_v44 = vld [vmem:[%s19192_s3 + $0x160] sm:$0xff] }
  0x17   :  { %19269 = vst [vmem:[#allocation51_spill] sm:$0xff] %v12875_v42  ;;  %19270 = vst [vmem:[#allocation52_spill] sm:$0xff] %v12880_v43  ;;  %v12890_v45 = vld [vmem:[%s19192_s3 + $0x168] sm:$0xff]  ;;  %v12895_v46 = vld [vmem:[%s19192_s3 + $0x170] sm:$0xff] }
  0x18   :  { %19271 = vst [vmem:[#allocation53_spill] sm:$0xff] %v12885_v44  ;;  %19272 = vst [vmem:[#allocation54_spill] sm:$0xff] %v12890_v45  ;;  %v12900_v47 = vld [vmem:[%s19192_s3 + $0x178] sm:$0xff]  ;;  %v12905_v48 = vld [vmem:[%s19192_s3 + $0x180] sm:$0xff] }
  0x19   :  { %19273 = vst [vmem:[#allocation55_spill] sm:$0xff] %v12895_v46  ;;  %19274 = vst [vmem:[#allocation56_spill] sm:$0xff] %v12900_v47  ;;  %v12910_v49 = vld [vmem:[%s19192_s3 + $0x188] sm:$0xff]  ;;  %v12915_v50 = vld [vmem:[%s19192_s3 + $0x190] sm:$0xff] }
  0x1a   :  { %19275 = vst [vmem:[#allocation57_spill] sm:$0xff] %v12905_v48  ;;  %19276 = vst [vmem:[#allocation58_spill] sm:$0xff] %v12910_v49  ;;  %v12920_v51 = vld [vmem:[%s19192_s3 + $0x198] sm:$0xff]  ;;  %v12925_v52 = vld [vmem:[%s19192_s3 + $0x1a0] sm:$0xff] }
  0x1b   :  { %19277 = vst [vmem:[#allocation59_spill] sm:$0xff] %v12915_v50  ;;  %19278 = vst [vmem:[#allocation60_spill] sm:$0xff] %v12920_v51  ;;  %v12930_v53 = vld [vmem:[%s19192_s3 + $0x1a8] sm:$0xff]  ;;  %v12935_v54 = vld [vmem:[%s19192_s3 + $0x1b0] sm:$0xff] }
  0x1c   :  { %19279 = vst [vmem:[#allocation61_spill] sm:$0xff] %v12925_v52  ;;  %19280 = vst [vmem:[#allocation62_spill] sm:$0xff] %v12930_v53  ;;  %v12940_v55 = vld [vmem:[%s19192_s3 + $0x1b8] sm:$0xff]  ;;  %v12945_v56 = vld [vmem:[%s19192_s3 + $0x1c0] sm:$0xff] }
  0x1d   :  { %19281 = vst [vmem:[#allocation63_spill] sm:$0xff] %v12935_v54  ;;  %19282 = vst [vmem:[#allocation64_spill] sm:$0xff] %v12940_v55  ;;  %v12950_v57 = vld [vmem:[%s19192_s3 + $0x1c8] sm:$0xff]  ;;  %v12955_v58 = vld [vmem:[%s19192_s3 + $0x1d0] sm:$0xff] }
  0x1e   :  { %19283 = vst [vmem:[#allocation65_spill] sm:$0xff] %v12945_v56  ;;  %19284 = vst [vmem:[#allocation66_spill] sm:$0xff] %v12950_v57  ;;  %v12960_v59 = vld [vmem:[%s19192_s3 + $0x1d8] sm:$0xff]  ;;  %v12965_v60 = vld [vmem:[%s19192_s3 + $0x1e0] sm:$0xff] }
  0x1f   :  { %19285 = vst [vmem:[#allocation67_spill] sm:$0xff] %v12955_v58  ;;  %19286 = vst [vmem:[#allocation68_spill] sm:$0xff] %v12960_v59  ;;  %v12970_v61 = vld [vmem:[%s19192_s3 + $0x1e8] sm:$0xff]  ;;  %v12975_v62 = vld [vmem:[%s19192_s3 + $0x1f0] sm:$0xff] }
  0x20   :  { %19287 = vst [vmem:[#allocation69_spill] sm:$0xff] %v12965_v60  ;;  %19288 = vst [vmem:[#allocation70_spill] sm:$0xff] %v12970_v61  ;;  %v12980_v63 = vld [vmem:[%s19192_s3 + $0x1f8] sm:$0xff]  ;;  %v12985_v59 = vld [vmem:[%s19192_s3 + $0x200] sm:$0xff] }
  0x21   :  { %19289 = vst [vmem:[#allocation71_spill] sm:$0xff] %v12975_v62  ;;  %19290 = vst [vmem:[#allocation72_spill] sm:$0xff] %v12980_v63  ;;  %v12990_v56 = vld [vmem:[%s19192_s3 + $0x208] sm:$0xff]  ;;  %v12995_v53 = vld [vmem:[%s19192_s3 + $0x210] sm:$0xff] }
  0x22   :  { %19291 = vst [vmem:[#allocation73_spill] sm:$0xff] %v12985_v59  ;;  %19292 = vst [vmem:[#allocation74_spill] sm:$0xff] %v12990_v56  ;;  %v13000_v62 = vld [vmem:[%s19192_s3 + $0x218] sm:$0xff]  ;;  %v13005_v50 = vld [vmem:[%s19192_s3 + $0x220] sm:$0xff] }
  0x23   :  { %19293 = vst [vmem:[#allocation75_spill] sm:$0xff] %v12995_v53  ;;  %19294 = vst [vmem:[#allocation76_spill] sm:$0xff] %v13000_v62  ;;  %v13010_v63 = vld [vmem:[%s19192_s3 + $0x228] sm:$0xff]  ;;  %v13015_v56 = vld [vmem:[%s19192_s3 + $0x230] sm:$0xff] }
  0x24   :  { %19295 = vst [vmem:[#allocation77_spill] sm:$0xff] %v13005_v50  ;;  %19296 = vst [vmem:[#allocation78_spill] sm:$0xff] %v13010_v63  ;;  %v13020_v53 = vld [vmem:[%s19192_s3 + $0x238] sm:$0xff]  ;;  %v13025_v62 = vld [vmem:[%s19192_s3 + $0x240] sm:$0xff] }
  0x25   :  { %19297 = vst [vmem:[#allocation79_spill] sm:$0xff] %v13015_v56  ;;  %19298 = vst [vmem:[#allocation80_spill] sm:$0xff] %v13020_v53  ;;  %v13030_v50 = vld [vmem:[%s19192_s3 + $0x248] sm:$0xff]  ;;  %v13035_v63 = vld [vmem:[%s19192_s3 + $0x250] sm:$0xff] }
  0x26   :  { %19299 = vst [vmem:[#allocation81_spill] sm:$0xff] %v13025_v62  ;;  %19300 = vst [vmem:[#allocation82_spill] sm:$0xff] %v13030_v50  ;;  %v13040_v56 = vld [vmem:[%s19192_s3 + $0x258] sm:$0xff]  ;;  %v13045_v53 = vld [vmem:[%s19192_s3 + $0x260] sm:$0xff] }
  0x27   :  { %19301 = vst [vmem:[#allocation83_spill] sm:$0xff] %v13035_v63  ;;  %19302 = vst [vmem:[#allocation84_spill] sm:$0xff] %v13040_v56  ;;  %v13050_v60 = vld [vmem:[%s19192_s3 + $0x268] sm:$0xff]  ;;  %v13055_v59 = vld [vmem:[%s19192_s3 + $0x270] sm:$0xff] }
  0x28   :  { %19303 = vst [vmem:[#allocation85_spill] sm:$0xff] %v13045_v53  ;;  %19304 = vst [vmem:[#allocation86_spill] sm:$0xff] %v13050_v60  ;;  %v13060_v63 = vld [vmem:[%s19192_s3 + $0x278] sm:$0xff]  ;;  %v13065_v61 = vld [vmem:[%s19192_s3 + $0x280] sm:$0xff] }
  0x29   :  { %19305 = vst [vmem:[#allocation87_spill] sm:$0xff] %v13055_v59  ;;  %19306 = vst [vmem:[#allocation88_spill] sm:$0xff] %v13060_v63  ;;  %v13070_v57 = vld [vmem:[%s19192_s3 + $0x288] sm:$0xff]  ;;  %v13075_v60 = vld [vmem:[%s19192_s3 + $0x290] sm:$0xff] }
  0x2a   :  { %19307 = vst [vmem:[#allocation89_spill] sm:$0xff] %v13065_v61  ;;  %19308 = vst [vmem:[#allocation90_spill] sm:$0xff] %v13070_v57  ;;  %v13080_v59 = vld [vmem:[%s19192_s3 + $0x298] sm:$0xff]  ;;  %v13085_v54 = vld [vmem:[%s19192_s3 + $0x2a0] sm:$0xff] }
  0x2b   :  { %19309 = vst [vmem:[#allocation91_spill] sm:$0xff] %v13075_v60  ;;  %19310 = vst [vmem:[#allocation92_spill] sm:$0xff] %v13080_v59  ;;  %v13090_v61 = vld [vmem:[%s19192_s3 + $0x2a8] sm:$0xff]  ;;  %v13095_v57 = vld [vmem:[%s19192_s3 + $0x2b0] sm:$0xff] }
  0x2c   :  { %19311 = vst [vmem:[#allocation93_spill] sm:$0xff] %v13085_v54  ;;  %19312 = vst [vmem:[#allocation94_spill] sm:$0xff] %v13090_v61  ;;  %v13100_v60 = vld [vmem:[%s19192_s3 + $0x2b8] sm:$0xff]  ;;  %v13105_v59 = vld [vmem:[%s19192_s3 + $0x2c0] sm:$0xff] }
  0x2d   :  { %19313 = vst [vmem:[#allocation95_spill] sm:$0xff] %v13095_v57  ;;  %19314 = vst [vmem:[#allocation96_spill] sm:$0xff] %v13100_v60  ;;  %v13110_v54 = vld [vmem:[%s19192_s3 + $0x2c8] sm:$0xff]  ;;  %v13115_v61 = vld [vmem:[%s19192_s3 + $0x2d0] sm:$0xff] }
  0x2e   :  { %19315 = vst [vmem:[#allocation97_spill] sm:$0xff] %v13105_v59  ;;  %19316 = vst [vmem:[#allocation98_spill] sm:$0xff] %v13110_v54  ;;  %v13120_v57 = vld [vmem:[%s19192_s3 + $0x2d8] sm:$0xff]  ;;  %v13125_v60 = vld [vmem:[%s19192_s3 + $0x2e0] sm:$0xff] }
  0x2f   :  { %19317 = vst [vmem:[#allocation99_spill] sm:$0xff] %v13115_v61  ;;  %19318 = vst [vmem:[#allocation100_spill] sm:$0xff] %v13120_v57  ;;  %v13130_v59 = vld [vmem:[%s19192_s3 + $0x2e8] sm:$0xff]  ;;  %v13135_v54 = vld [vmem:[%s19192_s3 + $0x2f0] sm:$0xff] }
  0x30   :  { %19319 = vst [vmem:[#allocation101_spill] sm:$0xff] %v13125_v60  ;;  %19320 = vst [vmem:[#allocation102_spill] sm:$0xff] %v13130_v59  ;;  %v13140_v61 = vld [vmem:[%s19192_s3 + $0x2f8] sm:$0xff]  ;;  %v13145_v57 = vld [vmem:[%s19192_s3 + $0x300] sm:$0xff] }
  0x31   :  { %19321 = vst [vmem:[#allocation103_spill] sm:$0xff] %v13135_v54  ;;  %19322 = vst [vmem:[#allocation104_spill] sm:$0xff] %v13140_v61  ;;  %v13150_v60 = vld [vmem:[%s19192_s3 + $0x308] sm:$0xff]  ;;  %v13155_v59 = vld [vmem:[%s19192_s3 + $0x310] sm:$0xff] }
  0x32   :  { %19323 = vst [vmem:[#allocation105_spill] sm:$0xff] %v13145_v57  ;;  %19324 = vst [vmem:[#allocation106_spill] sm:$0xff] %v13150_v60  ;;  %v13160_v54 = vld [vmem:[%s19192_s3 + $0x318] sm:$0xff]  ;;  %v13165_v61 = vld [vmem:[%s19192_s3 + $0x320] sm:$0xff] }
  0x33   :  { %19325 = vst [vmem:[#allocation107_spill] sm:$0xff] %v13155_v59  ;;  %19326 = vst [vmem:[#allocation108_spill] sm:$0xff] %v13160_v54  ;;  %v13170_v57 = vld [vmem:[%s19192_s3 + $0x328] sm:$0xff]  ;;  %v13175_v60 = vld [vmem:[%s19192_s3 + $0x330] sm:$0xff] }
  0x34   :  { %19327 = vst [vmem:[#allocation109_spill] sm:$0xff] %v13165_v61  ;;  %19328 = vst [vmem:[#allocation110_spill] sm:$0xff] %v13170_v57  ;;  %v13180_v59 = vld [vmem:[%s19192_s3 + $0x338] sm:$0xff]  ;;  %v13185_v54 = vld [vmem:[%s19192_s3 + $0x340] sm:$0xff] }
  0x35   :  { %19329 = vst [vmem:[#allocation111_spill] sm:$0xff] %v13175_v60  ;;  %19330 = vst [vmem:[#allocation112_spill] sm:$0xff] %v13180_v59  ;;  %v13190_v61 = vld [vmem:[%s19192_s3 + $0x348] sm:$0xff]  ;;  %v13195_v57 = vld [vmem:[%s19192_s3 + $0x350] sm:$0xff] }
  0x36   :  { %19331 = vst [vmem:[#allocation113_spill] sm:$0xff] %v13185_v54  ;;  %19332 = vst [vmem:[#allocation114_spill] sm:$0xff] %v13190_v61  ;;  %v13200_v60 = vld [vmem:[%s19192_s3 + $0x358] sm:$0xff]  ;;  %v13205_v59 = vld [vmem:[%s19192_s3 + $0x360] sm:$0xff] }
  0x37   :  { %19333 = vst [vmem:[#allocation115_spill] sm:$0xff] %v13195_v57  ;;  %19334 = vst [vmem:[#allocation116_spill] sm:$0xff] %v13200_v60  ;;  %v13210_v54 = vld [vmem:[%s19192_s3 + $0x368] sm:$0xff]  ;;  %v13215_v61 = vld [vmem:[%s19192_s3 + $0x370] sm:$0xff] }
  0x38   :  { %19335 = vst [vmem:[#allocation117_spill] sm:$0xff] %v13205_v59  ;;  %19336 = vst [vmem:[#allocation118_spill] sm:$0xff] %v13210_v54  ;;  %v13220_v57 = vld [vmem:[%s19192_s3 + $0x378] sm:$0xff]  ;;  %v13225_v60 = vld [vmem:[%s19192_s3 + $0x380] sm:$0xff] }
  0x39   :  { %19337 = vst [vmem:[#allocation119_spill] sm:$0xff] %v13215_v61  ;;  %19338 = vst [vmem:[#allocation120_spill] sm:$0xff] %v13220_v57  ;;  %v13230_v59 = vld [vmem:[%s19192_s3 + $0x388] sm:$0xff]  ;;  %v13235_v54 = vld [vmem:[%s19192_s3 + $0x390] sm:$0xff] }
  0x3a   :  { %19339 = vst [vmem:[#allocation121_spill] sm:$0xff] %v13225_v60  ;;  %19340 = vst [vmem:[#allocation122_spill] sm:$0xff] %v13230_v59  ;;  %v13240_v61 = vld [vmem:[%s19192_s3 + $0x398] sm:$0xff]  ;;  %v13245_v57 = vld [vmem:[%s19192_s3 + $0x3a0] sm:$0xff] }
  0x3b   :  { %19341 = vst [vmem:[#allocation123_spill] sm:$0xff] %v13235_v54  ;;  %19342 = vst [vmem:[#allocation124_spill] sm:$0xff] %v13240_v61  ;;  %v13250_v60 = vld [vmem:[%s19192_s3 + $0x3a8] sm:$0xff]  ;;  %v13255_v59 = vld [vmem:[%s19192_s3 + $0x3b0] sm:$0xff] }
  0x3c   :  { %19343 = vst [vmem:[#allocation125_spill] sm:$0xff] %v13245_v57  ;;  %19344 = vst [vmem:[#allocation126_spill] sm:$0xff] %v13250_v60  ;;  %v13260_v54 = vld [vmem:[%s19192_s3 + $0x3b8] sm:$0xff]  ;;  %v13265_v61 = vld [vmem:[%s19192_s3 + $0x3c0] sm:$0xff] }
  0x3d   :  { %19345 = vst [vmem:[#allocation127_spill] sm:$0xff] %v13255_v59  ;;  %19346 = vst [vmem:[#allocation128_spill] sm:$0xff] %v13260_v54  ;;  %v13270_v57 = vld [vmem:[%s19192_s3 + $0x3c8] sm:$0xff]  ;;  %v13275_v60 = vld [vmem:[%s19192_s3 + $0x3d0] sm:$0xff] }
  0x3e   :  { %19347 = vst [vmem:[#allocation129_spill] sm:$0xff] %v13265_v61  ;;  %19348 = vst [vmem:[#allocation130_spill] sm:$0xff] %v13270_v57  ;;  %v13280_v59 = vld [vmem:[%s19192_s3 + $0x3d8] sm:$0xff]  ;;  %v13285_v54 = vld [vmem:[%s19192_s3 + $0x3e0] sm:$0xff] }
  0x3f   :  { %19349 = vst [vmem:[#allocation131_spill] sm:$0xff] %v13275_v60  ;;  %19350 = vst [vmem:[#allocation132_spill] sm:$0xff] %v13280_v59  ;;  %v13290_v61 = vld [vmem:[%s19192_s3 + $0x3e8] sm:$0xff]  ;;  %v13295_v57 = vld [vmem:[%s19192_s3 + $0x3f0] sm:$0xff] }
  0x40   :  { %19351 = vst [vmem:[#allocation133_spill] sm:$0xff] %v13285_v54  ;;  %19352 = vst [vmem:[#allocation134_spill] sm:$0xff] %v13290_v61  ;;  %v13300_v60 = vld [vmem:[%s19192_s3 + $0x3f8] sm:$0xff]  ;;  %v13305_v59 = vld [vmem:[%s19192_s3 + $0x400] sm:$0xff] }
  0x41   :  { %19353 = vst [vmem:[#allocation135_spill] sm:$0xff] %v13295_v57  ;;  %19354 = vst [vmem:[#allocation136_spill] sm:$0xff] %v13300_v60  ;;  %v13310_v54 = vld [vmem:[%s19192_s3 + $0x408] sm:$0xff]  ;;  %v13315_v61 = vld [vmem:[%s19192_s3 + $0x410] sm:$0xff] }
  0x42   :  { %19355 = vst [vmem:[#allocation137_spill] sm:$0xff] %v13305_v59  ;;  %19356 = vst [vmem:[#allocation138_spill] sm:$0xff] %v13310_v54  ;;  %v13320_v57 = vld [vmem:[%s19192_s3 + $0x418] sm:$0xff]  ;;  %v13325_v60 = vld [vmem:[%s19192_s3 + $0x420] sm:$0xff] }
  0x43   :  { %19357 = vst [vmem:[#allocation139_spill] sm:$0xff] %v13315_v61  ;;  %19358 = vst [vmem:[#allocation140_spill] sm:$0xff] %v13320_v57  ;;  %v13330_v59 = vld [vmem:[%s19192_s3 + $0x428] sm:$0xff]  ;;  %v13335_v54 = vld [vmem:[%s19192_s3 + $0x430] sm:$0xff] }
  0x44   :  { %19359 = vst [vmem:[#allocation141_spill] sm:$0xff] %v13325_v60  ;;  %19360 = vst [vmem:[#allocation142_spill] sm:$0xff] %v13330_v59  ;;  %v13340_v61 = vld [vmem:[%s19192_s3 + $0x438] sm:$0xff]  ;;  %v13345_v57 = vld [vmem:[%s19192_s3 + $0x440] sm:$0xff] }
  0x45   :  { %19361 = vst [vmem:[#allocation143_spill] sm:$0xff] %v13335_v54  ;;  %19362 = vst [vmem:[#allocation144_spill] sm:$0xff] %v13340_v61  ;;  %v13350_v60 = vld [vmem:[%s19192_s3 + $0x448] sm:$0xff]  ;;  %v13355_v59 = vld [vmem:[%s19192_s3 + $0x450] sm:$0xff] }
  0x46   :  { %19363 = vst [vmem:[#allocation145_spill] sm:$0xff] %v13345_v57  ;;  %19364 = vst [vmem:[#allocation146_spill] sm:$0xff] %v13350_v60  ;;  %v13360_v54 = vld [vmem:[%s19192_s3 + $0x458] sm:$0xff]  ;;  %v13365_v61 = vld [vmem:[%s19192_s3 + $0x460] sm:$0xff] }
  0x47   :  { %19365 = vst [vmem:[#allocation147_spill] sm:$0xff] %v13355_v59  ;;  %19366 = vst [vmem:[#allocation148_spill] sm:$0xff] %v13360_v54  ;;  %v13370_v57 = vld [vmem:[%s19192_s3 + $0x468] sm:$0xff]  ;;  %v13375_v60 = vld [vmem:[%s19192_s3 + $0x470] sm:$0xff] }
  0x48   :  { %19367 = vst [vmem:[#allocation149_spill] sm:$0xff] %v13365_v61  ;;  %19368 = vst [vmem:[#allocation150_spill] sm:$0xff] %v13370_v57  ;;  %v13380_v59 = vld [vmem:[%s19192_s3 + $0x478] sm:$0xff]  ;;  %v13385_v54 = vld [vmem:[%s19192_s3 + $0x480] sm:$0xff] }
  0x49   :  { %19369 = vst [vmem:[#allocation151_spill] sm:$0xff] %v13375_v60  ;;  %19370 = vst [vmem:[#allocation152_spill] sm:$0xff] %v13380_v59  ;;  %v13390_v61 = vld [vmem:[%s19192_s3 + $0x488] sm:$0xff]  ;;  %v13395_v57 = vld [vmem:[%s19192_s3 + $0x490] sm:$0xff] }
  0x4a   :  { %19371 = vst [vmem:[#allocation153_spill] sm:$0xff] %v13385_v54  ;;  %19372 = vst [vmem:[#allocation154_spill] sm:$0xff] %v13390_v61  ;;  %v13400_v60 = vld [vmem:[%s19192_s3 + $0x498] sm:$0xff]  ;;  %v13405_v59 = vld [vmem:[%s19192_s3 + $0x4a0] sm:$0xff] }
  0x4b   :  { %19373 = vst [vmem:[#allocation155_spill] sm:$0xff] %v13395_v57  ;;  %19374 = vst [vmem:[#allocation156_spill] sm:$0xff] %v13400_v60  ;;  %v13410_v54 = vld [vmem:[%s19192_s3 + $0x4a8] sm:$0xff]  ;;  %v13415_v61 = vld [vmem:[%s19192_s3 + $0x4b0] sm:$0xff] }
  0x4c   :  { %19375 = vst [vmem:[#allocation157_spill] sm:$0xff] %v13405_v59  ;;  %19376 = vst [vmem:[#allocation158_spill] sm:$0xff] %v13410_v54  ;;  %v13420_v57 = vld [vmem:[%s19192_s3 + $0x4b8] sm:$0xff]  ;;  %v13425_v60 = vld [vmem:[%s19192_s3 + $0x4c0] sm:$0xff] }
  0x4d   :  { %19377 = vst [vmem:[#allocation159_spill] sm:$0xff] %v13415_v61  ;;  %19378 = vst [vmem:[#allocation160_spill] sm:$0xff] %v13420_v57  ;;  %v13430_v59 = vld [vmem:[%s19192_s3 + $0x4c8] sm:$0xff]  ;;  %v13435_v54 = vld [vmem:[%s19192_s3 + $0x4d0] sm:$0xff] }
  0x4e   :  { %19379 = vst [vmem:[#allocation161_spill] sm:$0xff] %v13425_v60  ;;  %19380 = vst [vmem:[#allocation162_spill] sm:$0xff] %v13430_v59  ;;  %v13440_v61 = vld [vmem:[%s19192_s3 + $0x4d8] sm:$0xff]  ;;  %v13445_v57 = vld [vmem:[%s19192_s3 + $0x4e0] sm:$0xff] }
  0x4f   :  { %19381 = vst [vmem:[#allocation163_spill] sm:$0xff] %v13435_v54  ;;  %19382 = vst [vmem:[#allocation164_spill] sm:$0xff] %v13440_v61  ;;  %v13450_v60 = vld [vmem:[%s19192_s3 + $0x4e8] sm:$0xff]  ;;  %v13455_v59 = vld [vmem:[%s19192_s3 + $0x4f0] sm:$0xff] }
  0x50   :  { %19383 = vst [vmem:[#allocation165_spill] sm:$0xff] %v13445_v57  ;;  %19384 = vst [vmem:[#allocation166_spill] sm:$0xff] %v13450_v60  ;;  %v13460_v54 = vld [vmem:[%s19192_s3 + $0x4f8] sm:$0xff]  ;;  %v13465_v61 = vld [vmem:[%s19192_s3 + $0x500] sm:$0xff] }
  0x51   :  { %19385 = vst [vmem:[#allocation167_spill] sm:$0xff] %v13455_v59  ;;  %19386 = vst [vmem:[#allocation168_spill] sm:$0xff] %v13460_v54  ;;  %v13470_v57 = vld [vmem:[%s19192_s3 + $0x508] sm:$0xff]  ;;  %v13475_v60 = vld [vmem:[%s19192_s3 + $0x510] sm:$0xff] }
  0x52   :  { %19387 = vst [vmem:[#allocation169_spill] sm:$0xff] %v13465_v61  ;;  %19388 = vst [vmem:[#allocation170_spill] sm:$0xff] %v13470_v57  ;;  %v13480_v59 = vld [vmem:[%s19192_s3 + $0x518] sm:$0xff]  ;;  %v13485_v54 = vld [vmem:[%s19192_s3 + $0x520] sm:$0xff] }
  0x53   :  { %19389 = vst [vmem:[#allocation171_spill] sm:$0xff] %v13475_v60  ;;  %19390 = vst [vmem:[#allocation172_spill] sm:$0xff] %v13480_v59  ;;  %v13490_v61 = vld [vmem:[%s19192_s3 + $0x528] sm:$0xff]  ;;  %v13495_v57 = vld [vmem:[%s19192_s3 + $0x530] sm:$0xff] }
  0x54   :  { %19391 = vst [vmem:[#allocation173_spill] sm:$0xff] %v13485_v54  ;;  %19392 = vst [vmem:[#allocation174_spill] sm:$0xff] %v13490_v61  ;;  %v13500_v60 = vld [vmem:[%s19192_s3 + $0x538] sm:$0xff]  ;;  %v13505_v59 = vld [vmem:[%s19192_s3 + $0x540] sm:$0xff] }
  0x55   :  { %19393 = vst [vmem:[#allocation175_spill] sm:$0xff] %v13495_v57  ;;  %19394 = vst [vmem:[#allocation176_spill] sm:$0xff] %v13500_v60  ;;  %v13510_v54 = vld [vmem:[%s19192_s3 + $0x548] sm:$0xff]  ;;  %v13515_v61 = vld [vmem:[%s19192_s3 + $0x550] sm:$0xff] }
  0x56   :  { %19395 = vst [vmem:[#allocation177_spill] sm:$0xff] %v13505_v59  ;;  %19396 = vst [vmem:[#allocation178_spill] sm:$0xff] %v13510_v54  ;;  %v13520_v57 = vld [vmem:[%s19192_s3 + $0x558] sm:$0xff]  ;;  %v13525_v60 = vld [vmem:[%s19192_s3 + $0x560] sm:$0xff] }
  0x57   :  { %19397 = vst [vmem:[#allocation179_spill] sm:$0xff] %v13515_v61  ;;  %19398 = vst [vmem:[#allocation180_spill] sm:$0xff] %v13520_v57  ;;  %v13530_v59 = vld [vmem:[%s19192_s3 + $0x568] sm:$0xff]  ;;  %v13535_v54 = vld [vmem:[%s19192_s3 + $0x570] sm:$0xff] }
  0x58   :  { %19399 = vst [vmem:[#allocation181_spill] sm:$0xff] %v13525_v60  ;;  %19400 = vst [vmem:[#allocation182_spill] sm:$0xff] %v13530_v59  ;;  %v13540_v61 = vld [vmem:[%s19192_s3 + $0x578] sm:$0xff]  ;;  %v13545_v57 = vld [vmem:[%s19192_s3 + $0x580] sm:$0xff] }
  0x59   :  { %19401 = vst [vmem:[#allocation183_spill] sm:$0xff] %v13535_v54  ;;  %19402 = vst [vmem:[#allocation184_spill] sm:$0xff] %v13540_v61  ;;  %v13550_v60 = vld [vmem:[%s19192_s3 + $0x588] sm:$0xff]  ;;  %v13555_v59 = vld [vmem:[%s19192_s3 + $0x590] sm:$0xff] }
  0x5a   :  { %19403 = vst [vmem:[#allocation185_spill] sm:$0xff] %v13545_v57  ;;  %19404 = vst [vmem:[#allocation186_spill] sm:$0xff] %v13550_v60  ;;  %v13560_v54 = vld [vmem:[%s19192_s3 + $0x598] sm:$0xff]  ;;  %v13565_v61 = vld [vmem:[%s19192_s3 + $0x5a0] sm:$0xff] }
  0x5b   :  { %19405 = vst [vmem:[#allocation187_spill] sm:$0xff] %v13555_v59  ;;  %19406 = vst [vmem:[#allocation188_spill] sm:$0xff] %v13560_v54  ;;  %v13570_v57 = vld [vmem:[%s19192_s3 + $0x5a8] sm:$0xff]  ;;  %v13575_v60 = vld [vmem:[%s19192_s3 + $0x5b0] sm:$0xff] }
  0x5c   :  { %19407 = vst [vmem:[#allocation189_spill] sm:$0xff] %v13565_v61  ;;  %19408 = vst [vmem:[#allocation190_spill] sm:$0xff] %v13570_v57  ;;  %v13580_v59 = vld [vmem:[%s19192_s3 + $0x5b8] sm:$0xff]  ;;  %v13585_v54 = vld [vmem:[%s19192_s3 + $0x5c0] sm:$0xff] }
  0x5d   :  { %19409 = vst [vmem:[#allocation191_spill] sm:$0xff] %v13575_v60  ;;  %19410 = vst [vmem:[#allocation192_spill] sm:$0xff] %v13580_v59  ;;  %v13590_v61 = vld [vmem:[%s19192_s3 + $0x5c8] sm:$0xff]  ;;  %v13595_v57 = vld [vmem:[%s19192_s3 + $0x5d0] sm:$0xff] }
  0x5e   :  { %19411 = vst [vmem:[#allocation193_spill] sm:$0xff] %v13585_v54  ;;  %19412 = vst [vmem:[#allocation194_spill] sm:$0xff] %v13590_v61  ;;  %v13600_v60 = vld [vmem:[%s19192_s3 + $0x5d8] sm:$0xff]  ;;  %v13605_v59 = vld [vmem:[%s19192_s3 + $0x5e0] sm:$0xff] }
  0x5f   :  { %19413 = vst [vmem:[#allocation195_spill] sm:$0xff] %v13595_v57  ;;  %19414 = vst [vmem:[#allocation196_spill] sm:$0xff] %v13600_v60  ;;  %v13610_v54 = vld [vmem:[%s19192_s3 + $0x5e8] sm:$0xff]  ;;  %v13615_v61 = vld [vmem:[%s19192_s3 + $0x5f0] sm:$0xff] }
  0x60   :  { %19415 = vst [vmem:[#allocation197_spill] sm:$0xff] %v13605_v59  ;;  %19416 = vst [vmem:[#allocation198_spill] sm:$0xff] %v13610_v54  ;;  %v13620_v57 = vld [vmem:[%s19192_s3 + $0x5f8] sm:$0xff]  ;;  %v13625_v60 = vld [vmem:[%s19192_s3 + $0x600] sm:$0xff] }
  0x61   :  { %19417 = vst [vmem:[#allocation199_spill] sm:$0xff] %v13615_v61  ;;  %19418 = vst [vmem:[#allocation200_spill] sm:$0xff] %v13620_v57  ;;  %v13630_v59 = vld [vmem:[%s19192_s3 + $0x608] sm:$0xff]  ;;  %v13635_v54 = vld [vmem:[%s19192_s3 + $0x610] sm:$0xff] }
  0x62   :  { %19419 = vst [vmem:[#allocation201_spill] sm:$0xff] %v13625_v60  ;;  %19420 = vst [vmem:[#allocation202_spill] sm:$0xff] %v13630_v59  ;;  %v13640_v61 = vld [vmem:[%s19192_s3 + $0x618] sm:$0xff]  ;;  %v13645_v57 = vld [vmem:[%s19192_s3 + $0x620] sm:$0xff] }
  0x63   :  { %19421 = vst [vmem:[#allocation203_spill] sm:$0xff] %v13635_v54  ;;  %19422 = vst [vmem:[#allocation204_spill] sm:$0xff] %v13640_v61  ;;  %v13650_v60 = vld [vmem:[%s19192_s3 + $0x628] sm:$0xff]  ;;  %v13655_v59 = vld [vmem:[%s19192_s3 + $0x630] sm:$0xff] }
  0x64   :  { %19423 = vst [vmem:[#allocation205_spill] sm:$0xff] %v13645_v57  ;;  %19424 = vst [vmem:[#allocation206_spill] sm:$0xff] %v13650_v60  ;;  %v13660_v54 = vld [vmem:[%s19192_s3 + $0x638] sm:$0xff]  ;;  %v13665_v61 = vld [vmem:[%s19192_s3 + $0x640] sm:$0xff] }
  0x65   :  { %19425 = vst [vmem:[#allocation207_spill] sm:$0xff] %v13655_v59  ;;  %19426 = vst [vmem:[#allocation208_spill] sm:$0xff] %v13660_v54  ;;  %v13670_v57 = vld [vmem:[%s19192_s3 + $0x648] sm:$0xff]  ;;  %v13675_v60 = vld [vmem:[%s19192_s3 + $0x650] sm:$0xff] }
  0x66   :  { %19427 = vst [vmem:[#allocation209_spill] sm:$0xff] %v13665_v61  ;;  %19428 = vst [vmem:[#allocation210_spill] sm:$0xff] %v13670_v57  ;;  %v13680_v59 = vld [vmem:[%s19192_s3 + $0x658] sm:$0xff]  ;;  %v13685_v54 = vld [vmem:[%s19192_s3 + $0x660] sm:$0xff] }
  0x67   :  { %19429 = vst [vmem:[#allocation211_spill] sm:$0xff] %v13675_v60  ;;  %19430 = vst [vmem:[#allocation212_spill] sm:$0xff] %v13680_v59  ;;  %v13690_v61 = vld [vmem:[%s19192_s3 + $0x668] sm:$0xff]  ;;  %v13695_v57 = vld [vmem:[%s19192_s3 + $0x670] sm:$0xff] }
  0x68   :  { %19431 = vst [vmem:[#allocation213_spill] sm:$0xff] %v13685_v54  ;;  %19432 = vst [vmem:[#allocation214_spill] sm:$0xff] %v13690_v61  ;;  %v13700_v60 = vld [vmem:[%s19192_s3 + $0x678] sm:$0xff]  ;;  %v13705_v59 = vld [vmem:[%s19192_s3 + $0x680] sm:$0xff] }
  0x69   :  { %19433 = vst [vmem:[#allocation215_spill] sm:$0xff] %v13695_v57  ;;  %19434 = vst [vmem:[#allocation216_spill] sm:$0xff] %v13700_v60  ;;  %v13710_v54 = vld [vmem:[%s19192_s3 + $0x688] sm:$0xff]  ;;  %v13715_v61 = vld [vmem:[%s19192_s3 + $0x690] sm:$0xff] }
  0x6a   :  { %19435 = vst [vmem:[#allocation217_spill] sm:$0xff] %v13705_v59  ;;  %19436 = vst [vmem:[#allocation218_spill] sm:$0xff] %v13710_v54  ;;  %v13720_v57 = vld [vmem:[%s19192_s3 + $0x698] sm:$0xff]  ;;  %v13725_v60 = vld [vmem:[%s19192_s3 + $0x6a0] sm:$0xff] }
  0x6b   :  { %19437 = vst [vmem:[#allocation219_spill] sm:$0xff] %v13715_v61  ;;  %19438 = vst [vmem:[#allocation220_spill] sm:$0xff] %v13720_v57  ;;  %v13730_v59 = vld [vmem:[%s19192_s3 + $0x6a8] sm:$0xff]  ;;  %v13735_v54 = vld [vmem:[%s19192_s3 + $0x6b0] sm:$0xff] }
  0x6c   :  { %19439 = vst [vmem:[#allocation221_spill] sm:$0xff] %v13725_v60  ;;  %19440 = vst [vmem:[#allocation222_spill] sm:$0xff] %v13730_v59  ;;  %v13740_v61 = vld [vmem:[%s19192_s3 + $0x6b8] sm:$0xff]  ;;  %v13745_v57 = vld [vmem:[%s19192_s3 + $0x6c0] sm:$0xff] }
  0x6d   :  { %19441 = vst [vmem:[#allocation223_spill] sm:$0xff] %v13735_v54  ;;  %19442 = vst [vmem:[#allocation224_spill] sm:$0xff] %v13740_v61  ;;  %v13750_v60 = vld [vmem:[%s19192_s3 + $0x6c8] sm:$0xff]  ;;  %v13755_v59 = vld [vmem:[%s19192_s3 + $0x6d0] sm:$0xff] }
  0x6e   :  { %19443 = vst [vmem:[#allocation225_spill] sm:$0xff] %v13745_v57  ;;  %19444 = vst [vmem:[#allocation226_spill] sm:$0xff] %v13750_v60  ;;  %v13760_v54 = vld [vmem:[%s19192_s3 + $0x6d8] sm:$0xff]  ;;  %v13765_v61 = vld [vmem:[%s19192_s3 + $0x6e0] sm:$0xff] }
  0x6f   :  { %19445 = vst [vmem:[#allocation227_spill] sm:$0xff] %v13755_v59  ;;  %19446 = vst [vmem:[#allocation228_spill] sm:$0xff] %v13760_v54  ;;  %v13770_v57 = vld [vmem:[%s19192_s3 + $0x6e8] sm:$0xff]  ;;  %v13775_v60 = vld [vmem:[%s19192_s3 + $0x6f0] sm:$0xff] }
  0x70   :  { %19447 = vst [vmem:[#allocation229_spill] sm:$0xff] %v13765_v61  ;;  %19448 = vst [vmem:[#allocation230_spill] sm:$0xff] %v13770_v57  ;;  %v13780_v59 = vld [vmem:[%s19192_s3 + $0x6f8] sm:$0xff]  ;;  %v13785_v54 = vld [vmem:[%s19192_s3 + $0x700] sm:$0xff] }
  0x71   :  { %19449 = vst [vmem:[#allocation231_spill] sm:$0xff] %v13775_v60  ;;  %19450 = vst [vmem:[#allocation232_spill] sm:$0xff] %v13780_v59  ;;  %v13790_v61 = vld [vmem:[%s19192_s3 + $0x708] sm:$0xff]  ;;  %v13795_v57 = vld [vmem:[%s19192_s3 + $0x710] sm:$0xff] }
  0x72   :  { %19451 = vst [vmem:[#allocation233_spill] sm:$0xff] %v13785_v54  ;;  %19452 = vst [vmem:[#allocation234_spill] sm:$0xff] %v13790_v61  ;;  %v13800_v60 = vld [vmem:[%s19192_s3 + $0x718] sm:$0xff]  ;;  %v13805_v59 = vld [vmem:[%s19192_s3 + $0x720] sm:$0xff] }
  0x73   :  { %19453 = vst [vmem:[#allocation235_spill] sm:$0xff] %v13795_v57  ;;  %19454 = vst [vmem:[#allocation236_spill] sm:$0xff] %v13800_v60  ;;  %v13810_v54 = vld [vmem:[%s19192_s3 + $0x728] sm:$0xff]  ;;  %v13815_v61 = vld [vmem:[%s19192_s3 + $0x730] sm:$0xff] }
  0x74   :  { %19455 = vst [vmem:[#allocation237_spill] sm:$0xff] %v13805_v59  ;;  %19456 = vst [vmem:[#allocation238_spill] sm:$0xff] %v13810_v54  ;;  %v13820_v57 = vld [vmem:[%s19192_s3 + $0x738] sm:$0xff]  ;;  %v13825_v60 = vld [vmem:[%s19192_s3 + $0x740] sm:$0xff] }
  0x75   :  { %19457 = vst [vmem:[#allocation239_spill] sm:$0xff] %v13815_v61  ;;  %19458 = vst [vmem:[#allocation240_spill] sm:$0xff] %v13820_v57  ;;  %v13830_v59 = vld [vmem:[%s19192_s3 + $0x748] sm:$0xff]  ;;  %v13835_v54 = vld [vmem:[%s19192_s3 + $0x750] sm:$0xff] }
  0x76   :  { %19459 = vst [vmem:[#allocation241_spill] sm:$0xff] %v13825_v60  ;;  %19460 = vst [vmem:[#allocation242_spill] sm:$0xff] %v13830_v59  ;;  %v13840_v61 = vld [vmem:[%s19192_s3 + $0x758] sm:$0xff]  ;;  %v13845_v57 = vld [vmem:[%s19192_s3 + $0x760] sm:$0xff] }
  0x77   :  { %19461 = vst [vmem:[#allocation243_spill] sm:$0xff] %v13835_v54  ;;  %19462 = vst [vmem:[#allocation244_spill] sm:$0xff] %v13840_v61  ;;  %v13850_v60 = vld [vmem:[%s19192_s3 + $0x768] sm:$0xff]  ;;  %v13855_v59 = vld [vmem:[%s19192_s3 + $0x770] sm:$0xff] }
  0x78   :  { %19463 = vst [vmem:[#allocation245_spill] sm:$0xff] %v13845_v57  ;;  %19464 = vst [vmem:[#allocation246_spill] sm:$0xff] %v13850_v60  ;;  %v13860_v54 = vld [vmem:[%s19192_s3 + $0x778] sm:$0xff]  ;;  %v13865_v61 = vld [vmem:[%s19192_s3 + $0x780] sm:$0xff] }
  0x79   :  { %19465 = vst [vmem:[#allocation247_spill] sm:$0xff] %v13855_v59  ;;  %19466 = vst [vmem:[#allocation248_spill] sm:$0xff] %v13860_v54  ;;  %v13870_v57 = vld [vmem:[%s19192_s3 + $0x788] sm:$0xff]  ;;  %v13875_v60 = vld [vmem:[%s19192_s3 + $0x790] sm:$0xff] }
  0x7a   :  { %19467 = vst [vmem:[#allocation249_spill] sm:$0xff] %v13865_v61  ;;  %19468 = vst [vmem:[#allocation250_spill] sm:$0xff] %v13870_v57  ;;  %v13880_v59 = vld [vmem:[%s19192_s3 + $0x798] sm:$0xff]  ;;  %v13885_v54 = vld [vmem:[%s19192_s3 + $0x7a0] sm:$0xff] }
  0x7b   :  { %19469 = vst [vmem:[#allocation251_spill] sm:$0xff] %v13875_v60  ;;  %19470 = vst [vmem:[#allocation252_spill] sm:$0xff] %v13880_v59  ;;  %v13890_v61 = vld [vmem:[%s19192_s3 + $0x7a8] sm:$0xff]  ;;  %v13895_v57 = vld [vmem:[%s19192_s3 + $0x7b0] sm:$0xff] }
  0x7c   :  { %19471 = vst [vmem:[#allocation253_spill] sm:$0xff] %v13885_v54  ;;  %19472 = vst [vmem:[#allocation254_spill] sm:$0xff] %v13890_v61  ;;  %v13900_v60 = vld [vmem:[%s19192_s3 + $0x7b8] sm:$0xff]  ;;  %v13905_v59 = vld [vmem:[%s19192_s3 + $0x7c0] sm:$0xff] }
  0x7d   :  { %19473 = vst [vmem:[#allocation255_spill] sm:$0xff] %v13895_v57  ;;  %19474 = vst [vmem:[#allocation256_spill] sm:$0xff] %v13900_v60  ;;  %v13910_v54 = vld [vmem:[%s19192_s3 + $0x7c8] sm:$0xff]  ;;  %v13915_v61 = vld [vmem:[%s19192_s3 + $0x7d0] sm:$0xff] }
  0x7e   :  { %19475 = vst [vmem:[#allocation257_spill] sm:$0xff] %v13905_v59  ;;  %19476 = vst [vmem:[#allocation258_spill] sm:$0xff] %v13910_v54  ;;  %v13920_v57 = vld [vmem:[%s19192_s3 + $0x7d8] sm:$0xff]  ;;  %v13925_v60 = vld [vmem:[%s19192_s3 + $0x7e0] sm:$0xff] }
  0x7f   :  { %19477 = vst [vmem:[#allocation259_spill] sm:$0xff] %v13915_v61  ;;  %19478 = vst [vmem:[#allocation260_spill] sm:$0xff] %v13920_v57  ;;  %v13930_v59 = vld [vmem:[%s19192_s3 + $0x7e8] sm:$0xff]  ;;  %v13935_v54 = vld [vmem:[%s19192_s3 + $0x7f0] sm:$0xff] }
  0x80   :  { %19479 = vst [vmem:[#allocation261_spill] sm:$0xff] %v13925_v60  ;;  %19480 = vst [vmem:[#allocation262_spill] sm:$0xff] %v13930_v59  ;;  %v13940_v61 = vld [vmem:[%s19192_s3 + $0x7f8] sm:$0xff]  ;;  %v13945_v57 = vld [vmem:[%s19192_s3 + $0x800] sm:$0xff] }
  0x81   :  { %19481 = vst [vmem:[#allocation263_spill] sm:$0xff] %v13935_v54  ;;  %19482 = vst [vmem:[#allocation264_spill] sm:$0xff] %v13940_v61  ;;  %v13950_v60 = vld [vmem:[%s19192_s3 + $0x808] sm:$0xff]  ;;  %v13955_v59 = vld [vmem:[%s19192_s3 + $0x810] sm:$0xff] }
  0x82   :  { %19483 = vst [vmem:[#allocation265_spill] sm:$0xff] %v13945_v57  ;;  %19484 = vst [vmem:[#allocation266_spill] sm:$0xff] %v13950_v60  ;;  %v13960_v54 = vld [vmem:[%s19192_s3 + $0x818] sm:$0xff]  ;;  %v13965_v61 = vld [vmem:[%s19192_s3 + $0x820] sm:$0xff] }
  0x83   :  { %19485 = vst [vmem:[#allocation267_spill] sm:$0xff] %v13955_v59  ;;  %19486 = vst [vmem:[#allocation268_spill] sm:$0xff] %v13960_v54  ;;  %v13970_v57 = vld [vmem:[%s19192_s3 + $0x828] sm:$0xff]  ;;  %v13975_v60 = vld [vmem:[%s19192_s3 + $0x830] sm:$0xff] }
  0x84   :  { %19487 = vst [vmem:[#allocation269_spill] sm:$0xff] %v13965_v61  ;;  %19488 = vst [vmem:[#allocation270_spill] sm:$0xff] %v13970_v57  ;;  %v13980_v59 = vld [vmem:[%s19192_s3 + $0x838] sm:$0xff]  ;;  %v13985_v54 = vld [vmem:[%s19192_s3 + $0x840] sm:$0xff] }
  0x85   :  { %19489 = vst [vmem:[#allocation271_spill] sm:$0xff] %v13975_v60  ;;  %19490 = vst [vmem:[#allocation272_spill] sm:$0xff] %v13980_v59  ;;  %v13990_v61 = vld [vmem:[%s19192_s3 + $0x848] sm:$0xff]  ;;  %v13995_v57 = vld [vmem:[%s19192_s3 + $0x850] sm:$0xff] }
  0x86   :  { %19491 = vst [vmem:[#allocation273_spill] sm:$0xff] %v13985_v54  ;;  %19492 = vst [vmem:[#allocation274_spill] sm:$0xff] %v13990_v61  ;;  %v14000_v60 = vld [vmem:[%s19192_s3 + $0x858] sm:$0xff]  ;;  %v14005_v59 = vld [vmem:[%s19192_s3 + $0x860] sm:$0xff] }
  0x87   :  { %19493 = vst [vmem:[#allocation275_spill] sm:$0xff] %v13995_v57  ;;  %19494 = vst [vmem:[#allocation276_spill] sm:$0xff] %v14000_v60  ;;  %v14010_v54 = vld [vmem:[%s19192_s3 + $0x868] sm:$0xff]  ;;  %v14015_v61 = vld [vmem:[%s19192_s3 + $0x870] sm:$0xff] }
  0x88   :  { %19495 = vst [vmem:[#allocation277_spill] sm:$0xff] %v14005_v59  ;;  %19496 = vst [vmem:[#allocation278_spill] sm:$0xff] %v14010_v54  ;;  %v14020_v57 = vld [vmem:[%s19192_s3 + $0x878] sm:$0xff]  ;;  %v14025_v60 = vld [vmem:[%s19192_s3 + $0x880] sm:$0xff] }
  0x89   :  { %19497 = vst [vmem:[#allocation279_spill] sm:$0xff] %v14015_v61  ;;  %19498 = vst [vmem:[#allocation280_spill] sm:$0xff] %v14020_v57  ;;  %v14030_v59 = vld [vmem:[%s19192_s3 + $0x888] sm:$0xff]  ;;  %v14035_v54 = vld [vmem:[%s19192_s3 + $0x890] sm:$0xff] }
  0x8a   :  { %19499 = vst [vmem:[#allocation281_spill] sm:$0xff] %v14025_v60  ;;  %19500 = vst [vmem:[#allocation282_spill] sm:$0xff] %v14030_v59  ;;  %v14040_v61 = vld [vmem:[%s19192_s3 + $0x898] sm:$0xff]  ;;  %v14045_v57 = vld [vmem:[%s19192_s3 + $0x8a0] sm:$0xff] }
  0x8b   :  { %19501 = vst [vmem:[#allocation283_spill] sm:$0xff] %v14035_v54  ;;  %19502 = vst [vmem:[#allocation284_spill] sm:$0xff] %v14040_v61  ;;  %v14050_v60 = vld [vmem:[%s19192_s3 + $0x8a8] sm:$0xff]  ;;  %v14055_v59 = vld [vmem:[%s19192_s3 + $0x8b0] sm:$0xff] }
  0x8c   :  { %19503 = vst [vmem:[#allocation285_spill] sm:$0xff] %v14045_v57  ;;  %19504 = vst [vmem:[#allocation286_spill] sm:$0xff] %v14050_v60  ;;  %v14060_v54 = vld [vmem:[%s19192_s3 + $0x8b8] sm:$0xff]  ;;  %v14065_v61 = vld [vmem:[%s19192_s3 + $0x8c0] sm:$0xff] }
  0x8d   :  { %19505 = vst [vmem:[#allocation287_spill] sm:$0xff] %v14055_v59  ;;  %19506 = vst [vmem:[#allocation288_spill] sm:$0xff] %v14060_v54  ;;  %v14070_v57 = vld [vmem:[%s19192_s3 + $0x8c8] sm:$0xff]  ;;  %v14075_v60 = vld [vmem:[%s19192_s3 + $0x8d0] sm:$0xff] }
  0x8e   :  { %19507 = vst [vmem:[#allocation289_spill] sm:$0xff] %v14065_v61  ;;  %19508 = vst [vmem:[#allocation290_spill] sm:$0xff] %v14070_v57  ;;  %v14080_v59 = vld [vmem:[%s19192_s3 + $0x8d8] sm:$0xff]  ;;  %v14085_v54 = vld [vmem:[%s19192_s3 + $0x8e0] sm:$0xff] }
  0x8f   :  { %19509 = vst [vmem:[#allocation291_spill] sm:$0xff] %v14075_v60  ;;  %19510 = vst [vmem:[#allocation292_spill] sm:$0xff] %v14080_v59  ;;  %v14090_v61 = vld [vmem:[%s19192_s3 + $0x8e8] sm:$0xff]  ;;  %v14095_v57 = vld [vmem:[%s19192_s3 + $0x8f0] sm:$0xff] }
  0x90   :  { %19511 = vst [vmem:[#allocation293_spill] sm:$0xff] %v14085_v54  ;;  %19512 = vst [vmem:[#allocation294_spill] sm:$0xff] %v14090_v61  ;;  %v14100_v60 = vld [vmem:[%s19192_s3 + $0x8f8] sm:$0xff]  ;;  %v14105_v59 = vld [vmem:[%s19192_s3 + $0x900] sm:$0xff] }
  0x91   :  { %19513 = vst [vmem:[#allocation295_spill] sm:$0xff] %v14095_v57  ;;  %19514 = vst [vmem:[#allocation296_spill] sm:$0xff] %v14100_v60  ;;  %v14110_v54 = vld [vmem:[%s19192_s3 + $0x908] sm:$0xff]  ;;  %v14115_v61 = vld [vmem:[%s19192_s3 + $0x910] sm:$0xff] }
  0x92   :  { %19515 = vst [vmem:[#allocation297_spill] sm:$0xff] %v14105_v59  ;;  %19516 = vst [vmem:[#allocation298_spill] sm:$0xff] %v14110_v54  ;;  %v14120_v57 = vld [vmem:[%s19192_s3 + $0x918] sm:$0xff]  ;;  %v14125_v60 = vld [vmem:[%s19192_s3 + $0x920] sm:$0xff] }
  0x93   :  { %19517 = vst [vmem:[#allocation299_spill] sm:$0xff] %v14115_v61  ;;  %19518 = vst [vmem:[#allocation300_spill] sm:$0xff] %v14120_v57  ;;  %v14130_v59 = vld [vmem:[%s19192_s3 + $0x928] sm:$0xff]  ;;  %v14135_v54 = vld [vmem:[%s19192_s3 + $0x930] sm:$0xff] }
  0x94   :  { %19519 = vst [vmem:[#allocation301_spill] sm:$0xff] %v14125_v60  ;;  %19520 = vst [vmem:[#allocation302_spill] sm:$0xff] %v14130_v59  ;;  %v14140_v61 = vld [vmem:[%s19192_s3 + $0x938] sm:$0xff]  ;;  %v14145_v57 = vld [vmem:[%s19192_s3 + $0x940] sm:$0xff] }
  0x95   :  { %19521 = vst [vmem:[#allocation303_spill] sm:$0xff] %v14135_v54  ;;  %19522 = vst [vmem:[#allocation304_spill] sm:$0xff] %v14140_v61  ;;  %v14150_v60 = vld [vmem:[%s19192_s3 + $0x948] sm:$0xff]  ;;  %v14155_v59 = vld [vmem:[%s19192_s3 + $0x950] sm:$0xff] }
  0x96   :  { %19523 = vst [vmem:[#allocation305_spill] sm:$0xff] %v14145_v57  ;;  %19524 = vst [vmem:[#allocation306_spill] sm:$0xff] %v14150_v60  ;;  %v14160_v54 = vld [vmem:[%s19192_s3 + $0x958] sm:$0xff]  ;;  %v14165_v61 = vld [vmem:[%s19192_s3 + $0x960] sm:$0xff] }
  0x97   :  { %19525 = vst [vmem:[#allocation307_spill] sm:$0xff] %v14155_v59  ;;  %19526 = vst [vmem:[#allocation308_spill] sm:$0xff] %v14160_v54  ;;  %v14170_v57 = vld [vmem:[%s19192_s3 + $0x968] sm:$0xff]  ;;  %v14175_v60 = vld [vmem:[%s19192_s3 + $0x970] sm:$0xff] }
  0x98   :  { %19527 = vst [vmem:[#allocation309_spill] sm:$0xff] %v14165_v61  ;;  %19528 = vst [vmem:[#allocation310_spill] sm:$0xff] %v14170_v57  ;;  %v14180_v59 = vld [vmem:[%s19192_s3 + $0x978] sm:$0xff]  ;;  %v14185_v54 = vld [vmem:[%s19192_s3 + $0x980] sm:$0xff] }
  0x99   :  { %19529 = vst [vmem:[#allocation311_spill] sm:$0xff] %v14175_v60  ;;  %19530 = vst [vmem:[#allocation312_spill] sm:$0xff] %v14180_v59  ;;  %v14190_v61 = vld [vmem:[%s19192_s3 + $0x988] sm:$0xff]  ;;  %v14195_v57 = vld [vmem:[%s19192_s3 + $0x990] sm:$0xff] }
  0x9a   :  { %19531 = vst [vmem:[#allocation313_spill] sm:$0xff] %v14185_v54  ;;  %19532 = vst [vmem:[#allocation314_spill] sm:$0xff] %v14190_v61  ;;  %v14200_v60 = vld [vmem:[%s19192_s3 + $0x998] sm:$0xff]  ;;  %v14205_v59 = vld [vmem:[%s19192_s3 + $0x9a0] sm:$0xff] }
  0x9b   :  { %19533 = vst [vmem:[#allocation315_spill] sm:$0xff] %v14195_v57  ;;  %19534 = vst [vmem:[#allocation316_spill] sm:$0xff] %v14200_v60  ;;  %v14210_v54 = vld [vmem:[%s19192_s3 + $0x9a8] sm:$0xff]  ;;  %v14215_v61 = vld [vmem:[%s19192_s3 + $0x9b0] sm:$0xff] }
  0x9c   :  { %19535 = vst [vmem:[#allocation317_spill] sm:$0xff] %v14205_v59  ;;  %19536 = vst [vmem:[#allocation318_spill] sm:$0xff] %v14210_v54  ;;  %v14220_v57 = vld [vmem:[%s19192_s3 + $0x9b8] sm:$0xff]  ;;  %v14225_v60 = vld [vmem:[%s19192_s3 + $0x9c0] sm:$0xff] }
  0x9d   :  { %19537 = vst [vmem:[#allocation319_spill] sm:$0xff] %v14215_v61  ;;  %19538 = vst [vmem:[#allocation320_spill] sm:$0xff] %v14220_v57  ;;  %v14230_v59 = vld [vmem:[%s19192_s3 + $0x9c8] sm:$0xff]  ;;  %v14235_v54 = vld [vmem:[%s19192_s3 + $0x9d0] sm:$0xff] }
  0x9e   :  { %19539 = vst [vmem:[#allocation321_spill] sm:$0xff] %v14225_v60  ;;  %19540 = vst [vmem:[#allocation322_spill] sm:$0xff] %v14230_v59  ;;  %v14240_v61 = vld [vmem:[%s19192_s3 + $0x9d8] sm:$0xff]  ;;  %v14245_v57 = vld [vmem:[%s19192_s3 + $0x9e0] sm:$0xff] }
  0x9f   :  { %19541 = vst [vmem:[#allocation323_spill] sm:$0xff] %v14235_v54  ;;  %19542 = vst [vmem:[#allocation324_spill] sm:$0xff] %v14240_v61  ;;  %v14250_v60 = vld [vmem:[%s19192_s3 + $0x9e8] sm:$0xff]  ;;  %v14255_v59 = vld [vmem:[%s19192_s3 + $0x9f0] sm:$0xff] }
  0xa0   :  { %19543 = vst [vmem:[#allocation325_spill] sm:$0xff] %v14245_v57  ;;  %19544 = vst [vmem:[#allocation326_spill] sm:$0xff] %v14250_v60  ;;  %v14260_v54 = vld [vmem:[%s19192_s3 + $0x9f8] sm:$0xff]  ;;  %v14265_v61 = vld [vmem:[%s19192_s3 + $0xa00] sm:$0xff] }
  0xa1   :  { %19545 = vst [vmem:[#allocation327_spill] sm:$0xff] %v14255_v59  ;;  %19546 = vst [vmem:[#allocation328_spill] sm:$0xff] %v14260_v54  ;;  %v14270_v57 = vld [vmem:[%s19192_s3 + $0xa08] sm:$0xff]  ;;  %v14275_v60 = vld [vmem:[%s19192_s3 + $0xa10] sm:$0xff] }
  0xa2   :  { %19547 = vst [vmem:[#allocation329_spill] sm:$0xff] %v14265_v61  ;;  %19548 = vst [vmem:[#allocation330_spill] sm:$0xff] %v14270_v57  ;;  %v14280_v59 = vld [vmem:[%s19192_s3 + $0xa18] sm:$0xff]  ;;  %v14285_v54 = vld [vmem:[%s19192_s3 + $0xa20] sm:$0xff] }
  0xa3   :  { %19549 = vst [vmem:[#allocation331_spill] sm:$0xff] %v14275_v60  ;;  %19550 = vst [vmem:[#allocation332_spill] sm:$0xff] %v14280_v59  ;;  %v14290_v61 = vld [vmem:[%s19192_s3 + $0xa28] sm:$0xff]  ;;  %v14295_v57 = vld [vmem:[%s19192_s3 + $0xa30] sm:$0xff] }
  0xa4   :  { %19551 = vst [vmem:[#allocation333_spill] sm:$0xff] %v14285_v54  ;;  %19552 = vst [vmem:[#allocation334_spill] sm:$0xff] %v14290_v61  ;;  %v14300_v60 = vld [vmem:[%s19192_s3 + $0xa38] sm:$0xff]  ;;  %v14305_v59 = vld [vmem:[%s19192_s3 + $0xa40] sm:$0xff] }
  0xa5   :  { %19553 = vst [vmem:[#allocation335_spill] sm:$0xff] %v14295_v57  ;;  %19554 = vst [vmem:[#allocation336_spill] sm:$0xff] %v14300_v60  ;;  %v14310_v54 = vld [vmem:[%s19192_s3 + $0xa48] sm:$0xff]  ;;  %v14315_v61 = vld [vmem:[%s19192_s3 + $0xa50] sm:$0xff] }
  0xa6   :  { %19555 = vst [vmem:[#allocation337_spill] sm:$0xff] %v14305_v59  ;;  %19556 = vst [vmem:[#allocation338_spill] sm:$0xff] %v14310_v54  ;;  %v14320_v57 = vld [vmem:[%s19192_s3 + $0xa58] sm:$0xff]  ;;  %v14325_v60 = vld [vmem:[%s19192_s3 + $0xa60] sm:$0xff] }
  0xa7   :  { %19557 = vst [vmem:[#allocation339_spill] sm:$0xff] %v14315_v61  ;;  %19558 = vst [vmem:[#allocation340_spill] sm:$0xff] %v14320_v57  ;;  %v14330_v59 = vld [vmem:[%s19192_s3 + $0xa68] sm:$0xff]  ;;  %v14335_v54 = vld [vmem:[%s19192_s3 + $0xa70] sm:$0xff] }
  0xa8   :  { %19559 = vst [vmem:[#allocation341_spill] sm:$0xff] %v14325_v60  ;;  %19560 = vst [vmem:[#allocation342_spill] sm:$0xff] %v14330_v59  ;;  %v14340_v61 = vld [vmem:[%s19192_s3 + $0xa78] sm:$0xff]  ;;  %v14345_v57 = vld [vmem:[%s19192_s3 + $0xa80] sm:$0xff] }
  0xa9   :  { %19561 = vst [vmem:[#allocation343_spill] sm:$0xff] %v14335_v54  ;;  %19562 = vst [vmem:[#allocation344_spill] sm:$0xff] %v14340_v61  ;;  %v14350_v60 = vld [vmem:[%s19192_s3 + $0xa88] sm:$0xff]  ;;  %v14355_v59 = vld [vmem:[%s19192_s3 + $0xa90] sm:$0xff] }
  0xaa   :  { %19563 = vst [vmem:[#allocation345_spill] sm:$0xff] %v14345_v57  ;;  %19564 = vst [vmem:[#allocation346_spill] sm:$0xff] %v14350_v60  ;;  %v14360_v54 = vld [vmem:[%s19192_s3 + $0xa98] sm:$0xff]  ;;  %v14365_v61 = vld [vmem:[%s19192_s3 + $0xaa0] sm:$0xff] }
  0xab   :  { %19565 = vst [vmem:[#allocation347_spill] sm:$0xff] %v14355_v59  ;;  %19566 = vst [vmem:[#allocation348_spill] sm:$0xff] %v14360_v54  ;;  %v14370_v57 = vld [vmem:[%s19192_s3 + $0xaa8] sm:$0xff]  ;;  %v14375_v60 = vld [vmem:[%s19192_s3 + $0xab0] sm:$0xff] }
  0xac   :  { %19567 = vst [vmem:[#allocation349_spill] sm:$0xff] %v14365_v61  ;;  %19568 = vst [vmem:[#allocation350_spill] sm:$0xff] %v14370_v57  ;;  %v14380_v59 = vld [vmem:[%s19192_s3 + $0xab8] sm:$0xff]  ;;  %v14385_v54 = vld [vmem:[%s19192_s3 + $0xac0] sm:$0xff] }
  0xad   :  { %19569 = vst [vmem:[#allocation351_spill] sm:$0xff] %v14375_v60  ;;  %19570 = vst [vmem:[#allocation352_spill] sm:$0xff] %v14380_v59  ;;  %v14390_v61 = vld [vmem:[%s19192_s3 + $0xac8] sm:$0xff]  ;;  %v14395_v57 = vld [vmem:[%s19192_s3 + $0xad0] sm:$0xff] }
  0xae   :  { %19571 = vst [vmem:[#allocation353_spill] sm:$0xff] %v14385_v54  ;;  %19572 = vst [vmem:[#allocation354_spill] sm:$0xff] %v14390_v61  ;;  %v14400_v60 = vld [vmem:[%s19192_s3 + $0xad8] sm:$0xff]  ;;  %v14405_v59 = vld [vmem:[%s19192_s3 + $0xae0] sm:$0xff] }
  0xaf   :  { %19573 = vst [vmem:[#allocation355_spill] sm:$0xff] %v14395_v57  ;;  %19574 = vst [vmem:[#allocation356_spill] sm:$0xff] %v14400_v60  ;;  %v14410_v54 = vld [vmem:[%s19192_s3 + $0xae8] sm:$0xff]  ;;  %v14415_v61 = vld [vmem:[%s19192_s3 + $0xaf0] sm:$0xff] }
  0xb0   :  { %19575 = vst [vmem:[#allocation357_spill] sm:$0xff] %v14405_v59  ;;  %19576 = vst [vmem:[#allocation358_spill] sm:$0xff] %v14410_v54  ;;  %v14420_v57 = vld [vmem:[%s19192_s3 + $0xaf8] sm:$0xff]  ;;  %v14425_v60 = vld [vmem:[%s19192_s3 + $0xb00] sm:$0xff] }
  0xb1   :  { %19577 = vst [vmem:[#allocation359_spill] sm:$0xff] %v14415_v61  ;;  %19578 = vst [vmem:[#allocation360_spill] sm:$0xff] %v14420_v57  ;;  %v14430_v59 = vld [vmem:[%s19192_s3 + $0xb08] sm:$0xff]  ;;  %v14435_v54 = vld [vmem:[%s19192_s3 + $0xb10] sm:$0xff] }
  0xb2   :  { %19579 = vst [vmem:[#allocation361_spill] sm:$0xff] %v14425_v60  ;;  %19580 = vst [vmem:[#allocation362_spill] sm:$0xff] %v14430_v59  ;;  %v14440_v61 = vld [vmem:[%s19192_s3 + $0xb18] sm:$0xff]  ;;  %v14445_v57 = vld [vmem:[%s19192_s3 + $0xb20] sm:$0xff] }
  0xb3   :  { %19581 = vst [vmem:[#allocation363_spill] sm:$0xff] %v14435_v54  ;;  %19582 = vst [vmem:[#allocation364_spill] sm:$0xff] %v14440_v61  ;;  %v14450_v60 = vld [vmem:[%s19192_s3 + $0xb28] sm:$0xff]  ;;  %v14455_v59 = vld [vmem:[%s19192_s3 + $0xb30] sm:$0xff] }
  0xb4   :  { %19583 = vst [vmem:[#allocation365_spill] sm:$0xff] %v14445_v57  ;;  %19584 = vst [vmem:[#allocation366_spill] sm:$0xff] %v14450_v60  ;;  %v14460_v54 = vld [vmem:[%s19192_s3 + $0xb38] sm:$0xff]  ;;  %v14465_v61 = vld [vmem:[%s19192_s3 + $0xb40] sm:$0xff] }
  0xb5   :  { %19585 = vst [vmem:[#allocation367_spill] sm:$0xff] %v14455_v59  ;;  %19586 = vst [vmem:[#allocation368_spill] sm:$0xff] %v14460_v54  ;;  %v14470_v57 = vld [vmem:[%s19192_s3 + $0xb48] sm:$0xff]  ;;  %v14475_v60 = vld [vmem:[%s19192_s3 + $0xb50] sm:$0xff] }
  0xb6   :  { %19587 = vst [vmem:[#allocation369_spill] sm:$0xff] %v14465_v61  ;;  %19588 = vst [vmem:[#allocation370_spill] sm:$0xff] %v14470_v57  ;;  %v14480_v59 = vld [vmem:[%s19192_s3 + $0xb58] sm:$0xff]  ;;  %v14485_v54 = vld [vmem:[%s19192_s3 + $0xb60] sm:$0xff] }
  0xb7   :  { %19589 = vst [vmem:[#allocation371_spill] sm:$0xff] %v14475_v60  ;;  %19590 = vst [vmem:[#allocation372_spill] sm:$0xff] %v14480_v59  ;;  %v14490_v61 = vld [vmem:[%s19192_s3 + $0xb68] sm:$0xff]  ;;  %v14495_v57 = vld [vmem:[%s19192_s3 + $0xb70] sm:$0xff] }
  0xb8   :  { %19591 = vst [vmem:[#allocation373_spill] sm:$0xff] %v14485_v54  ;;  %19592 = vst [vmem:[#allocation374_spill] sm:$0xff] %v14490_v61  ;;  %v14500_v60 = vld [vmem:[%s19192_s3 + $0xb78] sm:$0xff]  ;;  %v14505_v59 = vld [vmem:[%s19192_s3 + $0xb80] sm:$0xff] }
  0xb9   :  { %19593 = vst [vmem:[#allocation375_spill] sm:$0xff] %v14495_v57  ;;  %19594 = vst [vmem:[#allocation376_spill] sm:$0xff] %v14500_v60  ;;  %v14510_v54 = vld [vmem:[%s19192_s3 + $0xb88] sm:$0xff]  ;;  %v14515_v61 = vld [vmem:[%s19192_s3 + $0xb90] sm:$0xff] }
  0xba   :  { %19595 = vst [vmem:[#allocation377_spill] sm:$0xff] %v14505_v59  ;;  %19596 = vst [vmem:[#allocation378_spill] sm:$0xff] %v14510_v54  ;;  %v14520_v57 = vld [vmem:[%s19192_s3 + $0xb98] sm:$0xff]  ;;  %v14525_v60 = vld [vmem:[%s19192_s3 + $0xba0] sm:$0xff] }
  0xbb   :  { %19597 = vst [vmem:[#allocation379_spill] sm:$0xff] %v14515_v61  ;;  %19598 = vst [vmem:[#allocation380_spill] sm:$0xff] %v14520_v57  ;;  %v14530_v59 = vld [vmem:[%s19192_s3 + $0xba8] sm:$0xff]  ;;  %v14535_v54 = vld [vmem:[%s19192_s3 + $0xbb0] sm:$0xff] }
  0xbc   :  { %19599 = vst [vmem:[#allocation381_spill] sm:$0xff] %v14525_v60  ;;  %19600 = vst [vmem:[#allocation382_spill] sm:$0xff] %v14530_v59  ;;  %v14540_v61 = vld [vmem:[%s19192_s3 + $0xbb8] sm:$0xff]  ;;  %v14545_v57 = vld [vmem:[%s19192_s3 + $0xbc0] sm:$0xff] }
  0xbd   :  { %19601 = vst [vmem:[#allocation383_spill] sm:$0xff] %v14535_v54  ;;  %19602 = vst [vmem:[#allocation384_spill] sm:$0xff] %v14540_v61  ;;  %v14550_v60 = vld [vmem:[%s19192_s3 + $0xbc8] sm:$0xff]  ;;  %v14555_v59 = vld [vmem:[%s19192_s3 + $0xbd0] sm:$0xff] }
  0xbe   :  { %19603 = vst [vmem:[#allocation385_spill] sm:$0xff] %v14545_v57  ;;  %19604 = vst [vmem:[#allocation386_spill] sm:$0xff] %v14550_v60  ;;  %v14560_v54 = vld [vmem:[%s19192_s3 + $0xbd8] sm:$0xff]  ;;  %v14565_v61 = vld [vmem:[%s19192_s3 + $0xbe0] sm:$0xff] }
  0xbf   :  { %19605 = vst [vmem:[#allocation387_spill] sm:$0xff] %v14555_v59  ;;  %19606 = vst [vmem:[#allocation388_spill] sm:$0xff] %v14560_v54  ;;  %v14570_v57 = vld [vmem:[%s19192_s3 + $0xbe8] sm:$0xff]  ;;  %v14575_v60 = vld [vmem:[%s19192_s3 + $0xbf0] sm:$0xff] }
  0xc0   :  { %19607 = vst [vmem:[#allocation389_spill] sm:$0xff] %v14565_v61  ;;  %19608 = vst [vmem:[#allocation390_spill] sm:$0xff] %v14570_v57  ;;  %v14580_v59 = vld [vmem:[%s19192_s3 + $0xbf8] sm:$0xff]  ;;  %v14585_v54 = vld [vmem:[%s19192_s3 + $0xc00] sm:$0xff] }
  0xc1   :  { %19609 = vst [vmem:[#allocation391_spill] sm:$0xff] %v14575_v60  ;;  %19610 = vst [vmem:[#allocation392_spill] sm:$0xff] %v14580_v59  ;;  %v14590_v61 = vld [vmem:[%s19192_s3 + $0xc08] sm:$0xff]  ;;  %v14595_v57 = vld [vmem:[%s19192_s3 + $0xc10] sm:$0xff] }
  0xc2   :  { %19611 = vst [vmem:[#allocation393_spill] sm:$0xff] %v14585_v54  ;;  %19612 = vst [vmem:[#allocation394_spill] sm:$0xff] %v14590_v61  ;;  %v14600_v60 = vld [vmem:[%s19192_s3 + $0xc18] sm:$0xff]  ;;  %v14605_v59 = vld [vmem:[%s19192_s3 + $0xc20] sm:$0xff] }
  0xc3   :  { %19613 = vst [vmem:[#allocation395_spill] sm:$0xff] %v14595_v57  ;;  %19614 = vst [vmem:[#allocation396_spill] sm:$0xff] %v14600_v60  ;;  %v14610_v54 = vld [vmem:[%s19192_s3 + $0xc28] sm:$0xff]  ;;  %v14615_v61 = vld [vmem:[%s19192_s3 + $0xc30] sm:$0xff] }
  0xc4   :  { %19615 = vst [vmem:[#allocation397_spill] sm:$0xff] %v14605_v59  ;;  %19616 = vst [vmem:[#allocation398_spill] sm:$0xff] %v14610_v54  ;;  %v14620_v57 = vld [vmem:[%s19192_s3 + $0xc38] sm:$0xff]  ;;  %v14625_v60 = vld [vmem:[%s19192_s3 + $0xc40] sm:$0xff] }
  0xc5   :  { %19617 = vst [vmem:[#allocation399_spill] sm:$0xff] %v14615_v61  ;;  %19618 = vst [vmem:[#allocation400_spill] sm:$0xff] %v14620_v57  ;;  %v14630_v59 = vld [vmem:[%s19192_s3 + $0xc48] sm:$0xff]  ;;  %v14635_v54 = vld [vmem:[%s19192_s3 + $0xc50] sm:$0xff] }
  0xc6   :  { %19619 = vst [vmem:[#allocation401_spill] sm:$0xff] %v14625_v60  ;;  %19620 = vst [vmem:[#allocation402_spill] sm:$0xff] %v14630_v59  ;;  %v14640_v61 = vld [vmem:[%s19192_s3 + $0xc58] sm:$0xff]  ;;  %v14645_v57 = vld [vmem:[%s19192_s3 + $0xc60] sm:$0xff] }
  0xc7   :  { %19621 = vst [vmem:[#allocation403_spill] sm:$0xff] %v14635_v54  ;;  %19622 = vst [vmem:[#allocation404_spill] sm:$0xff] %v14640_v61  ;;  %v14650_v60 = vld [vmem:[%s19192_s3 + $0xc68] sm:$0xff]  ;;  %v14655_v59 = vld [vmem:[%s19192_s3 + $0xc70] sm:$0xff] }
  0xc8   :  { %19623 = vst [vmem:[#allocation405_spill] sm:$0xff] %v14645_v57  ;;  %19624 = vst [vmem:[#allocation406_spill] sm:$0xff] %v14650_v60  ;;  %v14660_v54 = vld [vmem:[%s19192_s3 + $0xc78] sm:$0xff]  ;;  %v14665_v61 = vld [vmem:[%s19192_s3 + $0xc80] sm:$0xff] }
  0xc9   :  { %19625 = vst [vmem:[#allocation407_spill] sm:$0xff] %v14655_v59  ;;  %19626 = vst [vmem:[#allocation408_spill] sm:$0xff] %v14660_v54  ;;  %v14670_v57 = vld [vmem:[%s19192_s3 + $0xc88] sm:$0xff]  ;;  %v14675_v60 = vld [vmem:[%s19192_s3 + $0xc90] sm:$0xff] }
  0xca   :  { %19627 = vst [vmem:[#allocation409_spill] sm:$0xff] %v14665_v61  ;;  %19628 = vst [vmem:[#allocation410_spill] sm:$0xff] %v14670_v57  ;;  %v14680_v59 = vld [vmem:[%s19192_s3 + $0xc98] sm:$0xff]  ;;  %v14685_v54 = vld [vmem:[%s19192_s3 + $0xca0] sm:$0xff] }
  0xcb   :  { %19629 = vst [vmem:[#allocation411_spill] sm:$0xff] %v14675_v60  ;;  %19630 = vst [vmem:[#allocation412_spill] sm:$0xff] %v14680_v59  ;;  %v14690_v61 = vld [vmem:[%s19192_s3 + $0xca8] sm:$0xff]  ;;  %v14695_v57 = vld [vmem:[%s19192_s3 + $0xcb0] sm:$0xff] }
  0xcc   :  { %19631 = vst [vmem:[#allocation413_spill] sm:$0xff] %v14685_v54  ;;  %19632 = vst [vmem:[#allocation414_spill] sm:$0xff] %v14690_v61  ;;  %v14700_v60 = vld [vmem:[%s19192_s3 + $0xcb8] sm:$0xff]  ;;  %v14705_v59 = vld [vmem:[%s19192_s3 + $0xcc0] sm:$0xff] }
  0xcd   :  { %19633 = vst [vmem:[#allocation415_spill] sm:$0xff] %v14695_v57  ;;  %19634 = vst [vmem:[#allocation416_spill] sm:$0xff] %v14700_v60  ;;  %v14710_v54 = vld [vmem:[%s19192_s3 + $0xcc8] sm:$0xff]  ;;  %v14715_v61 = vld [vmem:[%s19192_s3 + $0xcd0] sm:$0xff] }
  0xce   :  { %19635 = vst [vmem:[#allocation417_spill] sm:$0xff] %v14705_v59  ;;  %19636 = vst [vmem:[#allocation418_spill] sm:$0xff] %v14710_v54  ;;  %v14720_v57 = vld [vmem:[%s19192_s3 + $0xcd8] sm:$0xff]  ;;  %v14725_v60 = vld [vmem:[%s19192_s3 + $0xce0] sm:$0xff] }
  0xcf   :  { %19637 = vst [vmem:[#allocation419_spill] sm:$0xff] %v14715_v61  ;;  %19638 = vst [vmem:[#allocation420_spill] sm:$0xff] %v14720_v57  ;;  %v14730_v59 = vld [vmem:[%s19192_s3 + $0xce8] sm:$0xff]  ;;  %v14735_v54 = vld [vmem:[%s19192_s3 + $0xcf0] sm:$0xff] }
  0xd0   :  { %19639 = vst [vmem:[#allocation421_spill] sm:$0xff] %v14725_v60  ;;  %19640 = vst [vmem:[#allocation422_spill] sm:$0xff] %v14730_v59  ;;  %v14740_v61 = vld [vmem:[%s19192_s3 + $0xcf8] sm:$0xff]  ;;  %v14745_v57 = vld [vmem:[%s19192_s3 + $0xd00] sm:$0xff] }
  0xd1   :  { %19641 = vst [vmem:[#allocation423_spill] sm:$0xff] %v14735_v54  ;;  %19642 = vst [vmem:[#allocation424_spill] sm:$0xff] %v14740_v61  ;;  %v14750_v60 = vld [vmem:[%s19192_s3 + $0xd08] sm:$0xff]  ;;  %v14755_v59 = vld [vmem:[%s19192_s3 + $0xd10] sm:$0xff] }
  0xd2   :  { %19643 = vst [vmem:[#allocation425_spill] sm:$0xff] %v14745_v57  ;;  %19644 = vst [vmem:[#allocation426_spill] sm:$0xff] %v14750_v60  ;;  %v14760_v54 = vld [vmem:[%s19192_s3 + $0xd18] sm:$0xff]  ;;  %v14765_v61 = vld [vmem:[%s19192_s3 + $0xd20] sm:$0xff] }
  0xd3   :  { %19645 = vst [vmem:[#allocation427_spill] sm:$0xff] %v14755_v59  ;;  %19646 = vst [vmem:[#allocation428_spill] sm:$0xff] %v14760_v54  ;;  %v14770_v57 = vld [vmem:[%s19192_s3 + $0xd28] sm:$0xff]  ;;  %v14775_v60 = vld [vmem:[%s19192_s3 + $0xd30] sm:$0xff] }
  0xd4   :  { %19647 = vst [vmem:[#allocation429_spill] sm:$0xff] %v14765_v61  ;;  %19648 = vst [vmem:[#allocation430_spill] sm:$0xff] %v14770_v57  ;;  %v14780_v59 = vld [vmem:[%s19192_s3 + $0xd38] sm:$0xff]  ;;  %v14785_v54 = vld [vmem:[%s19192_s3 + $0xd40] sm:$0xff] }
  0xd5   :  { %19649 = vst [vmem:[#allocation431_spill] sm:$0xff] %v14775_v60  ;;  %19650 = vst [vmem:[#allocation432_spill] sm:$0xff] %v14780_v59  ;;  %v14790_v61 = vld [vmem:[%s19192_s3 + $0xd48] sm:$0xff]  ;;  %v14795_v57 = vld [vmem:[%s19192_s3 + $0xd50] sm:$0xff] }
  0xd6   :  { %19651 = vst [vmem:[#allocation433_spill] sm:$0xff] %v14785_v54  ;;  %19652 = vst [vmem:[#allocation434_spill] sm:$0xff] %v14790_v61  ;;  %v14800_v60 = vld [vmem:[%s19192_s3 + $0xd58] sm:$0xff]  ;;  %v14805_v59 = vld [vmem:[%s19192_s3 + $0xd60] sm:$0xff] }
  0xd7   :  { %19653 = vst [vmem:[#allocation435_spill] sm:$0xff] %v14795_v57  ;;  %19654 = vst [vmem:[#allocation436_spill] sm:$0xff] %v14800_v60  ;;  %v14810_v54 = vld [vmem:[%s19192_s3 + $0xd68] sm:$0xff]  ;;  %v14815_v61 = vld [vmem:[%s19192_s3 + $0xd70] sm:$0xff] }
  0xd8   :  { %19655 = vst [vmem:[#allocation437_spill] sm:$0xff] %v14805_v59  ;;  %19656 = vst [vmem:[#allocation438_spill] sm:$0xff] %v14810_v54  ;;  %v14820_v57 = vld [vmem:[%s19192_s3 + $0xd78] sm:$0xff]  ;;  %v14825_v60 = vld [vmem:[%s19192_s3 + $0xd80] sm:$0xff] }
  0xd9   :  { %19657 = vst [vmem:[#allocation439_spill] sm:$0xff] %v14815_v61  ;;  %19658 = vst [vmem:[#allocation440_spill] sm:$0xff] %v14820_v57  ;;  %v14830_v59 = vld [vmem:[%s19192_s3 + $0xd88] sm:$0xff]  ;;  %v14835_v54 = vld [vmem:[%s19192_s3 + $0xd90] sm:$0xff] }
  0xda   :  { %19659 = vst [vmem:[#allocation441_spill] sm:$0xff] %v14825_v60  ;;  %19660 = vst [vmem:[#allocation442_spill] sm:$0xff] %v14830_v59  ;;  %v14840_v61 = vld [vmem:[%s19192_s3 + $0xd98] sm:$0xff]  ;;  %v14845_v57 = vld [vmem:[%s19192_s3 + $0xda0] sm:$0xff] }
  0xdb   :  { %19661 = vst [vmem:[#allocation443_spill] sm:$0xff] %v14835_v54  ;;  %19662 = vst [vmem:[#allocation444_spill] sm:$0xff] %v14840_v61  ;;  %v14850_v60 = vld [vmem:[%s19192_s3 + $0xda8] sm:$0xff]  ;;  %v14855_v59 = vld [vmem:[%s19192_s3 + $0xdb0] sm:$0xff] }
  0xdc   :  { %19663 = vst [vmem:[#allocation445_spill] sm:$0xff] %v14845_v57  ;;  %19664 = vst [vmem:[#allocation446_spill] sm:$0xff] %v14850_v60  ;;  %v14860_v54 = vld [vmem:[%s19192_s3 + $0xdb8] sm:$0xff]  ;;  %v14865_v61 = vld [vmem:[%s19192_s3 + $0xdc0] sm:$0xff] }
  0xdd   :  { %19665 = vst [vmem:[#allocation447_spill] sm:$0xff] %v14855_v59  ;;  %19666 = vst [vmem:[#allocation448_spill] sm:$0xff] %v14860_v54  ;;  %v14870_v57 = vld [vmem:[%s19192_s3 + $0xdc8] sm:$0xff]  ;;  %v14875_v60 = vld [vmem:[%s19192_s3 + $0xdd0] sm:$0xff] }
  0xde   :  { %19667 = vst [vmem:[#allocation449_spill] sm:$0xff] %v14865_v61  ;;  %19668 = vst [vmem:[#allocation450_spill] sm:$0xff] %v14870_v57  ;;  %v14880_v59 = vld [vmem:[%s19192_s3 + $0xdd8] sm:$0xff]  ;;  %v14885_v54 = vld [vmem:[%s19192_s3 + $0xde0] sm:$0xff] }
  0xdf   :  { %19669 = vst [vmem:[#allocation451_spill] sm:$0xff] %v14875_v60  ;;  %19670 = vst [vmem:[#allocation452_spill] sm:$0xff] %v14880_v59  ;;  %v14890_v61 = vld [vmem:[%s19192_s3 + $0xde8] sm:$0xff]  ;;  %v14895_v57 = vld [vmem:[%s19192_s3 + $0xdf0] sm:$0xff] }
  0xe0   :  { %19671 = vst [vmem:[#allocation453_spill] sm:$0xff] %v14885_v54  ;;  %19672 = vst [vmem:[#allocation454_spill] sm:$0xff] %v14890_v61  ;;  %v14900_v60 = vld [vmem:[%s19192_s3 + $0xdf8] sm:$0xff]  ;;  %v14905_v59 = vld [vmem:[%s19192_s3 + $0xe00] sm:$0xff] }
  0xe1   :  { %19673 = vst [vmem:[#allocation455_spill] sm:$0xff] %v14895_v57  ;;  %19674 = vst [vmem:[#allocation456_spill] sm:$0xff] %v14900_v60  ;;  %v14910_v54 = vld [vmem:[%s19192_s3 + $0xe08] sm:$0xff]  ;;  %v14915_v61 = vld [vmem:[%s19192_s3 + $0xe10] sm:$0xff] }
  0xe2   :  { %19675 = vst [vmem:[#allocation457_spill] sm:$0xff] %v14905_v59  ;;  %19676 = vst [vmem:[#allocation458_spill] sm:$0xff] %v14910_v54  ;;  %v14920_v57 = vld [vmem:[%s19192_s3 + $0xe18] sm:$0xff]  ;;  %v14925_v60 = vld [vmem:[%s19192_s3 + $0xe20] sm:$0xff] }
  0xe3   :  { %19677 = vst [vmem:[#allocation459_spill] sm:$0xff] %v14915_v61  ;;  %19678 = vst [vmem:[#allocation460_spill] sm:$0xff] %v14920_v57  ;;  %v14930_v59 = vld [vmem:[%s19192_s3 + $0xe28] sm:$0xff]  ;;  %v14935_v54 = vld [vmem:[%s19192_s3 + $0xe30] sm:$0xff] }
  0xe4   :  { %19679 = vst [vmem:[#allocation461_spill] sm:$0xff] %v14925_v60  ;;  %19680 = vst [vmem:[#allocation462_spill] sm:$0xff] %v14930_v59  ;;  %v14940_v61 = vld [vmem:[%s19192_s3 + $0xe38] sm:$0xff]  ;;  %v14945_v57 = vld [vmem:[%s19192_s3 + $0xe40] sm:$0xff] }
  0xe5   :  { %19681 = vst [vmem:[#allocation463_spill] sm:$0xff] %v14935_v54  ;;  %19682 = vst [vmem:[#allocation464_spill] sm:$0xff] %v14940_v61  ;;  %v14950_v60 = vld [vmem:[%s19192_s3 + $0xe48] sm:$0xff]  ;;  %v14955_v59 = vld [vmem:[%s19192_s3 + $0xe50] sm:$0xff] }
  0xe6   :  { %19683 = vst [vmem:[#allocation465_spill] sm:$0xff] %v14945_v57  ;;  %19684 = vst [vmem:[#allocation466_spill] sm:$0xff] %v14950_v60  ;;  %v14960_v54 = vld [vmem:[%s19192_s3 + $0xe58] sm:$0xff]  ;;  %v14965_v61 = vld [vmem:[%s19192_s3 + $0xe60] sm:$0xff] }
  0xe7   :  { %19685 = vst [vmem:[#allocation467_spill] sm:$0xff] %v14955_v59  ;;  %19686 = vst [vmem:[#allocation468_spill] sm:$0xff] %v14960_v54  ;;  %v14970_v57 = vld [vmem:[%s19192_s3 + $0xe68] sm:$0xff]  ;;  %v14975_v60 = vld [vmem:[%s19192_s3 + $0xe70] sm:$0xff] }
  0xe8   :  { %19687 = vst [vmem:[#allocation469_spill] sm:$0xff] %v14965_v61  ;;  %19688 = vst [vmem:[#allocation470_spill] sm:$0xff] %v14970_v57  ;;  %v14980_v59 = vld [vmem:[%s19192_s3 + $0xe78] sm:$0xff]  ;;  %v14985_v54 = vld [vmem:[%s19192_s3 + $0xe80] sm:$0xff] }
  0xe9   :  { %19689 = vst [vmem:[#allocation471_spill] sm:$0xff] %v14975_v60  ;;  %19690 = vst [vmem:[#allocation472_spill] sm:$0xff] %v14980_v59  ;;  %v14990_v61 = vld [vmem:[%s19192_s3 + $0xe88] sm:$0xff]  ;;  %v14995_v57 = vld [vmem:[%s19192_s3 + $0xe90] sm:$0xff] }
  0xea   :  { %19691 = vst [vmem:[#allocation473_spill] sm:$0xff] %v14985_v54  ;;  %19692 = vst [vmem:[#allocation474_spill] sm:$0xff] %v14990_v61  ;;  %v15000_v60 = vld [vmem:[%s19192_s3 + $0xe98] sm:$0xff]  ;;  %v15005_v59 = vld [vmem:[%s19192_s3 + $0xea0] sm:$0xff] }
  0xeb   :  { %19693 = vst [vmem:[#allocation475_spill] sm:$0xff] %v14995_v57  ;;  %19694 = vst [vmem:[#allocation476_spill] sm:$0xff] %v15000_v60  ;;  %v15010_v54 = vld [vmem:[%s19192_s3 + $0xea8] sm:$0xff]  ;;  %v15015_v61 = vld [vmem:[%s19192_s3 + $0xeb0] sm:$0xff] }
  0xec   :  { %19695 = vst [vmem:[#allocation477_spill] sm:$0xff] %v15005_v59  ;;  %19696 = vst [vmem:[#allocation478_spill] sm:$0xff] %v15010_v54  ;;  %v15020_v57 = vld [vmem:[%s19192_s3 + $0xeb8] sm:$0xff]  ;;  %v15025_v60 = vld [vmem:[%s19192_s3 + $0xec0] sm:$0xff] }
  0xed   :  { %19697 = vst [vmem:[#allocation479_spill] sm:$0xff] %v15015_v61  ;;  %19698 = vst [vmem:[#allocation480_spill] sm:$0xff] %v15020_v57  ;;  %v15030_v59 = vld [vmem:[%s19192_s3 + $0xec8] sm:$0xff]  ;;  %v15035_v54 = vld [vmem:[%s19192_s3 + $0xed0] sm:$0xff] }
  0xee   :  { %19699 = vst [vmem:[#allocation481_spill] sm:$0xff] %v15025_v60  ;;  %19700 = vst [vmem:[#allocation482_spill] sm:$0xff] %v15030_v59  ;;  %v15040_v61 = vld [vmem:[%s19192_s3 + $0xed8] sm:$0xff]  ;;  %v15045_v57 = vld [vmem:[%s19192_s3 + $0xee0] sm:$0xff] }
  0xef   :  { %19701 = vst [vmem:[#allocation483_spill] sm:$0xff] %v15035_v54  ;;  %19702 = vst [vmem:[#allocation484_spill] sm:$0xff] %v15040_v61  ;;  %v15050_v60 = vld [vmem:[%s19192_s3 + $0xee8] sm:$0xff]  ;;  %v15055_v59 = vld [vmem:[%s19192_s3 + $0xef0] sm:$0xff] }
  0xf0   :  { %19703 = vst [vmem:[#allocation485_spill] sm:$0xff] %v15045_v57  ;;  %19704 = vst [vmem:[#allocation486_spill] sm:$0xff] %v15050_v60  ;;  %v15060_v54 = vld [vmem:[%s19192_s3 + $0xef8] sm:$0xff]  ;;  %v15065_v61 = vld [vmem:[%s19192_s3 + $0xf00] sm:$0xff] }
  0xf1   :  { %19705 = vst [vmem:[#allocation487_spill] sm:$0xff] %v15055_v59  ;;  %19706 = vst [vmem:[#allocation488_spill] sm:$0xff] %v15060_v54  ;;  %v15070_v57 = vld [vmem:[%s19192_s3 + $0xf08] sm:$0xff]  ;;  %v15075_v60 = vld [vmem:[%s19192_s3 + $0xf10] sm:$0xff] }
  0xf2   :  { %19707 = vst [vmem:[#allocation489_spill] sm:$0xff] %v15065_v61  ;;  %19708 = vst [vmem:[#allocation490_spill] sm:$0xff] %v15070_v57  ;;  %v15080_v59 = vld [vmem:[%s19192_s3 + $0xf18] sm:$0xff]  ;;  %v15085_v54 = vld [vmem:[%s19192_s3 + $0xf20] sm:$0xff] }
  0xf3   :  { %19709 = vst [vmem:[#allocation491_spill] sm:$0xff] %v15075_v60  ;;  %19710 = vst [vmem:[#allocation492_spill] sm:$0xff] %v15080_v59  ;;  %v15090_v61 = vld [vmem:[%s19192_s3 + $0xf28] sm:$0xff]  ;;  %v15095_v57 = vld [vmem:[%s19192_s3 + $0xf30] sm:$0xff] }
  0xf4   :  { %19711 = vst [vmem:[#allocation493_spill] sm:$0xff] %v15085_v54  ;;  %19712 = vst [vmem:[#allocation494_spill] sm:$0xff] %v15090_v61  ;;  %v15100_v60 = vld [vmem:[%s19192_s3 + $0xf38] sm:$0xff]  ;;  %v15105_v59 = vld [vmem:[%s19192_s3 + $0xf40] sm:$0xff] }
  0xf5   :  { %19713 = vst [vmem:[#allocation495_spill] sm:$0xff] %v15095_v57  ;;  %19714 = vst [vmem:[#allocation496_spill] sm:$0xff] %v15100_v60  ;;  %v15110_v54 = vld [vmem:[%s19192_s3 + $0xf48] sm:$0xff]  ;;  %v15115_v61 = vld [vmem:[%s19192_s3 + $0xf50] sm:$0xff] }
  0xf6   :  { %19715 = vst [vmem:[#allocation497_spill] sm:$0xff] %v15105_v59  ;;  %19716 = vst [vmem:[#allocation498_spill] sm:$0xff] %v15110_v54  ;;  %v15120_v57 = vld [vmem:[%s19192_s3 + $0xf58] sm:$0xff]  ;;  %v15125_v60 = vld [vmem:[%s19192_s3 + $0xf60] sm:$0xff] }
  0xf7   :  { %19717 = vst [vmem:[#allocation499_spill] sm:$0xff] %v15115_v61  ;;  %19718 = vst [vmem:[#allocation500_spill] sm:$0xff] %v15120_v57  ;;  %v15130_v59 = vld [vmem:[%s19192_s3 + $0xf68] sm:$0xff]  ;;  %v15135_v54 = vld [vmem:[%s19192_s3 + $0xf70] sm:$0xff] }
  0xf8   :  { %19719 = vst [vmem:[#allocation501_spill] sm:$0xff] %v15125_v60  ;;  %19720 = vst [vmem:[#allocation502_spill] sm:$0xff] %v15130_v59  ;;  %v15140_v61 = vld [vmem:[%s19192_s3 + $0xf78] sm:$0xff]  ;;  %v15145_v57 = vld [vmem:[%s19192_s3 + $0xf80] sm:$0xff] }
  0xf9   :  { %19721 = vst [vmem:[#allocation503_spill] sm:$0xff] %v15135_v54  ;;  %19722 = vst [vmem:[#allocation504_spill] sm:$0xff] %v15140_v61  ;;  %v15150_v60 = vld [vmem:[%s19192_s3 + $0xf88] sm:$0xff]  ;;  %v15155_v59 = vld [vmem:[%s19192_s3 + $0xf90] sm:$0xff] }
  0xfa   :  { %19723 = vst [vmem:[#allocation505_spill] sm:$0xff] %v15145_v57  ;;  %19724 = vst [vmem:[#allocation506_spill] sm:$0xff] %v15150_v60  ;;  %v15160_v54 = vld [vmem:[%s19192_s3 + $0xf98] sm:$0xff]  ;;  %v15165_v61 = vld [vmem:[%s19192_s3 + $0xfa0] sm:$0xff] }
  0xfb   :  { %19725 = vst [vmem:[#allocation507_spill] sm:$0xff] %v15155_v59  ;;  %19726 = vst [vmem:[#allocation508_spill] sm:$0xff] %v15160_v54  ;;  %v15170_v57 = vld [vmem:[%s19192_s3 + $0xfa8] sm:$0xff]  ;;  %v15175_v60 = vld [vmem:[%s19192_s3 + $0xfb0] sm:$0xff] }
  0xfc   :  { %19727 = vst [vmem:[#allocation509_spill] sm:$0xff] %v15165_v61  ;;  %19728 = vst [vmem:[#allocation510_spill] sm:$0xff] %v15170_v57  ;;  %v15180_v59 = vld [vmem:[%s19192_s3 + $0xfb8] sm:$0xff]  ;;  %v15185_v54 = vld [vmem:[%s19192_s3 + $0xfc0] sm:$0xff] }
  0xfd   :  { %19729 = vst [vmem:[#allocation511_spill] sm:$0xff] %v15175_v60  ;;  %19730 = vst [vmem:[#allocation512_spill] sm:$0xff] %v15180_v59  ;;  %v15190_v61 = vld [vmem:[%s19192_s3 + $0xfc8] sm:$0xff]  ;;  %v15195_v57 = vld [vmem:[%s19192_s3 + $0xfd0] sm:$0xff] }
  0xfe   :  { %19731 = vst [vmem:[#allocation513_spill] sm:$0xff] %v15185_v54  ;;  %19732 = vst [vmem:[#allocation514_spill] sm:$0xff] %v15190_v61  ;;  %v15200_v60 = vld [vmem:[%s19192_s3 + $0xfd8] sm:$0xff]  ;;  %v15205_v59 = vld [vmem:[%s19192_s3 + $0xfe0] sm:$0xff] }
  0xff   :  { %19733 = vst [vmem:[#allocation515_spill] sm:$0xff] %v15195_v57  ;;  %19734 = vst [vmem:[#allocation516_spill] sm:$0xff] %v15200_v60  ;;  %v15210_v54 = vld [vmem:[%s19192_s3 + $0xfe8] sm:$0xff]  ;;  %v15215_v61 = vld [vmem:[%s19192_s3 + $0xff0] sm:$0xff] }
 0x100   :  { %19735 = vst [vmem:[#allocation517_spill] sm:$0xff] %v15205_v59  ;;  %19736 = vst [vmem:[#allocation518_spill] sm:$0xff] %v15210_v54  ;;  %v15220_v57 = vld [vmem:[%s19192_s3 + $0xff8] sm:$0xff]  ;;  %v15225_v60 = vld [vmem:[%s19192_s3 + $0x1000] sm:$0xff] }
 0x101   :  { %19737 = vst [vmem:[#allocation519_spill] sm:$0xff] %v15215_v61  ;;  %19738 = vst [vmem:[#allocation520_spill] sm:$0xff] %v15220_v57  ;;  %v15230_v59 = vld [vmem:[%s19192_s3 + $0x1008] sm:$0xff]  ;;  %v15235_v54 = vld [vmem:[%s19192_s3 + $0x1010] sm:$0xff] }
 0x102   :  { %19739 = vst [vmem:[#allocation521_spill] sm:$0xff] %v15225_v60  ;;  %19740 = vst [vmem:[#allocation522_spill] sm:$0xff] %v15230_v59  ;;  %v15240_v61 = vld [vmem:[%s19192_s3 + $0x1018] sm:$0xff]  ;;  %v15245_v57 = vld [vmem:[%s19192_s3 + $0x1020] sm:$0xff] }
 0x103   :  { %19741 = vst [vmem:[#allocation523_spill] sm:$0xff] %v15235_v54  ;;  %19742 = vst [vmem:[#allocation524_spill] sm:$0xff] %v15240_v61  ;;  %v15250_v60 = vld [vmem:[%s19192_s3 + $0x1028] sm:$0xff]  ;;  %v15255_v59 = vld [vmem:[%s19192_s3 + $0x1030] sm:$0xff] }
 0x104   :  { %19743 = vst [vmem:[#allocation525_spill] sm:$0xff] %v15245_v57  ;;  %19744 = vst [vmem:[#allocation526_spill] sm:$0xff] %v15250_v60  ;;  %v15260_v54 = vld [vmem:[%s19192_s3 + $0x1038] sm:$0xff]  ;;  %v15265_v61 = vld [vmem:[%s19192_s3 + $0x1040] sm:$0xff] }
 0x105   :  { %19745 = vst [vmem:[#allocation527_spill] sm:$0xff] %v15255_v59  ;;  %19746 = vst [vmem:[#allocation528_spill] sm:$0xff] %v15260_v54  ;;  %v15270_v57 = vld [vmem:[%s19192_s3 + $0x1048] sm:$0xff]  ;;  %v15275_v60 = vld [vmem:[%s19192_s3 + $0x1050] sm:$0xff] }
 0x106   :  { %19747 = vst [vmem:[#allocation529_spill] sm:$0xff] %v15265_v61  ;;  %19748 = vst [vmem:[#allocation530_spill] sm:$0xff] %v15270_v57  ;;  %v15280_v59 = vld [vmem:[%s19192_s3 + $0x1058] sm:$0xff]  ;;  %v15285_v54 = vld [vmem:[%s19192_s3 + $0x1060] sm:$0xff] }
 0x107   :  { %19749 = vst [vmem:[#allocation531_spill] sm:$0xff] %v15275_v60  ;;  %19750 = vst [vmem:[#allocation532_spill] sm:$0xff] %v15280_v59  ;;  %v15290_v61 = vld [vmem:[%s19192_s3 + $0x1068] sm:$0xff]  ;;  %v15295_v57 = vld [vmem:[%s19192_s3 + $0x1070] sm:$0xff] }
 0x108   :  { %19751 = vst [vmem:[#allocation533_spill] sm:$0xff] %v15285_v54  ;;  %19752 = vst [vmem:[#allocation534_spill] sm:$0xff] %v15290_v61  ;;  %v15300_v60 = vld [vmem:[%s19192_s3 + $0x1078] sm:$0xff]  ;;  %v15305_v59 = vld [vmem:[%s19192_s3 + $0x1080] sm:$0xff] }
 0x109   :  { %19753 = vst [vmem:[#allocation535_spill] sm:$0xff] %v15295_v57  ;;  %19754 = vst [vmem:[#allocation536_spill] sm:$0xff] %v15300_v60  ;;  %v15310_v54 = vld [vmem:[%s19192_s3 + $0x1088] sm:$0xff]  ;;  %v15315_v61 = vld [vmem:[%s19192_s3 + $0x1090] sm:$0xff] }
 0x10a   :  { %19755 = vst [vmem:[#allocation537_spill] sm:$0xff] %v15305_v59  ;;  %19756 = vst [vmem:[#allocation538_spill] sm:$0xff] %v15310_v54  ;;  %v15320_v57 = vld [vmem:[%s19192_s3 + $0x1098] sm:$0xff]  ;;  %v15325_v60 = vld [vmem:[%s19192_s3 + $0x10a0] sm:$0xff] }
 0x10b   :  { %19757 = vst [vmem:[#allocation539_spill] sm:$0xff] %v15315_v61  ;;  %19758 = vst [vmem:[#allocation540_spill] sm:$0xff] %v15320_v57  ;;  %v15330_v59 = vld [vmem:[%s19192_s3 + $0x10a8] sm:$0xff]  ;;  %v15335_v54 = vld [vmem:[%s19192_s3 + $0x10b0] sm:$0xff] }
 0x10c   :  { %19759 = vst [vmem:[#allocation541_spill] sm:$0xff] %v15325_v60  ;;  %19760 = vst [vmem:[#allocation542_spill] sm:$0xff] %v15330_v59  ;;  %v15340_v61 = vld [vmem:[%s19192_s3 + $0x10b8] sm:$0xff]  ;;  %v15345_v57 = vld [vmem:[%s19192_s3 + $0x10c0] sm:$0xff] }
 0x10d   :  { %19761 = vst [vmem:[#allocation543_spill] sm:$0xff] %v15335_v54  ;;  %19762 = vst [vmem:[#allocation544_spill] sm:$0xff] %v15340_v61  ;;  %v15350_v60 = vld [vmem:[%s19192_s3 + $0x10c8] sm:$0xff]  ;;  %v15355_v59 = vld [vmem:[%s19192_s3 + $0x10d0] sm:$0xff] }
 0x10e   :  { %19763 = vst [vmem:[#allocation545_spill] sm:$0xff] %v15345_v57  ;;  %19764 = vst [vmem:[#allocation546_spill] sm:$0xff] %v15350_v60  ;;  %v15360_v54 = vld [vmem:[%s19192_s3 + $0x10d8] sm:$0xff]  ;;  %v15365_v61 = vld [vmem:[%s19192_s3 + $0x10e0] sm:$0xff] }
 0x10f   :  { %19765 = vst [vmem:[#allocation547_spill] sm:$0xff] %v15355_v59  ;;  %19766 = vst [vmem:[#allocation548_spill] sm:$0xff] %v15360_v54  ;;  %v15370_v57 = vld [vmem:[%s19192_s3 + $0x10e8] sm:$0xff]  ;;  %v15375_v60 = vld [vmem:[%s19192_s3 + $0x10f0] sm:$0xff] }
 0x110   :  { %19767 = vst [vmem:[#allocation549_spill] sm:$0xff] %v15365_v61  ;;  %19768 = vst [vmem:[#allocation550_spill] sm:$0xff] %v15370_v57  ;;  %v15380_v59 = vld [vmem:[%s19192_s3 + $0x10f8] sm:$0xff]  ;;  %v15385_v54 = vld [vmem:[%s19192_s3 + $0x1100] sm:$0xff] }
 0x111   :  { %19769 = vst [vmem:[#allocation551_spill] sm:$0xff] %v15375_v60  ;;  %19770 = vst [vmem:[#allocation552_spill] sm:$0xff] %v15380_v59  ;;  %v15390_v61 = vld [vmem:[%s19192_s3 + $0x1108] sm:$0xff]  ;;  %v15395_v57 = vld [vmem:[%s19192_s3 + $0x1110] sm:$0xff] }
 0x112   :  { %19771 = vst [vmem:[#allocation553_spill] sm:$0xff] %v15385_v54  ;;  %19772 = vst [vmem:[#allocation554_spill] sm:$0xff] %v15390_v61  ;;  %v15400_v60 = vld [vmem:[%s19192_s3 + $0x1118] sm:$0xff]  ;;  %v15405_v59 = vld [vmem:[%s19192_s3 + $0x1120] sm:$0xff] }
 0x113   :  { %19773 = vst [vmem:[#allocation555_spill] sm:$0xff] %v15395_v57  ;;  %19774 = vst [vmem:[#allocation556_spill] sm:$0xff] %v15400_v60  ;;  %v15410_v54 = vld [vmem:[%s19192_s3 + $0x1128] sm:$0xff]  ;;  %v15415_v61 = vld [vmem:[%s19192_s3 + $0x1130] sm:$0xff] }
 0x114   :  { %19775 = vst [vmem:[#allocation557_spill] sm:$0xff] %v15405_v59  ;;  %19776 = vst [vmem:[#allocation558_spill] sm:$0xff] %v15410_v54  ;;  %v15420_v57 = vld [vmem:[%s19192_s3 + $0x1138] sm:$0xff]  ;;  %v15425_v60 = vld [vmem:[%s19192_s3 + $0x1140] sm:$0xff] }
 0x115   :  { %19777 = vst [vmem:[#allocation559_spill] sm:$0xff] %v15415_v61  ;;  %19778 = vst [vmem:[#allocation560_spill] sm:$0xff] %v15420_v57  ;;  %v15430_v59 = vld [vmem:[%s19192_s3 + $0x1148] sm:$0xff]  ;;  %v15435_v54 = vld [vmem:[%s19192_s3 + $0x1150] sm:$0xff] }
 0x116   :  { %19779 = vst [vmem:[#allocation561_spill] sm:$0xff] %v15425_v60  ;;  %19780 = vst [vmem:[#allocation562_spill] sm:$0xff] %v15430_v59  ;;  %v15440_v61 = vld [vmem:[%s19192_s3 + $0x1158] sm:$0xff]  ;;  %v15445_v57 = vld [vmem:[%s19192_s3 + $0x1160] sm:$0xff] }
 0x117   :  { %19781 = vst [vmem:[#allocation563_spill] sm:$0xff] %v15435_v54  ;;  %19782 = vst [vmem:[#allocation564_spill] sm:$0xff] %v15440_v61  ;;  %v15450_v60 = vld [vmem:[%s19192_s3 + $0x1168] sm:$0xff]  ;;  %v15455_v59 = vld [vmem:[%s19192_s3 + $0x1170] sm:$0xff] }
 0x118   :  { %19783 = vst [vmem:[#allocation565_spill] sm:$0xff] %v15445_v57  ;;  %19784 = vst [vmem:[#allocation566_spill] sm:$0xff] %v15450_v60  ;;  %v15460_v54 = vld [vmem:[%s19192_s3 + $0x1178] sm:$0xff]  ;;  %v15465_v61 = vld [vmem:[%s19192_s3 + $0x1180] sm:$0xff] }
 0x119   :  { %19785 = vst [vmem:[#allocation567_spill] sm:$0xff] %v15455_v59  ;;  %19786 = vst [vmem:[#allocation568_spill] sm:$0xff] %v15460_v54  ;;  %v15470_v57 = vld [vmem:[%s19192_s3 + $0x1188] sm:$0xff]  ;;  %v15475_v60 = vld [vmem:[%s19192_s3 + $0x1190] sm:$0xff] }
 0x11a   :  { %19787 = vst [vmem:[#allocation569_spill] sm:$0xff] %v15465_v61  ;;  %19788 = vst [vmem:[#allocation570_spill] sm:$0xff] %v15470_v57  ;;  %v15480_v59 = vld [vmem:[%s19192_s3 + $0x1198] sm:$0xff]  ;;  %v15485_v54 = vld [vmem:[%s19192_s3 + $0x11a0] sm:$0xff] }
 0x11b   :  { %19789 = vst [vmem:[#allocation571_spill] sm:$0xff] %v15475_v60  ;;  %19790 = vst [vmem:[#allocation572_spill] sm:$0xff] %v15480_v59  ;;  %v15490_v61 = vld [vmem:[%s19192_s3 + $0x11a8] sm:$0xff]  ;;  %v15495_v57 = vld [vmem:[%s19192_s3 + $0x11b0] sm:$0xff] }
 0x11c   :  { %19791 = vst [vmem:[#allocation573_spill] sm:$0xff] %v15485_v54  ;;  %19792 = vst [vmem:[#allocation574_spill] sm:$0xff] %v15490_v61  ;;  %v15500_v60 = vld [vmem:[%s19192_s3 + $0x11b8] sm:$0xff]  ;;  %v15505_v59 = vld [vmem:[%s19192_s3 + $0x11c0] sm:$0xff] }
 0x11d   :  { %19793 = vst [vmem:[#allocation575_spill] sm:$0xff] %v15495_v57  ;;  %19794 = vst [vmem:[#allocation576_spill] sm:$0xff] %v15500_v60  ;;  %v15510_v54 = vld [vmem:[%s19192_s3 + $0x11c8] sm:$0xff]  ;;  %v15515_v61 = vld [vmem:[%s19192_s3 + $0x11d0] sm:$0xff] }
 0x11e   :  { %19795 = vst [vmem:[#allocation577_spill] sm:$0xff] %v15505_v59  ;;  %19796 = vst [vmem:[#allocation578_spill] sm:$0xff] %v15510_v54  ;;  %v15520_v57 = vld [vmem:[%s19192_s3 + $0x11d8] sm:$0xff]  ;;  %v15525_v60 = vld [vmem:[%s19192_s3 + $0x11e0] sm:$0xff] }
 0x11f   :  { %19797 = vst [vmem:[#allocation579_spill] sm:$0xff] %v15515_v61  ;;  %19798 = vst [vmem:[#allocation580_spill] sm:$0xff] %v15520_v57  ;;  %v15530_v59 = vld [vmem:[%s19192_s3 + $0x11e8] sm:$0xff]  ;;  %v15535_v54 = vld [vmem:[%s19192_s3 + $0x11f0] sm:$0xff] }
 0x120   :  { %19799 = vst [vmem:[#allocation581_spill] sm:$0xff] %v15525_v60  ;;  %19800 = vst [vmem:[#allocation582_spill] sm:$0xff] %v15530_v59  ;;  %v15540_v61 = vld [vmem:[%s19192_s3 + $0x11f8] sm:$0xff]  ;;  %v15545_v57 = vld [vmem:[%s19192_s3 + $0x1200] sm:$0xff] }
 0x121   :  { %19801 = vst [vmem:[#allocation583_spill] sm:$0xff] %v15535_v54  ;;  %19802 = vst [vmem:[#allocation584_spill] sm:$0xff] %v15540_v61  ;;  %v15550_v60 = vld [vmem:[%s19192_s3 + $0x1208] sm:$0xff]  ;;  %v15555_v59 = vld [vmem:[%s19192_s3 + $0x1210] sm:$0xff] }
 0x122   :  { %19803 = vst [vmem:[#allocation585_spill] sm:$0xff] %v15545_v57  ;;  %19804 = vst [vmem:[#allocation586_spill] sm:$0xff] %v15550_v60  ;;  %v15560_v54 = vld [vmem:[%s19192_s3 + $0x1218] sm:$0xff]  ;;  %v15565_v61 = vld [vmem:[%s19192_s3 + $0x1220] sm:$0xff] }
 0x123   :  { %19805 = vst [vmem:[#allocation587_spill] sm:$0xff] %v15555_v59  ;;  %19806 = vst [vmem:[#allocation588_spill] sm:$0xff] %v15560_v54  ;;  %v15570_v57 = vld [vmem:[%s19192_s3 + $0x1228] sm:$0xff]  ;;  %v15575_v60 = vld [vmem:[%s19192_s3 + $0x1230] sm:$0xff] }
 0x124   :  { %19807 = vst [vmem:[#allocation589_spill] sm:$0xff] %v15565_v61  ;;  %19808 = vst [vmem:[#allocation590_spill] sm:$0xff] %v15570_v57  ;;  %v15580_v59 = vld [vmem:[%s19192_s3 + $0x1238] sm:$0xff]  ;;  %v15585_v54 = vld [vmem:[%s19192_s3 + $0x1240] sm:$0xff] }
 0x125   :  { %19809 = vst [vmem:[#allocation591_spill] sm:$0xff] %v15575_v60  ;;  %19810 = vst [vmem:[#allocation592_spill] sm:$0xff] %v15580_v59  ;;  %v15590_v61 = vld [vmem:[%s19192_s3 + $0x1248] sm:$0xff]  ;;  %v15595_v57 = vld [vmem:[%s19192_s3 + $0x1250] sm:$0xff] }
 0x126   :  { %19811 = vst [vmem:[#allocation593_spill] sm:$0xff] %v15585_v54  ;;  %19812 = vst [vmem:[#allocation594_spill] sm:$0xff] %v15590_v61  ;;  %v15600_v60 = vld [vmem:[%s19192_s3 + $0x1258] sm:$0xff]  ;;  %v15605_v59 = vld [vmem:[%s19192_s3 + $0x1260] sm:$0xff] }
 0x127   :  { %19813 = vst [vmem:[#allocation595_spill] sm:$0xff] %v15595_v57  ;;  %19814 = vst [vmem:[#allocation596_spill] sm:$0xff] %v15600_v60  ;;  %v15610_v54 = vld [vmem:[%s19192_s3 + $0x1268] sm:$0xff]  ;;  %v15615_v61 = vld [vmem:[%s19192_s3 + $0x1270] sm:$0xff] }
 0x128   :  { %19815 = vst [vmem:[#allocation597_spill] sm:$0xff] %v15605_v59  ;;  %19816 = vst [vmem:[#allocation598_spill] sm:$0xff] %v15610_v54  ;;  %v15620_v57 = vld [vmem:[%s19192_s3 + $0x1278] sm:$0xff]  ;;  %v15625_v60 = vld [vmem:[%s19192_s3 + $0x1280] sm:$0xff] }
 0x129   :  { %19817 = vst [vmem:[#allocation599_spill] sm:$0xff] %v15615_v61  ;;  %19818 = vst [vmem:[#allocation600_spill] sm:$0xff] %v15620_v57  ;;  %v15630_v59 = vld [vmem:[%s19192_s3 + $0x1288] sm:$0xff]  ;;  %v15635_v54 = vld [vmem:[%s19192_s3 + $0x1290] sm:$0xff] }
 0x12a   :  { %19819 = vst [vmem:[#allocation601_spill] sm:$0xff] %v15625_v60  ;;  %19820 = vst [vmem:[#allocation602_spill] sm:$0xff] %v15630_v59  ;;  %v15640_v61 = vld [vmem:[%s19192_s3 + $0x1298] sm:$0xff]  ;;  %v15645_v57 = vld [vmem:[%s19192_s3 + $0x12a0] sm:$0xff] }
 0x12b   :  { %19821 = vst [vmem:[#allocation603_spill] sm:$0xff] %v15635_v54  ;;  %19822 = vst [vmem:[#allocation604_spill] sm:$0xff] %v15640_v61  ;;  %v15650_v60 = vld [vmem:[%s19192_s3 + $0x12a8] sm:$0xff]  ;;  %v15655_v59 = vld [vmem:[%s19192_s3 + $0x12b0] sm:$0xff] }
 0x12c   :  { %19823 = vst [vmem:[#allocation605_spill] sm:$0xff] %v15645_v57  ;;  %19824 = vst [vmem:[#allocation606_spill] sm:$0xff] %v15650_v60  ;;  %v15660_v54 = vld [vmem:[%s19192_s3 + $0x12b8] sm:$0xff]  ;;  %v15665_v61 = vld [vmem:[%s19192_s3 + $0x12c0] sm:$0xff] }
 0x12d   :  { %19825 = vst [vmem:[#allocation607_spill] sm:$0xff] %v15655_v59  ;;  %19826 = vst [vmem:[#allocation608_spill] sm:$0xff] %v15660_v54  ;;  %v15670_v57 = vld [vmem:[%s19192_s3 + $0x12c8] sm:$0xff]  ;;  %v15675_v60 = vld [vmem:[%s19192_s3 + $0x12d0] sm:$0xff] }
 0x12e   :  { %19827 = vst [vmem:[#allocation609_spill] sm:$0xff] %v15665_v61  ;;  %19828 = vst [vmem:[#allocation610_spill] sm:$0xff] %v15670_v57  ;;  %v15680_v59 = vld [vmem:[%s19192_s3 + $0x12d8] sm:$0xff]  ;;  %v15685_v54 = vld [vmem:[%s19192_s3 + $0x12e0] sm:$0xff] }
 0x12f   :  { %19829 = vst [vmem:[#allocation611_spill] sm:$0xff] %v15675_v60  ;;  %19830 = vst [vmem:[#allocation612_spill] sm:$0xff] %v15680_v59  ;;  %v15690_v61 = vld [vmem:[%s19192_s3 + $0x12e8] sm:$0xff]  ;;  %v15695_v57 = vld [vmem:[%s19192_s3 + $0x12f0] sm:$0xff] }
 0x130   :  { %19831 = vst [vmem:[#allocation613_spill] sm:$0xff] %v15685_v54  ;;  %19832 = vst [vmem:[#allocation614_spill] sm:$0xff] %v15690_v61  ;;  %v15700_v60 = vld [vmem:[%s19192_s3 + $0x12f8] sm:$0xff]  ;;  %v15705_v59 = vld [vmem:[%s19192_s3 + $0x1300] sm:$0xff] }
 0x131   :  { %19833 = vst [vmem:[#allocation615_spill] sm:$0xff] %v15695_v57  ;;  %19834 = vst [vmem:[#allocation616_spill] sm:$0xff] %v15700_v60  ;;  %v15710_v54 = vld [vmem:[%s19192_s3 + $0x1308] sm:$0xff]  ;;  %v15715_v61 = vld [vmem:[%s19192_s3 + $0x1310] sm:$0xff] }
 0x132   :  { %19835 = vst [vmem:[#allocation617_spill] sm:$0xff] %v15705_v59  ;;  %19836 = vst [vmem:[#allocation618_spill] sm:$0xff] %v15710_v54  ;;  %v15720_v57 = vld [vmem:[%s19192_s3 + $0x1318] sm:$0xff]  ;;  %v15725_v60 = vld [vmem:[%s19192_s3 + $0x1320] sm:$0xff] }
 0x133   :  { %19837 = vst [vmem:[#allocation619_spill] sm:$0xff] %v15715_v61  ;;  %19838 = vst [vmem:[#allocation620_spill] sm:$0xff] %v15720_v57  ;;  %v15730_v59 = vld [vmem:[%s19192_s3 + $0x1328] sm:$0xff]  ;;  %v15735_v54 = vld [vmem:[%s19192_s3 + $0x1330] sm:$0xff] }
 0x134   :  { %19839 = vst [vmem:[#allocation621_spill] sm:$0xff] %v15725_v60  ;;  %19840 = vst [vmem:[#allocation622_spill] sm:$0xff] %v15730_v59  ;;  %v15740_v61 = vld [vmem:[%s19192_s3 + $0x1338] sm:$0xff]  ;;  %v15745_v57 = vld [vmem:[%s19192_s3 + $0x1340] sm:$0xff] }
 0x135   :  { %19841 = vst [vmem:[#allocation623_spill] sm:$0xff] %v15735_v54  ;;  %19842 = vst [vmem:[#allocation624_spill] sm:$0xff] %v15740_v61  ;;  %v15750_v60 = vld [vmem:[%s19192_s3 + $0x1348] sm:$0xff]  ;;  %v15755_v59 = vld [vmem:[%s19192_s3 + $0x1350] sm:$0xff] }
 0x136   :  { %19843 = vst [vmem:[#allocation625_spill] sm:$0xff] %v15745_v57  ;;  %19844 = vst [vmem:[#allocation626_spill] sm:$0xff] %v15750_v60  ;;  %v15760_v54 = vld [vmem:[%s19192_s3 + $0x1358] sm:$0xff]  ;;  %v15765_v61 = vld [vmem:[%s19192_s3 + $0x1360] sm:$0xff] }
 0x137   :  { %19845 = vst [vmem:[#allocation627_spill] sm:$0xff] %v15755_v59  ;;  %19846 = vst [vmem:[#allocation628_spill] sm:$0xff] %v15760_v54  ;;  %v15770_v57 = vld [vmem:[%s19192_s3 + $0x1368] sm:$0xff]  ;;  %v15775_v60 = vld [vmem:[%s19192_s3 + $0x1370] sm:$0xff] }
 0x138   :  { %19847 = vst [vmem:[#allocation629_spill] sm:$0xff] %v15765_v61  ;;  %19848 = vst [vmem:[#allocation630_spill] sm:$0xff] %v15770_v57  ;;  %v15780_v59 = vld [vmem:[%s19192_s3 + $0x1378] sm:$0xff]  ;;  %v15785_v54 = vld [vmem:[%s19192_s3 + $0x1380] sm:$0xff] }
 0x139   :  { %19849 = vst [vmem:[#allocation631_spill] sm:$0xff] %v15775_v60  ;;  %19850 = vst [vmem:[#allocation632_spill] sm:$0xff] %v15780_v59  ;;  %v15790_v61 = vld [vmem:[%s19192_s3 + $0x1388] sm:$0xff]  ;;  %v15795_v57 = vld [vmem:[%s19192_s3 + $0x1390] sm:$0xff] }
 0x13a   :  { %19851 = vst [vmem:[#allocation633_spill] sm:$0xff] %v15785_v54  ;;  %19852 = vst [vmem:[#allocation634_spill] sm:$0xff] %v15790_v61  ;;  %v15800_v60 = vld [vmem:[%s19192_s3 + $0x1398] sm:$0xff]  ;;  %v15805_v59 = vld [vmem:[%s19192_s3 + $0x13a0] sm:$0xff] }
 0x13b   :  { %19853 = vst [vmem:[#allocation635_spill] sm:$0xff] %v15795_v57  ;;  %19854 = vst [vmem:[#allocation636_spill] sm:$0xff] %v15800_v60  ;;  %v15810_v54 = vld [vmem:[%s19192_s3 + $0x13a8] sm:$0xff]  ;;  %v15815_v61 = vld [vmem:[%s19192_s3 + $0x13b0] sm:$0xff] }
 0x13c   :  { %19855 = vst [vmem:[#allocation637_spill] sm:$0xff] %v15805_v59  ;;  %19856 = vst [vmem:[#allocation638_spill] sm:$0xff] %v15810_v54  ;;  %v15820_v57 = vld [vmem:[%s19192_s3 + $0x13b8] sm:$0xff]  ;;  %v15825_v60 = vld [vmem:[%s19192_s3 + $0x13c0] sm:$0xff] }
 0x13d   :  { %19857 = vst [vmem:[#allocation639_spill] sm:$0xff] %v15815_v61  ;;  %19858 = vst [vmem:[#allocation640_spill] sm:$0xff] %v15820_v57  ;;  %v15830_v59 = vld [vmem:[%s19192_s3 + $0x13c8] sm:$0xff]  ;;  %v15835_v54 = vld [vmem:[%s19192_s3 + $0x13d0] sm:$0xff] }
 0x13e   :  { %19859 = vst [vmem:[#allocation641_spill] sm:$0xff] %v15825_v60  ;;  %19860 = vst [vmem:[#allocation642_spill] sm:$0xff] %v15830_v59  ;;  %v15840_v61 = vld [vmem:[%s19192_s3 + $0x13d8] sm:$0xff]  ;;  %v15845_v57 = vld [vmem:[%s19192_s3 + $0x13e0] sm:$0xff] }
 0x13f   :  { %19861 = vst [vmem:[#allocation643_spill] sm:$0xff] %v15835_v54  ;;  %19862 = vst [vmem:[#allocation644_spill] sm:$0xff] %v15840_v61  ;;  %v15850_v60 = vld [vmem:[%s19192_s3 + $0x13e8] sm:$0xff]  ;;  %v15855_v59 = vld [vmem:[%s19192_s3 + $0x13f0] sm:$0xff] }
 0x140   :  { %19863 = vst [vmem:[#allocation645_spill] sm:$0xff] %v15845_v57  ;;  %19864 = vst [vmem:[#allocation646_spill] sm:$0xff] %v15850_v60  ;;  %v15860_v54 = vld [vmem:[%s19192_s3 + $0x13f8] sm:$0xff]  ;;  %v15865_v61 = vld [vmem:[%s19192_s3 + $0x1400] sm:$0xff] }
 0x141   :  { %19865 = vst [vmem:[#allocation647_spill] sm:$0xff] %v15855_v59  ;;  %19866 = vst [vmem:[#allocation648_spill] sm:$0xff] %v15860_v54  ;;  %v15870_v57 = vld [vmem:[%s19192_s3 + $0x1408] sm:$0xff]  ;;  %v15875_v60 = vld [vmem:[%s19192_s3 + $0x1410] sm:$0xff] }
 0x142   :  { %19867 = vst [vmem:[#allocation649_spill] sm:$0xff] %v15865_v61  ;;  %19868 = vst [vmem:[#allocation650_spill] sm:$0xff] %v15870_v57  ;;  %v15880_v59 = vld [vmem:[%s19192_s3 + $0x1418] sm:$0xff]  ;;  %v15885_v54 = vld [vmem:[%s19192_s3 + $0x1420] sm:$0xff] }
 0x143   :  { %19869 = vst [vmem:[#allocation651_spill] sm:$0xff] %v15875_v60  ;;  %19870 = vst [vmem:[#allocation652_spill] sm:$0xff] %v15880_v59  ;;  %v15890_v61 = vld [vmem:[%s19192_s3 + $0x1428] sm:$0xff]  ;;  %v15895_v57 = vld [vmem:[%s19192_s3 + $0x1430] sm:$0xff] }
 0x144   :  { %19871 = vst [vmem:[#allocation653_spill] sm:$0xff] %v15885_v54  ;;  %19872 = vst [vmem:[#allocation654_spill] sm:$0xff] %v15890_v61  ;;  %v15900_v60 = vld [vmem:[%s19192_s3 + $0x1438] sm:$0xff]  ;;  %v15905_v59 = vld [vmem:[%s19192_s3 + $0x1440] sm:$0xff] }
 0x145   :  { %19873 = vst [vmem:[#allocation655_spill] sm:$0xff] %v15895_v57  ;;  %19874 = vst [vmem:[#allocation656_spill] sm:$0xff] %v15900_v60  ;;  %v15910_v54 = vld [vmem:[%s19192_s3 + $0x1448] sm:$0xff]  ;;  %v15915_v61 = vld [vmem:[%s19192_s3 + $0x1450] sm:$0xff] }
 0x146   :  { %19875 = vst [vmem:[#allocation657_spill] sm:$0xff] %v15905_v59  ;;  %19876 = vst [vmem:[#allocation658_spill] sm:$0xff] %v15910_v54  ;;  %v15920_v57 = vld [vmem:[%s19192_s3 + $0x1458] sm:$0xff]  ;;  %v15925_v60 = vld [vmem:[%s19192_s3 + $0x1460] sm:$0xff] }
 0x147   :  { %19877 = vst [vmem:[#allocation659_spill] sm:$0xff] %v15915_v61  ;;  %19878 = vst [vmem:[#allocation660_spill] sm:$0xff] %v15920_v57  ;;  %v15930_v59 = vld [vmem:[%s19192_s3 + $0x1468] sm:$0xff]  ;;  %v15935_v54 = vld [vmem:[%s19192_s3 + $0x1470] sm:$0xff] }
 0x148   :  { %19879 = vst [vmem:[#allocation661_spill] sm:$0xff] %v15925_v60  ;;  %19880 = vst [vmem:[#allocation662_spill] sm:$0xff] %v15930_v59  ;;  %v15940_v61 = vld [vmem:[%s19192_s3 + $0x1478] sm:$0xff]  ;;  %v15945_v57 = vld [vmem:[%s19192_s3 + $0x1480] sm:$0xff] }
 0x149   :  { %19881 = vst [vmem:[#allocation663_spill] sm:$0xff] %v15935_v54  ;;  %19882 = vst [vmem:[#allocation664_spill] sm:$0xff] %v15940_v61  ;;  %v15950_v60 = vld [vmem:[%s19192_s3 + $0x1488] sm:$0xff]  ;;  %v15955_v59 = vld [vmem:[%s19192_s3 + $0x1490] sm:$0xff] }
 0x14a   :  { %19883 = vst [vmem:[#allocation665_spill] sm:$0xff] %v15945_v57  ;;  %19884 = vst [vmem:[#allocation666_spill] sm:$0xff] %v15950_v60  ;;  %v15960_v54 = vld [vmem:[%s19192_s3 + $0x1498] sm:$0xff]  ;;  %v15965_v61 = vld [vmem:[%s19192_s3 + $0x14a0] sm:$0xff] }
 0x14b   :  { %19885 = vst [vmem:[#allocation667_spill] sm:$0xff] %v15955_v59  ;;  %19886 = vst [vmem:[#allocation668_spill] sm:$0xff] %v15960_v54  ;;  %v15970_v57 = vld [vmem:[%s19192_s3 + $0x14a8] sm:$0xff]  ;;  %v15975_v60 = vld [vmem:[%s19192_s3 + $0x14b0] sm:$0xff] }
 0x14c   :  { %19887 = vst [vmem:[#allocation669_spill] sm:$0xff] %v15965_v61  ;;  %19888 = vst [vmem:[#allocation670_spill] sm:$0xff] %v15970_v57  ;;  %v15980_v59 = vld [vmem:[%s19192_s3 + $0x14b8] sm:$0xff]  ;;  %v15985_v54 = vld [vmem:[%s19192_s3 + $0x14c0] sm:$0xff] }
 0x14d   :  { %19889 = vst [vmem:[#allocation671_spill] sm:$0xff] %v15975_v60  ;;  %19890 = vst [vmem:[#allocation672_spill] sm:$0xff] %v15980_v59  ;;  %v15990_v61 = vld [vmem:[%s19192_s3 + $0x14c8] sm:$0xff]  ;;  %v15995_v57 = vld [vmem:[%s19192_s3 + $0x14d0] sm:$0xff] }
 0x14e   :  { %19891 = vst [vmem:[#allocation673_spill] sm:$0xff] %v15985_v54  ;;  %19892 = vst [vmem:[#allocation674_spill] sm:$0xff] %v15990_v61  ;;  %v16000_v60 = vld [vmem:[%s19192_s3 + $0x14d8] sm:$0xff]  ;;  %v16005_v59 = vld [vmem:[%s19192_s3 + $0x14e0] sm:$0xff] }
 0x14f   :  { %19893 = vst [vmem:[#allocation675_spill] sm:$0xff] %v15995_v57  ;;  %19894 = vst [vmem:[#allocation676_spill] sm:$0xff] %v16000_v60  ;;  %v16010_v54 = vld [vmem:[%s19192_s3 + $0x14e8] sm:$0xff]  ;;  %v16015_v61 = vld [vmem:[%s19192_s3 + $0x14f0] sm:$0xff] }
 0x150   :  { %19895 = vst [vmem:[#allocation677_spill] sm:$0xff] %v16005_v59  ;;  %19896 = vst [vmem:[#allocation678_spill] sm:$0xff] %v16010_v54  ;;  %v16020_v57 = vld [vmem:[%s19192_s3 + $0x14f8] sm:$0xff]  ;;  %v16025_v60 = vld [vmem:[%s19192_s3 + $0x1500] sm:$0xff] }
 0x151   :  { %19897 = vst [vmem:[#allocation679_spill] sm:$0xff] %v16015_v61  ;;  %19898 = vst [vmem:[#allocation680_spill] sm:$0xff] %v16020_v57  ;;  %v16030_v59 = vld [vmem:[%s19192_s3 + $0x1508] sm:$0xff]  ;;  %v16035_v54 = vld [vmem:[%s19192_s3 + $0x1510] sm:$0xff] }
 0x152   :  { %19899 = vst [vmem:[#allocation681_spill] sm:$0xff] %v16025_v60  ;;  %19900 = vst [vmem:[#allocation682_spill] sm:$0xff] %v16030_v59  ;;  %v16040_v61 = vld [vmem:[%s19192_s3 + $0x1518] sm:$0xff]  ;;  %v16045_v57 = vld [vmem:[%s19192_s3 + $0x1520] sm:$0xff] }
 0x153   :  { %19901 = vst [vmem:[#allocation683_spill] sm:$0xff] %v16035_v54  ;;  %19902 = vst [vmem:[#allocation684_spill] sm:$0xff] %v16040_v61  ;;  %v16050_v60 = vld [vmem:[%s19192_s3 + $0x1528] sm:$0xff]  ;;  %v16055_v59 = vld [vmem:[%s19192_s3 + $0x1530] sm:$0xff] }
 0x154   :  { %19903 = vst [vmem:[#allocation685_spill] sm:$0xff] %v16045_v57  ;;  %19904 = vst [vmem:[#allocation686_spill] sm:$0xff] %v16050_v60  ;;  %v16060_v54 = vld [vmem:[%s19192_s3 + $0x1538] sm:$0xff]  ;;  %v16065_v61 = vld [vmem:[%s19192_s3 + $0x1540] sm:$0xff] }
 0x155   :  { %19905 = vst [vmem:[#allocation687_spill] sm:$0xff] %v16055_v59  ;;  %19906 = vst [vmem:[#allocation688_spill] sm:$0xff] %v16060_v54  ;;  %v16070_v57 = vld [vmem:[%s19192_s3 + $0x1548] sm:$0xff]  ;;  %v16075_v60 = vld [vmem:[%s19192_s3 + $0x1550] sm:$0xff] }
 0x156   :  { %19907 = vst [vmem:[#allocation689_spill] sm:$0xff] %v16065_v61  ;;  %19908 = vst [vmem:[#allocation690_spill] sm:$0xff] %v16070_v57  ;;  %v16080_v59 = vld [vmem:[%s19192_s3 + $0x1558] sm:$0xff]  ;;  %v16085_v54 = vld [vmem:[%s19192_s3 + $0x1560] sm:$0xff] }
 0x157   :  { %19909 = vst [vmem:[#allocation691_spill] sm:$0xff] %v16075_v60  ;;  %19910 = vst [vmem:[#allocation692_spill] sm:$0xff] %v16080_v59  ;;  %v16090_v61 = vld [vmem:[%s19192_s3 + $0x1568] sm:$0xff]  ;;  %v16095_v57 = vld [vmem:[%s19192_s3 + $0x1570] sm:$0xff] }
 0x158   :  { %19911 = vst [vmem:[#allocation693_spill] sm:$0xff] %v16085_v54  ;;  %19912 = vst [vmem:[#allocation694_spill] sm:$0xff] %v16090_v61  ;;  %v16100_v60 = vld [vmem:[%s19192_s3 + $0x1578] sm:$0xff]  ;;  %v16105_v59 = vld [vmem:[%s19192_s3 + $0x1580] sm:$0xff] }
 0x159   :  { %19913 = vst [vmem:[#allocation695_spill] sm:$0xff] %v16095_v57  ;;  %19914 = vst [vmem:[#allocation696_spill] sm:$0xff] %v16100_v60  ;;  %v16110_v54 = vld [vmem:[%s19192_s3 + $0x1588] sm:$0xff]  ;;  %v16115_v61 = vld [vmem:[%s19192_s3 + $0x1590] sm:$0xff] }
 0x15a   :  { %19915 = vst [vmem:[#allocation697_spill] sm:$0xff] %v16105_v59  ;;  %19916 = vst [vmem:[#allocation698_spill] sm:$0xff] %v16110_v54  ;;  %v16120_v57 = vld [vmem:[%s19192_s3 + $0x1598] sm:$0xff]  ;;  %v16125_v60 = vld [vmem:[%s19192_s3 + $0x15a0] sm:$0xff] }
 0x15b   :  { %19917 = vst [vmem:[#allocation699_spill] sm:$0xff] %v16115_v61  ;;  %19918 = vst [vmem:[#allocation700_spill] sm:$0xff] %v16120_v57  ;;  %v16130_v59 = vld [vmem:[%s19192_s3 + $0x15a8] sm:$0xff]  ;;  %v16135_v54 = vld [vmem:[%s19192_s3 + $0x15b0] sm:$0xff] }
 0x15c   :  { %19919 = vst [vmem:[#allocation701_spill] sm:$0xff] %v16125_v60  ;;  %19920 = vst [vmem:[#allocation702_spill] sm:$0xff] %v16130_v59  ;;  %v16140_v61 = vld [vmem:[%s19192_s3 + $0x15b8] sm:$0xff]  ;;  %v16145_v57 = vld [vmem:[%s19192_s3 + $0x15c0] sm:$0xff] }
 0x15d   :  { %19921 = vst [vmem:[#allocation703_spill] sm:$0xff] %v16135_v54  ;;  %19922 = vst [vmem:[#allocation704_spill] sm:$0xff] %v16140_v61  ;;  %v16150_v60 = vld [vmem:[%s19192_s3 + $0x15c8] sm:$0xff]  ;;  %v16155_v59 = vld [vmem:[%s19192_s3 + $0x15d0] sm:$0xff] }
 0x15e   :  { %19923 = vst [vmem:[#allocation705_spill] sm:$0xff] %v16145_v57  ;;  %19924 = vst [vmem:[#allocation706_spill] sm:$0xff] %v16150_v60  ;;  %v16160_v54 = vld [vmem:[%s19192_s3 + $0x15d8] sm:$0xff]  ;;  %v16165_v61 = vld [vmem:[%s19192_s3 + $0x15e0] sm:$0xff] }
 0x15f   :  { %19925 = vst [vmem:[#allocation707_spill] sm:$0xff] %v16155_v59  ;;  %19926 = vst [vmem:[#allocation708_spill] sm:$0xff] %v16160_v54  ;;  %v16170_v57 = vld [vmem:[%s19192_s3 + $0x15e8] sm:$0xff]  ;;  %v16175_v60 = vld [vmem:[%s19192_s3 + $0x15f0] sm:$0xff] }
 0x160   :  { %19927 = vst [vmem:[#allocation709_spill] sm:$0xff] %v16165_v61  ;;  %19928 = vst [vmem:[#allocation710_spill] sm:$0xff] %v16170_v57  ;;  %v16180_v59 = vld [vmem:[%s19192_s3 + $0x15f8] sm:$0xff]  ;;  %v16185_v54 = vld [vmem:[%s19192_s3 + $0x1600] sm:$0xff] }
 0x161   :  { %19929 = vst [vmem:[#allocation711_spill] sm:$0xff] %v16175_v60  ;;  %19930 = vst [vmem:[#allocation712_spill] sm:$0xff] %v16180_v59  ;;  %v16190_v61 = vld [vmem:[%s19192_s3 + $0x1608] sm:$0xff]  ;;  %v16195_v57 = vld [vmem:[%s19192_s3 + $0x1610] sm:$0xff] }
 0x162   :  { %19931 = vst [vmem:[#allocation713_spill] sm:$0xff] %v16185_v54  ;;  %19932 = vst [vmem:[#allocation714_spill] sm:$0xff] %v16190_v61  ;;  %v16200_v60 = vld [vmem:[%s19192_s3 + $0x1618] sm:$0xff]  ;;  %v16205_v59 = vld [vmem:[%s19192_s3 + $0x1620] sm:$0xff] }
 0x163   :  { %19933 = vst [vmem:[#allocation715_spill] sm:$0xff] %v16195_v57  ;;  %19934 = vst [vmem:[#allocation716_spill] sm:$0xff] %v16200_v60  ;;  %v16210_v54 = vld [vmem:[%s19192_s3 + $0x1628] sm:$0xff]  ;;  %v16215_v61 = vld [vmem:[%s19192_s3 + $0x1630] sm:$0xff] }
 0x164   :  { %19935 = vst [vmem:[#allocation717_spill] sm:$0xff] %v16205_v59  ;;  %19936 = vst [vmem:[#allocation718_spill] sm:$0xff] %v16210_v54  ;;  %v16220_v57 = vld [vmem:[%s19192_s3 + $0x1638] sm:$0xff]  ;;  %v16225_v60 = vld [vmem:[%s19192_s3 + $0x1640] sm:$0xff] }
 0x165   :  { %19937 = vst [vmem:[#allocation719_spill] sm:$0xff] %v16215_v61  ;;  %19938 = vst [vmem:[#allocation720_spill] sm:$0xff] %v16220_v57  ;;  %v16230_v59 = vld [vmem:[%s19192_s3 + $0x1648] sm:$0xff]  ;;  %v16235_v54 = vld [vmem:[%s19192_s3 + $0x1650] sm:$0xff] }
 0x166   :  { %19939 = vst [vmem:[#allocation721_spill] sm:$0xff] %v16225_v60  ;;  %19940 = vst [vmem:[#allocation722_spill] sm:$0xff] %v16230_v59  ;;  %v16240_v61 = vld [vmem:[%s19192_s3 + $0x1658] sm:$0xff]  ;;  %v16245_v57 = vld [vmem:[%s19192_s3 + $0x1660] sm:$0xff] }
 0x167   :  { %19941 = vst [vmem:[#allocation723_spill] sm:$0xff] %v16235_v54  ;;  %19942 = vst [vmem:[#allocation724_spill] sm:$0xff] %v16240_v61  ;;  %v16250_v60 = vld [vmem:[%s19192_s3 + $0x1668] sm:$0xff]  ;;  %v16255_v59 = vld [vmem:[%s19192_s3 + $0x1670] sm:$0xff] }
 0x168   :  { %19943 = vst [vmem:[#allocation725_spill] sm:$0xff] %v16245_v57  ;;  %19944 = vst [vmem:[#allocation726_spill] sm:$0xff] %v16250_v60  ;;  %v16260_v54 = vld [vmem:[%s19192_s3 + $0x1678] sm:$0xff]  ;;  %v16265_v61 = vld [vmem:[%s19192_s3 + $0x1680] sm:$0xff] }
 0x169   :  { %19945 = vst [vmem:[#allocation727_spill] sm:$0xff] %v16255_v59  ;;  %19946 = vst [vmem:[#allocation728_spill] sm:$0xff] %v16260_v54  ;;  %v16270_v57 = vld [vmem:[%s19192_s3 + $0x1688] sm:$0xff]  ;;  %v16275_v60 = vld [vmem:[%s19192_s3 + $0x1690] sm:$0xff] }
 0x16a   :  { %19947 = vst [vmem:[#allocation729_spill] sm:$0xff] %v16265_v61  ;;  %19948 = vst [vmem:[#allocation730_spill] sm:$0xff] %v16270_v57  ;;  %v16280_v59 = vld [vmem:[%s19192_s3 + $0x1698] sm:$0xff]  ;;  %v16285_v54 = vld [vmem:[%s19192_s3 + $0x16a0] sm:$0xff] }
 0x16b   :  { %19949 = vst [vmem:[#allocation731_spill] sm:$0xff] %v16275_v60  ;;  %19950 = vst [vmem:[#allocation732_spill] sm:$0xff] %v16280_v59  ;;  %v16290_v61 = vld [vmem:[%s19192_s3 + $0x16a8] sm:$0xff]  ;;  %v16295_v57 = vld [vmem:[%s19192_s3 + $0x16b0] sm:$0xff] }
 0x16c   :  { %19951 = vst [vmem:[#allocation733_spill] sm:$0xff] %v16285_v54  ;;  %19952 = vst [vmem:[#allocation734_spill] sm:$0xff] %v16290_v61  ;;  %v16300_v60 = vld [vmem:[%s19192_s3 + $0x16b8] sm:$0xff]  ;;  %v16305_v59 = vld [vmem:[%s19192_s3 + $0x16c0] sm:$0xff] }
 0x16d   :  { %19953 = vst [vmem:[#allocation735_spill] sm:$0xff] %v16295_v57  ;;  %19954 = vst [vmem:[#allocation736_spill] sm:$0xff] %v16300_v60  ;;  %v16310_v54 = vld [vmem:[%s19192_s3 + $0x16c8] sm:$0xff]  ;;  %v16315_v61 = vld [vmem:[%s19192_s3 + $0x16d0] sm:$0xff] }
 0x16e   :  { %19955 = vst [vmem:[#allocation737_spill] sm:$0xff] %v16305_v59  ;;  %19956 = vst [vmem:[#allocation738_spill] sm:$0xff] %v16310_v54  ;;  %v16320_v57 = vld [vmem:[%s19192_s3 + $0x16d8] sm:$0xff]  ;;  %v16325_v60 = vld [vmem:[%s19192_s3 + $0x16e0] sm:$0xff] }
 0x16f   :  { %19957 = vst [vmem:[#allocation739_spill] sm:$0xff] %v16315_v61  ;;  %19958 = vst [vmem:[#allocation740_spill] sm:$0xff] %v16320_v57  ;;  %v16330_v59 = vld [vmem:[%s19192_s3 + $0x16e8] sm:$0xff]  ;;  %v16335_v54 = vld [vmem:[%s19192_s3 + $0x16f0] sm:$0xff] }
 0x170   :  { %19959 = vst [vmem:[#allocation741_spill] sm:$0xff] %v16325_v60  ;;  %19960 = vst [vmem:[#allocation742_spill] sm:$0xff] %v16330_v59  ;;  %v16340_v61 = vld [vmem:[%s19192_s3 + $0x16f8] sm:$0xff]  ;;  %v16345_v57 = vld [vmem:[%s19192_s3 + $0x1700] sm:$0xff] }
 0x171   :  { %19961 = vst [vmem:[#allocation743_spill] sm:$0xff] %v16335_v54  ;;  %19962 = vst [vmem:[#allocation744_spill] sm:$0xff] %v16340_v61  ;;  %v16350_v60 = vld [vmem:[%s19192_s3 + $0x1708] sm:$0xff]  ;;  %v16355_v59 = vld [vmem:[%s19192_s3 + $0x1710] sm:$0xff] }
 0x172   :  { %19963 = vst [vmem:[#allocation745_spill] sm:$0xff] %v16345_v57  ;;  %19964 = vst [vmem:[#allocation746_spill] sm:$0xff] %v16350_v60  ;;  %v16360_v54 = vld [vmem:[%s19192_s3 + $0x1718] sm:$0xff]  ;;  %v16365_v61 = vld [vmem:[%s19192_s3 + $0x1720] sm:$0xff] }
 0x173   :  { %19965 = vst [vmem:[#allocation747_spill] sm:$0xff] %v16355_v59  ;;  %19966 = vst [vmem:[#allocation748_spill] sm:$0xff] %v16360_v54  ;;  %v16370_v57 = vld [vmem:[%s19192_s3 + $0x1728] sm:$0xff]  ;;  %v16375_v60 = vld [vmem:[%s19192_s3 + $0x1730] sm:$0xff] }
 0x174   :  { %19967 = vst [vmem:[#allocation749_spill] sm:$0xff] %v16365_v61  ;;  %19968 = vst [vmem:[#allocation750_spill] sm:$0xff] %v16370_v57  ;;  %v16380_v59 = vld [vmem:[%s19192_s3 + $0x1738] sm:$0xff]  ;;  %v16385_v54 = vld [vmem:[%s19192_s3 + $0x1740] sm:$0xff] }
 0x175   :  { %19969 = vst [vmem:[#allocation751_spill] sm:$0xff] %v16375_v60  ;;  %19970 = vst [vmem:[#allocation752_spill] sm:$0xff] %v16380_v59  ;;  %v16390_v61 = vld [vmem:[%s19192_s3 + $0x1748] sm:$0xff]  ;;  %v16395_v57 = vld [vmem:[%s19192_s3 + $0x1750] sm:$0xff] }
 0x176   :  { %19971 = vst [vmem:[#allocation753_spill] sm:$0xff] %v16385_v54  ;;  %19972 = vst [vmem:[#allocation754_spill] sm:$0xff] %v16390_v61  ;;  %v16400_v60 = vld [vmem:[%s19192_s3 + $0x1758] sm:$0xff]  ;;  %v16405_v59 = vld [vmem:[%s19192_s3 + $0x1760] sm:$0xff] }
 0x177   :  { %19973 = vst [vmem:[#allocation755_spill] sm:$0xff] %v16395_v57  ;;  %19974 = vst [vmem:[#allocation756_spill] sm:$0xff] %v16400_v60  ;;  %v16410_v54 = vld [vmem:[%s19192_s3 + $0x1768] sm:$0xff]  ;;  %v16415_v61 = vld [vmem:[%s19192_s3 + $0x1770] sm:$0xff] }
 0x178   :  { %19975 = vst [vmem:[#allocation757_spill] sm:$0xff] %v16405_v59  ;;  %19976 = vst [vmem:[#allocation758_spill] sm:$0xff] %v16410_v54  ;;  %v16420_v57 = vld [vmem:[%s19192_s3 + $0x1778] sm:$0xff]  ;;  %v16425_v60 = vld [vmem:[%s19192_s3 + $0x1780] sm:$0xff] }
 0x179   :  { %19977 = vst [vmem:[#allocation759_spill] sm:$0xff] %v16415_v61  ;;  %19978 = vst [vmem:[#allocation760_spill] sm:$0xff] %v16420_v57  ;;  %v16430_v59 = vld [vmem:[%s19192_s3 + $0x1788] sm:$0xff]  ;;  %v16435_v54 = vld [vmem:[%s19192_s3 + $0x1790] sm:$0xff] }
 0x17a   :  { %19979 = vst [vmem:[#allocation761_spill] sm:$0xff] %v16425_v60  ;;  %19980 = vst [vmem:[#allocation762_spill] sm:$0xff] %v16430_v59  ;;  %v16440_v61 = vld [vmem:[%s19192_s3 + $0x1798] sm:$0xff]  ;;  %v16445_v57 = vld [vmem:[%s19192_s3 + $0x17a0] sm:$0xff] }
 0x17b   :  { %19981 = vst [vmem:[#allocation763_spill] sm:$0xff] %v16435_v54  ;;  %19982 = vst [vmem:[#allocation764_spill] sm:$0xff] %v16440_v61  ;;  %v16450_v60 = vld [vmem:[%s19192_s3 + $0x17a8] sm:$0xff]  ;;  %v16455_v59 = vld [vmem:[%s19192_s3 + $0x17b0] sm:$0xff] }
 0x17c   :  { %19983 = vst [vmem:[#allocation765_spill] sm:$0xff] %v16445_v57  ;;  %19984 = vst [vmem:[#allocation766_spill] sm:$0xff] %v16450_v60  ;;  %v16460_v54 = vld [vmem:[%s19192_s3 + $0x17b8] sm:$0xff]  ;;  %v16465_v61 = vld [vmem:[%s19192_s3 + $0x17c0] sm:$0xff] }
 0x17d   :  { %19985 = vst [vmem:[#allocation767_spill] sm:$0xff] %v16455_v59  ;;  %19986 = vst [vmem:[#allocation768_spill] sm:$0xff] %v16460_v54  ;;  %v16470_v57 = vld [vmem:[%s19192_s3 + $0x17c8] sm:$0xff]  ;;  %v16475_v60 = vld [vmem:[%s19192_s3 + $0x17d0] sm:$0xff] }
 0x17e   :  { %19987 = vst [vmem:[#allocation769_spill] sm:$0xff] %v16465_v61  ;;  %19988 = vst [vmem:[#allocation770_spill] sm:$0xff] %v16470_v57  ;;  %v16480_v59 = vld [vmem:[%s19192_s3 + $0x17d8] sm:$0xff]  ;;  %v16485_v54 = vld [vmem:[%s19192_s3 + $0x17e0] sm:$0xff] }
 0x17f   :  { %19989 = vst [vmem:[#allocation771_spill] sm:$0xff] %v16475_v60  ;;  %19990 = vst [vmem:[#allocation772_spill] sm:$0xff] %v16480_v59  ;;  %v16490_v61 = vld [vmem:[%s19192_s3 + $0x17e8] sm:$0xff]  ;;  %v16495_v57 = vld [vmem:[%s19192_s3 + $0x17f0] sm:$0xff] }
 0x180   :  { %19991 = vst [vmem:[#allocation773_spill] sm:$0xff] %v16485_v54  ;;  %19992 = vst [vmem:[#allocation774_spill] sm:$0xff] %v16490_v61  ;;  %v16500_v60 = vld [vmem:[%s19192_s3 + $0x17f8] sm:$0xff] }
 0x181   :  { %19993 = vst [vmem:[#allocation775_spill] sm:$0xff] %v16495_v57  ;;  %19994 = vst [vmem:[#allocation776_spill] sm:$0xff] %v16500_v60 }
 0x182   :  { %1600 = vsyncadd [#allocation3], 98304  ;;  %v1606_v54 = vld [vmem:[%s19189_s0 + $0x8] sm:$0xff]  ;;  %vm1690_vm0 = vcmask 1040384   ;;  %v1605_v57 = vld [vmem:[%s19189_s0] sm:$0xff]  ;;  %vm12614_vm1 = vmmov 1   ;;  %v3003_v10 = vlaneseq }
 0x183   :  { %v1630_v59 = vld [vmem:[%s19189_s0 + $0xc8] sm:$0x1]  ;;  %v1629_v63 = vld [vmem:[%s19189_s0 + $0xc0] sm:$0x1]  ;;  %vm16514_vm2 = vmpackc.low %vm1690_vm0, %vm12614_vm1  ;;  %v19197_v55 = vmov 0.0   ;;  %vm1677_vm3 = vcmask 72704  }
 0x184   :  { %v11400_v61 = vpack.c.bf16 %v1630_v59, %v1606_v54  ;;  %v11403_v58 = vpack.c.bf16 %v1629_v63, %v1605_v57  ;;  %1827 = vmatprep.mubr.f32.mxu0 %v19197_v55  ;;  %1839 = vmatprep.mubr.f32.mxu1 %v19197_v55  ;;  %v1608_v54 = vld [vmem:[%s19189_s0 + $0x18] sm:$0xff]  ;;  %v1607_v57 = vld [vmem:[%s19189_s0 + $0x10] sm:$0xff]  ;;  %v1610_v51 = vld [vmem:[%s19189_s0 + $0x28] sm:$0xff]  ;;  %v12616_v50 = vmov 0   ;;  %v12618_v7 = vmov 1934713408  }
 0x185   :  { %v1632_v59 = vld [vmem:[%s19189_s0 + $0xd8] sm:$0x1]  ;;  %v1631_v63 = vld [vmem:[%s19189_s0 + $0xd0] sm:$0x1]  ;;  %v1609_v48 = vld [vmem:[%s19189_s0 + $0x20] sm:$0xff]  ;;  %12583 = vset.pattern.permute.xlu1 %v12616_v50  ;;  %12582 = vset.pattern.permute.xlu0 %v12616_v50 }
 0x186   :  { %11402 = vmatprep.subr.msk.bf16.mxu0 %vm16514_vm2, %v11400_v61  ;;  %12508 = vmatprep.subr.msk.bf16.mxu1 %vm16514_vm2, %v11400_v61  ;;  %v16543_v61 = vld [vmem:[%s19190_s1] sm:$0xff]  ;;  %v16548_v55 = vld [vmem:[%s19190_s1 + $0x10] sm:$0xff]  ;;  %v11406_v56 = vpack.c.bf16 %v1632_v59, %v1608_v54  ;;  %v11409_v62 = vpack.c.bf16 %v1631_v63, %v1607_v57  ;;  %v1612_v57 = vld [vmem:[%s19189_s0 + $0x38] sm:$0xff] }
 0x187   :  { %11405 = vmatpush1.bf16.msk.msra.mxu0 %vm16514_vm2, %v11403_v58  ;;  %12509 = vmatpush1.bf16.msk.msra.mxu1 %vm16514_vm2, %v11403_v58  ;;  %v1634_v58 = vld [vmem:[%s19189_s0 + $0xe8] sm:$0x1]  ;;  %v1633_v53 = vld [vmem:[%s19189_s0 + $0xe0] sm:$0x1]  ;;  %v1636_v63 = vld [vmem:[%s19189_s0 + $0xf8] sm:$0x1] }
 0x188   :  { %11408 = vmatprep.subr.msk.bf16.mxu1 %vm16514_vm2, %v11406_v56  ;;  %v11412_v54 = vpack.c.bf16 %v1634_v58, %v1610_v51  ;;  %v11415_v59 = vpack.c.bf16 %v1633_v53, %v1609_v48  ;;  %v11418_v50 = vpack.c.bf16 %v1636_v63, %v1612_v57  ;;  %v1614_v51 = vld [vmem:[%s19189_s0 + $0x48] sm:$0xff]  ;;  %v19997_v53 = vmov 0.0   ;;  %v16591_v58 = vld [vmem:[%s19190_s1 + $0x18] sm:$0xff]  ;;  %v1635_v57 = vld [vmem:[%s19189_s0 + $0xf0] sm:$0x1] }
 0x189   :  { %v1638_v48 = vld [vmem:[%s19189_s0 + $0x108] sm:$0x1]  ;;  %v1613_v52 = vld [vmem:[%s19189_s0 + $0x40] sm:$0xff]  ;;  %v1616_v49 = vld [vmem:[%s19189_s0 + $0x58] sm:$0xff] }
 0x18a   :  { %10114 = vmatmul.mubr.msk.f32.vlgmr.msra.gmra.mrb[0].mxu0 %vm1677_vm3, %v16543_v61  ;;  %10116 = vmatmul.mubr.msk.f32.vlgmr.msra.gmra.mrb[0].mxu1 %vm1677_vm3, %v16548_v55  ;;  %v16586_v56 = vld [vmem:[%s19190_s1 + $0x8] sm:$0xff]  ;;  %v11424_v63 = vpack.c.bf16 %v1638_v48, %v1614_v51 }
 0x18b   :  { %11411 = vmatpush1.bf16.msk.msra.mxu1 %vm16514_vm2, %v11409_v62  ;;  %1833 = vmatprep.mubr.f32.mxu0 %v19997_v53  ;;  %v1611_v62 = vld [vmem:[%s19189_s0 + $0x30] sm:$0xff]  ;;  %v1642_v51 = vld [vmem:[%s19189_s0 + $0x128] sm:$0x1] }
 0x18c   :  { %1845 = vmatprep.mubr.f32.mxu1 %v19997_v53  ;;  %11414 = vmatprep.subr.msk.bf16.mxu0 %vm16514_vm2, %v11412_v54  ;;  %v1637_v54 = vld [vmem:[%s19189_s0 + $0x100] sm:$0x1]  ;;  %v11421_v48 = vpack.c.bf16 %v1635_v57, %v1611_v62  ;;  %v1639_v62 = vld [vmem:[%s19189_s0 + $0x110] sm:$0x1] }
 0x18d   :  { %11417 = vmatpush1.bf16.msk.msra.mxu0 %vm16514_vm2, %v11415_v59  ;;  %11420 = vmatprep.subr.msk.bf16.mxu1 %vm16514_vm2, %v11418_v50  ;;  %v1640_v59 = vld [vmem:[%s19189_s0 + $0x118] sm:$0x1]  ;;  %v1618_v50 = vld [vmem:[%s19189_s0 + $0x68] sm:$0xff]  ;;  %v11427_v47 = vpack.c.bf16 %v1637_v54, %v1613_v52  ;;  %v1653_v52 = vld [vmem:[%s19191_s2] sm:$0xff] }
 0x18e   :  { %10115 = vmatmul.mubr.msk.f32.gmra.mrb[2].mxu0 %vm1677_vm3, %v16586_v56  ;;  %10117 = vmatmul.mubr.msk.f32.gmra.mrb[2].mxu1 %vm1677_vm3, %v16591_v58  ;;  %v11430_v44 = vpack.c.bf16 %v1640_v59, %v1616_v49  ;;  %v11436_v23 = vpack.c.bf16 %v1642_v51, %v1618_v50  ;;  %v1655_v49 = vld [vmem:[%s19191_s2 + $0x10] sm:$0xff]  ;;  %v1617_v57 = vld [vmem:[%s19189_s0 + $0x60] sm:$0xff]  ;;  %v1620_v54 = vld [vmem:[%s19189_s0 + $0x78] sm:$0xff] }
 0x18f   :  { %1916 = vmatprep.mubr.f32.mxu1 %v19997_v53  ;;  %2005 = vmatprep.mubr.f32.mxu0 %v19997_v53  ;;  %v1644_v59 = vld [vmem:[%s19189_s0 + $0x138] sm:$0x1]  ;;  %v1622_v50 = vld [vmem:[%s19189_s0 + $0x88] sm:$0xff] }
 0x190   :  { %11426 = vmatprep.subr.msk.bf16.mxu0 %vm16514_vm2, %v11424_v63  ;;  %1669 = vperm.xlu1 %12583, %v1655_v49   ;;  %v1641_v63 = vld [vmem:[%s19189_s0 + $0x120] sm:$0x1]  ;;  %v1646_v51 = vld [vmem:[%s19189_s0 + $0x148] sm:$0x1] }
 0x191   :  { %1659 = vperm.xlu0 %12582, %v1653_v52   ;;  %v11439_v49 = vpack.c.bf16 %v1641_v63, %v1617_v57  ;;  %v11442_v52 = vpack.c.bf16 %v1644_v59, %v1620_v54  ;;  %v1645_v57 = vld [vmem:[%s19189_s0 + $0x140] sm:$0x1]  ;;  %v1624_v63 = vld [vmem:[%s19189_s0 + $0x98] sm:$0xff]  ;;  %v1626_v59 = vld [vmem:[%s19189_s0 + $0xa8] sm:$0xff] }
 0x192   :  { %10120 = vmatmul.mubr.msk.f32.vlgmr.msra.gmra.mrb[4].mxu1 %vm1677_vm3, %v16543_v61  ;;  %10126 = vmatmul.mubr.msk.f32.vlgmr.msra.gmra.mrb[4].mxu0 %vm1677_vm3, %v16543_v61  ;;  %v1648_v54 = vld [vmem:[%s19189_s0 + $0x158] sm:$0x1] }
 0x193   :  { %11423 = vmatpush1.bf16.msk.msra.mxu1 %vm16514_vm2, %v11421_v48  ;;  %1922 = vmatprep.mubr.f32.mxu1 %v19997_v53 }
 0x194   :  { %2011 = vmatprep.mubr.f32.mxu0 %v19997_v53  ;;  %11429 = vmatpush1.bf16.msk.msra.mxu0 %vm16514_vm2, %v11427_v47  ;;  %v1615_v47 = vld [vmem:[%s19189_s0 + $0x50] sm:$0xff] }
 0x195   :  { %11432 = vmatprep.subr.msk.bf16.mxu1 %vm16514_vm2, %v11430_v44  ;;  %11438 = vmatprep.subr.msk.bf16.mxu0 %vm16514_vm2, %v11436_v23  ;;  %v1656_v23 = vld [vmem:[%s19191_s2 + $0x18] sm:$0xff]  ;;  %v1654_v44 = vld [vmem:[%s19191_s2 + $0x8] sm:$0xff]  ;;  %v11433_v48 = vpack.c.bf16 %v1639_v62, %v1615_v47  ;;  %v1643_v47 = vld [vmem:[%s19189_s0 + $0x130] sm:$0x1] }
 0x196   :  { %10121 = vmatmul.mubr.msk.f32.gmra.mrb[6].mxu1 %vm1677_vm3, %v16586_v56  ;;  %10127 = vmatmul.mubr.msk.f32.gmra.mrb[6].mxu0 %vm1677_vm3, %v16586_v56  ;;  %v1621_v62 = vld [vmem:[%s19189_s0 + $0x80] sm:$0xff] }
 0x197   :  { %1928 = vmatprep.mubr.f32.mxu1 %v19997_v53  ;;  %2017 = vmatprep.mubr.f32.mxu0 %v19997_v53 }
 0x198   :  { %1674 = vperm.xlu1 %12583, %v1656_v23   ;;  %1664 = vperm.xlu0 %12582, %v1654_v44   ;;  %v11448_v23 = vpack.c.bf16 %v1646_v51, %v1622_v50  ;;  %v1619_v44 = vld [vmem:[%s19189_s0 + $0x70] sm:$0xff]  ;;  %v1650_v50 = vld [vmem:[%s19189_s0 + $0x168] sm:$0x1] }
 0x199   :  { %v11445_v51 = vpack.c.bf16 %v1643_v47, %v1619_v44  ;;  %v1647_v44 = vld [vmem:[%s19189_s0 + $0x150] sm:$0x1]  ;;  %v1625_v47 = vld [vmem:[%s19189_s0 + $0xa0] sm:$0xff] }
 0x19a   :  { %10122 = vmatmul.mubr.msk.f32.gmra.mrb[8].mxu1 %vm1677_vm3, %v16548_v55  ;;  %10128 = vmatmul.mubr.msk.f32.gmra.mrb[8].mxu0 %vm1677_vm3, %v16548_v55 }
 0x19b   :  { %1934 = vmatprep.mubr.f32.mxu1 %v19997_v53  ;;  %2023 = vmatprep.mubr.f32.mxu0 %v19997_v53 }
 0x19e   :  { %10123 = vmatmul.mubr.msk.f32.gmra.mrb[10].mxu1 %vm1677_vm3, %v16591_v58  ;;  %10129 = vmatmul.mubr.msk.f32.gmra.mrb[10].mxu0 %vm1677_vm3, %v16591_v58 }
 0x19f   :  { %2094 = vmatprep.mubr.f32.mxu1 %v19997_v53  ;;  %2183 = vmatprep.mubr.f32.mxu0 %v19997_v53 }
 0x1a2   :  { %10132 = vmatmul.mubr.msk.f32.vlgmr.msra.gmra.mrb[12].mxu1 %vm1677_vm3, %v16543_v61  ;;  %10138 = vmatmul.mubr.msk.f32.vlgmr.msra.gmra.mrb[12].mxu0 %vm1677_vm3, %v16543_v61 }
 0x1a3   :  { %11435 = vmatpush1.bf16.msk.msra.mxu1 %vm16514_vm2, %v11433_v48  ;;  %2100 = vmatprep.mubr.f32.mxu1 %v19997_v53  ;;  %v11451_v48 = vpack.c.bf16 %v1645_v57, %v1621_v62  ;;  %v1649_v62 = vld [vmem:[%s19189_s0 + $0x160] sm:$0x1]  ;;  %v1628_v57 = vld [vmem:[%s19189_s0 + $0xb8] sm:$0xff] }
 0x1a4   :  { %2189 = vmatprep.mubr.f32.mxu0 %v19997_v53  ;;  %11441 = vmatpush1.bf16.msk.msra.mxu0 %vm16514_vm2, %v11439_v49  ;;  %v11454_v49 = vpack.c.bf16 %v1648_v54, %v1624_v63  ;;  %v1652_v63 = vld [vmem:[%s19189_s0 + $0x178] sm:$0x1] }
 0x1a5   :  { %11444 = vmatprep.subr.msk.bf16.mxu1 %vm16514_vm2, %v11442_v52  ;;  %11450 = vmatprep.subr.msk.bf16.mxu0 %vm16514_vm2, %v11448_v23  ;;  %v11460_v52 = vpack.c.bf16 %v1650_v50, %v1626_v59  ;;  %v1623_v23 = vld [vmem:[%s19189_s0 + $0x90] sm:$0xff]  ;;  %v11463_v59 = vpack.c.bf16 %v1649_v62, %v1625_v47  ;;  %v11466_v50 = vpack.c.bf16 %v1652_v63, %v1628_v57 }
 0x1a6   :  { %10133 = vmatmul.mubr.msk.f32.gmra.mrb[14].mxu1 %vm1677_vm3, %v16586_v56  ;;  %10139 = vmatmul.mubr.msk.f32.gmra.mrb[14].mxu0 %vm1677_vm3, %v16586_v56  ;;  %v11457_v54 = vpack.c.bf16 %v1647_v44, %v1623_v23 }
 0x1a7   :  { %2106 = vmatprep.mubr.f32.mxu1 %v19997_v53  ;;  %2195 = vmatprep.mubr.f32.mxu0 %v19997_v53 }
 0x1aa   :  { %10134 = vmatmul.mubr.msk.f32.gmra.mrb[16].mxu1 %vm1677_vm3, %v16548_v55  ;;  %10140 = vmatmul.mubr.msk.f32.gmra.mrb[16].mxu0 %vm1677_vm3, %v16548_v55 }
 0x1ab   :  { %2112 = vmatprep.mubr.f32.mxu1 %v19997_v53  ;;  %2201 = vmatprep.mubr.f32.mxu0 %v19997_v53 }
 0x1ae   :  { %10135 = vmatmul.mubr.msk.f32.gmra.mrb[18].mxu1 %vm1677_vm3, %v16591_v58  ;;  %10141 = vmatmul.mubr.msk.f32.gmra.mrb[18].mxu0 %vm1677_vm3, %v16591_v58 }
 0x1af   :  { %2272 = vmatprep.mubr.f32.mxu1 %v19997_v53  ;;  %2361 = vmatprep.mubr.f32.mxu0 %v19997_v53 }
 0x1b2   :  { %10144 = vmatmul.mubr.msk.f32.vlgmr.msra.gmra.mrb[20].mxu1 %vm1677_vm3, %v16543_v61  ;;  %10150 = vmatmul.mubr.msk.f32.vlgmr.msra.gmra.mrb[20].mxu0 %vm1677_vm3, %v16543_v61 }
 0x1b3   :  { %11447 = vmatpush1.bf16.msk.msra.mxu1 %vm16514_vm2, %v11445_v51  ;;  %2278 = vmatprep.mubr.f32.mxu1 %v19997_v53  ;;  %v1627_v51 = vld [vmem:[%s19189_s0 + $0xb0] sm:$0xff] }
 0x1b4   :  { %2367 = vmatprep.mubr.f32.mxu0 %v19997_v53  ;;  %11453 = vmatpush1.bf16.msk.msra.mxu0 %vm16514_vm2, %v11451_v48  ;;  %v1651_v48 = vld [vmem:[%s19189_s0 + $0x170] sm:$0x1] }
 0x1b5   :  { %11456 = vmatprep.subr.msk.bf16.mxu1 %vm16514_vm2, %v11454_v49  ;;  %11462 = vmatprep.subr.msk.bf16.mxu0 %vm16514_vm2, %v11460_v52  ;;  %v11469_v49 = vpack.c.bf16 %v1651_v48, %v1627_v51 }
 0x1b6   :  { %10145 = vmatmul.mubr.msk.f32.gmra.mrb[22].mxu1 %vm1677_vm3, %v16586_v56  ;;  %10151 = vmatmul.mubr.msk.f32.gmra.mrb[22].mxu0 %vm1677_vm3, %v16586_v56 }
 0x1b7   :  { %2284 = vmatprep.mubr.f32.mxu1 %v19997_v53  ;;  %2373 = vmatprep.mubr.f32.mxu0 %v19997_v53 }
 0x1ba   :  { %10146 = vmatmul.mubr.msk.f32.gmra.mrb[24].mxu1 %vm1677_vm3, %v16548_v55  ;;  %10152 = vmatmul.mubr.msk.f32.gmra.mrb[24].mxu0 %vm1677_vm3, %v16548_v55 }
 0x1bb   :  { %2290 = vmatprep.mubr.f32.mxu1 %v19997_v53  ;;  %2379 = vmatprep.mubr.f32.mxu0 %v19997_v53 }
 0x1be   :  { %10147 = vmatmul.mubr.msk.f32.gmra.mrb[26].mxu1 %vm1677_vm3, %v16591_v58  ;;  %10153 = vmatmul.mubr.msk.f32.gmra.mrb[26].mxu0 %vm1677_vm3, %v16591_v58 }
 0x1bf   :  { %2450 = vmatprep.mubr.f32.mxu1 %v19997_v53  ;;  %2539 = vmatprep.mubr.f32.mxu0 %v19997_v53 }
 0x1c2   :  { %10156 = vmatmul.mubr.msk.f32.vlgmr.msra.gmra.mrb[28].mxu1 %vm1677_vm3, %v16543_v61  ;;  %10162 = vmatmul.mubr.msk.f32.vlgmr.msra.gmra.mrb[28].mxu0 %vm1677_vm3, %v16543_v61 }
 0x1c3   :  { %11459 = vmatpush1.bf16.msk.msra.mxu1 %vm16514_vm2, %v11457_v54  ;;  %2456 = vmatprep.mubr.f32.mxu1 %v19997_v53 }
 0x1c4   :  { %2545 = vmatprep.mubr.f32.mxu0 %v19997_v53  ;;  %11465 = vmatpush1.bf16.msk.msra.mxu0 %vm16514_vm2, %v11463_v59 }
 0x1c5   :  { %11468 = vmatprep.subr.msk.bf16.mxu1 %vm16514_vm2, %v11466_v50 }
 0x1c6   :  { %10157 = vmatmul.mubr.msk.f32.gmra.mrb[30].mxu1 %vm1677_vm3, %v16586_v56  ;;  %10163 = vmatmul.mubr.msk.f32.gmra.mrb[30].mxu0 %vm1677_vm3, %v16586_v56 }
 0x1c7   :  { %2462 = vmatprep.mubr.f32.mxu1 %v19997_v53  ;;  %2551 = vmatprep.mubr.f32.mxu0 %v19997_v53 }
 0x1ca   :  { %10158 = vmatmul.mubr.msk.f32.gmra.mrb[32].mxu1 %vm1677_vm3, %v16548_v55  ;;  %10164 = vmatmul.mubr.msk.f32.gmra.mrb[32].mxu0 %vm1677_vm3, %v16548_v55 }
 0x1cb   :  { %2468 = vmatprep.mubr.f32.mxu1 %v19997_v53  ;;  %2557 = vmatprep.mubr.f32.mxu0 %v19997_v53 }
 0x1ce   :  { %10159 = vmatmul.mubr.msk.f32.gmra.mrb[34].mxu1 %vm1677_vm3, %v16591_v58  ;;  %10165 = vmatmul.mubr.msk.f32.gmra.mrb[34].mxu0 %vm1677_vm3, %v16591_v58 }
 0x1cf   :  { %2628 = vmatprep.mubr.f32.mxu1 %v19997_v53  ;;  %2717 = vmatprep.mubr.f32.mxu0 %v19997_v53 }
 0x1d2   :  { %10168 = vmatmul.mubr.msk.f32.vlgmr.msra.gmra.mrb[36].mxu1 %vm1677_vm3, %v16543_v61  ;;  %10174 = vmatmul.mubr.msk.f32.vlgmr.msra.gmra.mrb[36].mxu0 %vm1677_vm3, %v16543_v61 }
 0x1d3   :  { %11471 = vmatpush1.bf16.msk.msra.mxu1 %vm16514_vm2, %v11469_v49  ;;  %2634 = vmatprep.mubr.f32.mxu1 %v19997_v53 }
 0x1d4   :  { %2723 = vmatprep.mubr.f32.mxu0 %v19997_v53 }
 0x1d6   :  { %10169 = vmatmul.mubr.msk.f32.gmra.mrb[38].mxu1 %vm1677_vm3, %v16586_v56  ;;  %10175 = vmatmul.mubr.msk.f32.gmra.mrb[38].mxu0 %vm1677_vm3, %v16586_v56 }
 0x1d7   :  { %2640 = vmatprep.mubr.f32.mxu1 %v19997_v53  ;;  %2729 = vmatprep.mubr.f32.mxu0 %v19997_v53 }
 0x1da   :  { %10170 = vmatmul.mubr.msk.f32.gmra.mrb[40].mxu1 %vm1677_vm3, %v16548_v55  ;;  %10176 = vmatmul.mubr.msk.f32.gmra.mrb[40].mxu0 %vm1677_vm3, %v16548_v55 }
 0x1db   :  { %2646 = vmatprep.mubr.f32.mxu1 %v19997_v53  ;;  %2735 = vmatprep.mubr.f32.mxu0 %v19997_v53 }
 0x1de   :  { %10171 = vmatmul.mubr.msk.f32.gmra.mrb[42].mxu1 %vm1677_vm3, %v16591_v58  ;;  %10177 = vmatmul.mubr.msk.f32.gmra.mrb[42].mxu0 %vm1677_vm3, %v16591_v58 }
 0x1df   :  { %2806 = vmatprep.mubr.f32.mxu1 %v19997_v53 }
 0x1e2   :  { %10180 = vmatmul.mubr.msk.f32.vlgmr.msra.gmra.mrb[44].mxu1 %vm1677_vm3, %v16543_v61 }
 0x1e3   :  { %2812 = vmatprep.mubr.f32.mxu1 %v19997_v53 }
 0x1e6   :  { %10181 = vmatmul.mubr.msk.f32.gmra.mrb[46].mxu1 %vm1677_vm3, %v16586_v56 }
 0x1e7   :  { %2818 = vmatprep.mubr.f32.mxu1 %v19997_v53 }
 0x1ea   :  { %10182 = vmatmul.mubr.msk.f32.gmra.mrb[48].mxu1 %vm1677_vm3, %v16548_v55 }
 0x1eb   :  { %2824 = vmatprep.mubr.f32.mxu1 %v19997_v53 }
 0x1ee   :  { %10183 = vmatmul.mubr.msk.f32.gmra.mrb[50].mxu1 %vm1677_vm3, %v16591_v58 }
 0x20f   :  { %v16882_v55 = vpop.permute.xlu1 %1669 }
 0x210   :  { %v16884_v50 = vpop.permute.xlu0 %1659 }
 0x217   :  { %v16894_v14 = vpop.permute.xlu1 %1674  ;;  %v16897_v32 = vpop.permute.xlu0 %1664 }
 0x25d   :  { %v1841_v60 = vpop.f32.mrb[0].mxu1  ;;  %v1829_v52 = vpop.f32.mrb[0].mxu0 }
 0x25e   :  { %v1843_v23 = vpop.f32.mrb[1].mxu1  ;;  %v1831_v44 = vpop.f32.mrb[1].mxu0  ;;  %v1830_v35 = vadd.f32 %v1829_v52, %v16884_v50  ;;  %v16908_v5 = vadd.f32 %v1841_v60, %v16882_v55 }
 0x25f   :  { %v16900_v11 = vadd.f32 %v1843_v23, %v16882_v55  ;;  %v1832_v8 = vadd.f32 %v1831_v44, %v16884_v50 }
 0x260   :  { %v2831_v21 = vmax.f32 %v1830_v35, 0.0  ;;  %v2879_v19 = vmax.f32 %v16908_v5, 0.0 }
 0x261   :  { %v1847_v61 = vpop.f32.mrb[2].mxu1  ;;  %v1835_v47 = vpop.f32.mrb[2].mxu0 }
 0x262   :  { %v1849_v62 = vpop.f32.mrb[3].mxu1  ;;  %v1837_v57 = vpop.f32.mrb[3].mxu0  ;;  %v1836_v2 = vadd.f32 %v1835_v47, %v16897_v32  ;;  %v16916_v52 = vadd.f32 %v1847_v61, %v16894_v14  ;;  %v2832_v47 = vmax.f32 %v1832_v8, 0.0 }
 0x263   :  { %v16919_v23 = vadd.f32 %v1849_v62, %v16894_v14  ;;  %v1838_v44 = vadd.f32 %v1837_v57, %v16897_v32 }
 0x264   :  { %v2855_v39 = vmax.f32 %v1836_v2, 0.0 }
 0x265   :  { %v1918_v63 = vpop.f32.mrb[4].mxu1  ;;  %v16878_v56 = vpop.f32.mrb[4].mxu0 }
 0x266   :  { %v1920_v54 = vpop.f32.mrb[5].mxu1  ;;  %v16880_v59 = vpop.f32.mrb[5].mxu0  ;;  %v1919_v18 = vadd.f32 %v1918_v63, %v16884_v50  ;;  %v2856_v63 = vmax.f32 %v1838_v44, 0.0 }
 0x267   :  { %v1921_v46 = vadd.f32 %v1920_v54, %v16884_v50 }
 0x268   :  { %v2833_v12 = vmax.f32 %v1919_v18, 0.0 }
 0x269   :  { %v1924_v51 = vpop.f32.mrb[6].mxu1  ;;  %v16886_v58 = vpop.f32.mrb[6].mxu0  ;;  %v2834_v5 = vmax.f32 %v1921_v46, 0.0 }
 0x26a   :  { %v1926_v48 = vpop.f32.mrb[7].mxu1  ;;  %v16888_v49 = vpop.f32.mrb[7].mxu0  ;;  %v1925_v2 = vadd.f32 %v1924_v51, %v16897_v32 }
 0x26d   :  { %v1930_v20 = vpop.f32.mrb[8].mxu1  ;;  %v16890_v41 = vpop.f32.mrb[8].mxu0 }
 0x26e   :  { %v1932_v38 = vpop.f32.mrb[9].mxu1  ;;  %v16892_v17 = vpop.f32.mrb[9].mxu0 }
 0x271   :  { %v16903_v29 = vpop.f32.mrb[10].mxu1  ;;  %v16905_v26 = vpop.f32.mrb[10].mxu0 }
 0x272   :  { %v16911_v45 = vpop.f32.mrb[11].mxu1  ;;  %v16913_v42 = vpop.f32.mrb[11].mxu0 }
 0x275   :  { %v2096_v43 = vpop.f32.mrb[12].mxu1  ;;  %v2185_v22 = vpop.f32.mrb[12].mxu0 }
 0x276   :  { %v2097_v61 = vadd.f32 %v2096_v43, %v16884_v50  ;;  %v2186_v62 = vadd.f32 %v2185_v22, %v16884_v50  ;;  %v2098_v36 = vpop.f32.mrb[13].mxu1  ;;  %v2187_v15 = vpop.f32.mrb[13].mxu0  ;;  %v1927_v43 = vadd.f32 %v1926_v48, %v16897_v32 }
 0x277   :  { %v2099_v60 = vadd.f32 %v2098_v36, %v16884_v50  ;;  %v2188_v8 = vadd.f32 %v2187_v15, %v16884_v50 }
 0x278   :  { %v2837_v54 = vmax.f32 %v2097_v61, 0.0  ;;  %v2839_v40 = vmax.f32 %v2186_v62, 0.0  ;;  %v2857_v62 = vmax.f32 %v1925_v2, 0.0 }
 0x279   :  { %v2838_v22 = vmax.f32 %v2099_v60, 0.0  ;;  %v2840_v37 = vmax.f32 %v2188_v8, 0.0  ;;  %v2102_v16 = vpop.f32.mrb[14].mxu1  ;;  %v2191_v13 = vpop.f32.mrb[14].mxu0  ;;  %v1931_v60 = vadd.f32 %v1930_v20, %v16882_v55 }
 0x27a   :  { %v16934_v35 = vmax.f32 %v2831_v21, %v2837_v54  ;;  %v16936_v57 = vmax.f32 %v2833_v12, %v2839_v40  ;;  %v2103_v36 = vadd.f32 %v2102_v16, %v16897_v32  ;;  %v2192_v15 = vadd.f32 %v2191_v13, %v16897_v32  ;;  %v2104_v44 = vpop.f32.mrb[15].mxu1  ;;  %v2193_v18 = vpop.f32.mrb[15].mxu0 }
 0x27b   :  { %v16940_v61 = vmax.f32 %v2832_v47, %v2838_v22  ;;  %v16942_v51 = vmax.f32 %v2834_v5, %v2840_v37  ;;  %v2105_v46 = vadd.f32 %v2104_v44, %v16897_v32  ;;  %v2194_v48 = vadd.f32 %v2193_v18, %v16897_v32 }
 0x27c   :  { %v2861_v21 = vmax.f32 %v2103_v36, 0.0  ;;  %v2863_v12 = vmax.f32 %v2192_v15, 0.0  ;;  %v2858_v40 = vmax.f32 %v1927_v43, 0.0  ;;  %v1933_v16 = vadd.f32 %v1932_v38, %v16882_v55 }
 0x27d   :  { %v2862_v8 = vmax.f32 %v2105_v46, 0.0  ;;  %v2864_v13 = vmax.f32 %v2194_v48, 0.0  ;;  %v2108_v54 = vpop.f32.mrb[16].mxu1  ;;  %v2197_v33 = vpop.f32.mrb[16].mxu0  ;;  %v2881_v15 = vmax.f32 %v1931_v60, 0.0 }
 0x27e   :  { %v16948_v47 = vmax.f32 %v2855_v39, %v2861_v21  ;;  %v16950_v37 = vmax.f32 %v2857_v62, %v2863_v12  ;;  %v2109_v5 = vadd.f32 %v2108_v54, %v16882_v55  ;;  %v2198_v22 = vadd.f32 %v2197_v33, %v16882_v55  ;;  %v2110_v44 = vpop.f32.mrb[17].mxu1  ;;  %v2199_v20 = vpop.f32.mrb[17].mxu0 }
 0x27f   :  { %v16954_v36 = vmax.f32 %v2856_v63, %v2862_v8  ;;  %v16956_v2 = vmax.f32 %v2858_v40, %v2864_v13  ;;  %v2111_v38 = vadd.f32 %v2110_v44, %v16882_v55  ;;  %v2200_v43 = vadd.f32 %v2199_v20, %v16882_v55 }
 0x280   :  { %v1937_v39 = vadd.f32 %v16903_v29, %v16894_v14  ;;  %v2885_v18 = vmax.f32 %v2109_v5, 0.0  ;;  %v2887_v46 = vmax.f32 %v2198_v22, 0.0  ;;  %v2882_v48 = vmax.f32 %v1933_v16, 0.0 }
 0x281   :  { %v1939_v33 = vadd.f32 %v16911_v45, %v16894_v14  ;;  %v2886_v21 = vmax.f32 %v2111_v38, 0.0  ;;  %v2888_v62 = vmax.f32 %v2200_v43, 0.0  ;;  %v2114_v63 = vpop.f32.mrb[18].mxu1  ;;  %v2203_v12 = vpop.f32.mrb[18].mxu0  ;;  %v19998_v5 = vmax.f32 %v16900_v11, 0.0 }
 0x282   :  { %v16964_v40 = vmax.f32 %v2879_v19, %v2885_v18  ;;  %v16966_v8 = vmax.f32 %v2881_v15, %v2887_v46  ;;  %v2115_v13 = vadd.f32 %v2114_v63, %v16894_v14  ;;  %v2204_v60 = vadd.f32 %v2203_v12, %v16894_v14  ;;  %v2116_v54 = vpop.f32.mrb[19].mxu1  ;;  %v2205_v29 = vpop.f32.mrb[19].mxu0 }
 0x283   :  { %v16972_v16 = vmax.f32 %v19998_v5, %v2886_v21  ;;  %v16974_v22 = vmax.f32 %v2882_v48, %v2888_v62  ;;  %v2117_v45 = vadd.f32 %v2116_v54, %v16894_v14  ;;  %v2206_v44 = vadd.f32 %v2205_v29, %v16894_v14 }
 0x284   :  { %v2008_v19 = vadd.f32 %v16878_v56, %v16884_v50  ;;  %v2905_v20 = vmax.f32 %v1937_v39, 0.0  ;;  %v2909_v38 = vmax.f32 %v2115_v13, 0.0  ;;  %v2911_v43 = vmax.f32 %v2204_v60, 0.0 }
 0x285   :  { %v2010_v15 = vadd.f32 %v16880_v59, %v16884_v50  ;;  %v2906_v18 = vmax.f32 %v1939_v33, 0.0  ;;  %v2910_v46 = vmax.f32 %v2117_v45, 0.0  ;;  %v2912_v11 = vmax.f32 %v2206_v44, 0.0  ;;  %v2274_v21 = vpop.f32.mrb[20].mxu1  ;;  %v16982_v63 = vpop.f32.mrb[20].mxu0 }
 0x286   :  { %v19999_v48 = vmax.f32 %v16916_v52, 0.0  ;;  %v16988_v12 = vmax.f32 %v2905_v20, %v2911_v43  ;;  %v2275_v56 = vadd.f32 %v2274_v21, %v16884_v50  ;;  %v2276_v39 = vpop.f32.mrb[21].mxu1  ;;  %v16991_v13 = vpop.f32.mrb[21].mxu0  ;;  %v20000_v60 = vmax.f32 %v16919_v23, 0.0 }
 0x287   :  { %v16997_v33 = vmax.f32 %v2906_v18, %v2912_v11  ;;  %v2277_v54 = vadd.f32 %v2276_v39, %v16884_v50  ;;  %v2835_v29 = vmax.f32 %v2008_v19, 0.0  ;;  %v2014_v52 = vadd.f32 %v16886_v58, %v16897_v32 }
 0x288   :  { %v16986_v62 = vmax.f32 %v19999_v48, %v2909_v38  ;;  %v16995_v59 = vmax.f32 %v20000_v60, %v2910_v46  ;;  %v2841_v5 = vmax.f32 %v2275_v56, 0.0  ;;  %v2836_v45 = vmax.f32 %v2010_v15, 0.0 }
 0x289   :  { %v2016_v44 = vadd.f32 %v16888_v49, %v16897_v32  ;;  %v2842_v20 = vmax.f32 %v2277_v54, 0.0  ;;  %v2280_v38 = vpop.f32.mrb[22].mxu1  ;;  %v2369_v43 = vpop.f32.mrb[22].mxu0  ;;  %v2859_v48 = vmax.f32 %v2014_v52, 0.0  ;;  %v2020_v58 = vadd.f32 %v16890_v41, %v16882_v55 }
 0x28a   :  { %v17004_v21 = vmax.f32 %v2835_v29, %v2841_v5  ;;  %v2281_v23 = vadd.f32 %v2280_v38, %v16897_v32  ;;  %v2282_v18 = vpop.f32.mrb[23].mxu1  ;;  %v2371_v46 = vpop.f32.mrb[23].mxu0  ;;  %v2022_v49 = vadd.f32 %v16892_v17, %v16882_v55  ;;  %v2026_v41 = vadd.f32 %v16905_v26, %v16894_v14 }
 0x28b   :  { %v17007_v11 = vmax.f32 %v2836_v45, %v2842_v20  ;;  %v2283_v19 = vadd.f32 %v2282_v18, %v16897_v32  ;;  %v2860_v56 = vmax.f32 %v2016_v44, 0.0  ;;  %v2883_v18 = vmax.f32 %v2020_v58, 0.0 }
 0x28c   :  { %20001 = vst [vmem:[#allocation777_spill] sm:$0xff] %v17004_v21  ;;  %v2865_v15 = vmax.f32 %v2281_v23, 0.0  ;;  %v2884_v23 = vmax.f32 %v2022_v49, 0.0  ;;  %v2028_v17 = vadd.f32 %v16913_v42, %v16894_v14 }
 0x28d   :  { %20002 = vst [vmem:[#allocation778_spill] sm:$0xff] %v17007_v11  ;;  %v2866_v39 = vmax.f32 %v2283_v19, 0.0  ;;  %v2286_v60 = vpop.f32.mrb[24].mxu1  ;;  %v2375_v54 = vpop.f32.mrb[24].mxu0 }
 0x28e   :  { %v17014_v29 = vmax.f32 %v2859_v48, %v2865_v15  ;;  %v2287_v5 = vadd.f32 %v2286_v60, %v16882_v55  ;;  %v2288_v45 = vpop.f32.mrb[25].mxu1  ;;  %v2377_v20 = vpop.f32.mrb[25].mxu0 }
 0x28f   :  { %v17017_v38 = vmax.f32 %v2860_v56, %v2866_v39  ;;  %v2289_v52 = vadd.f32 %v2288_v45, %v16882_v55  ;;  %v2907_v45 = vmax.f32 %v2026_v41, 0.0 }
 0x290   :  { %20003 = vst [vmem:[#allocation779_spill] sm:$0xff] %v17014_v29  ;;  %v2889_v44 = vmax.f32 %v2287_v5, 0.0  ;;  %v2908_v5 = vmax.f32 %v2028_v17, 0.0  ;;  %v3004_v17 = vshrl.u32 %v3003_v10, 7 }
 0x291   :  { %20004 = vst [vmem:[#allocation780_spill] sm:$0xff] %v17017_v38  ;;  %v2890_v19 = vmax.f32 %v2289_v52, 0.0  ;;  %v2292_v48 = vpop.f32.mrb[26].mxu1  ;;  %v2381_v15 = vpop.f32.mrb[26].mxu0 }
 0x292   :  { %v17024_v30 = vmax.f32 %v2883_v18, %v2889_v44  ;;  %v2293_v60 = vadd.f32 %v2292_v48, %v16894_v14  ;;  %v2294_v56 = vpop.f32.mrb[27].mxu1  ;;  %v2383_v39 = vpop.f32.mrb[27].mxu0  ;;  %v12617_v18 = vmov 1983009808  }
 0x293   :  { %v17027_v9 = vmax.f32 %v2884_v23, %v2890_v19  ;;  %v2295_v58 = vadd.f32 %v2294_v56, %v16894_v14  ;;  %v3001_v44 = vunpack.c.l.s4 %v12617_v18  ;;  %v3032_v23 = vunpack.c.l.s4 %v12618_v7 }
 0x294   :  { %20005 = vst [vmem:[#allocation781_spill] sm:$0xff] %v17024_v30  ;;  %v2913_v26 = vmax.f32 %v2293_v60, 0.0  ;;  %v17046_v18 = vadd.f32 %v2371_v46, %v16897_v32 }
 0x295   :  { %20006 = vst [vmem:[#allocation782_spill] sm:$0xff] %v17027_v9  ;;  %v2914_v49 = vmax.f32 %v2295_v58, 0.0  ;;  %v2452_v6 = vpop.f32.mrb[28].mxu1  ;;  %v2541_v34 = vpop.f32.mrb[28].mxu0  ;;  %v3002_v60 = vunpack.c.0.s8 %v3001_v44  ;;  %v3033_v58 = vunpack.c.0.s8 %v3032_v23  ;;  %v17049_v44 = vadd.f32 %v2375_v54, %v16882_v55 }
 0x296   :  { %v17030_v42 = vmax.f32 %v2907_v45, %v2913_v26  ;;  %v2454_v52 = vpop.f32.mrb[29].mxu1  ;;  %v2543_v31 = vpop.f32.mrb[29].mxu0  ;;  %v17036_v45 = vadd.f32 %v16982_v63, %v16884_v50  ;;  %v17040_v26 = vadd.f32 %v16991_v13, %v16884_v50  ;;  %v17054_v63 = vadd.f32 %v2377_v20, %v16882_v55 }
 0x297   :  { %v17032_v48 = vmax.f32 %v2908_v5, %v2914_v49  ;;  %v17043_v5 = vadd.f32 %v2369_v43, %v16897_v32  ;;  %v17051_v24 = vsub.s32 %v3002_v60, %v3004_v17  ;;  %v17057_v13 = vadd.f32 %v2381_v15, %v16894_v14 }
 0x298   :  { %20007 = vst [vmem:[#allocation783_spill] sm:$0xff] %v17030_v42  ;;  %v17060_v43 = vadd.f32 %v2383_v39, %v16894_v14  ;;  %v17062_v3 = vsub.s32 %v3033_v58, %v3004_v17  ;;  %v2843_v46 = vmax.f32 %v17036_v45, 0.0  ;;  %v2453_v54 = vadd.f32 %v2452_v6, %v16884_v50 }
 0x299   :  { %20008 = vst [vmem:[#allocation784_spill] sm:$0xff] %v17032_v48  ;;  %v2458_v19 = vpop.f32.mrb[30].mxu1  ;;  %v2547_v27 = vpop.f32.mrb[30].mxu0  ;;  %v2844_v0 = vmax.f32 %v17040_v26, 0.0  ;;  %v17068_v60 = vadd.f32 %v2541_v34, %v16884_v50  ;;  %v2455_v20 = vadd.f32 %v2454_v52, %v16884_v50  ;;  %v17076_v39 = vadd.f32 %v2543_v31, %v16884_v50 }
 0x29a   :  { %v2460_v56 = vpop.f32.mrb[31].mxu1  ;;  %v2549_v41 = vpop.f32.mrb[31].mxu0  ;;  %v17073_v15 = vadd.f32 %v2458_v19, %v16897_v32  ;;  %v17084_v34 = vadd.f32 %v2547_v27, %v16897_v32  ;;  %v2845_v45 = vmax.f32 %v2453_v54, 0.0 }
 0x29b   :  { %v17081_v26 = vadd.f32 %v2460_v56, %v16897_v32  ;;  %v17090_v4 = vadd.f32 %v2549_v41, %v16897_v32  ;;  %v2846_v1 = vmax.f32 %v2455_v20, 0.0 }
 0x29c   :  { %20009 = vst [vmem:[#allocation785_spill] sm:$0xff] %v17084_v34  ;;  %v2869_v48 = vmax.f32 %v17073_v15, 0.0 }
 0x29d   :  { %v2464_v49 = vpop.f32.mrb[32].mxu1  ;;  %v2553_v7 = vpop.f32.mrb[32].mxu0  ;;  %20010 = vst [vmem:[#allocation786_spill] sm:$0xff] %v17090_v4 }
 0x29e   :  { %v2466_v10 = vpop.f32.mrb[33].mxu1  ;;  %v2555_v23 = vpop.f32.mrb[33].mxu0  ;;  %v17093_v6 = vadd.f32 %v2464_v49, %v16882_v55  ;;  %v17097_v27 = vadd.f32 %v2553_v7, %v16882_v55 }
 0x29f   :  { %v17101_v19 = vadd.f32 %v2466_v10, %v16882_v55  ;;  %v17110_v15 = vadd.f32 %v2555_v23, %v16882_v55 }
 0x2a0   :  { %20011 = vst [vmem:[#allocation787_spill] sm:$0xff] %v17097_v27 }
 0x2a1   :  { %v2470_v17 = vpop.f32.mrb[34].mxu1  ;;  %v2559_v58 = vpop.f32.mrb[34].mxu0 }
 0x2a2   :  { %v2472_v52 = vpop.f32.mrb[35].mxu1  ;;  %v2561_v28 = vpop.f32.mrb[35].mxu0 }
 0x2a5   :  { %v2630_v25 = vpop.f32.mrb[36].mxu1  ;;  %v2719_v41 = vpop.f32.mrb[36].mxu0 }
 0x2a6   :  { %v2631_v42 = vadd.f32 %v2630_v25, %v16884_v50  ;;  %v2720_v56 = vadd.f32 %v2719_v41, %v16884_v50  ;;  %v2632_v7 = vpop.f32.mrb[37].mxu1  ;;  %v2721_v9 = vpop.f32.mrb[37].mxu0  ;;  %v17118_v41 = vadd.f32 %v2470_v17, %v16894_v14 }
 0x2a7   :  { %v2633_v10 = vadd.f32 %v2632_v7, %v16884_v50  ;;  %v2722_v31 = vadd.f32 %v2721_v9, %v16884_v50 }
 0x2a8   :  { %v2849_v49 = vmax.f32 %v2631_v42, 0.0  ;;  %v2851_v38 = vmax.f32 %v2720_v56, 0.0 }
 0x2a9   :  { %v2850_v29 = vmax.f32 %v2633_v10, 0.0  ;;  %v2852_v20 = vmax.f32 %v2722_v31, 0.0  ;;  %v2636_v4 = vpop.f32.mrb[38].mxu1  ;;  %v2725_v23 = vpop.f32.mrb[38].mxu0 }
 0x2aa   :  { %v2951_v34 = vmax.f32 %v2843_v46, %v2849_v49  ;;  %v2953_v11 = vmax.f32 %v2845_v45, %v2851_v38  ;;  %v2637_v7 = vadd.f32 %v2636_v4, %v16897_v32  ;;  %v2726_v9 = vadd.f32 %v2725_v23, %v16897_v32  ;;  %v2638_v30 = vpop.f32.mrb[39].mxu1  ;;  %v2727_v21 = vpop.f32.mrb[39].mxu0 }
 0x2ab   :  { %v2952_v54 = vmax.f32 %v2844_v0, %v2850_v29  ;;  %v2954_v42 = vmax.f32 %v2846_v1, %v2852_v20  ;;  %v2639_v56 = vadd.f32 %v2638_v30, %v16897_v32  ;;  %v2728_v25 = vadd.f32 %v2727_v21, %v16897_v32 }
 0x2ac   :  { %v2975_v17 = vmax.f32 %v16934_v35, %v2951_v34  ;;  %v2977_v31 = vmax.f32 %v16936_v57, %v2953_v11  ;;  %v2873_v10 = vmax.f32 %v2637_v7, 0.0  ;;  %v2875_v27 = vmax.f32 %v2726_v9, 0.0 }
 0x2ad   :  { %v17128_v4 = vadd.f32 %v2559_v58, %v16894_v14  ;;  %v2976_v46 = vmax.f32 %v16940_v61, %v2952_v54  ;;  %v2978_v0 = vmax.f32 %v16942_v51, %v2954_v42  ;;  %v2642_v1 = vpop.f32.mrb[40].mxu1  ;;  %v2731_v29 = vpop.f32.mrb[40].mxu0  ;;  %v2874_v35 = vmax.f32 %v2639_v56, 0.0 }
 0x2ae   :  { %v2999_v30 = vcombine.high %v2975_v17, %v19997_v53  ;;  %v3006_v21 = vrot.slane %v2975_v17, %v17051_v24  ;;  %v2876_v45 = vmax.f32 %v2728_v25, 0.0  ;;  %v2644_v57 = vpop.f32.mrb[41].mxu1  ;;  %v2733_v11 = vpop.f32.mrb[41].mxu0  ;;  %v17135_v34 = vadd.f32 %v2472_v52, %v16894_v14 }
 0x2af   :  { %v17138_v58 = vadd.f32 %v2561_v28, %v16894_v14  ;;  %v3014_v61 = vcombine.high %v2978_v0, %v19997_v53  ;;  %v3021_v51 = vrot.slane %v2978_v0, %v17051_v24  ;;  %v20012_v20 = vmax.f32 %v17043_v5, 0.0 }
 0x2b0   :  { %v3013_v49 = vrot.slane %v2999_v30, %v17051_v24  ;;  %v2959_v25 = vmax.f32 %v2869_v48, %v2875_v27  ;;  %v20013_v30 = vmax.f32 %v17046_v18, 0.0  ;;  %v20014_v48 = vmax.f32 %v17081_v26, 0.0 }
 0x2b1   :  { %v2957_v23 = vmax.f32 %v20012_v20, %v2873_v10  ;;  %v3028_v52 = vrot.slane %v3014_v61, %v17051_v24  ;;  %v3029_v9 = vcombine.low %v3006_v21, %v3021_v51  ;;  %v3030_v42 = vcombine.high %v3006_v21, %v3021_v51  ;;  %v17148_v28 = vpop.f32.mrb[42].mxu1  ;;  %v17150_v56 = vpop.f32.mrb[42].mxu0 }
 0x2b2   :  { %v17154_v0 = vmax.f32 %v16950_v37, %v2959_v25  ;;  %v2958_v5 = vmax.f32 %v20013_v30, %v2874_v35  ;;  %v2960_v27 = vmax.f32 %v20014_v48, %v2876_v45  ;;  %v17160_v10 = vpop.f32.mrb[43].mxu1  ;;  %v17162_v61 = vpop.f32.mrb[43].mxu0  ;;  %v3527_v35 = vcombine.high %v2977_v31, %v19997_v53 }
 0x2b3   :  { %v2981_v17 = vmax.f32 %v16948_v47, %v2957_v23  ;;  %v17165_v21 = vrot.slane %v3029_v9, %v17062_v3  ;;  %v17168_v51 = vrot.slane %v3030_v42, %v17062_v3  ;;  %v3045_v47 = vcombine.low %v3013_v49, %v3028_v52 }
 0x2b4   :  { %v3046_v20 = vcombine.high %v3013_v49, %v3028_v52  ;;  %v17191_v9 = vrot.slane %v2977_v31, %v17051_v24  ;;  %v17195_v30 = vmax.f32 %v16954_v36, %v2958_v5  ;;  %v2984_v48 = vmax.f32 %v16956_v2, %v2960_v27 }
 0x2b5   :  { %20015 = vst [vmem:[#allocation788_spill] sm:$0xff] %v17168_v51  ;;  %v3065_v26 = vcombine.high %v2981_v17, %v19997_v53  ;;  %v17175_v45 = vrot.slane %v3045_v47, %v17062_v3  ;;  %v17182_v25 = vcombine.high %v17165_v21, %v19997_v53  ;;  %v17186_v49 = vcombine.high %v17168_v51, %v19997_v53  ;;  %v17188_v52 = vpop.f32.mrb[44].mxu1 }
 0x2b6   :  { %v17178_v23 = vrot.slane %v3046_v20, %v17062_v3  ;;  %v3072_v42 = vrot.slane %v2981_v17, %v17051_v24  ;;  %v17198_v47 = vpop.f32.mrb[45].mxu1  ;;  %v2643_v31 = vadd.f32 %v2642_v1, %v16882_v55  ;;  %v2732_v7 = vadd.f32 %v2731_v29, %v16882_v55 }
 0x2b7   :  { %20016 = vst [vmem:[#allocation789_spill] sm:$0xff] %v17175_v45  ;;  %20018 = vst [vmem:[#allocation791_spill] sm:$0xff] %v17186_v49  ;;  %v17202_v20 = vcombine.high %v17175_v45, %v19997_v53  ;;  %v3263_v17 = vcombine.high %v2976_v46, %v19997_v53  ;;  %v3079_v36 = vrot.slane %v3065_v26, %v17051_v24  ;;  %v20021_v45 = vmax.f32 %v17049_v44, 0.0 }
 0x2b8   :  { %20017 = vst [vmem:[#allocation790_spill] sm:$0xff] %v17178_v23  ;;  %v17206_v18 = vcombine.high %v17178_v23, %v19997_v53  ;;  %v3080_v2 = vcombine.high %v2984_v48, %v19997_v53  ;;  %v3087_v5 = vrot.slane %v2984_v48, %v17051_v24  ;;  %v2897_v27 = vmax.f32 %v2643_v31, 0.0 }
 0x2b9   :  { %20019 = vst [vmem:[#allocation792_spill] sm:$0xff] %v17202_v20  ;;  %v2899_v38 = vmax.f32 %v2732_v7, 0.0  ;;  %v2645_v37 = vadd.f32 %v2644_v57, %v16882_v55  ;;  %v2734_v54 = vadd.f32 %v2733_v11, %v16882_v55  ;;  %v17216_v23 = vpop.f32.mrb[46].mxu1  ;;  %v17219_v1 = vrot.slane %v2976_v46, %v17051_v24 }
 0x2ba   :  { %20020 = vst [vmem:[#allocation793_spill] sm:$0xff] %v17206_v18  ;;  %v3094_v29 = vrot.slane %v3080_v2, %v17051_v24  ;;  %v3095_v18 = vcombine.low %v3072_v42, %v3087_v5  ;;  %v3096_v20 = vcombine.high %v3072_v42, %v3087_v5  ;;  %v17222_v26 = vpop.f32.mrb[47].mxu1  ;;  %v2963_v48 = vmax.f32 %v20021_v45, %v2897_v27 }
 0x2bb   :  { %v20022_v7 = vmax.f32 %v17093_v6, 0.0  ;;  %v2898_v57 = vmax.f32 %v2645_v37, 0.0  ;;  %v2900_v49 = vmax.f32 %v2734_v54, 0.0  ;;  %v20024_v44 = vmax.f32 %v17054_v63, 0.0 }
 0x2bc   :  { %v17229_v11 = vrot.slane %v3095_v18, %v17062_v3  ;;  %v17232_v46 = vrot.slane %v3096_v20, %v17062_v3  ;;  %v3111_v51 = vcombine.low %v3079_v36, %v3094_v29  ;;  %v3112_v2 = vcombine.high %v3079_v36, %v3094_v29 }
 0x2bd   :  { %v2965_v31 = vmax.f32 %v20022_v7, %v2899_v38  ;;  %v2987_v42 = vmax.f32 %v16964_v40, %v2963_v48  ;;  %v2964_v45 = vmax.f32 %v20024_v44, %v2898_v57  ;;  %v20025_v6 = vmax.f32 %v17101_v19, 0.0  ;;  %v17240_v37 = vpop.f32.mrb[48].mxu1 }
 0x2be   :  { %20023 = vst [vmem:[#allocation794_spill] sm:$0xff] %v17232_v46  ;;  %v17243_v54 = vrot.slane %v3111_v51, %v17062_v3  ;;  %v17246_v18 = vrot.slane %v3112_v2, %v17062_v3  ;;  %v17250_v20 = vcombine.high %v17229_v11, %v19997_v53  ;;  %v17254_v40 = vcombine.high %v17232_v46, %v19997_v53 }
 0x2bf   :  { %v2989_v5 = vmax.f32 %v16966_v8, %v2965_v31  ;;  %v2966_v38 = vmax.f32 %v20025_v6, %v2900_v49  ;;  %v17256_v8 = vpop.f32.mrb[49].mxu1  ;;  %v17259_v63 = vrot.slane %v3527_v35, %v17051_v24  ;;  %v17262_v19 = vrot.slane %v3263_v17, %v17051_v24 }
 0x2c0   :  { %20026 = vst [vmem:[#allocation795_spill] sm:$0xff] %v17243_v54  ;;  %20027 = vst [vmem:[#allocation796_spill] sm:$0xff] %v17246_v18  ;;  %v3131_v51 = vcombine.high %v2987_v42, %v19997_v53  ;;  %v3138_v49 = vrot.slane %v2987_v42, %v17051_v24  ;;  %v17268_v36 = vcombine.high %v17243_v54, %v19997_v53 }
 0x2c1   :  { %20028 = vst [vmem:[#allocation797_spill] sm:$0xff] %v17254_v40  ;;  %v17272_v27 = vcombine.high %v17246_v18, %v19997_v53  ;;  %v17275_v29 = vmax.f32 %v16972_v16, %v2964_v45  ;;  %v2990_v35 = vmax.f32 %v16974_v22, %v2966_v38  ;;  %v3593_v17 = vcombine.high %v17154_v0, %v19997_v53  ;;  %v17288_v57 = vpop.f32.mrb[50].mxu1 }
 0x2c2   :  { %20029 = vst [vmem:[#allocation798_spill] sm:$0xff] %v17268_v36  ;;  %v17282_v48 = vrot.slane %v17154_v0, %v17051_v24  ;;  %v2649_v7 = vadd.f32 %v17148_v28, %v16894_v14  ;;  %v2738_v31 = vadd.f32 %v17150_v56, %v16894_v14  ;;  %v3329_v16 = vcombine.high %v17195_v30, %v19997_v53  ;;  %v17295_v44 = vpop.f32.mrb[51].mxu1 }
 0x2c3   :  { %20030 = vst [vmem:[#allocation799_spill] sm:$0xff] %v17272_v27  ;;  %v3145_v22 = vrot.slane %v3131_v51, %v17051_v24  ;;  %v3146_v2 = vcombine.high %v2990_v35, %v19997_v53  ;;  %v3153_v42 = vrot.slane %v2990_v35, %v17051_v24  ;;  %v2651_v28 = vadd.f32 %v17160_v10, %v16894_v14 }
 0x2c4   :  { %v2921_v0 = vmax.f32 %v2649_v7, 0.0  ;;  %v2923_v45 = vmax.f32 %v2738_v31, 0.0  ;;  %v2740_v56 = vadd.f32 %v17162_v61, %v16894_v14  ;;  %v3659_v6 = vcombine.high %v2989_v5, %v19997_v53 }
 0x2c5   :  { %v3160_v38 = vrot.slane %v3146_v2, %v17051_v24  ;;  %v3161_v27 = vcombine.low %v3138_v49, %v3153_v42  ;;  %v3162_v51 = vcombine.high %v3138_v49, %v3153_v42  ;;  %v20031_v18 = vmax.f32 %v17057_v13, 0.0 }
 0x2c6   :  { %v20032_v35 = vmax.f32 %v17118_v41, 0.0  ;;  %v2922_v7 = vmax.f32 %v2651_v28, 0.0  ;;  %v2924_v31 = vmax.f32 %v2740_v56, 0.0  ;;  %v20035_v13 = vmax.f32 %v17060_v43, 0.0 }
 0x2c7   :  { %v2969_v36 = vmax.f32 %v20031_v18, %v2921_v0  ;;  %v17308_v40 = vrot.slane %v3161_v27, %v17062_v3  ;;  %v17311_v10 = vrot.slane %v3162_v51, %v17062_v3  ;;  %v3177_v61 = vcombine.low %v3145_v22, %v3160_v38 }
 0x2c8   :  { %v2971_v54 = vmax.f32 %v20032_v35, %v2923_v45  ;;  %v3178_v46 = vcombine.high %v3145_v22, %v3160_v38  ;;  %v2970_v18 = vmax.f32 %v20035_v13, %v2922_v7  ;;  %v20036_v41 = vmax.f32 %v17135_v34, 0.0 }
 0x2c9   :  { %20033 = vst [vmem:[#allocation800_spill] sm:$0xff] %v17308_v40  ;;  %20034 = vst [vmem:[#allocation801_spill] sm:$0xff] %v17311_v10  ;;  %v2993_v2 = vmax.f32 %v16986_v62, %v2969_v36  ;;  %v17322_v0 = vrot.slane %v3177_v61, %v17062_v3  ;;  %v17329_v22 = vcombine.high %v17308_v40, %v19997_v53  ;;  %v20043_v61 = vmax.f32 %v17068_v60, 0.0 }
 0x2ca   :  { %v17315_v49 = vmax.f32 %v16988_v12, %v2971_v54  ;;  %v2972_v42 = vmax.f32 %v20036_v41, %v2924_v31  ;;  %v17325_v27 = vrot.slane %v3178_v46, %v17062_v3  ;;  %v17333_v62 = vcombine.high %v17311_v10, %v19997_v53 }
 0x2cb   :  { %20037 = vst [vmem:[#allocation802_spill] sm:$0xff] %v17322_v0  ;;  %20039 = vst [vmem:[#allocation804_spill] sm:$0xff] %v17329_v22  ;;  %v17336_v12 = vrot.slane %v3593_v17, %v17051_v24  ;;  %v17340_v43 = vrot.slane %v17195_v30, %v17051_v24  ;;  %v3197_v34 = vcombine.high %v2993_v2, %v19997_v53  ;;  %v20044_v13 = vmax.f32 %v17076_v39, 0.0  ;;  %v20067_v22 = vld [vmem:[#allocation782_spill] sm:$0xff] }
 0x2cc   :  { %20038 = vst [vmem:[#allocation803_spill] sm:$0xff] %v17325_v27  ;;  %20040 = vst [vmem:[#allocation805_spill] sm:$0xff] %v17333_v62  ;;  %v3204_v46 = vrot.slane %v2993_v2, %v17051_v24  ;;  %v17346_v54 = vcombine.high %v17322_v0, %v19997_v53  ;;  %v17350_v36 = vcombine.high %v17325_v27, %v19997_v53 }
 0x2cd   :  { %v17353_v45 = vmax.f32 %v16995_v59, %v2970_v18  ;;  %v2996_v17 = vmax.f32 %v16997_v33, %v2972_v42  ;;  %v17357_v30 = vrot.slane %v3329_v16, %v17051_v24  ;;  %v17360_v28 = vrot.slane %v2989_v5, %v17051_v24 }
 0x2ce   :  { %20041 = vst [vmem:[#allocation806_spill] sm:$0xff] %v17346_v54  ;;  %20042 = vst [vmem:[#allocation807_spill] sm:$0xff] %v17350_v36  ;;  %v2809_v56 = vadd.f32 %v17188_v52, %v16884_v50  ;;  %v2811_v38 = vadd.f32 %v17198_v47, %v16884_v50  ;;  %v17367_v51 = vrot.slane %v3659_v6, %v17051_v24  ;;  %v20062_v36 = vld [vmem:[#allocation787_spill] sm:$0xff] }
 0x2cf   :  { %v3211_v59 = vrot.slane %v3197_v34, %v17051_v24  ;;  %v3212_v35 = vcombine.high %v2996_v17, %v19997_v53  ;;  %v3219_v33 = vrot.slane %v2996_v17, %v17051_v24  ;;  %v2815_v5 = vadd.f32 %v17216_v23, %v16897_v32  ;;  %v20047_v17 = vld [vmem:[#allocation777_spill] sm:$0xff] }
 0x2d0   :  { %v2853_v16 = vmax.f32 %v2809_v56, 0.0  ;;  %v2854_v7 = vmax.f32 %v2811_v38, 0.0  ;;  %v2817_v52 = vadd.f32 %v17222_v26, %v16897_v32  ;;  %v17378_v50 = vcombine.high %v17275_v29, %v19997_v53  ;;  %v20048_v38 = vld [vmem:[#allocation778_spill] sm:$0xff] }
 0x2d1   :  { %v3226_v47 = vrot.slane %v3212_v35, %v17051_v24  ;;  %v3227_v6 = vcombine.low %v3204_v46, %v3219_v33  ;;  %v3228_v31 = vcombine.high %v3204_v46, %v3219_v33  ;;  %v2877_v41 = vmax.f32 %v2815_v5, 0.0  ;;  %v20049_v35 = vld [vmem:[#allocation785_spill] sm:$0xff] }
 0x2d2   :  { %v2955_v2 = vmax.f32 %v20043_v61, %v2853_v16  ;;  %v2956_v18 = vmax.f32 %v20044_v13, %v2854_v7  ;;  %v2878_v42 = vmax.f32 %v2817_v52, 0.0  ;;  %v20050_v60 = vmax.f32 %v20049_v35, 0.0  ;;  %v20051_v16 = vld [vmem:[#allocation786_spill] sm:$0xff] }
 0x2d3   :  { %v17386_v23 = vrot.slane %v3227_v6, %v17062_v3  ;;  %v17389_v32 = vrot.slane %v3228_v31, %v17062_v3  ;;  %v3243_v26 = vcombine.low %v3211_v59, %v3226_v47  ;;  %v3244_v34 = vcombine.high %v3211_v59, %v3226_v47 }
 0x2d4   :  { %v2979_v56 = vmax.f32 %v20047_v17, %v2955_v2  ;;  %v2980_v46 = vmax.f32 %v20048_v38, %v2956_v18  ;;  %v2961_v33 = vmax.f32 %v20050_v60, %v2877_v41  ;;  %v20052_v39 = vmax.f32 %v20051_v16, 0.0  ;;  %v20059_v41 = vld [vmem:[#allocation779_spill] sm:$0xff] }
 0x2d5   :  { %20045 = vst [vmem:[#allocation808_spill] sm:$0xff] %v17386_v23  ;;  %20046 = vst [vmem:[#allocation809_spill] sm:$0xff] %v17389_v32  ;;  %v17398_v5 = vrot.slane %v3243_v26, %v17062_v3  ;;  %v17401_v52 = vrot.slane %v3244_v34, %v17062_v3  ;;  %v17405_v6 = vcombine.high %v17386_v23, %v19997_v53  ;;  %v20060_v26 = vld [vmem:[#allocation780_spill] sm:$0xff]  ;;  %v20063_v27 = vmax.f32 %v20062_v36, 0.0 }
 0x2d6   :  { %v2962_v7 = vmax.f32 %v20052_v39, %v2878_v42  ;;  %v17409_v59 = vcombine.high %v17389_v32, %v19997_v53  ;;  %v3278_v47 = vcombine.high %v2979_v56, %v19997_v53  ;;  %v3285_v31 = vrot.slane %v2979_v56, %v17051_v24 }
 0x2d7   :  { %20053 = vst [vmem:[#allocation777_spill] sm:$0xff] %v17398_v5  ;;  %20054 = vst [vmem:[#allocation778_spill] sm:$0xff] %v17401_v52  ;;  %v3542_v61 = vcombine.high %v2980_v46, %v19997_v53  ;;  %v3549_v2 = vrot.slane %v2980_v46, %v17051_v24  ;;  %v17417_v13 = vcombine.high %v17398_v5, %v19997_v53 }
 0x2d8   :  { %20055 = vst [vmem:[#allocation785_spill] sm:$0xff] %v17405_v6  ;;  %20056 = vst [vmem:[#allocation786_spill] sm:$0xff] %v17409_v59  ;;  %v17421_v18 = vcombine.high %v17401_v52, %v19997_v53  ;;  %v2985_v42 = vmax.f32 %v20059_v41, %v2961_v33  ;;  %v2986_v34 = vmax.f32 %v20060_v26, %v2962_v7 }
 0x2d9   :  { %20057 = vst [vmem:[#allocation810_spill] sm:$0xff] %v17417_v13  ;;  %v3292_v17 = vrot.slane %v3278_v47, %v17051_v24  ;;  %v3293_v56 = vcombine.low %v17219_v1, %v3285_v31  ;;  %v3294_v38 = vcombine.high %v17219_v1, %v3285_v31  ;;  %v3556_v46 = vrot.slane %v3542_v61, %v17051_v24 }
 0x2da   :  { %20058 = vst [vmem:[#allocation811_spill] sm:$0xff] %v17421_v18  ;;  %v3557_v35 = vcombine.low %v17191_v9, %v3549_v2  ;;  %v3558_v60 = vcombine.high %v17191_v9, %v3549_v2  ;;  %v3344_v16 = vcombine.high %v2985_v42, %v19997_v53  ;;  %v3351_v39 = vrot.slane %v2985_v42, %v17051_v24 }
 0x2db   :  { %v17434_v33 = vrot.slane %v3293_v56, %v17062_v3  ;;  %v17437_v7 = vrot.slane %v3294_v38, %v17062_v3  ;;  %v3309_v47 = vcombine.low %v17262_v19, %v3292_v17  ;;  %v3310_v1 = vcombine.high %v17262_v19, %v3292_v17 }
 0x2dc   :  { %v17442_v31 = vrot.slane %v3557_v35, %v17062_v3  ;;  %v17445_v61 = vrot.slane %v3558_v60, %v17062_v3  ;;  %v3573_v9 = vcombine.low %v17259_v63, %v3556_v46  ;;  %v3574_v2 = vcombine.high %v17259_v63, %v3556_v46 }
 0x2dd   :  { %v17450_v41 = vrot.slane %v3309_v47, %v17062_v3  ;;  %v17453_v42 = vrot.slane %v3310_v1, %v17062_v3  ;;  %v17457_v26 = vcombine.high %v17434_v33, %v19997_v53  ;;  %v17461_v19 = vcombine.high %v17437_v7, %v19997_v53  ;;  %4656 = vmatprep.mubr.f32.mxu0 %v17434_v33 }
 0x2de   :  { %v17464_v17 = vrot.slane %v3573_v9, %v17062_v3  ;;  %v17467_v56 = vrot.slane %v3574_v2, %v17062_v3  ;;  %v17471_v63 = vcombine.high %v17442_v31, %v19997_v53  ;;  %v17475_v38 = vcombine.high %v17445_v61, %v19997_v53 }
 0x2df   :  { %v17479_v46 = vcombine.high %v17450_v41, %v19997_v53  ;;  %v17483_v35 = vcombine.high %v17453_v42, %v19997_v53  ;;  %v3358_v60 = vrot.slane %v3344_v16, %v17051_v24  ;;  %v3359_v47 = vcombine.low %v17340_v43, %v3351_v39 }
 0x2e0   :  { %v17489_v1 = vcombine.high %v17464_v17, %v19997_v53  ;;  %v17493_v9 = vcombine.high %v17467_v56, %v19997_v53  ;;  %v3360_v2 = vcombine.high %v17340_v43, %v3351_v39  ;;  %v3608_v18 = vcombine.high %v2986_v34, %v19997_v53 }
 0x2e1   :  { %v17498_v52 = vrot.slane %v3359_v47, %v17062_v3  ;;  %v3375_v13 = vcombine.low %v17357_v30, %v3358_v60  ;;  %v3376_v16 = vcombine.high %v17357_v30, %v3358_v60  ;;  %v3615_v5 = vrot.slane %v2986_v34, %v17051_v24 }
 0x2e2   :  { %v17504_v59 = vrot.slane %v3360_v2, %v17062_v3  ;;  %v3622_v32 = vrot.slane %v3608_v18, %v17051_v24  ;;  %v2821_v6 = vadd.f32 %v17240_v37, %v16882_v55  ;;  %v2823_v43 = vadd.f32 %v17256_v8, %v16882_v55 }
 0x2e3   :  { %v17512_v39 = vrot.slane %v3375_v13, %v17062_v3  ;;  %v17515_v47 = vrot.slane %v3376_v16, %v17062_v3  ;;  %v17519_v30 = vcombine.high %v17498_v52, %v19997_v53  ;;  %v3623_v34 = vcombine.low %v17282_v48, %v3615_v5 }
 0x2e4   :  { %v17524_v18 = vcombine.high %v17504_v59, %v19997_v53  ;;  %v3624_v37 = vcombine.high %v17282_v48, %v3615_v5  ;;  %v3639_v55 = vcombine.low %v17336_v12, %v3622_v32  ;;  %v3640_v8 = vcombine.high %v17336_v12, %v3622_v32 }
 0x2e5   :  { %v17531_v13 = vcombine.high %v17512_v39, %v19997_v53  ;;  %v17535_v60 = vcombine.high %v17515_v47, %v19997_v53  ;;  %v17538_v2 = vrot.slane %v3623_v34, %v17062_v3  ;;  %v2901_v16 = vmax.f32 %v2821_v6, 0.0 }
 0x2e6   :  { %v17541_v23 = vrot.slane %v3624_v37, %v17062_v3  ;;  %v17544_v48 = vrot.slane %v3639_v55, %v17062_v3  ;;  %v17547_v12 = vrot.slane %v3640_v8, %v17062_v3  ;;  %v2902_v32 = vmax.f32 %v2823_v43, 0.0  ;;  %v20066_v8 = vld [vmem:[#allocation781_spill] sm:$0xff] }
 0x2e7   :  { %v17551_v5 = vcombine.high %v17538_v2, %v19997_v53  ;;  %v2967_v54 = vmax.f32 %v20063_v27, %v2901_v16  ;;  %v2827_v6 = vadd.f32 %v17288_v57, %v16894_v14  ;;  %v2829_v34 = vadd.f32 %v17295_v44, %v16894_v14 }
 0x2e8   :  { %20061 = vst [vmem:[#allocation779_spill] sm:$0xff] %v17547_v12  ;;  %v17561_v37 = vcombine.high %v17541_v23, %v19997_v53  ;;  %v17565_v43 = vcombine.high %v17544_v48, %v19997_v53  ;;  %v17569_v55 = vcombine.high %v17547_v12, %v19997_v53  ;;  %v20065_v27 = vmax.f32 %v17110_v15, 0.0 }
 0x2e9   :  { %v3402_v57 = vrot.slane %v17275_v29, %v17051_v24  ;;  %v2991_v14 = vmax.f32 %v20066_v8, %v2967_v54  ;;  %v2925_v44 = vmax.f32 %v2827_v6, 0.0  ;;  %v2926_v16 = vmax.f32 %v2829_v34, 0.0 }
 0x2ea   :  { %20064 = vst [vmem:[#allocation780_spill] sm:$0xff] %v17569_v55  ;;  %v2968_v36 = vmax.f32 %v20065_v27, %v2902_v32  ;;  %v3409_v0 = vrot.slane %v17378_v50, %v17051_v24  ;;  %v3725_v62 = vcombine.high %v17315_v49, %v19997_v53  ;;  %v3732_v10 = vrot.slane %v17315_v49, %v17051_v24  ;;  %v20070_v55 = vld [vmem:[#allocation783_spill] sm:$0xff] }
 0x2eb   :  { %v3410_v15 = vcombine.high %v2991_v14, %v19997_v53  ;;  %v3417_v32 = vrot.slane %v2991_v14, %v17051_v24  ;;  %v20068_v29 = vmax.f32 %v17128_v4, 0.0  ;;  %v20069_v6 = vmax.f32 %v17138_v58, 0.0 }
 0x2ec   :  { %v2992_v40 = vmax.f32 %v20067_v22, %v2968_v36  ;;  %v3461_v50 = vcombine.high %v17353_v45, %v19997_v53  ;;  %v3468_v27 = vrot.slane %v17353_v45, %v17051_v24 }
 0x2ed   :  { %v2973_v54 = vmax.f32 %v20068_v29, %v2925_v44  ;;  %v2974_v34 = vmax.f32 %v20069_v6, %v2926_v16  ;;  %v3424_v36 = vrot.slane %v3410_v15, %v17051_v24  ;;  %v3425_v8 = vcombine.low %v3402_v57, %v3417_v32  ;;  %v20071_v29 = vld [vmem:[#allocation784_spill] sm:$0xff] }
 0x2ee   :  { %v3674_v49 = vcombine.high %v2992_v40, %v19997_v53  ;;  %v3681_v22 = vrot.slane %v2992_v40, %v17051_v24  ;;  %v3426_v14 = vcombine.high %v3402_v57, %v3417_v32 }
 0x2ef   :  { %v2997_v4 = vmax.f32 %v20070_v55, %v2973_v54  ;;  %v2998_v6 = vmax.f32 %v20071_v29, %v2974_v34  ;;  %v17602_v45 = vrot.slane %v3425_v8, %v17062_v3  ;;  %v3441_v40 = vcombine.low %v3409_v0, %v3424_v36 }
 0x2f0   :  { %v3688_v44 = vrot.slane %v3674_v49, %v17051_v24  ;;  %v3689_v58 = vcombine.low %v17360_v28, %v3681_v22  ;;  %v3690_v16 = vcombine.high %v17360_v28, %v3681_v22  ;;  %v17605_v12 = vrot.slane %v3426_v14, %v17062_v3 }
 0x2f1   :  { %v3442_v15 = vcombine.high %v3409_v0, %v3424_v36  ;;  %v17616_v54 = vrot.slane %v3441_v40, %v17062_v3  ;;  %v17623_v49 = vcombine.high %v17602_v45, %v19997_v53 }
 0x2f2   :  { %v17608_v57 = vrot.slane %v3689_v58, %v17062_v3  ;;  %v17611_v55 = vrot.slane %v3690_v16, %v17062_v3  ;;  %v3705_v32 = vcombine.low %v17367_v51, %v3688_v44  ;;  %v3706_v28 = vcombine.high %v17367_v51, %v3688_v44 }
 0x2f3   :  { %20072 = vst [vmem:[#allocation787_spill] sm:$0xff] %v17616_v54  ;;  %v17619_v34 = vrot.slane %v3442_v15, %v17062_v3  ;;  %v17627_v0 = vcombine.high %v17605_v12, %v19997_v53  ;;  %v17645_v14 = vcombine.high %v17616_v54, %v19997_v53  ;;  %v3476_v58 = vcombine.high %v2997_v4, %v19997_v53 }
 0x2f4   :  { %v17630_v22 = vrot.slane %v3705_v32, %v17062_v3  ;;  %v17633_v36 = vrot.slane %v3706_v28, %v17062_v3  ;;  %v17637_v51 = vcombine.high %v17608_v57, %v19997_v53  ;;  %v17641_v8 = vcombine.high %v17611_v55, %v19997_v53 }
 0x2f5   :  { %20073 = vst [vmem:[#allocation781_spill] sm:$0xff] %v17619_v34  ;;  %20077 = vst [vmem:[#allocation812_spill] sm:$0xff] %v17645_v14  ;;  %v17649_v44 = vcombine.high %v17619_v34, %v19997_v53  ;;  %v3483_v16 = vrot.slane %v2997_v4, %v17051_v24  ;;  %v3740_v15 = vcombine.high %v2998_v6, %v19997_v53 }
 0x2f6   :  { %20074 = vst [vmem:[#allocation782_spill] sm:$0xff] %v17630_v22  ;;  %20075 = vst [vmem:[#allocation783_spill] sm:$0xff] %v17633_v36  ;;  %v17655_v29 = vcombine.high %v17630_v22, %v19997_v53  ;;  %v17659_v40 = vcombine.high %v17633_v36, %v19997_v53  ;;  %v3747_v32 = vrot.slane %v2998_v6, %v17051_v24 }
 0x2f7   :  { %20076 = vst [vmem:[#allocation784_spill] sm:$0xff] %v17641_v8  ;;  %20078 = vst [vmem:[#allocation813_spill] sm:$0xff] %v17649_v44  ;;  %v3475_v28 = vrot.slane %v3461_v50, %v17051_v24  ;;  %v3490_v44 = vrot.slane %v3476_v58, %v17051_v24  ;;  %v3491_v34 = vcombine.low %v3468_v27, %v3483_v16 }
 0x2f8   :  { %20079 = vst [vmem:[#allocation814_spill] sm:$0xff] %v17655_v29  ;;  %20080 = vst [vmem:[#allocation815_spill] sm:$0xff] %v17659_v40  ;;  %v3492_v14 = vcombine.high %v3468_v27, %v3483_v16  ;;  %v3739_v4 = vrot.slane %v3725_v62, %v17051_v24  ;;  %v3754_v54 = vrot.slane %v3740_v15, %v17051_v24 }
 0x2f9   :  { %v3755_v22 = vcombine.low %v3732_v10, %v3747_v32  ;;  %v3756_v29 = vcombine.high %v3732_v10, %v3747_v32  ;;  %v17668_v8 = vrot.slane %v3491_v34, %v17062_v3  ;;  %v3507_v36 = vcombine.low %v3475_v28, %v3490_v44  ;;  %v20093_v32 = vld [vmem:[#allocation10_spill] sm:$0xff] }
 0x2fa   :  { %v17671_v40 = vrot.slane %v3492_v14, %v17062_v3  ;;  %v3508_v6 = vcombine.high %v3475_v28, %v3490_v44  ;;  %v3771_v27 = vcombine.low %v3739_v4, %v3754_v54  ;;  %v3772_v62 = vcombine.high %v3739_v4, %v3754_v54  ;;  %v20094_v28 = vld [vmem:[#allocation13_spill] sm:$0xff] }
 0x2fb   :  { %v17674_v50 = vrot.slane %v3755_v22, %v17062_v3  ;;  %v17677_v58 = vrot.slane %v3756_v29, %v17062_v3  ;;  %v17680_v24 = vrot.slane %v3507_v36, %v17062_v3  ;;  %v17687_v34 = vcombine.high %v17668_v8, %v19997_v53 }
 0x2fc   :  { %20081 = vst [vmem:[#allocation816_spill] sm:$0xff] %v17671_v40  ;;  %v17683_v10 = vrot.slane %v3508_v6, %v17062_v3  ;;  %v17691_v14 = vcombine.high %v17671_v40, %v19997_v53  ;;  %v17694_v22 = vrot.slane %v3771_v27, %v17062_v3  ;;  %v17697_v44 = vrot.slane %v3772_v62, %v17062_v3  ;;  %v20095_v6 = vld [vmem:[#allocation34_spill] sm:$0xff]  ;;  %v20096_v27 = vld [vmem:[#allocation37_spill] sm:$0xff] }
 0x2fd   :  { %20082 = vst [vmem:[#allocation817_spill] sm:$0xff] %v17677_v58  ;;  %20083 = vst [vmem:[#allocation818_spill] sm:$0xff] %v17680_v24  ;;  %v17701_v54 = vcombine.high %v17674_v50, %v19997_v53  ;;  %v17705_v36 = vcombine.high %v17677_v58, %v19997_v53  ;;  %v17709_v16 = vcombine.high %v17680_v24, %v19997_v53  ;;  %v20097_v24 = vld [vmem:[#allocation9_spill] sm:$0xff] }
 0x2fe   :  { %20084 = vst [vmem:[#allocation819_spill] sm:$0xff] %v17683_v10  ;;  %20085 = vst [vmem:[#allocation820_spill] sm:$0xff] %v17691_v14  ;;  %v17713_v29 = vcombine.high %v17683_v10, %v19997_v53  ;;  %v17717_v3 = vcombine.high %v17694_v22, %v19997_v53  ;;  %v17721_v15 = vcombine.high %v17697_v44, %v19997_v53  ;;  %v20099_v58 = vld [vmem:[#allocation33_spill] sm:$0xff]  ;;  %v20100_v10 = vld [vmem:[#allocation36_spill] sm:$0xff] }
 0x2ff   :  { %20086 = vst [vmem:[#allocation821_spill] sm:$0xff] %v17694_v22  ;;  %20087 = vst [vmem:[#allocation822_spill] sm:$0xff] %v17697_v44  ;;  %v11472_v4 = vpack.c.bf16 %v20094_v28, %v20093_v32  ;;  %v11504_v62 = vpack.c.bf16 %v20096_v27, %v20095_v6 }
 0x300   :  { %20088 = vst [vmem:[#allocation823_spill] sm:$0xff] %v17705_v36  ;;  %20089 = vst [vmem:[#allocation824_spill] sm:$0xff] %v17709_v16  ;;  %v20098_v16 = vld [vmem:[#allocation12_spill] sm:$0xff] }
 0x301   :  { %20090 = vst [vmem:[#allocation825_spill] sm:$0xff] %v17713_v29  ;;  %20091 = vst [vmem:[#allocation826_spill] sm:$0xff] %v17717_v3  ;;  %v11474_v36 = vpack.c.bf16 %v20098_v16, %v20097_v24  ;;  %v11506_v29 = vpack.c.bf16 %v20100_v10, %v20099_v58 }
 0x302   :  { %20092 = vst [vmem:[#allocation827_spill] sm:$0xff] %v17721_v15 }
 0x303   :  { %12610 = dma.done.wait [#allocation3], 98304 }
 0x304   :  { %12611 = vsyncadd [#allocation3], 4294868992  ;;  %v20101_v3 = vld [vmem:[#allocation16_spill] sm:$0xff]  ;;  %v20102_v22 = vld [vmem:[#allocation19_spill] sm:$0xff]  ;;  %4823 = vmatprep.mubr.f32.mxu1 %v17457_v26  ;;  %11473 = vmatprep.subr.bf16.mxu0 %v11472_v4  ;;  %vm4564_vm4 = vcmask 162816   ;;  %vm12620_vm6 = vmmov 0  }
 0x305   :  { %v11476_v44 = vpack.c.bf16 %v20102_v22, %v20101_v3  ;;  %v20103_v15 = vld [vmem:[#allocation40_spill] sm:$0xff]  ;;  %v20104_v14 = vld [vmem:[#allocation43_spill] sm:$0xff]  ;;  %11505 = vmatprep.subr.bf16.mxu1 %v11504_v62  ;;  %11475 = vmatpush1.bf16.xpose.msra.mxu0 %v11474_v36  ;;  %v20106_v58 = vld [vmem:[#allocation18_spill] sm:$0xff]  ;;  %vm9909_vm7 = vcmask 517120   ;;  %vm9997_vm8 = vcmask 523264   ;;  %vm10071_vm9 = vcmask 58368  }
 0x306   :  { %v11508_v40 = vpack.c.bf16 %v20104_v14, %v20103_v15  ;;  %11507 = vmatpush1.bf16.xpose.msra.mxu1 %v11506_v29  ;;  %v20105_v24 = vld [vmem:[#allocation15_spill] sm:$0xff]  ;;  %v20108_v16 = vld [vmem:[#allocation42_spill] sm:$0xff]  ;;  %v20110_v6 = vld [vmem:[#allocation25_spill] sm:$0xff] }
 0x307   :  { %11477 = vmatprep.subr.bf16.mxu0 %v11476_v44  ;;  %v11478_v10 = vpack.c.bf16 %v20106_v58, %v20105_v24  ;;  %v20107_v33 = vld [vmem:[#allocation39_spill] sm:$0xff]  ;;  %v20109_v28 = vld [vmem:[#allocation22_spill] sm:$0xff]  ;;  %v20112_v27 = vld [vmem:[#allocation49_spill] sm:$0xff] }
 0x308   :  { %11509 = vmatprep.subr.bf16.mxu1 %v11508_v40  ;;  %v11510_v32 = vpack.c.bf16 %v20108_v16, %v20107_v33  ;;  %v11480_v22 = vpack.c.bf16 %v20110_v6, %v20109_v28  ;;  %v20111_v3 = vld [vmem:[#allocation46_spill] sm:$0xff]  ;;  %v20113_v26 = vld [vmem:[#allocation21_spill] sm:$0xff]  ;;  %v20114_v36 = vld [vmem:[#allocation24_spill] sm:$0xff] }
 0x309   :  { %v11512_v14 = vpack.c.bf16 %v20112_v27, %v20111_v3  ;;  %v11482_v44 = vpack.c.bf16 %v20114_v36, %v20113_v26  ;;  %v20115_v40 = vld [vmem:[#allocation45_spill] sm:$0xff]  ;;  %v20116_v29 = vld [vmem:[#allocation48_spill] sm:$0xff]  ;;  %v20118_v62 = vld [vmem:[#allocation31_spill] sm:$0xff]  ;;  %v12619_v27 = vmov 0.0|0.0  }
 0x30a   :  { %v11514_v15 = vpack.c.bf16 %v20116_v29, %v20115_v40  ;;  %v20117_v4 = vld [vmem:[#allocation28_spill] sm:$0xff]  ;;  %v20120_v33 = vld [vmem:[#allocation55_spill] sm:$0xff]  ;;  %v20126_v26 = vld [vmem:[#allocation14_spill] sm:$0xff] }
 0x30b   :  { %v11484_v24 = vpack.c.bf16 %v20118_v62, %v20117_v4  ;;  %v20119_v58 = vld [vmem:[#allocation52_spill] sm:$0xff]  ;;  %v20123_v6 = vld [vmem:[#allocation51_spill] sm:$0xff]  ;;  %v20128_v40 = vld [vmem:[#allocation38_spill] sm:$0xff] }
 0x30c   :  { %v11516_v16 = vpack.c.bf16 %v20120_v33, %v20119_v58  ;;  %vm17765_vm5 = vmpackc.low %vm4564_vm4, %vm4564_vm4  ;;  %v20132_v4 = vld [vmem:[#allocation20_spill] sm:$0xff]  ;;  %v20133_v62 = vld [vmem:[#allocation41_spill] sm:$0xff] }
 0x30d   :  { %11479 = vmatpush1.bf16.xpose.msra.mxu0 %v11478_v10  ;;  %v20121_v10 = vld [vmem:[#allocation27_spill] sm:$0xff] }
 0x30e   :  { %11511 = vmatpush1.bf16.xpose.msra.mxu1 %v11510_v32  ;;  %11481 = vmatprep.subr.bf16.mxu0 %v11480_v22  ;;  %v20122_v32 = vld [vmem:[#allocation30_spill] sm:$0xff]  ;;  %v20135_v33 = vld [vmem:[#allocation23_spill] sm:$0xff] }
 0x30f   :  { %11513 = vmatprep.subr.bf16.mxu1 %v11512_v14  ;;  %v11486_v28 = vpack.c.bf16 %v20122_v32, %v20121_v10  ;;  %v20124_v22 = vld [vmem:[#allocation54_spill] sm:$0xff]  ;;  %v20125_v14 = vld [vmem:[#allocation11_spill] sm:$0xff] }
 0x310   :  { %v11518_v3 = vpack.c.bf16 %v20124_v22, %v20123_v6  ;;  %v11489_v36 = vpack.c.bf16 %v20126_v26, %v20125_v14  ;;  %v20137_v32 = vld [vmem:[#allocation47_spill] sm:$0xff]  ;;  %v20139_v22 = vld [vmem:[#allocation29_spill] sm:$0xff] }
 0x311   :  { %v20141_v26 = vld [vmem:[#allocation53_spill] sm:$0xff] }
 0x315   :  { %11483 = vmatpush1.bf16.xpose.msra.mxu0 %v11482_v44  ;;  %v20127_v44 = vld [vmem:[#allocation35_spill] sm:$0xff] }
 0x316   :  { %11515 = vmatpush1.bf16.xpose.msra.mxu1 %v11514_v15  ;;  %11485 = vmatprep.subr.bf16.mxu0 %v11484_v24  ;;  %v11521_v29 = vpack.c.bf16 %v20128_v40, %v20127_v44  ;;  %v20134_v24 = vld [vmem:[#allocation44_spill] sm:$0xff]  ;;  %v20143_v40 = vld [vmem:[#allocation58_spill] sm:$0xff] }
 0x317   :  { %11517 = vmatprep.subr.bf16.mxu1 %v11516_v16  ;;  %v11525_v58 = vpack.c.bf16 %v20134_v24, %v20133_v62  ;;  %v20136_v16 = vld [vmem:[#allocation26_spill] sm:$0xff]  ;;  %v20147_v24 = vld [vmem:[#allocation57_spill] sm:$0xff] }
 0x318   :  { %v11497_v10 = vpack.c.bf16 %v20136_v16, %v20135_v33  ;;  %v20149_v16 = vld [vmem:[#allocation81_spill] sm:$0xff] }
 0x31d   :  { %11487 = vmatpush1.bf16.xpose.msra.mxu0 %v11486_v28  ;;  %v20138_v28 = vld [vmem:[#allocation50_spill] sm:$0xff] }
 0x31e   :  { %11519 = vmatpush1.bf16.xpose.msra.mxu1 %v11518_v3  ;;  %11488 = vmatprep.subr.bf16.mxu0 %v12619_v27  ;;  %v11529_v6 = vpack.c.bf16 %v20138_v28, %v20137_v32  ;;  %v20140_v3 = vld [vmem:[#allocation32_spill] sm:$0xff] }
 0x31f   :  { %11520 = vmatprep.subr.bf16.mxu1 %v12619_v27  ;;  %v11501_v14 = vpack.c.bf16 %v20140_v3, %v20139_v22  ;;  %v20151_v28 = vld [vmem:[#allocation64_spill] sm:$0xff] }
 0x320   :  { %v20153_v3 = vld [vmem:[#allocation88_spill] sm:$0xff] }
 0x324   :  { %4657 = vmatmul.mubr.f32.vlgmr.msra.gmra.mrb[44].mxu0 %v17165_v21  ;;  %v20131_v21 = vld [vmem:[#allocation17_spill] sm:$0xff] }
 0x325   :  { %4824 = vmatmul.mubr.f32.vlgmr.msra.gmra.mrb[52].mxu1 %v17182_v25  ;;  %11491 = vmatpush3.bf16.xpose.msk.msra.mxu0 %vm17765_vm5, %v11489_v36  ;;  %v11493_v25 = vpack.c.bf16 %v20132_v4, %v20131_v21  ;;  %v20142_v36 = vld [vmem:[#allocation56_spill] sm:$0xff]  ;;  %v20145_v4 = vld [vmem:[#allocation82_spill] sm:$0xff] }
 0x326   :  { %11523 = vmatpush3.bf16.xpose.msk.msra.mxu1 %vm17765_vm5, %v11521_v29  ;;  %11492 = vmatprep.subr.bf16.mxu0 %v12619_v27  ;;  %v11533_v44 = vpack.c.bf16 %v20142_v36, %v20141_v26  ;;  %v20144_v29 = vld [vmem:[#allocation61_spill] sm:$0xff]  ;;  %v20154_v26 = vld [vmem:[#allocation91_spill] sm:$0xff] }
 0x327   :  { %11524 = vmatprep.subr.bf16.mxu1 %v12619_v27  ;;  %10789 = vmatprep.mubr.msk.f32.mxu0 %vm12620_vm6, %v19997_v53  ;;  %v11536_v21 = vpack.c.bf16 %v20144_v29, %v20143_v40  ;;  %v11572_v36 = vpack.c.bf16 %v20154_v26, %v20153_v3  ;;  %v20157_v29 = vld [vmem:[#allocation87_spill] sm:$0xff]  ;;  %v20169_v3 = vld [vmem:[#allocation100_spill] sm:$0xff] }
 0x328   :  { %10808 = vmatprep.mubr.msk.f32.mxu1 %vm12620_vm6, %v19997_v53  ;;  %v20170_v26 = vld [vmem:[#allocation103_spill] sm:$0xff] }
 0x32d   :  { %11495 = vmatpush3.bf16.xpose.msk.msra.mxu0 %vm17765_vm5, %v11493_v25  ;;  %v20146_v25 = vld [vmem:[#allocation85_spill] sm:$0xff] }
 0x32e   :  { %11527 = vmatpush3.bf16.xpose.msk.msra.mxu1 %vm17765_vm5, %v11525_v58  ;;  %11496 = vmatprep.subr.bf16.mxu0 %v12619_v27  ;;  %v11568_v62 = vpack.c.bf16 %v20146_v25, %v20145_v4  ;;  %v20148_v58 = vld [vmem:[#allocation60_spill] sm:$0xff]  ;;  %v20159_v25 = vld [vmem:[#allocation70_spill] sm:$0xff] }
 0x32f   :  { %11528 = vmatprep.subr.bf16.mxu1 %v12619_v27  ;;  %v11538_v33 = vpack.c.bf16 %v20148_v58, %v20147_v24  ;;  %v20161_v24 = vld [vmem:[#allocation94_spill] sm:$0xff]  ;;  %v20162_v58 = vld [vmem:[#allocation97_spill] sm:$0xff] }
 0x335   :  { %11499 = vmatpush3.bf16.xpose.msk.msra.mxu0 %vm17765_vm5, %v11497_v10  ;;  %v20150_v10 = vld [vmem:[#allocation84_spill] sm:$0xff] }
 0x336   :  { %11531 = vmatpush3.bf16.xpose.msk.msra.mxu1 %vm17765_vm5, %v11529_v6  ;;  %11500 = vmatprep.subr.bf16.mxu0 %v12619_v27  ;;  %v11570_v32 = vpack.c.bf16 %v20150_v10, %v20149_v16  ;;  %v20152_v6 = vld [vmem:[#allocation67_spill] sm:$0xff]  ;;  %v20166_v10 = vld [vmem:[#allocation96_spill] sm:$0xff] }
 0x337   :  { %11532 = vmatprep.subr.bf16.mxu1 %v12619_v27  ;;  %v11540_v22 = vpack.c.bf16 %v20152_v6, %v20151_v28  ;;  %v20167_v28 = vld [vmem:[#allocation76_spill] sm:$0xff]  ;;  %v20168_v6 = vld [vmem:[#allocation79_spill] sm:$0xff] }
 0x33d   :  { %11503 = vmatpush3.bf16.xpose.msk.msra.mxu0 %vm17765_vm5, %v11501_v14  ;;  %v20155_v14 = vld [vmem:[#allocation63_spill] sm:$0xff] }
 0x33e   :  { %11535 = vmatpush3.bf16.xpose.msk.msra.mxu1 %vm17765_vm5, %v11533_v44  ;;  %11537 = vmatprep.subr.bf16.mxu0 %v11536_v21  ;;  %v20156_v44 = vld [vmem:[#allocation66_spill] sm:$0xff] }
 0x33f   :  { %11569 = vmatprep.subr.bf16.mxu1 %v11568_v62  ;;  %v11542_v40 = vpack.c.bf16 %v20156_v44, %v20155_v14  ;;  %v20158_v21 = vld [vmem:[#allocation90_spill] sm:$0xff]  ;;  %v20160_v62 = vld [vmem:[#allocation73_spill] sm:$0xff]  ;;  %v20171_v14 = vld [vmem:[#allocation75_spill] sm:$0xff] }
 0x340   :  { %v11574_v4 = vpack.c.bf16 %v20158_v21, %v20157_v29  ;;  %v20172_v44 = vld [vmem:[#allocation78_spill] sm:$0xff]  ;;  %v20173_v29 = vld [vmem:[#allocation99_spill] sm:$0xff] }
 0x341   :  { %v20174_v21 = vld [vmem:[#allocation102_spill] sm:$0xff] }
 0x344   :  { %10790 = vmatmul.mubr.msk.f32.vlgmr.msra.gmra.mrb[44].mxu0 %vm4564_vm4, %v17442_v31  ;;  %v11544_v31 = vpack.c.bf16 %v20160_v62, %v20159_v25  ;;  %v20175_v25 = vld [vmem:[#allocation59_spill] sm:$0xff]  ;;  %v20176_v62 = vld [vmem:[#allocation62_spill] sm:$0xff] }
 0x345   :  { %10809 = vmatmul.mubr.msk.f32.vlgmr.msra.gmra.mrb[52].mxu1 %vm4564_vm4, %v17471_v63  ;;  %11539 = vmatpush1.bf16.xpose.msra.mxu0 %v11538_v33  ;;  %v11576_v63 = vpack.c.bf16 %v20162_v58, %v20161_v24  ;;  %v20163_v33 = vld [vmem:[#allocation69_spill] sm:$0xff]  ;;  %v20177_v24 = vld [vmem:[#allocation83_spill] sm:$0xff]  ;;  %v20178_v58 = vld [vmem:[#allocation86_spill] sm:$0xff] }
 0x346   :  { %11571 = vmatpush1.bf16.xpose.msra.mxu1 %v11570_v32  ;;  %11541 = vmatprep.subr.bf16.mxu0 %v11540_v22  ;;  %v11548_v22 = vpack.c.bf16 %v20168_v6, %v20167_v28  ;;  %v20184_v28 = vld [vmem:[#allocation92_spill] sm:$0xff] }
 0x347   :  { %11573 = vmatprep.subr.bf16.mxu1 %v11572_v36  ;;  %4990 = vmatprep.mubr.f32.mxu0 %v17437_v7  ;;  %v20164_v7 = vld [vmem:[#allocation72_spill] sm:$0xff]  ;;  %v11580_v36 = vpack.c.bf16 %v20170_v26, %v20169_v3  ;;  %v20186_v3 = vld [vmem:[#allocation74_spill] sm:$0xff] }
 0x348   :  { %5157 = vmatprep.mubr.f32.mxu1 %v17461_v19  ;;  %v11546_v16 = vpack.c.bf16 %v20164_v7, %v20163_v33  ;;  %v20165_v19 = vld [vmem:[#allocation93_spill] sm:$0xff]  ;;  %v20179_v33 = vld [vmem:[#allocation788_spill] sm:$0xff]  ;;  %v20180_v7 = vld [vmem:[#allocation791_spill] sm:$0xff] }
 0x349   :  { %v11578_v32 = vpack.c.bf16 %v20166_v10, %v20165_v19  ;;  %v20182_v19 = vld [vmem:[#allocation68_spill] sm:$0xff] }
 0x34d   :  { %11543 = vmatpush1.bf16.xpose.msra.mxu0 %v11542_v40  ;;  %v11550_v40 = vpack.c.bf16 %v20172_v44, %v20171_v14  ;;  %v20188_v14 = vld [vmem:[#allocation98_spill] sm:$0xff] }
 0x34e   :  { %11575 = vmatpush1.bf16.xpose.msra.mxu1 %v11574_v4  ;;  %11545 = vmatprep.subr.bf16.mxu0 %v11544_v31  ;;  %v11582_v4 = vpack.c.bf16 %v20174_v21, %v20173_v29  ;;  %v11553_v31 = vpack.c.bf16 %v20176_v62, %v20175_v25  ;;  %v20190_v29 = vld [vmem:[#allocation80_spill] sm:$0xff] }
 0x34f   :  { %11577 = vmatprep.subr.bf16.mxu1 %v11576_v63  ;;  %v11585_v63 = vpack.c.bf16 %v20178_v58, %v20177_v24  ;;  %v20192_v25 = vld [vmem:[#allocation104_spill] sm:$0xff]  ;;  %v20194_v24 = vld [vmem:[#allocation109_spill] sm:$0xff] }
 0x355   :  { %11547 = vmatpush1.bf16.xpose.msra.mxu0 %v11546_v16  ;;  %v20181_v16 = vld [vmem:[#allocation65_spill] sm:$0xff] }
 0x356   :  { %11579 = vmatpush1.bf16.xpose.msra.mxu1 %v11578_v32  ;;  %11549 = vmatprep.subr.bf16.mxu0 %v11548_v22  ;;  %v11557_v10 = vpack.c.bf16 %v20182_v19, %v20181_v16  ;;  %v20183_v32 = vld [vmem:[#allocation89_spill] sm:$0xff]  ;;  %v20185_v22 = vld [vmem:[#allocation71_spill] sm:$0xff]  ;;  %v20198_v19 = vld [vmem:[#allocation108_spill] sm:$0xff] }
 0x357   :  { %11581 = vmatprep.subr.bf16.mxu1 %v11580_v36  ;;  %v11589_v6 = vpack.c.bf16 %v20184_v28, %v20183_v32  ;;  %v11561_v26 = vpack.c.bf16 %v20186_v3, %v20185_v22  ;;  %v20187_v36 = vld [vmem:[#allocation95_spill] sm:$0xff]  ;;  %v20197_v16 = vld [vmem:[#allocation105_spill] sm:$0xff]  ;;  %v20200_v28 = vld [vmem:[#allocation132_spill] sm:$0xff] }
 0x358   :  { %v11593_v44 = vpack.c.bf16 %v20188_v14, %v20187_v36  ;;  %v20199_v32 = vld [vmem:[#allocation129_spill] sm:$0xff]  ;;  %v20201_v22 = vld [vmem:[#allocation112_spill] sm:$0xff]  ;;  %v20202_v3 = vld [vmem:[#allocation115_spill] sm:$0xff] }
 0x359   :  { %v20203_v36 = vld [vmem:[#allocation136_spill] sm:$0xff]  ;;  %v20204_v14 = vld [vmem:[#allocation139_spill] sm:$0xff] }
 0x35d   :  { %11551 = vmatpush1.bf16.xpose.msra.mxu0 %v11550_v40  ;;  %v20189_v40 = vld [vmem:[#allocation77_spill] sm:$0xff] }
 0x35e   :  { %11583 = vmatpush1.bf16.xpose.msra.mxu1 %v11582_v4  ;;  %11552 = vmatprep.subr.bf16.mxu0 %v12619_v27  ;;  %v11565_v21 = vpack.c.bf16 %v20190_v29, %v20189_v40  ;;  %v20191_v4 = vld [vmem:[#allocation101_spill] sm:$0xff]  ;;  %v20205_v40 = vld [vmem:[#allocation111_spill] sm:$0xff]  ;;  %v20206_v29 = vld [vmem:[#allocation114_spill] sm:$0xff] }
 0x35f   :  { %11584 = vmatprep.subr.bf16.mxu1 %v12619_v27  ;;  %v11597_v62 = vpack.c.bf16 %v20192_v25, %v20191_v4  ;;  %v20207_v4 = vld [vmem:[#allocation135_spill] sm:$0xff]  ;;  %v20208_v25 = vld [vmem:[#allocation138_spill] sm:$0xff] }
 0x364   :  { %4991 = vmatmul.mubr.f32.vlgmr.msra.gmra.mrb[46].mxu0 %v20179_v33  ;;  %v20196_v33 = vld [vmem:[#allocation133_spill] sm:$0xff] }
 0x365   :  { %5158 = vmatmul.mubr.f32.vlgmr.msra.gmra.mrb[54].mxu1 %v20180_v7  ;;  %11555 = vmatpush3.bf16.xpose.msk.msra.mxu0 %vm17765_vm5, %v11553_v31  ;;  %v20193_v31 = vld [vmem:[#allocation106_spill] sm:$0xff] }
 0x366   :  { %11587 = vmatpush3.bf16.xpose.msk.msra.mxu1 %vm17765_vm5, %v11585_v63  ;;  %11556 = vmatprep.subr.bf16.mxu0 %v12619_v27  ;;  %v11600_v58 = vpack.c.bf16 %v20194_v24, %v20193_v31  ;;  %v20195_v63 = vld [vmem:[#allocation130_spill] sm:$0xff]  ;;  %v20210_v24 = vld [vmem:[#allocation121_spill] sm:$0xff] }
 0x367   :  { %11588 = vmatprep.subr.bf16.mxu1 %v12619_v27  ;;  %10827 = vmatprep.mubr.msk.f32.mxu0 %vm12620_vm6, %v19997_v53  ;;  %v11632_v7 = vpack.c.bf16 %v20196_v33, %v20195_v63  ;;  %v20209_v31 = vld [vmem:[#allocation118_spill] sm:$0xff]  ;;  %v20212_v63 = vld [vmem:[#allocation145_spill] sm:$0xff] }
 0x368   :  { %10846 = vmatprep.mubr.msk.f32.mxu1 %vm12620_vm6, %v19997_v53  ;;  %v20213_v33 = vld [vmem:[#allocation117_spill] sm:$0xff] }
 0x36d   :  { %11559 = vmatpush3.bf16.xpose.msk.msra.mxu0 %vm17765_vm5, %v11557_v10  ;;  %v11602_v10 = vpack.c.bf16 %v20198_v19, %v20197_v16  ;;  %v20216_v16 = vld [vmem:[#allocation144_spill] sm:$0xff] }
 0x36e   :  { %11591 = vmatpush3.bf16.xpose.msk.msra.mxu1 %vm17765_vm5, %v11589_v6  ;;  %11560 = vmatprep.subr.bf16.mxu0 %v12619_v27  ;;  %v11634_v6 = vpack.c.bf16 %v20200_v28, %v20199_v32  ;;  %v20218_v32 = vld [vmem:[#allocation127_spill] sm:$0xff] }
 0x36f   :  { %11592 = vmatprep.subr.bf16.mxu1 %v12619_v27 }
 0x375   :  { %11563 = vmatpush3.bf16.xpose.msk.msra.mxu0 %vm17765_vm5, %v11561_v26  ;;  %v11604_v26 = vpack.c.bf16 %v20202_v3, %v20201_v22  ;;  %v20220_v22 = vld [vmem:[#allocation151_spill] sm:$0xff] }
 0x376   :  { %11595 = vmatpush3.bf16.xpose.msk.msra.mxu1 %vm17765_vm5, %v11593_v44  ;;  %11564 = vmatprep.subr.bf16.mxu0 %v12619_v27  ;;  %v11636_v44 = vpack.c.bf16 %v20204_v14, %v20203_v36  ;;  %v20222_v36 = vld [vmem:[#allocation126_spill] sm:$0xff] }
 0x377   :  { %11596 = vmatprep.subr.bf16.mxu1 %v12619_v27 }
 0x37d   :  { %11567 = vmatpush3.bf16.xpose.msk.msra.mxu0 %vm17765_vm5, %v11565_v21  ;;  %v11606_v21 = vpack.c.bf16 %v20206_v29, %v20205_v40  ;;  %v20224_v40 = vld [vmem:[#allocation150_spill] sm:$0xff] }
 0x37e   :  { %11599 = vmatpush3.bf16.xpose.msk.msra.mxu1 %vm17765_vm5, %v11597_v62  ;;  %11601 = vmatprep.subr.bf16.mxu0 %v11600_v58  ;;  %v11638_v62 = vpack.c.bf16 %v20208_v25, %v20207_v4  ;;  %v20211_v58 = vld [vmem:[#allocation142_spill] sm:$0xff] }
 0x37f   :  { %11633 = vmatprep.subr.bf16.mxu1 %v11632_v7  ;;  %v20226_v4 = vld [vmem:[#allocation110_spill] sm:$0xff] }
 0x384   :  { %10828 = vmatmul.mubr.msk.f32.vlgmr.msra.gmra.mrb[46].mxu0 %vm4564_vm4, %v17445_v61  ;;  %v11608_v61 = vpack.c.bf16 %v20210_v24, %v20209_v31  ;;  %v20228_v31 = vld [vmem:[#allocation134_spill] sm:$0xff] }
 0x385   :  { %10847 = vmatmul.mubr.msk.f32.vlgmr.msra.gmra.mrb[54].mxu1 %vm4564_vm4, %v17475_v38  ;;  %11603 = vmatpush1.bf16.xpose.msra.mxu0 %v11602_v10  ;;  %v11640_v38 = vpack.c.bf16 %v20212_v63, %v20211_v58  ;;  %v20217_v10 = vld [vmem:[#allocation124_spill] sm:$0xff]  ;;  %v20231_v63 = vld [vmem:[#allocation113_spill] sm:$0xff] }
 0x386   :  { %11635 = vmatpush1.bf16.xpose.msra.mxu1 %v11634_v6  ;;  %11605 = vmatprep.subr.bf16.mxu0 %v11604_v26  ;;  %v11612_v28 = vpack.c.bf16 %v20218_v32, %v20217_v10  ;;  %v20219_v6 = vld [vmem:[#allocation148_spill] sm:$0xff]  ;;  %v20221_v26 = vld [vmem:[#allocation123_spill] sm:$0xff] }
 0x387   :  { %11637 = vmatprep.subr.bf16.mxu1 %v11636_v44  ;;  %5324 = vmatprep.mubr.f32.mxu0 %v17450_v41  ;;  %v20214_v41 = vld [vmem:[#allocation120_spill] sm:$0xff]  ;;  %v11644_v3 = vpack.c.bf16 %v20220_v22, %v20219_v6  ;;  %v11614_v14 = vpack.c.bf16 %v20222_v36, %v20221_v26  ;;  %v20223_v44 = vld [vmem:[#allocation147_spill] sm:$0xff]  ;;  %v20239_v22 = vld [vmem:[#allocation125_spill] sm:$0xff] }
 0x388   :  { %5491 = vmatprep.mubr.f32.mxu1 %v17479_v46  ;;  %v11610_v7 = vpack.c.bf16 %v20214_v41, %v20213_v33  ;;  %v20215_v46 = vld [vmem:[#allocation141_spill] sm:$0xff]  ;;  %v11646_v29 = vpack.c.bf16 %v20224_v40, %v20223_v44  ;;  %v20230_v58 = vld [vmem:[#allocation792_spill] sm:$0xff]  ;;  %v20237_v32 = vld [vmem:[#allocation143_spill] sm:$0xff] }
 0x389   :  { %v11642_v19 = vpack.c.bf16 %v20216_v16, %v20215_v46  ;;  %v20233_v41 = vld [vmem:[#allocation137_spill] sm:$0xff]  ;;  %v20235_v16 = vld [vmem:[#allocation119_spill] sm:$0xff]  ;;  %v20243_v40 = vld [vmem:[#allocation154_spill] sm:$0xff] }
 0x38a   :  { %v20241_v36 = vld [vmem:[#allocation149_spill] sm:$0xff] }
 0x38d   :  { %11607 = vmatpush1.bf16.xpose.msra.mxu0 %v11606_v21  ;;  %v20225_v21 = vld [vmem:[#allocation107_spill] sm:$0xff] }
 0x38e   :  { %11639 = vmatpush1.bf16.xpose.msra.mxu1 %v11638_v62  ;;  %11609 = vmatprep.subr.bf16.mxu0 %v11608_v61  ;;  %v11617_v25 = vpack.c.bf16 %v20226_v4, %v20225_v21  ;;  %v20227_v62 = vld [vmem:[#allocation131_spill] sm:$0xff]  ;;  %v20229_v61 = vld [vmem:[#allocation789_spill] sm:$0xff]  ;;  %v20245_v4 = vld [vmem:[#allocation178_spill] sm:$0xff] }
 0x38f   :  { %11641 = vmatprep.subr.bf16.mxu1 %v11640_v38  ;;  %v11649_v24 = vpack.c.bf16 %v20228_v31, %v20227_v62  ;;  %v20232_v38 = vld [vmem:[#allocation116_spill] sm:$0xff]  ;;  %v20247_v31 = vld [vmem:[#allocation153_spill] sm:$0xff] }
 0x390   :  { %v11621_v33 = vpack.c.bf16 %v20232_v38, %v20231_v63  ;;  %v20250_v63 = vld [vmem:[#allocation180_spill] sm:$0xff] }
 0x395   :  { %11611 = vmatpush1.bf16.xpose.msra.mxu0 %v11610_v7  ;;  %v20234_v7 = vld [vmem:[#allocation140_spill] sm:$0xff] }
 0x396   :  { %11643 = vmatpush1.bf16.xpose.msra.mxu1 %v11642_v19  ;;  %11613 = vmatprep.subr.bf16.mxu0 %v11612_v28  ;;  %v11653_v46 = vpack.c.bf16 %v20234_v7, %v20233_v41  ;;  %v20236_v19 = vld [vmem:[#allocation122_spill] sm:$0xff]  ;;  %v20252_v41 = vld [vmem:[#allocation163_spill] sm:$0xff] }
 0x397   :  { %11645 = vmatprep.subr.bf16.mxu1 %v11644_v3  ;;  %v11625_v10 = vpack.c.bf16 %v20236_v19, %v20235_v16  ;;  %v20238_v28 = vld [vmem:[#allocation146_spill] sm:$0xff]  ;;  %v20240_v3 = vld [vmem:[#allocation128_spill] sm:$0xff]  ;;  %v20254_v16 = vld [vmem:[#allocation187_spill] sm:$0xff] }
 0x398   :  { %v11657_v6 = vpack.c.bf16 %v20238_v28, %v20237_v32  ;;  %v11629_v26 = vpack.c.bf16 %v20240_v3, %v20239_v22  ;;  %v20256_v32 = vld [vmem:[#allocation162_spill] sm:$0xff] }
 0x399   :  { %v20258_v22 = vld [vmem:[#allocation186_spill] sm:$0xff] }
 0x39d   :  { %11615 = vmatpush1.bf16.xpose.msra.mxu0 %v11614_v14  ;;  %v20242_v14 = vld [vmem:[#allocation152_spill] sm:$0xff] }
 0x39e   :  { %11647 = vmatpush1.bf16.xpose.msra.mxu1 %v11646_v29  ;;  %11616 = vmatprep.subr.bf16.mxu0 %v12619_v27  ;;  %v11661_v44 = vpack.c.bf16 %v20242_v14, %v20241_v36  ;;  %v20244_v29 = vld [vmem:[#allocation157_spill] sm:$0xff]  ;;  %v20261_v14 = vld [vmem:[#allocation190_spill] sm:$0xff] }
 0x39f   :  { %11648 = vmatprep.subr.bf16.mxu1 %v12619_v27  ;;  %v11664_v21 = vpack.c.bf16 %v20244_v29, %v20243_v40  ;;  %v20260_v36 = vld [vmem:[#allocation169_spill] sm:$0xff] }
 0x3a0   :  { %v20263_v40 = vld [vmem:[#allocation165_spill] sm:$0xff] }
 0x3a4   :  { %5325 = vmatmul.mubr.f32.vlgmr.msra.gmra.mrb[48].mxu0 %v20229_v61 }
 0x3a5   :  { %5492 = vmatmul.mubr.f32.vlgmr.msra.gmra.mrb[56].mxu1 %v20230_v58  ;;  %11619 = vmatpush3.bf16.xpose.msk.msra.mxu0 %vm17765_vm5, %v11617_v25  ;;  %v20246_v25 = vld [vmem:[#allocation181_spill] sm:$0xff] }
 0x3a6   :  { %11651 = vmatpush3.bf16.xpose.msk.msra.mxu1 %vm17765_vm5, %v11649_v24  ;;  %11620 = vmatprep.subr.bf16.mxu0 %v12619_v27  ;;  %v11696_v62 = vpack.c.bf16 %v20246_v25, %v20245_v4  ;;  %v20248_v24 = vld [vmem:[#allocation156_spill] sm:$0xff]  ;;  %v20249_v58 = vld [vmem:[#allocation177_spill] sm:$0xff] }
 0x3a7   :  { %11652 = vmatprep.subr.bf16.mxu1 %v12619_v27  ;;  %10865 = vmatprep.mubr.msk.f32.mxu0 %vm12620_vm6, %v19997_v53  ;;  %v11666_v61 = vpack.c.bf16 %v20248_v24, %v20247_v31  ;;  %v11698_v38 = vpack.c.bf16 %v20250_v63, %v20249_v58  ;;  %v20267_v25 = vld [vmem:[#allocation172_spill] sm:$0xff]  ;;  %v20271_v63 = vld [vmem:[#allocation171_spill] sm:$0xff] }
 0x3a8   :  { %10884 = vmatprep.mubr.msk.f32.mxu1 %vm12620_vm6, %v19997_v53  ;;  %v20269_v24 = vld [vmem:[#allocation196_spill] sm:$0xff] }
 0x3ad   :  { %11623 = vmatpush3.bf16.xpose.msk.msra.mxu0 %vm17765_vm5, %v11621_v33  ;;  %v20251_v33 = vld [vmem:[#allocation160_spill] sm:$0xff] }
 0x3ae   :  { %11655 = vmatpush3.bf16.xpose.msk.msra.mxu1 %vm17765_vm5, %v11653_v46  ;;  %11624 = vmatprep.subr.bf16.mxu0 %v12619_v27  ;;  %v11668_v7 = vpack.c.bf16 %v20252_v41, %v20251_v33  ;;  %v20253_v46 = vld [vmem:[#allocation184_spill] sm:$0xff]  ;;  %v20273_v41 = vld [vmem:[#allocation195_spill] sm:$0xff] }
 0x3af   :  { %11656 = vmatprep.subr.bf16.mxu1 %v12619_v27  ;;  %v11700_v19 = vpack.c.bf16 %v20254_v16, %v20253_v46  ;;  %v20275_v16 = vld [vmem:[#allocation155_spill] sm:$0xff] }
 0x3b5   :  { %11627 = vmatpush3.bf16.xpose.msk.msra.mxu0 %vm17765_vm5, %v11625_v10  ;;  %v20255_v10 = vld [vmem:[#allocation159_spill] sm:$0xff] }
 0x3b6   :  { %11659 = vmatpush3.bf16.xpose.msk.msra.mxu1 %vm17765_vm5, %v11657_v6  ;;  %11628 = vmatprep.subr.bf16.mxu0 %v12619_v27  ;;  %v11670_v28 = vpack.c.bf16 %v20256_v32, %v20255_v10  ;;  %v20257_v6 = vld [vmem:[#allocation183_spill] sm:$0xff] }
 0x3b7   :  { %11660 = vmatprep.subr.bf16.mxu1 %v12619_v27  ;;  %v11702_v3 = vpack.c.bf16 %v20258_v22, %v20257_v6  ;;  %v20277_v32 = vld [vmem:[#allocation179_spill] sm:$0xff]  ;;  %v20279_v22 = vld [vmem:[#allocation790_spill] sm:$0xff] }
 0x3bd   :  { %11631 = vmatpush3.bf16.xpose.msk.msra.mxu0 %vm17765_vm5, %v11629_v26  ;;  %v20259_v26 = vld [vmem:[#allocation166_spill] sm:$0xff] }
 0x3be   :  { %11663 = vmatpush3.bf16.xpose.msk.msra.mxu1 %vm17765_vm5, %v11661_v44  ;;  %11665 = vmatprep.subr.bf16.mxu0 %v11664_v21  ;;  %v20262_v44 = vld [vmem:[#allocation193_spill] sm:$0xff]  ;;  %v20266_v21 = vld [vmem:[#allocation192_spill] sm:$0xff] }
 0x3bf   :  { %11697 = vmatprep.subr.bf16.mxu1 %v11696_v62  ;;  %v20268_v62 = vld [vmem:[#allocation175_spill] sm:$0xff] }
 0x3c0   :  { %v11676_v31 = vpack.c.bf16 %v20268_v62, %v20267_v25  ;;  %v20289_v25 = vld [vmem:[#allocation173_spill] sm:$0xff]  ;;  %v20290_v62 = vld [vmem:[#allocation176_spill] sm:$0xff] }
 0x3c4   :  { %10866 = vmatmul.mubr.msk.f32.vlgmr.msra.gmra.mrb[48].mxu0 %vm4564_vm4, %v17464_v17  ;;  %v11672_v17 = vpack.c.bf16 %v20260_v36, %v20259_v26  ;;  %v20281_v26 = vld [vmem:[#allocation161_spill] sm:$0xff]  ;;  %v20282_v36 = vld [vmem:[#allocation164_spill] sm:$0xff] }
 0x3c5   :  { %10885 = vmatmul.mubr.msk.f32.vlgmr.msra.gmra.mrb[56].mxu1 %vm4564_vm4, %v17489_v1  ;;  %11667 = vmatpush1.bf16.xpose.msra.mxu0 %v11666_v61  ;;  %v11704_v1 = vpack.c.bf16 %v20262_v44, %v20261_v14  ;;  %v20270_v61 = vld [vmem:[#allocation199_spill] sm:$0xff]  ;;  %v20283_v14 = vld [vmem:[#allocation185_spill] sm:$0xff]  ;;  %v20284_v44 = vld [vmem:[#allocation188_spill] sm:$0xff] }
 0x3c6   :  { %11699 = vmatpush1.bf16.xpose.msra.mxu1 %v11698_v38  ;;  %11669 = vmatprep.subr.bf16.mxu0 %v11668_v7  ;;  %v11708_v58 = vpack.c.bf16 %v20270_v61, %v20269_v24  ;;  %v20272_v38 = vld [vmem:[#allocation174_spill] sm:$0xff]  ;;  %v20291_v24 = vld [vmem:[#allocation197_spill] sm:$0xff]  ;;  %v20292_v61 = vld [vmem:[#allocation200_spill] sm:$0xff] }
 0x3c7   :  { %11701 = vmatprep.subr.bf16.mxu1 %v11700_v19  ;;  %5658 = vmatprep.mubr.f32.mxu0 %v17453_v42  ;;  %v20264_v42 = vld [vmem:[#allocation168_spill] sm:$0xff]  ;;  %v11678_v33 = vpack.c.bf16 %v20272_v38, %v20271_v63  ;;  %v20274_v7 = vld [vmem:[#allocation198_spill] sm:$0xff]  ;;  %v20294_v38 = vld [vmem:[#allocation205_spill] sm:$0xff] }
 0x3c8   :  { %5825 = vmatprep.mubr.f32.mxu1 %v17483_v35  ;;  %v11674_v29 = vpack.c.bf16 %v20264_v42, %v20263_v40  ;;  %v20265_v35 = vld [vmem:[#allocation189_spill] sm:$0xff]  ;;  %v11710_v46 = vpack.c.bf16 %v20274_v7, %v20273_v41  ;;  %v20276_v19 = vld [vmem:[#allocation158_spill] sm:$0xff]  ;;  %v20285_v40 = vld [vmem:[#allocation167_spill] sm:$0xff] }
 0x3c9   :  { %v11706_v4 = vpack.c.bf16 %v20266_v21, %v20265_v35  ;;  %v11681_v10 = vpack.c.bf16 %v20276_v19, %v20275_v16  ;;  %v20286_v42 = vld [vmem:[#allocation170_spill] sm:$0xff]  ;;  %v20287_v35 = vld [vmem:[#allocation191_spill] sm:$0xff]  ;;  %v20296_v7 = vld [vmem:[#allocation229_spill] sm:$0xff] }
 0x3ca   :  { %v20288_v21 = vld [vmem:[#allocation194_spill] sm:$0xff]  ;;  %v20297_v16 = vld [vmem:[#allocation201_spill] sm:$0xff]  ;;  %v20298_v19 = vld [vmem:[#allocation204_spill] sm:$0xff] }
 0x3cb   :  { %v20293_v63 = vld [vmem:[#allocation202_spill] sm:$0xff] }
 0x3cc   :  { %v20295_v41 = vld [vmem:[#allocation226_spill] sm:$0xff] }
 0x3cd   :  { %11671 = vmatpush1.bf16.xpose.msra.mxu0 %v11670_v28  ;;  %v20278_v28 = vld [vmem:[#allocation182_spill] sm:$0xff] }
 0x3ce   :  { %11703 = vmatpush1.bf16.xpose.msra.mxu1 %v11702_v3  ;;  %11673 = vmatprep.subr.bf16.mxu0 %v11672_v17  ;;  %v11713_v6 = vpack.c.bf16 %v20278_v28, %v20277_v32  ;;  %v20280_v3 = vld [vmem:[#allocation793_spill] sm:$0xff]  ;;  %v11685_v17 = vpack.c.bf16 %v20282_v36, %v20281_v26  ;;  %v20300_v28 = vld [vmem:[#allocation228_spill] sm:$0xff] }
 0x3cf   :  { %11705 = vmatprep.subr.bf16.mxu1 %v11704_v1  ;;  %v11717_v1 = vpack.c.bf16 %v20284_v44, %v20283_v14  ;;  %v20299_v32 = vld [vmem:[#allocation225_spill] sm:$0xff]  ;;  %v20303_v36 = vld [vmem:[#allocation232_spill] sm:$0xff]  ;;  %v20305_v44 = vld [vmem:[#allocation207_spill] sm:$0xff] }
 0x3d5   :  { %11675 = vmatpush1.bf16.xpose.msra.mxu0 %v11674_v29  ;;  %v11689_v29 = vpack.c.bf16 %v20286_v42, %v20285_v40  ;;  %v20307_v42 = vld [vmem:[#allocation231_spill] sm:$0xff] }
 0x3d6   :  { %11707 = vmatpush1.bf16.xpose.msra.mxu1 %v11706_v4  ;;  %11677 = vmatprep.subr.bf16.mxu0 %v11676_v31  ;;  %v11721_v4 = vpack.c.bf16 %v20288_v21, %v20287_v35  ;;  %v11693_v31 = vpack.c.bf16 %v20290_v62, %v20289_v25  ;;  %v20309_v21 = vld [vmem:[#allocation214_spill] sm:$0xff]  ;;  %v20312_v62 = vld [vmem:[#allocation241_spill] sm:$0xff] }
 0x3d7   :  { %11709 = vmatprep.subr.bf16.mxu1 %v11708_v58  ;;  %v11725_v58 = vpack.c.bf16 %v20292_v61, %v20291_v24  ;;  %v20311_v25 = vld [vmem:[#allocation238_spill] sm:$0xff]  ;;  %v20316_v61 = vld [vmem:[#allocation240_spill] sm:$0xff] }
 0x3dd   :  { %11679 = vmatpush1.bf16.xpose.msra.mxu0 %v11678_v33  ;;  %v11728_v33 = vpack.c.bf16 %v20294_v38, %v20293_v63  ;;  %v20317_v63 = vld [vmem:[#allocation220_spill] sm:$0xff]  ;;  %v20318_v38 = vld [vmem:[#allocation223_spill] sm:$0xff] }
 0x3de   :  { %11711 = vmatpush1.bf16.xpose.msra.mxu1 %v11710_v46  ;;  %11680 = vmatprep.subr.bf16.mxu0 %v12619_v27  ;;  %v11760_v46 = vpack.c.bf16 %v20296_v7, %v20295_v41  ;;  %v20319_v41 = vld [vmem:[#allocation244_spill] sm:$0xff]  ;;  %v20320_v7 = vld [vmem:[#allocation247_spill] sm:$0xff] }
 0x3df   :  { %11712 = vmatprep.subr.bf16.mxu1 %v12619_v27 }
 0x3e4   :  { %5659 = vmatmul.mubr.f32.vlgmr.msra.gmra.mrb[50].mxu0 %v20279_v22  ;;  %v20301_v22 = vld [vmem:[#allocation208_spill] sm:$0xff] }
 0x3e5   :  { %5826 = vmatmul.mubr.f32.vlgmr.msra.gmra.mrb[58].mxu1 %v20280_v3  ;;  %11683 = vmatpush3.bf16.xpose.msk.msra.mxu0 %vm17765_vm5, %v11681_v10  ;;  %v11730_v10 = vpack.c.bf16 %v20298_v19, %v20297_v16  ;;  %v20302_v3 = vld [vmem:[#allocation211_spill] sm:$0xff] }
 0x3e6   :  { %11715 = vmatpush3.bf16.xpose.msk.msra.mxu1 %vm17765_vm5, %v11713_v6  ;;  %11684 = vmatprep.subr.bf16.mxu0 %v12619_v27  ;;  %v11762_v6 = vpack.c.bf16 %v20300_v28, %v20299_v32  ;;  %v11732_v26 = vpack.c.bf16 %v20302_v3, %v20301_v22  ;;  %v20321_v3 = vld [vmem:[#allocation219_spill] sm:$0xff] }
 0x3e7   :  { %11716 = vmatprep.subr.bf16.mxu1 %v12619_v27  ;;  %10903 = vmatprep.mubr.msk.f32.mxu0 %vm12620_vm6, %v19997_v53 }
 0x3e8   :  { %10922 = vmatprep.mubr.msk.f32.mxu1 %vm12620_vm6, %v19997_v53 }
 0x3ed   :  { %11687 = vmatpush3.bf16.xpose.msk.msra.mxu0 %vm17765_vm5, %v11685_v17  ;;  %v20304_v17 = vld [vmem:[#allocation235_spill] sm:$0xff] }
 0x3ee   :  { %11719 = vmatpush3.bf16.xpose.msk.msra.mxu1 %vm17765_vm5, %v11717_v1  ;;  %11688 = vmatprep.subr.bf16.mxu0 %v12619_v27  ;;  %v11764_v14 = vpack.c.bf16 %v20304_v17, %v20303_v36  ;;  %v20306_v1 = vld [vmem:[#allocation210_spill] sm:$0xff]  ;;  %v20323_v17 = vld [vmem:[#allocation243_spill] sm:$0xff] }
 0x3ef   :  { %11720 = vmatprep.subr.bf16.mxu1 %v12619_v27  ;;  %v11734_v40 = vpack.c.bf16 %v20306_v1, %v20305_v44  ;;  %v20325_v1 = vld [vmem:[#allocation203_spill] sm:$0xff] }
 0x3f5   :  { %11691 = vmatpush3.bf16.xpose.msk.msra.mxu0 %vm17765_vm5, %v11689_v29  ;;  %v20308_v29 = vld [vmem:[#allocation234_spill] sm:$0xff] }
 0x3f6   :  { %11723 = vmatpush3.bf16.xpose.msk.msra.mxu1 %vm17765_vm5, %v11721_v4  ;;  %11692 = vmatprep.subr.bf16.mxu0 %v12619_v27  ;;  %v11766_v35 = vpack.c.bf16 %v20308_v29, %v20307_v42  ;;  %v20310_v4 = vld [vmem:[#allocation217_spill] sm:$0xff]  ;;  %v20327_v29 = vld [vmem:[#allocation227_spill] sm:$0xff] }
 0x3f7   :  { %11724 = vmatprep.subr.bf16.mxu1 %v12619_v27 }
 0x3fd   :  { %11695 = vmatpush3.bf16.xpose.msk.msra.mxu0 %vm17765_vm5, %v11693_v31  ;;  %v20313_v31 = vld [vmem:[#allocation213_spill] sm:$0xff] }
 0x3fe   :  { %11727 = vmatpush3.bf16.xpose.msk.msra.mxu1 %vm17765_vm5, %v11725_v58  ;;  %11729 = vmatprep.subr.bf16.mxu0 %v11728_v33  ;;  %v11740_v33 = vpack.c.bf16 %v20318_v38, %v20317_v63  ;;  %v20338_v63 = vld [vmem:[#allocation224_spill] sm:$0xff] }
 0x3ff   :  { %11761 = vmatprep.subr.bf16.mxu1 %v11760_v46  ;;  %v11772_v46 = vpack.c.bf16 %v20320_v7, %v20319_v41  ;;  %v20340_v41 = vld [vmem:[#allocation248_spill] sm:$0xff] }
 0x404   :  { %10904 = vmatmul.mubr.msk.f32.vlgmr.msra.gmra.mrb[50].mxu0 %vm4564_vm4, %v17467_v56  ;;  %v11736_v56 = vpack.c.bf16 %v20310_v4, %v20309_v21  ;;  %v20329_v4 = vld [vmem:[#allocation209_spill] sm:$0xff] }
 0x405   :  { %10923 = vmatmul.mubr.msk.f32.vlgmr.msra.gmra.mrb[58].mxu1 %vm4564_vm4, %v17493_v9  ;;  %11731 = vmatpush1.bf16.xpose.msra.mxu0 %v11730_v10  ;;  %v11768_v9 = vpack.c.bf16 %v20312_v62, %v20311_v25  ;;  %v20332_v25 = vld [vmem:[#allocation236_spill] sm:$0xff] }
 0x406   :  { %11763 = vmatpush1.bf16.xpose.msra.mxu1 %v11762_v6  ;;  %11733 = vmatprep.subr.bf16.mxu0 %v11732_v26  ;;  %v20322_v26 = vld [vmem:[#allocation222_spill] sm:$0xff] }
 0x407   :  { %11765 = vmatprep.subr.bf16.mxu1 %v11764_v14  ;;  %5992 = vmatprep.mubr.f32.mxu0 %v17498_v52  ;;  %v20314_v52 = vld [vmem:[#allocation216_spill] sm:$0xff]  ;;  %v11742_v36 = vpack.c.bf16 %v20322_v26, %v20321_v3  ;;  %v20324_v14 = vld [vmem:[#allocation246_spill] sm:$0xff] }
 0x408   :  { %6159 = vmatprep.mubr.f32.mxu1 %v17519_v30  ;;  %v11738_v24 = vpack.c.bf16 %v20314_v52, %v20313_v31  ;;  %v20315_v30 = vld [vmem:[#allocation237_spill] sm:$0xff]  ;;  %v11774_v44 = vpack.c.bf16 %v20324_v14, %v20323_v17  ;;  %v20334_v31 = vld [vmem:[#allocation218_spill] sm:$0xff]  ;;  %v20346_v3 = vld [vmem:[#allocation252_spill] sm:$0xff] }
 0x409   :  { %v11770_v58 = vpack.c.bf16 %v20316_v61, %v20315_v30  ;;  %v20336_v30 = vld [vmem:[#allocation242_spill] sm:$0xff]  ;;  %v20348_v17 = vld [vmem:[#allocation276_spill] sm:$0xff] }
 0x40d   :  { %11735 = vmatpush1.bf16.xpose.msra.mxu0 %v11734_v40  ;;  %v20326_v40 = vld [vmem:[#allocation206_spill] sm:$0xff] }
 0x40e   :  { %11767 = vmatpush1.bf16.xpose.msra.mxu1 %v11766_v35  ;;  %11737 = vmatprep.subr.bf16.mxu0 %v11736_v56  ;;  %v11745_v42 = vpack.c.bf16 %v20326_v40, %v20325_v1  ;;  %v20328_v35 = vld [vmem:[#allocation230_spill] sm:$0xff]  ;;  %v20350_v1 = vld [vmem:[#allocation259_spill] sm:$0xff] }
 0x40f   :  { %11769 = vmatprep.subr.bf16.mxu1 %v11768_v9  ;;  %v11777_v21 = vpack.c.bf16 %v20328_v35, %v20327_v29  ;;  %v20333_v9 = vld [vmem:[#allocation215_spill] sm:$0xff] }
 0x410   :  { %v11753_v52 = vpack.c.bf16 %v20334_v31, %v20333_v9  ;;  %v20352_v29 = vld [vmem:[#allocation283_spill] sm:$0xff]  ;;  %v20358_v9 = vld [vmem:[#allocation265_spill] sm:$0xff]  ;;  %v20359_v31 = vld [vmem:[#allocation286_spill] sm:$0xff] }
 0x415   :  { %11739 = vmatpush1.bf16.xpose.msra.mxu0 %v11738_v24  ;;  %v20335_v24 = vld [vmem:[#allocation239_spill] sm:$0xff] }
 0x416   :  { %11771 = vmatpush1.bf16.xpose.msra.mxu1 %v11770_v58  ;;  %11741 = vmatprep.subr.bf16.mxu0 %v11740_v33  ;;  %v11785_v61 = vpack.c.bf16 %v20336_v30, %v20335_v24  ;;  %v20337_v58 = vld [vmem:[#allocation221_spill] sm:$0xff] }
 0x417   :  { %11773 = vmatprep.subr.bf16.mxu1 %v11772_v46  ;;  %v4728_v16 = vpop.f32.mrb[44].mxu0  ;;  %v11757_v38 = vpack.c.bf16 %v20338_v63, %v20337_v58  ;;  %v20339_v33 = vld [vmem:[#allocation245_spill] sm:$0xff]  ;;  %v20341_v46 = vld [vmem:[#allocation250_spill] sm:$0xff]  ;;  %v20365_v63 = vld [vmem:[#allocation268_spill] sm:$0xff] }
 0x418   :  { %v4895_v19 = vpop.f32.mrb[52].mxu1  ;;  %v9910_v10 = vsel %vm9909_vm7, %v4728_v16, 0.0  ;;  %v10791_v28 = vpop.f32.mrb[45].mxu0  ;;  %v11789_v7 = vpack.c.bf16 %v20340_v41, %v20339_v33  ;;  %v20342_v16 = vld [vmem:[#allocation253_spill] sm:$0xff]  ;;  %v20367_v41 = vld [vmem:[#allocation292_spill] sm:$0xff] }
 0x419   :  { %v9911_v32 = vsel %vm9909_vm7, %v4895_v19, 0.0  ;;  %v10810_v6 = vpop.f32.mrb[53].mxu1  ;;  %v11792_v19 = vpack.c.bf16 %v20342_v16, %v20341_v46  ;;  %v20361_v24 = vld [vmem:[#allocation261_spill] sm:$0xff] }
 0x41a   :  { %v18097_v22 = vadd.f32 %v9911_v32, %v9910_v10  ;;  %v20343_v10 = vld [vmem:[#allocation274_spill] sm:$0xff]  ;;  %v20344_v32 = vld [vmem:[#allocation277_spill] sm:$0xff] }
 0x41b   :  { %v11824_v28 = vpack.c.bf16 %v20344_v32, %v20343_v10  ;;  %v20345_v6 = vld [vmem:[#allocation249_spill] sm:$0xff] }
 0x41c   :  { %v11794_v26 = vpack.c.bf16 %v20346_v3, %v20345_v6  ;;  %v20369_v3 = vld [vmem:[#allocation267_spill] sm:$0xff] }
 0x41d   :  { %11743 = vmatpush1.bf16.xpose.msra.mxu0 %v11742_v36  ;;  %v20347_v36 = vld [vmem:[#allocation273_spill] sm:$0xff] }
 0x41e   :  { %11775 = vmatpush1.bf16.xpose.msra.mxu1 %v11774_v44  ;;  %11744 = vmatprep.subr.bf16.mxu0 %v12619_v27  ;;  %v11826_v14 = vpack.c.bf16 %v20348_v17, %v20347_v36  ;;  %v20349_v44 = vld [vmem:[#allocation256_spill] sm:$0xff]  ;;  %v20371_v17 = vld [vmem:[#allocation291_spill] sm:$0xff] }
 0x41f   :  { %11776 = vmatprep.subr.bf16.mxu1 %v12619_v27  ;;  %v11796_v40 = vpack.c.bf16 %v20350_v1, %v20349_v44 }
 0x424   :  { %5993 = vmatmul.mubr.f32.vlgmr.msra.gmra.mrb[52].mxu0 %v17229_v11  ;;  %v20330_v11 = vld [vmem:[#allocation212_spill] sm:$0xff] }
 0x425   :  { %6160 = vmatmul.mubr.f32.vlgmr.msra.gmra.mrb[60].mxu1 %v17250_v20  ;;  %11747 = vmatpush3.bf16.xpose.msk.msra.mxu0 %vm17765_vm5, %v11745_v42  ;;  %v11749_v56 = vpack.c.bf16 %v20330_v11, %v20329_v4  ;;  %v20331_v20 = vld [vmem:[#allocation233_spill] sm:$0xff]  ;;  %v20351_v42 = vld [vmem:[#allocation280_spill] sm:$0xff]  ;;  %v20354_v4 = vld [vmem:[#allocation258_spill] sm:$0xff] }
 0x426   :  { %11779 = vmatpush3.bf16.xpose.msk.msra.mxu1 %vm17765_vm5, %v11777_v21  ;;  %11748 = vmatprep.subr.bf16.mxu0 %v12619_v27  ;;  %v11781_v62 = vpack.c.bf16 %v20332_v25, %v20331_v20  ;;  %v11828_v35 = vpack.c.bf16 %v20352_v29, %v20351_v42  ;;  %v20353_v21 = vld [vmem:[#allocation255_spill] sm:$0xff]  ;;  %v20356_v20 = vld [vmem:[#allocation282_spill] sm:$0xff] }
 0x427   :  { %11780 = vmatprep.subr.bf16.mxu1 %v12619_v27  ;;  %10941 = vmatprep.mubr.msk.f32.mxu0 %vm12620_vm6, %v19997_v53  ;;  %v11798_v11 = vpack.c.bf16 %v20354_v4, %v20353_v21  ;;  %v20373_v42 = vld [vmem:[#allocation251_spill] sm:$0xff]  ;;  %v20374_v29 = vld [vmem:[#allocation254_spill] sm:$0xff] }
 0x428   :  { %10960 = vmatprep.mubr.msk.f32.mxu1 %vm12620_vm6, %v19997_v53  ;;  %v20376_v21 = vld [vmem:[#allocation278_spill] sm:$0xff] }
 0x42d   :  { %11751 = vmatpush3.bf16.xpose.msk.msra.mxu0 %vm17765_vm5, %v11749_v56  ;;  %v20355_v56 = vld [vmem:[#allocation279_spill] sm:$0xff] }
 0x42e   :  { %11783 = vmatpush3.bf16.xpose.msk.msra.mxu1 %vm17765_vm5, %v11781_v62  ;;  %11752 = vmatprep.subr.bf16.mxu0 %v12619_v27  ;;  %v11830_v25 = vpack.c.bf16 %v20356_v20, %v20355_v56  ;;  %v20357_v62 = vld [vmem:[#allocation262_spill] sm:$0xff]  ;;  %v20378_v56 = vld [vmem:[#allocation797_spill] sm:$0xff] }
 0x42f   :  { %11784 = vmatprep.subr.bf16.mxu1 %v12619_v27  ;;  %v20379_v20 = vld [vmem:[#allocation257_spill] sm:$0xff] }
 0x435   :  { %11755 = vmatpush3.bf16.xpose.msk.msra.mxu0 %vm17765_vm5, %v11753_v52  ;;  %v20360_v52 = vld [vmem:[#allocation289_spill] sm:$0xff] }
 0x436   :  { %11787 = vmatpush3.bf16.xpose.msk.msra.mxu1 %vm17765_vm5, %v11785_v61  ;;  %11756 = vmatprep.subr.bf16.mxu0 %v12619_v27  ;;  %v20364_v61 = vld [vmem:[#allocation288_spill] sm:$0xff] }
 0x437   :  { %11788 = vmatprep.subr.bf16.mxu1 %v12619_v27 }
 0x43d   :  { %11759 = vmatpush3.bf16.xpose.msk.msra.mxu0 %vm17765_vm5, %v11757_v38  ;;  %v20366_v38 = vld [vmem:[#allocation271_spill] sm:$0xff] }
 0x43e   :  { %11791 = vmatpush3.bf16.xpose.msk.msra.mxu1 %vm17765_vm5, %v11789_v7  ;;  %11793 = vmatprep.subr.bf16.mxu0 %v11792_v19  ;;  %v11804_v33 = vpack.c.bf16 %v20366_v38, %v20365_v63  ;;  %v20368_v7 = vld [vmem:[#allocation295_spill] sm:$0xff]  ;;  %v20389_v38 = vld [vmem:[#allocation293_spill] sm:$0xff] }
 0x43f   :  { %11825 = vmatprep.subr.bf16.mxu1 %v11824_v28  ;;  %v11836_v46 = vpack.c.bf16 %v20368_v7, %v20367_v41  ;;  %v20391_v7 = vld [vmem:[#allocation298_spill] sm:$0xff] }
 0x444   :  { %10942 = vmatmul.mubr.msk.f32.vlgmr.msra.gmra.mrb[52].mxu0 %vm4564_vm4, %v17538_v2  ;;  %v11800_v2 = vpack.c.bf16 %v20358_v9, %v20357_v62  ;;  %v20381_v9 = vld [vmem:[#allocation281_spill] sm:$0xff] }
 0x445   :  { %10961 = vmatmul.mubr.msk.f32.vlgmr.msra.gmra.mrb[60].mxu1 %vm4564_vm4, %v17551_v5  ;;  %11795 = vmatpush1.bf16.xpose.msra.mxu0 %v11794_v26  ;;  %v11832_v5 = vpack.c.bf16 %v20360_v52, %v20359_v31  ;;  %v20370_v26 = vld [vmem:[#allocation270_spill] sm:$0xff]  ;;  %v20383_v52 = vld [vmem:[#allocation263_spill] sm:$0xff] }
 0x446   :  { %11827 = vmatpush1.bf16.xpose.msra.mxu1 %v11826_v14  ;;  %11797 = vmatprep.subr.bf16.mxu0 %v11796_v40  ;;  %v11806_v36 = vpack.c.bf16 %v20370_v26, %v20369_v3  ;;  %v20372_v14 = vld [vmem:[#allocation294_spill] sm:$0xff]  ;;  %v20397_v26 = vld [vmem:[#allocation321_spill] sm:$0xff] }
 0x447   :  { %11829 = vmatprep.subr.bf16.mxu1 %v11828_v35  ;;  %6326 = vmatprep.mubr.f32.mxu0 %v17504_v59  ;;  %v20362_v59 = vld [vmem:[#allocation264_spill] sm:$0xff]  ;;  %v11838_v44 = vpack.c.bf16 %v20372_v14, %v20371_v17  ;;  %v11809_v35 = vpack.c.bf16 %v20374_v29, %v20373_v42  ;;  %v20402_v29 = vld [vmem:[#allocation331_spill] sm:$0xff] }
 0x448   :  { %6493 = vmatprep.mubr.f32.mxu1 %v17524_v18  ;;  %v11802_v30 = vpack.c.bf16 %v20362_v59, %v20361_v24  ;;  %v20363_v18 = vld [vmem:[#allocation285_spill] sm:$0xff]  ;;  %v20385_v59 = vld [vmem:[#allocation287_spill] sm:$0xff]  ;;  %v20399_v14 = vld [vmem:[#allocation304_spill] sm:$0xff] }
 0x449   :  { %v11834_v58 = vpack.c.bf16 %v20364_v61, %v20363_v18  ;;  %v20387_v61 = vld [vmem:[#allocation269_spill] sm:$0xff]  ;;  %v20401_v42 = vld [vmem:[#allocation328_spill] sm:$0xff] }
 0x44d   :  { %11799 = vmatpush1.bf16.xpose.msra.mxu0 %v11798_v11  ;;  %v20377_v11 = vld [vmem:[#allocation794_spill] sm:$0xff] }
 0x44e   :  { %11831 = vmatpush1.bf16.xpose.msra.mxu1 %v11830_v25  ;;  %11801 = vmatprep.subr.bf16.mxu0 %v11800_v2  ;;  %v20380_v25 = vld [vmem:[#allocation260_spill] sm:$0xff] }
 0x44f   :  { %11833 = vmatprep.subr.bf16.mxu1 %v11832_v5  ;;  %v11813_v62 = vpack.c.bf16 %v20380_v25, %v20379_v20  ;;  %v20382_v2 = vld [vmem:[#allocation284_spill] sm:$0xff]  ;;  %v20384_v5 = vld [vmem:[#allocation266_spill] sm:$0xff] }
 0x450   :  { %v11845_v31 = vpack.c.bf16 %v20382_v2, %v20381_v9  ;;  %v11817_v24 = vpack.c.bf16 %v20384_v5, %v20383_v52  ;;  %v20407_v25 = vld [vmem:[#allocation310_spill] sm:$0xff]  ;;  %v20410_v2 = vld [vmem:[#allocation337_spill] sm:$0xff]  ;;  %v20414_v5 = vld [vmem:[#allocation336_spill] sm:$0xff] }
 0x451   :  { %v20409_v9 = vld [vmem:[#allocation334_spill] sm:$0xff] }
 0x455   :  { %11803 = vmatpush1.bf16.xpose.msra.mxu0 %v11802_v30  ;;  %v20386_v30 = vld [vmem:[#allocation290_spill] sm:$0xff] }
 0x456   :  { %11835 = vmatpush1.bf16.xpose.msra.mxu1 %v11834_v58  ;;  %11805 = vmatprep.subr.bf16.mxu0 %v11804_v33  ;;  %v11849_v18 = vpack.c.bf16 %v20386_v30, %v20385_v59  ;;  %v20388_v58 = vld [vmem:[#allocation272_spill] sm:$0xff]  ;;  %v20416_v30 = vld [vmem:[#allocation319_spill] sm:$0xff] }
 0x457   :  { %11837 = vmatprep.subr.bf16.mxu1 %v11836_v46  ;;  %v5062_v16 = vpop.f32.mrb[46].mxu0  ;;  %v11821_v63 = vpack.c.bf16 %v20388_v58, %v20387_v61  ;;  %v20390_v33 = vld [vmem:[#allocation296_spill] sm:$0xff]  ;;  %v20392_v46 = vld [vmem:[#allocation301_spill] sm:$0xff]  ;;  %v20418_v58 = vld [vmem:[#allocation343_spill] sm:$0xff] }
 0x458   :  { %v5229_v19 = vpop.f32.mrb[54].mxu1  ;;  %v9913_v10 = vsel %vm9909_vm7, %v5062_v16, 0.0  ;;  %v10829_v32 = vpop.f32.mrb[47].mxu0  ;;  %v11853_v41 = vpack.c.bf16 %v20390_v33, %v20389_v38  ;;  %v11856_v16 = vpack.c.bf16 %v20392_v46, %v20391_v7  ;;  %v20415_v59 = vld [vmem:[#allocation316_spill] sm:$0xff] }
 0x459   :  { %v10848_v28 = vpop.f32.mrb[55].mxu1  ;;  %v9914_v6 = vadd.f32 %v9913_v10, %v18097_v22  ;;  %v9915_v1 = vsel %vm9909_vm7, %v5229_v19, 0.0  ;;  %v20375_v22 = vld [vmem:[#allocation275_spill] sm:$0xff]  ;;  %v20393_v19 = vld [vmem:[#allocation322_spill] sm:$0xff]  ;;  %v20394_v10 = vld [vmem:[#allocation325_spill] sm:$0xff] }
 0x45a   :  { %v11841_v4 = vpack.c.bf16 %v20376_v21, %v20375_v22  ;;  %v11888_v32 = vpack.c.bf16 %v20394_v10, %v20393_v19  ;;  %v20395_v28 = vld [vmem:[#allocation297_spill] sm:$0xff]  ;;  %v20403_v22 = vld [vmem:[#allocation303_spill] sm:$0xff]  ;;  %v20404_v21 = vld [vmem:[#allocation306_spill] sm:$0xff] }
 0x45b   :  { %v18190_v40 = vadd.f32 %v9915_v1, %v9914_v6  ;;  %v20396_v6 = vld [vmem:[#allocation300_spill] sm:$0xff]  ;;  %v20419_v19 = vld [vmem:[#allocation315_spill] sm:$0xff]  ;;  %v20420_v10 = vld [vmem:[#allocation318_spill] sm:$0xff] }
 0x45c   :  { %v11858_v3 = vpack.c.bf16 %v20396_v6, %v20395_v28  ;;  %v20417_v61 = vld [vmem:[#allocation340_spill] sm:$0xff]  ;;  %v20421_v28 = vld [vmem:[#allocation339_spill] sm:$0xff]  ;;  %v20422_v6 = vld [vmem:[#allocation342_spill] sm:$0xff] }
 0x45d   :  { %11807 = vmatpush1.bf16.xpose.msra.mxu0 %v11806_v36  ;;  %v20398_v36 = vld [vmem:[#allocation324_spill] sm:$0xff] }
 0x45e   :  { %11839 = vmatpush1.bf16.xpose.msra.mxu1 %v11838_v44  ;;  %11808 = vmatprep.subr.bf16.mxu0 %v12619_v27  ;;  %v11890_v17 = vpack.c.bf16 %v20398_v36, %v20397_v26  ;;  %v20400_v44 = vld [vmem:[#allocation307_spill] sm:$0xff] }
 0x45f   :  { %11840 = vmatprep.subr.bf16.mxu1 %v12619_v27  ;;  %v11860_v1 = vpack.c.bf16 %v20400_v44, %v20399_v14  ;;  %v20424_v14 = vld [vmem:[#allocation302_spill] sm:$0xff] }
 0x464   :  { %6327 = vmatmul.mubr.f32.vlgmr.msra.gmra.mrb[54].mxu0 %v20377_v11  ;;  %v20405_v11 = vld [vmem:[#allocation327_spill] sm:$0xff] }
 0x465   :  { %6494 = vmatmul.mubr.f32.vlgmr.msra.gmra.mrb[62].mxu1 %v20378_v56  ;;  %11811 = vmatpush3.bf16.xpose.msk.msra.mxu0 %vm17765_vm5, %v11809_v35  ;;  %v11892_v35 = vpack.c.bf16 %v20402_v29, %v20401_v42  ;;  %v20406_v56 = vld [vmem:[#allocation330_spill] sm:$0xff]  ;;  %v20427_v29 = vld [vmem:[#allocation795_spill] sm:$0xff] }
 0x466   :  { %11843 = vmatpush3.bf16.xpose.msk.msra.mxu1 %vm17765_vm5, %v11841_v4  ;;  %11812 = vmatprep.subr.bf16.mxu0 %v12619_v27  ;;  %v11862_v4 = vpack.c.bf16 %v20404_v21, %v20403_v22  ;;  %v11894_v20 = vpack.c.bf16 %v20406_v56, %v20405_v11  ;;  %v20429_v22 = vld [vmem:[#allocation305_spill] sm:$0xff]  ;;  %v20430_v21 = vld [vmem:[#allocation308_spill] sm:$0xff] }
 0x467   :  { %11844 = vmatprep.subr.bf16.mxu1 %v12619_v27  ;;  %10979 = vmatprep.mubr.msk.f32.mxu0 %vm12620_vm6, %v19997_v53  ;;  %v20431_v11 = vld [vmem:[#allocation329_spill] sm:$0xff]  ;;  %v20432_v56 = vld [vmem:[#allocation332_spill] sm:$0xff] }
 0x468   :  { %10998 = vmatprep.mubr.msk.f32.mxu1 %vm12620_vm6, %v19997_v53 }
 0x46d   :  { %11815 = vmatpush3.bf16.xpose.msk.msra.mxu0 %vm17765_vm5, %v11813_v62  ;;  %v20408_v62 = vld [vmem:[#allocation313_spill] sm:$0xff] }
 0x46e   :  { %11847 = vmatpush3.bf16.xpose.msk.msra.mxu1 %vm17765_vm5, %v11845_v31  ;;  %11816 = vmatprep.subr.bf16.mxu0 %v12619_v27  ;;  %v20411_v31 = vld [vmem:[#allocation309_spill] sm:$0xff] }
 0x46f   :  { %11848 = vmatprep.subr.bf16.mxu1 %v12619_v27 }
 0x475   :  { %11819 = vmatpush3.bf16.xpose.msk.msra.mxu0 %vm17765_vm5, %v11817_v24 }
 0x476   :  { %11851 = vmatpush3.bf16.xpose.msk.msra.mxu1 %vm17765_vm5, %v11849_v18  ;;  %11820 = vmatprep.subr.bf16.mxu0 %v12619_v27  ;;  %v11868_v18 = vpack.c.bf16 %v20416_v30, %v20415_v59  ;;  %v20441_v59 = vld [vmem:[#allocation346_spill] sm:$0xff]  ;;  %v20442_v30 = vld [vmem:[#allocation349_spill] sm:$0xff] }
 0x477   :  { %11852 = vmatprep.subr.bf16.mxu1 %v12619_v27 }
 0x47d   :  { %11823 = vmatpush3.bf16.xpose.msk.msra.mxu0 %vm17765_vm5, %v11821_v63  ;;  %v11900_v63 = vpack.c.bf16 %v20418_v58, %v20417_v61  ;;  %v20443_v61 = vld [vmem:[#allocation370_spill] sm:$0xff]  ;;  %v20444_v58 = vld [vmem:[#allocation373_spill] sm:$0xff] }
 0x47e   :  { %11855 = vmatpush3.bf16.xpose.msk.msra.mxu1 %vm17765_vm5, %v11853_v41  ;;  %11857 = vmatprep.subr.bf16.mxu0 %v11856_v16 }
 0x47f   :  { %11889 = vmatprep.subr.bf16.mxu1 %v11888_v32  ;;  %v11870_v32 = vpack.c.bf16 %v20420_v10, %v20419_v19  ;;  %v20449_v19 = vld [vmem:[#allocation352_spill] sm:$0xff]  ;;  %v20450_v10 = vld [vmem:[#allocation355_spill] sm:$0xff] }
 0x484   :  { %10980 = vmatmul.mubr.msk.f32.vlgmr.msra.gmra.mrb[54].mxu0 %vm4564_vm4, %v17541_v23  ;;  %v11864_v23 = vpack.c.bf16 %v20408_v62, %v20407_v25  ;;  %v20433_v25 = vld [vmem:[#allocation311_spill] sm:$0xff]  ;;  %v20434_v62 = vld [vmem:[#allocation314_spill] sm:$0xff] }
 0x485   :  { %10999 = vmatmul.mubr.msk.f32.vlgmr.msra.gmra.mrb[62].mxu1 %vm4564_vm4, %v17561_v37  ;;  %11859 = vmatpush1.bf16.xpose.msra.mxu0 %v11858_v3  ;;  %v11896_v37 = vpack.c.bf16 %v20410_v2, %v20409_v9  ;;  %v11902_v3 = vpack.c.bf16 %v20422_v6, %v20421_v28  ;;  %v20435_v9 = vld [vmem:[#allocation335_spill] sm:$0xff]  ;;  %v20436_v2 = vld [vmem:[#allocation338_spill] sm:$0xff]  ;;  %v20451_v28 = vld [vmem:[#allocation376_spill] sm:$0xff] }
 0x486   :  { %11891 = vmatpush1.bf16.xpose.msra.mxu1 %v11890_v17  ;;  %11861 = vmatprep.subr.bf16.mxu0 %v11860_v1  ;;  %v20423_v17 = vld [vmem:[#allocation299_spill] sm:$0xff]  ;;  %v20426_v1 = vld [vmem:[#allocation326_spill] sm:$0xff] }
 0x487   :  { %11893 = vmatprep.subr.bf16.mxu1 %v11892_v35  ;;  %6660 = vmatprep.mubr.f32.mxu0 %v17512_v39  ;;  %v20412_v39 = vld [vmem:[#allocation312_spill] sm:$0xff]  ;;  %v11873_v44 = vpack.c.bf16 %v20424_v14, %v20423_v17  ;;  %v20428_v35 = vld [vmem:[#allocation798_spill] sm:$0xff]  ;;  %v20452_v6 = vld [vmem:[#allocation379_spill] sm:$0xff] }
 0x488   :  { %6827 = vmatprep.mubr.f32.mxu1 %v17531_v13  ;;  %v11866_v52 = vpack.c.bf16 %v20412_v39, %v20411_v31  ;;  %v20413_v13 = vld [vmem:[#allocation333_spill] sm:$0xff]  ;;  %v20438_v39 = vld [vmem:[#allocation320_spill] sm:$0xff]  ;;  %v20454_v17 = vld [vmem:[#allocation354_spill] sm:$0xff] }
 0x489   :  { %v11898_v24 = vpack.c.bf16 %v20414_v5, %v20413_v13  ;;  %v20437_v31 = vld [vmem:[#allocation317_spill] sm:$0xff]  ;;  %v20440_v5 = vld [vmem:[#allocation344_spill] sm:$0xff] }
 0x48a   :  { %v20439_v13 = vld [vmem:[#allocation341_spill] sm:$0xff] }
 0x48d   :  { %11863 = vmatpush1.bf16.xpose.msra.mxu0 %v11862_v4  ;;  %v11877_v4 = vpack.c.bf16 %v20430_v21, %v20429_v22  ;;  %v20460_v22 = vld [vmem:[#allocation385_spill] sm:$0xff] }
 0x48e   :  { %11895 = vmatpush1.bf16.xpose.msra.mxu1 %v11894_v20  ;;  %11865 = vmatprep.subr.bf16.mxu0 %v11864_v23  ;;  %v11909_v20 = vpack.c.bf16 %v20432_v56, %v20431_v11  ;;  %v11881_v23 = vpack.c.bf16 %v20434_v62, %v20433_v25  ;;  %v20461_v21 = vld [vmem:[#allocation357_spill] sm:$0xff]  ;;  %v20464_v11 = vld [vmem:[#allocation384_spill] sm:$0xff]  ;;  %v20466_v25 = vld [vmem:[#allocation367_spill] sm:$0xff] }
 0x48f   :  { %11897 = vmatprep.subr.bf16.mxu1 %v11896_v37  ;;  %v11913_v37 = vpack.c.bf16 %v20436_v2, %v20435_v9  ;;  %v20468_v9 = vld [vmem:[#allocation391_spill] sm:$0xff] }
 0x495   :  { %11867 = vmatpush1.bf16.xpose.msra.mxu0 %v11866_v52  ;;  %v11885_v52 = vpack.c.bf16 %v20438_v39, %v20437_v31 }
 0x496   :  { %11899 = vmatpush1.bf16.xpose.msra.mxu1 %v11898_v24  ;;  %11869 = vmatprep.subr.bf16.mxu0 %v11868_v18  ;;  %v11917_v24 = vpack.c.bf16 %v20440_v5, %v20439_v13  ;;  %v11920_v18 = vpack.c.bf16 %v20442_v30, %v20441_v59  ;;  %v20470_v59 = vld [vmem:[#allocation366_spill] sm:$0xff] }
 0x497   :  { %11901 = vmatprep.subr.bf16.mxu1 %v11900_v63  ;;  %v5396_v38 = vpop.f32.mrb[48].mxu0  ;;  %v11952_v63 = vpack.c.bf16 %v20444_v58, %v20443_v61  ;;  %v20472_v61 = vld [vmem:[#allocation390_spill] sm:$0xff] }
 0x498   :  { %v5563_v33 = vpop.f32.mrb[56].mxu1  ;;  %v9917_v41 = vsel %vm9909_vm7, %v5396_v38, 0.0  ;;  %v10867_v7 = vpop.f32.mrb[49].mxu0  ;;  %v20445_v38 = vld [vmem:[#allocation345_spill] sm:$0xff] }
 0x499   :  { %v10886_v46 = vpop.f32.mrb[57].mxu1  ;;  %v9918_v16 = vadd.f32 %v9917_v41, %v18190_v40  ;;  %v9919_v26 = vsel %vm9909_vm7, %v5563_v33, 0.0  ;;  %v20425_v40 = vld [vmem:[#allocation323_spill] sm:$0xff]  ;;  %v20446_v33 = vld [vmem:[#allocation348_spill] sm:$0xff]  ;;  %v20447_v7 = vld [vmem:[#allocation369_spill] sm:$0xff] }
 0x49a   :  { %v11905_v42 = vpack.c.bf16 %v20426_v1, %v20425_v40  ;;  %v11922_v41 = vpack.c.bf16 %v20446_v33, %v20445_v38  ;;  %v20448_v46 = vld [vmem:[#allocation372_spill] sm:$0xff]  ;;  %v20456_v40 = vld [vmem:[#allocation378_spill] sm:$0xff]  ;;  %v20473_v33 = vld [vmem:[#allocation347_spill] sm:$0xff] }
 0x49b   :  { %v18279_v36 = vadd.f32 %v9919_v26, %v9918_v16  ;;  %v11954_v16 = vpack.c.bf16 %v20448_v46, %v20447_v7  ;;  %v20453_v26 = vld [vmem:[#allocation351_spill] sm:$0xff]  ;;  %v20476_v46 = vld [vmem:[#allocation374_spill] sm:$0xff] }
 0x49c   :  { %v11926_v14 = vpack.c.bf16 %v20454_v17, %v20453_v26  ;;  %v20482_v26 = vld [vmem:[#allocation380_spill] sm:$0xff] }
 0x49d   :  { %11871 = vmatpush1.bf16.xpose.msra.mxu0 %v11870_v32  ;;  %v11924_v32 = vpack.c.bf16 %v20450_v10, %v20449_v19  ;;  %v20477_v19 = vld [vmem:[#allocation796_spill] sm:$0xff]  ;;  %v20478_v10 = vld [vmem:[#allocation799_spill] sm:$0xff] }
 0x49e   :  { %11903 = vmatpush1.bf16.xpose.msra.mxu1 %v11902_v3  ;;  %11872 = vmatprep.subr.bf16.mxu0 %v12619_v27  ;;  %v11956_v3 = vpack.c.bf16 %v20452_v6, %v20451_v28  ;;  %v20480_v28 = vld [vmem:[#allocation356_spill] sm:$0xff] }
 0x49f   :  { %11904 = vmatprep.subr.bf16.mxu1 %v12619_v27 }
 0x4a4   :  { %6661 = vmatmul.mubr.f32.vlgmr.msra.gmra.mrb[56].mxu0 %v20427_v29  ;;  %v20458_v29 = vld [vmem:[#allocation361_spill] sm:$0xff] }
 0x4a5   :  { %6828 = vmatmul.mubr.f32.vlgmr.msra.gmra.mrb[64].mxu1 %v20428_v35  ;;  %11875 = vmatpush3.bf16.xpose.msk.msra.mxu0 %vm17765_vm5, %v11873_v44  ;;  %v20455_v44 = vld [vmem:[#allocation375_spill] sm:$0xff]  ;;  %v20459_v35 = vld [vmem:[#allocation382_spill] sm:$0xff] }
 0x4a6   :  { %11907 = vmatpush3.bf16.xpose.msk.msra.mxu1 %vm17765_vm5, %v11905_v42  ;;  %11876 = vmatprep.subr.bf16.mxu0 %v12619_v27  ;;  %v11958_v1 = vpack.c.bf16 %v20456_v40, %v20455_v44  ;;  %v20457_v42 = vld [vmem:[#allocation358_spill] sm:$0xff] }
 0x4a7   :  { %11908 = vmatprep.subr.bf16.mxu1 %v12619_v27  ;;  %11017 = vmatprep.mubr.msk.f32.mxu0 %vm12620_vm6, %v19997_v53  ;;  %v20484_v44 = vld [vmem:[#allocation362_spill] sm:$0xff] }
 0x4a8   :  { %11036 = vmatprep.mubr.msk.f32.mxu1 %vm12620_vm6, %v19997_v53 }
 0x4ad   :  { %11879 = vmatpush3.bf16.xpose.msk.msra.mxu0 %vm17765_vm5, %v11877_v4 }
 0x4ae   :  { %11911 = vmatpush3.bf16.xpose.msk.msra.mxu1 %vm17765_vm5, %v11909_v20  ;;  %11880 = vmatprep.subr.bf16.mxu0 %v12619_v27  ;;  %v20465_v20 = vld [vmem:[#allocation364_spill] sm:$0xff] }
 0x4af   :  { %11912 = vmatprep.subr.bf16.mxu1 %v12619_v27  ;;  %v11932_v62 = vpack.c.bf16 %v20466_v25, %v20465_v20  ;;  %v20494_v20 = vld [vmem:[#allocation421_spill] sm:$0xff] }
 0x4b5   :  { %11883 = vmatpush3.bf16.xpose.msk.msra.mxu0 %vm17765_vm5, %v11881_v23  ;;  %v20467_v23 = vld [vmem:[#allocation388_spill] sm:$0xff] }
 0x4b6   :  { %11915 = vmatpush3.bf16.xpose.msk.msra.mxu1 %vm17765_vm5, %v11913_v37  ;;  %11884 = vmatprep.subr.bf16.mxu0 %v12619_v27  ;;  %v11964_v2 = vpack.c.bf16 %v20468_v9, %v20467_v23  ;;  %v20496_v23 = vld [vmem:[#allocation396_spill] sm:$0xff] }
 0x4b7   :  { %11916 = vmatprep.subr.bf16.mxu1 %v12619_v27 }
 0x4bd   :  { %11887 = vmatpush3.bf16.xpose.msk.msra.mxu0 %vm17765_vm5, %v11885_v52 }
 0x4be   :  { %11919 = vmatpush3.bf16.xpose.msk.msra.mxu1 %vm17765_vm5, %v11917_v24  ;;  %11921 = vmatprep.subr.bf16.mxu0 %v11920_v18  ;;  %v20469_v24 = vld [vmem:[#allocation363_spill] sm:$0xff] }
 0x4bf   :  { %11953 = vmatprep.subr.bf16.mxu1 %v11952_v63  ;;  %v11934_v30 = vpack.c.bf16 %v20470_v59, %v20469_v24  ;;  %v20471_v18 = vld [vmem:[#allocation387_spill] sm:$0xff] }
 0x4c0   :  { %v11966_v58 = vpack.c.bf16 %v20472_v61, %v20471_v18  ;;  %v20502_v24 = vld [vmem:[#allocation427_spill] sm:$0xff]  ;;  %v20504_v18 = vld [vmem:[#allocation780_spill] sm:$0xff] }
 0x4c1   :  { %v20505_v61 = vld [vmem:[#allocation399_spill] sm:$0xff] }
 0x4c4   :  { %11018 = vmatmul.mubr.msk.f32.vlgmr.msra.gmra.mrb[56].mxu0 %vm4564_vm4, %v17544_v48  ;;  %v11928_v48 = vpack.c.bf16 %v20458_v29, %v20457_v42  ;;  %v20486_v42 = vld [vmem:[#allocation386_spill] sm:$0xff] }
 0x4c5   :  { %11037 = vmatmul.mubr.msk.f32.vlgmr.msra.gmra.mrb[64].mxu1 %vm4564_vm4, %v17565_v43  ;;  %11923 = vmatpush1.bf16.xpose.msra.mxu0 %v11922_v41  ;;  %v11960_v43 = vpack.c.bf16 %v20460_v22, %v20459_v35  ;;  %v20474_v41 = vld [vmem:[#allocation350_spill] sm:$0xff]  ;;  %v20488_v35 = vld [vmem:[#allocation368_spill] sm:$0xff] }
 0x4c6   :  { %11955 = vmatpush1.bf16.xpose.msra.mxu1 %v11954_v16  ;;  %11925 = vmatprep.subr.bf16.mxu0 %v11924_v32  ;;  %v11937_v7 = vpack.c.bf16 %v20474_v41, %v20473_v33  ;;  %v20479_v32 = vld [vmem:[#allocation353_spill] sm:$0xff]  ;;  %v20507_v33 = vld [vmem:[#allocation423_spill] sm:$0xff]  ;;  %v20508_v41 = vld [vmem:[#allocation426_spill] sm:$0xff] }
 0x4c7   :  { %11957 = vmatprep.subr.bf16.mxu1 %v11956_v3  ;;  %6994 = vmatprep.mubr.f32.mxu0 %v17515_v47  ;;  %v20462_v47 = vld [vmem:[#allocation360_spill] sm:$0xff]  ;;  %v11941_v6 = vpack.c.bf16 %v20480_v28, %v20479_v32  ;;  %v20481_v3 = vld [vmem:[#allocation377_spill] sm:$0xff] }
 0x4c8   :  { %7161 = vmatprep.mubr.f32.mxu1 %v17535_v60  ;;  %v11930_v4 = vpack.c.bf16 %v20462_v47, %v20461_v21  ;;  %v20463_v60 = vld [vmem:[#allocation381_spill] sm:$0xff]  ;;  %v11973_v17 = vpack.c.bf16 %v20482_v26, %v20481_v3  ;;  %v20490_v21 = vld [vmem:[#allocation392_spill] sm:$0xff] }
 0x4c9   :  { %v11962_v56 = vpack.c.bf16 %v20464_v11, %v20463_v60  ;;  %v20492_v60 = vld [vmem:[#allocation397_spill] sm:$0xff]  ;;  %v20516_v3 = vld [vmem:[#allocation432_spill] sm:$0xff] }
 0x4ca   :  { %v20513_v28 = vld [vmem:[#allocation405_spill] sm:$0xff] }
 0x4cd   :  { %11927 = vmatpush1.bf16.xpose.msra.mxu0 %v11926_v14  ;;  %v20483_v14 = vld [vmem:[#allocation359_spill] sm:$0xff] }
 0x4ce   :  { %11959 = vmatpush1.bf16.xpose.msra.mxu1 %v11958_v1  ;;  %11929 = vmatprep.subr.bf16.mxu0 %v11928_v48  ;;  %v11945_v40 = vpack.c.bf16 %v20484_v44, %v20483_v14  ;;  %v20485_v1 = vld [vmem:[#allocation383_spill] sm:$0xff]  ;;  %v20487_v48 = vld [vmem:[#allocation365_spill] sm:$0xff] }
 0x4cf   :  { %11961 = vmatprep.subr.bf16.mxu1 %v11960_v43  ;;  %v11977_v29 = vpack.c.bf16 %v20486_v42, %v20485_v1  ;;  %v11949_v22 = vpack.c.bf16 %v20488_v35, %v20487_v48  ;;  %v20489_v43 = vld [vmem:[#allocation389_spill] sm:$0xff]  ;;  %v20518_v14 = vld [vmem:[#allocation415_spill] sm:$0xff] }
 0x4d0   :  { %v11981_v47 = vpack.c.bf16 %v20490_v21, %v20489_v43  ;;  %v20520_v1 = vld [vmem:[#allocation439_spill] sm:$0xff] }
 0x4d5   :  { %11931 = vmatpush1.bf16.xpose.msra.mxu0 %v11930_v4  ;;  %v20491_v4 = vld [vmem:[#allocation394_spill] sm:$0xff] }
 0x4d6   :  { %11963 = vmatpush1.bf16.xpose.msra.mxu1 %v11962_v56  ;;  %11933 = vmatprep.subr.bf16.mxu0 %v11932_v62  ;;  %v11984_v11 = vpack.c.bf16 %v20492_v60, %v20491_v4  ;;  %v20493_v56 = vld [vmem:[#allocation418_spill] sm:$0xff]  ;;  %v20495_v62 = vld [vmem:[#allocation393_spill] sm:$0xff] }
 0x4d7   :  { %11965 = vmatprep.subr.bf16.mxu1 %v11964_v2  ;;  %v5730_v37 = vpop.f32.mrb[50].mxu0  ;;  %v12016_v25 = vpack.c.bf16 %v20494_v20, %v20493_v56  ;;  %v11986_v9 = vpack.c.bf16 %v20496_v23, %v20495_v62  ;;  %v20497_v2 = vld [vmem:[#allocation417_spill] sm:$0xff]  ;;  %v20522_v4 = vld [vmem:[#allocation414_spill] sm:$0xff]  ;;  %v20525_v23 = vld [vmem:[#allocation395_spill] sm:$0xff] }
 0x4d8   :  { %v5897_v31 = vpop.f32.mrb[58].mxu1  ;;  %v9921_v39 = vsel %vm9909_vm7, %v5730_v37, 0.0  ;;  %v10905_v52 = vpop.f32.mrb[51].mxu0  ;;  %v20498_v37 = vld [vmem:[#allocation420_spill] sm:$0xff]  ;;  %v20524_v56 = vld [vmem:[#allocation438_spill] sm:$0xff] }
 0x4d9   :  { %v10924_v13 = vpop.f32.mrb[59].mxu1  ;;  %v9922_v5 = vadd.f32 %v9921_v39, %v18279_v36  ;;  %v9923_v63 = vsel %vm9909_vm7, %v5897_v31, 0.0  ;;  %v20475_v36 = vld [vmem:[#allocation371_spill] sm:$0xff]  ;;  %v12018_v31 = vpack.c.bf16 %v20498_v37, %v20497_v2  ;;  %v20499_v39 = vld [vmem:[#allocation400_spill] sm:$0xff]  ;;  %v20528_v37 = vld [vmem:[#allocation422_spill] sm:$0xff] }
 0x4da   :  { %v11969_v16 = vpack.c.bf16 %v20476_v46, %v20475_v36  ;;  %v20500_v52 = vld [vmem:[#allocation403_spill] sm:$0xff]  ;;  %v20509_v36 = vld [vmem:[#allocation406_spill] sm:$0xff]  ;;  %v20510_v46 = vld [vmem:[#allocation409_spill] sm:$0xff] }
 0x4db   :  { %v18368_v38 = vadd.f32 %v9923_v63, %v9922_v5  ;;  %v11988_v13 = vpack.c.bf16 %v20500_v52, %v20499_v39  ;;  %v20501_v5 = vld [vmem:[#allocation424_spill] sm:$0xff] }
 0x4dc   :  { %v12020_v59 = vpack.c.bf16 %v20502_v24, %v20501_v5  ;;  %v20529_v39 = vld [vmem:[#allocation800_spill] sm:$0xff] }
 0x4dd   :  { %11935 = vmatpush1.bf16.xpose.msra.mxu0 %v11934_v30  ;;  %v20503_v30 = vld [vmem:[#allocation779_spill] sm:$0xff]  ;;  %v20530_v52 = vld [vmem:[#allocation804_spill] sm:$0xff] }
 0x4de   :  { %11967 = vmatpush1.bf16.xpose.msra.mxu1 %v11966_v58  ;;  %11936 = vmatprep.subr.bf16.mxu0 %v12619_v27  ;;  %v20506_v58 = vld [vmem:[#allocation402_spill] sm:$0xff]  ;;  %v20532_v5 = vld [vmem:[#allocation404_spill] sm:$0xff] }
 0x4df   :  { %11968 = vmatprep.subr.bf16.mxu1 %v12619_v27  ;;  %v11990_v63 = vpack.c.bf16 %v20506_v58, %v20505_v61  ;;  %v20535_v61 = vld [vmem:[#allocation407_spill] sm:$0xff]  ;;  %v20536_v58 = vld [vmem:[#allocation410_spill] sm:$0xff] }
 0x4e4   :  { %6995 = vmatmul.mubr.f32.vlgmr.msra.gmra.mrb[58].mxu0 %v20477_v19  ;;  %v20511_v19 = vld [vmem:[#allocation430_spill] sm:$0xff] }
 0x4e5   :  { %7162 = vmatmul.mubr.f32.vlgmr.msra.gmra.mrb[66].mxu1 %v20478_v10  ;;  %11939 = vmatpush3.bf16.xpose.msk.msra.mxu0 %vm17765_vm5, %v11937_v7  ;;  %v12022_v7 = vpack.c.bf16 %v20508_v41, %v20507_v33  ;;  %v20512_v10 = vld [vmem:[#allocation433_spill] sm:$0xff]  ;;  %v20537_v33 = vld [vmem:[#allocation431_spill] sm:$0xff]  ;;  %v20538_v41 = vld [vmem:[#allocation434_spill] sm:$0xff] }
 0x4e6   :  { %11971 = vmatpush3.bf16.xpose.msk.msra.mxu1 %vm17765_vm5, %v11969_v16  ;;  %11940 = vmatprep.subr.bf16.mxu0 %v12619_v27  ;;  %v11992_v16 = vpack.c.bf16 %v20510_v46, %v20509_v36  ;;  %v12024_v32 = vpack.c.bf16 %v20512_v10, %v20511_v19  ;;  %v20539_v36 = vld [vmem:[#allocation413_spill] sm:$0xff]  ;;  %v20540_v46 = vld [vmem:[#allocation416_spill] sm:$0xff] }
 0x4e7   :  { %11972 = vmatprep.subr.bf16.mxu1 %v12619_v27  ;;  %11055 = vmatprep.mubr.msk.f32.mxu0 %vm12620_vm6, %v19997_v53  ;;  %v20541_v19 = vld [vmem:[#allocation437_spill] sm:$0xff]  ;;  %v20542_v10 = vld [vmem:[#allocation440_spill] sm:$0xff] }
 0x4e8   :  { %11074 = vmatprep.mubr.msk.f32.mxu1 %vm12620_vm6, %v19997_v53 }
 0x4ed   :  { %11943 = vmatpush3.bf16.xpose.msk.msra.mxu0 %vm17765_vm5, %v11941_v6 }
 0x4ee   :  { %11975 = vmatpush3.bf16.xpose.msk.msra.mxu1 %vm17765_vm5, %v11973_v17  ;;  %11944 = vmatprep.subr.bf16.mxu0 %v12619_v27  ;;  %v20517_v17 = vld [vmem:[#allocation412_spill] sm:$0xff] }
 0x4ef   :  { %11976 = vmatprep.subr.bf16.mxu1 %v12619_v27  ;;  %v11996_v44 = vpack.c.bf16 %v20518_v14, %v20517_v17  ;;  %v20547_v17 = vld [vmem:[#allocation441_spill] sm:$0xff]  ;;  %v20548_v14 = vld [vmem:[#allocation444_spill] sm:$0xff] }
 0x4f5   :  { %11947 = vmatpush3.bf16.xpose.msk.msra.mxu0 %vm17765_vm5, %v11945_v40  ;;  %v20519_v40 = vld [vmem:[#allocation436_spill] sm:$0xff] }
 0x4f6   :  { %11979 = vmatpush3.bf16.xpose.msk.msra.mxu1 %vm17765_vm5, %v11977_v29  ;;  %11948 = vmatprep.subr.bf16.mxu0 %v12619_v27  ;;  %v12028_v42 = vpack.c.bf16 %v20520_v1, %v20519_v40  ;;  %v20549_v40 = vld [vmem:[#allocation465_spill] sm:$0xff]  ;;  %v20550_v1 = vld [vmem:[#allocation468_spill] sm:$0xff] }
 0x4f7   :  { %11980 = vmatprep.subr.bf16.mxu1 %v12619_v27 }
 0x4fd   :  { %11951 = vmatpush3.bf16.xpose.msk.msra.mxu0 %vm17765_vm5, %v11949_v22 }
 0x4fe   :  { %11983 = vmatpush3.bf16.xpose.msk.msra.mxu1 %vm17765_vm5, %v11981_v47  ;;  %11985 = vmatprep.subr.bf16.mxu0 %v11984_v11  ;;  %v20521_v47 = vld [vmem:[#allocation411_spill] sm:$0xff] }
 0x4ff   :  { %12017 = vmatprep.subr.bf16.mxu1 %v12016_v25  ;;  %v11998_v60 = vpack.c.bf16 %v20522_v4, %v20521_v47  ;;  %v20523_v11 = vld [vmem:[#allocation435_spill] sm:$0xff]  ;;  %v20556_v4 = vld [vmem:[#allocation450_spill] sm:$0xff] }
 0x500   :  { %v12030_v20 = vpack.c.bf16 %v20524_v56, %v20523_v11  ;;  %v20555_v47 = vld [vmem:[#allocation447_spill] sm:$0xff]  ;;  %v20558_v56 = vld [vmem:[#allocation474_spill] sm:$0xff] }
 0x501   :  { %v20557_v11 = vld [vmem:[#allocation471_spill] sm:$0xff] }
 0x504   :  { %11056 = vmatmul.mubr.msk.f32.vlgmr.msra.gmra.mrb[58].mxu0 %vm4564_vm4, %v20503_v30  ;;  %v20534_v30 = vld [vmem:[#allocation428_spill] sm:$0xff] }
 0x505   :  { %11075 = vmatmul.mubr.msk.f32.vlgmr.msra.gmra.mrb[66].mxu1 %vm4564_vm4, %v20504_v18  ;;  %11987 = vmatpush1.bf16.xpose.msra.mxu0 %v11986_v9  ;;  %v20526_v9 = vld [vmem:[#allocation398_spill] sm:$0xff] }
 0x506   :  { %12019 = vmatpush1.bf16.xpose.msra.mxu1 %v12018_v31  ;;  %11989 = vmatprep.subr.bf16.mxu0 %v11988_v13  ;;  %v12001_v2 = vpack.c.bf16 %v20526_v9, %v20525_v23  ;;  %v20531_v13 = vld [vmem:[#allocation401_spill] sm:$0xff]  ;;  %v20561_v9 = vld [vmem:[#allocation478_spill] sm:$0xff] }
 0x507   :  { %12021 = vmatprep.subr.bf16.mxu1 %v12020_v59  ;;  %7328 = vmatprep.mubr.f32.mxu0 %v17602_v45  ;;  %v20514_v45 = vld [vmem:[#allocation408_spill] sm:$0xff]  ;;  %v12005_v24 = vpack.c.bf16 %v20532_v5, %v20531_v13  ;;  %v20533_v59 = vld [vmem:[#allocation425_spill] sm:$0xff]  ;;  %v20568_v13 = vld [vmem:[#allocation463_spill] sm:$0xff] }
 0x508   :  { %7495 = vmatprep.mubr.f32.mxu1 %v17623_v49  ;;  %v11994_v6 = vpack.c.bf16 %v20514_v45, %v20513_v28  ;;  %v20515_v49 = vld [vmem:[#allocation429_spill] sm:$0xff]  ;;  %v12037_v18 = vpack.c.bf16 %v20534_v30, %v20533_v59  ;;  %v20543_v28 = vld [vmem:[#allocation442_spill] sm:$0xff]  ;;  %v20570_v59 = vld [vmem:[#allocation487_spill] sm:$0xff] }
 0x509   :  { %v12026_v26 = vpack.c.bf16 %v20516_v3, %v20515_v49  ;;  %v20544_v45 = vld [vmem:[#allocation445_spill] sm:$0xff]  ;;  %v20545_v49 = vld [vmem:[#allocation466_spill] sm:$0xff] }
 0x50a   :  { %v20546_v3 = vld [vmem:[#allocation469_spill] sm:$0xff] }
 0x50b   :  { %v20560_v23 = vld [vmem:[#allocation457_spill] sm:$0xff] }
 0x50d   :  { %11991 = vmatpush1.bf16.xpose.msra.mxu0 %v11990_v63  ;;  %v12009_v63 = vpack.c.bf16 %v20536_v58, %v20535_v61 }
 0x50e   :  { %12023 = vmatpush1.bf16.xpose.msra.mxu1 %v12022_v7  ;;  %11993 = vmatprep.subr.bf16.mxu0 %v11992_v16  ;;  %v12041_v7 = vpack.c.bf16 %v20538_v41, %v20537_v33  ;;  %v12013_v16 = vpack.c.bf16 %v20540_v46, %v20539_v36  ;;  %v20572_v36 = vld [vmem:[#allocation462_spill] sm:$0xff] }
 0x50f   :  { %12025 = vmatprep.subr.bf16.mxu1 %v12024_v32  ;;  %v12045_v32 = vpack.c.bf16 %v20542_v10, %v20541_v19  ;;  %v20574_v19 = vld [vmem:[#allocation486_spill] sm:$0xff] }
 0x515   :  { %11995 = vmatpush1.bf16.xpose.msra.mxu0 %v11994_v6  ;;  %v12048_v6 = vpack.c.bf16 %v20544_v45, %v20543_v28  ;;  %v20575_v45 = vld [vmem:[#allocation443_spill] sm:$0xff] }
 0x516   :  { %12027 = vmatpush1.bf16.xpose.msra.mxu1 %v12026_v26  ;;  %11997 = vmatprep.subr.bf16.mxu0 %v11996_v44  ;;  %v12080_v26 = vpack.c.bf16 %v20546_v3, %v20545_v49  ;;  %v12050_v44 = vpack.c.bf16 %v20548_v14, %v20547_v17  ;;  %v20578_v3 = vld [vmem:[#allocation470_spill] sm:$0xff]  ;;  %v20579_v17 = vld [vmem:[#allocation801_spill] sm:$0xff] }
 0x517   :  { %12029 = vmatprep.subr.bf16.mxu1 %v12028_v42  ;;  %v6064_v29 = vpop.f32.mrb[52].mxu0  ;;  %v12082_v42 = vpack.c.bf16 %v20550_v1, %v20549_v40  ;;  %v20580_v14 = vld [vmem:[#allocation805_spill] sm:$0xff]  ;;  %v20582_v40 = vld [vmem:[#allocation452_spill] sm:$0xff] }
 0x518   :  { %v6231_v48 = vpop.f32.mrb[60].mxu1  ;;  %v9925_v35 = vsel %vm9909_vm7, %v6064_v29, 0.0  ;;  %v10943_v22 = vpop.f32.mrb[53].mxu0  ;;  %v20551_v29 = vld [vmem:[#allocation448_spill] sm:$0xff] }
 0x519   :  { %v10962_v43 = vpop.f32.mrb[61].mxu1  ;;  %v9926_v21 = vadd.f32 %v9925_v35, %v18368_v38  ;;  %v9927_v25 = vsel %vm9909_vm7, %v6231_v48, 0.0  ;;  %v20527_v38 = vld [vmem:[#allocation419_spill] sm:$0xff]  ;;  %v20553_v22 = vld [vmem:[#allocation472_spill] sm:$0xff] }
 0x51a   :  { %v12033_v31 = vpack.c.bf16 %v20528_v37, %v20527_v38  ;;  %v20552_v48 = vld [vmem:[#allocation451_spill] sm:$0xff]  ;;  %v20563_v38 = vld [vmem:[#allocation453_spill] sm:$0xff] }
 0x51b   :  { %v18457_v62 = vadd.f32 %v9927_v25, %v9926_v21  ;;  %v12052_v35 = vpack.c.bf16 %v20552_v48, %v20551_v29  ;;  %v20554_v43 = vld [vmem:[#allocation475_spill] sm:$0xff]  ;;  %v20559_v25 = vld [vmem:[#allocation454_spill] sm:$0xff]  ;;  %v20584_v29 = vld [vmem:[#allocation476_spill] sm:$0xff] }
 0x51c   :  { %v12084_v21 = vpack.c.bf16 %v20554_v43, %v20553_v22  ;;  %v20586_v22 = vld [vmem:[#allocation458_spill] sm:$0xff] }
 0x51d   :  { %11999 = vmatpush1.bf16.xpose.msra.mxu0 %v11998_v60  ;;  %v12054_v60 = vpack.c.bf16 %v20556_v4, %v20555_v47  ;;  %v20588_v47 = vld [vmem:[#allocation482_spill] sm:$0xff] }
 0x51e   :  { %12031 = vmatpush1.bf16.xpose.msra.mxu1 %v12030_v20  ;;  %12000 = vmatprep.subr.bf16.mxu0 %v12619_v27  ;;  %v12086_v20 = vpack.c.bf16 %v20558_v56, %v20557_v11  ;;  %v20590_v11 = vld [vmem:[#allocation464_spill] sm:$0xff] }
 0x51f   :  { %12032 = vmatprep.subr.bf16.mxu1 %v12619_v27 }
 0x524   :  { %7329 = vmatmul.mubr.f32.vlgmr.msra.gmra.mrb[60].mxu0 %v20529_v39 }
 0x525   :  { %7496 = vmatmul.mubr.f32.vlgmr.msra.gmra.mrb[68].mxu1 %v20530_v52  ;;  %12003 = vmatpush3.bf16.xpose.msk.msra.mxu0 %vm17765_vm5, %v12001_v2  ;;  %v20562_v2 = vld [vmem:[#allocation481_spill] sm:$0xff]  ;;  %v20567_v52 = vld [vmem:[#allocation460_spill] sm:$0xff] }
 0x526   :  { %12035 = vmatpush3.bf16.xpose.msk.msra.mxu1 %vm17765_vm5, %v12033_v31  ;;  %12004 = vmatprep.subr.bf16.mxu0 %v12619_v27  ;;  %v20566_v31 = vld [vmem:[#allocation480_spill] sm:$0xff]  ;;  %v12060_v5 = vpack.c.bf16 %v20568_v13, %v20567_v52 }
 0x527   :  { %12036 = vmatprep.subr.bf16.mxu1 %v12619_v27  ;;  %11093 = vmatprep.mubr.msk.f32.mxu0 %vm12620_vm6, %v19997_v53  ;;  %v20600_v52 = vld [vmem:[#allocation516_spill] sm:$0xff] }
 0x528   :  { %11112 = vmatprep.mubr.msk.f32.mxu1 %vm12620_vm6, %v19997_v53 }
 0x52d   :  { %12007 = vmatpush3.bf16.xpose.msk.msra.mxu0 %vm17765_vm5, %v12005_v24  ;;  %v20569_v24 = vld [vmem:[#allocation484_spill] sm:$0xff] }
 0x52e   :  { %12039 = vmatpush3.bf16.xpose.msk.msra.mxu1 %vm17765_vm5, %v12037_v18  ;;  %12008 = vmatprep.subr.bf16.mxu0 %v12619_v27  ;;  %v12092_v30 = vpack.c.bf16 %v20570_v59, %v20569_v24  ;;  %v20602_v24 = vld [vmem:[#allocation499_spill] sm:$0xff] }
 0x52f   :  { %12040 = vmatprep.subr.bf16.mxu1 %v12619_v27 }
 0x535   :  { %12011 = vmatpush3.bf16.xpose.msk.msra.mxu0 %vm17765_vm5, %v12009_v63 }
 0x536   :  { %12043 = vmatpush3.bf16.xpose.msk.msra.mxu1 %vm17765_vm5, %v12041_v7  ;;  %12012 = vmatprep.subr.bf16.mxu0 %v12619_v27  ;;  %v20571_v7 = vld [vmem:[#allocation459_spill] sm:$0xff] }
 0x537   :  { %12044 = vmatprep.subr.bf16.mxu1 %v12619_v27  ;;  %v12062_v46 = vpack.c.bf16 %v20572_v36, %v20571_v7  ;;  %v20609_v7 = vld [vmem:[#allocation498_spill] sm:$0xff] }
 0x53d   :  { %12015 = vmatpush3.bf16.xpose.msk.msra.mxu0 %vm17765_vm5, %v12013_v16  ;;  %v20573_v16 = vld [vmem:[#allocation483_spill] sm:$0xff] }
 0x53e   :  { %12047 = vmatpush3.bf16.xpose.msk.msra.mxu1 %vm17765_vm5, %v12045_v32  ;;  %12049 = vmatprep.subr.bf16.mxu0 %v12048_v6  ;;  %v12094_v10 = vpack.c.bf16 %v20574_v19, %v20573_v16  ;;  %v20576_v6 = vld [vmem:[#allocation446_spill] sm:$0xff] }
 0x53f   :  { %12081 = vmatprep.subr.bf16.mxu1 %v12080_v26  ;;  %v12065_v49 = vpack.c.bf16 %v20576_v6, %v20575_v45  ;;  %v20611_v16 = vld [vmem:[#allocation522_spill] sm:$0xff]  ;;  %v20615_v6 = vld [vmem:[#allocation529_spill] sm:$0xff] }
 0x540   :  { %v20614_v45 = vld [vmem:[#allocation526_spill] sm:$0xff] }
 0x544   :  { %11094 = vmatmul.mubr.msk.f32.vlgmr.msra.gmra.mrb[60].mxu0 %vm4564_vm4, %v17608_v57  ;;  %v12056_v57 = vpack.c.bf16 %v20560_v23, %v20559_v25  ;;  %v20592_v25 = vld [vmem:[#allocation488_spill] sm:$0xff] }
 0x545   :  { %11113 = vmatmul.mubr.msk.f32.vlgmr.msra.gmra.mrb[68].mxu1 %vm4564_vm4, %v17637_v51  ;;  %12051 = vmatpush1.bf16.xpose.msra.mxu0 %v12050_v44  ;;  %v12088_v51 = vpack.c.bf16 %v20562_v2, %v20561_v9  ;;  %v20581_v44 = vld [vmem:[#allocation449_spill] sm:$0xff] }
 0x546   :  { %12083 = vmatpush1.bf16.xpose.msra.mxu1 %v12082_v42  ;;  %12053 = vmatprep.subr.bf16.mxu0 %v12052_v35  ;;  %v12069_v1 = vpack.c.bf16 %v20582_v40, %v20581_v44  ;;  %v20583_v42 = vld [vmem:[#allocation473_spill] sm:$0xff]  ;;  %v20585_v35 = vld [vmem:[#allocation455_spill] sm:$0xff]  ;;  %v20620_v40 = vld [vmem:[#allocation508_spill] sm:$0xff] }
 0x547   :  { %12085 = vmatprep.subr.bf16.mxu1 %v12084_v21  ;;  %7662 = vmatprep.mubr.f32.mxu0 %v17605_v12  ;;  %v20564_v12 = vld [vmem:[#allocation456_spill] sm:$0xff]  ;;  %v12101_v48 = vpack.c.bf16 %v20584_v29, %v20583_v42  ;;  %v12073_v43 = vpack.c.bf16 %v20586_v22, %v20585_v35  ;;  %v20587_v21 = vld [vmem:[#allocation479_spill] sm:$0xff]  ;;  %v20594_v9 = vld [vmem:[#allocation493_spill] sm:$0xff] }
 0x548   :  { %7829 = vmatprep.mubr.f32.mxu1 %v17627_v0  ;;  %v12058_v37 = vpack.c.bf16 %v20564_v12, %v20563_v38  ;;  %v20565_v0 = vld [vmem:[#allocation477_spill] sm:$0xff]  ;;  %v12105_v4 = vpack.c.bf16 %v20588_v47, %v20587_v21  ;;  %v20622_v29 = vld [vmem:[#allocation532_spill] sm:$0xff] }
 0x549   :  { %v12090_v39 = vpack.c.bf16 %v20566_v31, %v20565_v0  ;;  %v20596_v38 = vld [vmem:[#allocation517_spill] sm:$0xff]  ;;  %v20598_v0 = vld [vmem:[#allocation492_spill] sm:$0xff] }
 0x54d   :  { %12055 = vmatpush1.bf16.xpose.msra.mxu0 %v12054_v60  ;;  %v20589_v60 = vld [vmem:[#allocation461_spill] sm:$0xff] }
 0x54e   :  { %12087 = vmatpush1.bf16.xpose.msra.mxu1 %v12086_v20  ;;  %12057 = vmatprep.subr.bf16.mxu0 %v12056_v57  ;;  %v12077_v56 = vpack.c.bf16 %v20590_v11, %v20589_v60  ;;  %v20591_v20 = vld [vmem:[#allocation485_spill] sm:$0xff]  ;;  %v20593_v57 = vld [vmem:[#allocation490_spill] sm:$0xff]  ;;  %v20624_v11 = vld [vmem:[#allocation507_spill] sm:$0xff] }
 0x54f   :  { %12089 = vmatprep.subr.bf16.mxu1 %v12088_v51  ;;  %v12109_v23 = vpack.c.bf16 %v20592_v25, %v20591_v20  ;;  %v12112_v2 = vpack.c.bf16 %v20594_v9, %v20593_v57  ;;  %v20595_v51 = vld [vmem:[#allocation514_spill] sm:$0xff]  ;;  %v20626_v25 = vld [vmem:[#allocation531_spill] sm:$0xff] }
 0x550   :  { %v12144_v12 = vpack.c.bf16 %v20596_v38, %v20595_v51  ;;  %v20628_v51 = vld [vmem:[#allocation491_spill] sm:$0xff]  ;;  %v20629_v38 = vld [vmem:[#allocation494_spill] sm:$0xff] }
 0x555   :  { %12059 = vmatpush1.bf16.xpose.msra.mxu0 %v12058_v37  ;;  %v20597_v37 = vld [vmem:[#allocation489_spill] sm:$0xff] }
 0x556   :  { %12091 = vmatpush1.bf16.xpose.msra.mxu1 %v12090_v39  ;;  %12061 = vmatprep.subr.bf16.mxu0 %v12060_v5  ;;  %v12114_v31 = vpack.c.bf16 %v20598_v0, %v20597_v37  ;;  %v20599_v39 = vld [vmem:[#allocation513_spill] sm:$0xff]  ;;  %v20601_v5 = vld [vmem:[#allocation496_spill] sm:$0xff]  ;;  %v20631_v37 = vld [vmem:[#allocation518_spill] sm:$0xff] }
 0x557   :  { %12093 = vmatprep.subr.bf16.mxu1 %v12092_v30  ;;  %v6398_v18 = vpop.f32.mrb[54].mxu0  ;;  %v12146_v13 = vpack.c.bf16 %v20600_v52, %v20599_v39  ;;  %v12116_v59 = vpack.c.bf16 %v20602_v24, %v20601_v5  ;;  %v20603_v30 = vld [vmem:[#allocation520_spill] sm:$0xff]  ;;  %v20633_v39 = vld [vmem:[#allocation806_spill] sm:$0xff]  ;;  %v20634_v52 = vld [vmem:[#allocation497_spill] sm:$0xff] }
 0x558   :  { %v6565_v61 = vpop.f32.mrb[62].mxu1  ;;  %v9929_v58 = vsel %vm9909_vm7, %v6398_v18, 0.0  ;;  %v10981_v63 = vpop.f32.mrb[55].mxu0  ;;  %v20604_v18 = vld [vmem:[#allocation523_spill] sm:$0xff]  ;;  %v20636_v24 = vld [vmem:[#allocation521_spill] sm:$0xff] }
 0x559   :  { %v11000_v33 = vpop.f32.mrb[63].mxu1  ;;  %v9930_v41 = vadd.f32 %v9929_v58, %v18457_v62  ;;  %v9931_v32 = vsel %vm9909_vm7, %v6565_v61, 0.0  ;;  %v20577_v62 = vld [vmem:[#allocation467_spill] sm:$0xff]  ;;  %v12148_v61 = vpack.c.bf16 %v20604_v18, %v20603_v30  ;;  %v20605_v58 = vld [vmem:[#allocation784_spill] sm:$0xff] }
 0x55a   :  { %v12097_v26 = vpack.c.bf16 %v20578_v3, %v20577_v62  ;;  %v20606_v63 = vld [vmem:[#allocation787_spill] sm:$0xff]  ;;  %v20607_v33 = vld [vmem:[#allocation812_spill] sm:$0xff]  ;;  %v20616_v62 = vld [vmem:[#allocation501_spill] sm:$0xff] }
 0x55b   :  { %v18546_v28 = vadd.f32 %v9931_v32, %v9930_v41  ;;  %v20608_v41 = vld [vmem:[#allocation495_spill] sm:$0xff]  ;;  %v20613_v32 = vld [vmem:[#allocation505_spill] sm:$0xff]  ;;  %v20617_v3 = vld [vmem:[#allocation504_spill] sm:$0xff] }
 0x55c   :  { %v12118_v36 = vpack.c.bf16 %v20609_v7, %v20608_v41  ;;  %v20638_v18 = vld [vmem:[#allocation503_spill] sm:$0xff]  ;;  %v20642_v7 = vld [vmem:[#allocation509_spill] sm:$0xff] }
 0x55d   :  { %12063 = vmatpush1.bf16.xpose.msra.mxu0 %v12062_v46  ;;  %v20610_v46 = vld [vmem:[#allocation519_spill] sm:$0xff] }
 0x55e   :  { %12095 = vmatpush1.bf16.xpose.msra.mxu1 %v12094_v10  ;;  %12064 = vmatprep.subr.bf16.mxu0 %v12619_v27  ;;  %v12150_v19 = vpack.c.bf16 %v20611_v16, %v20610_v46  ;;  %v20612_v10 = vld [vmem:[#allocation502_spill] sm:$0xff]  ;;  %v20644_v16 = vld [vmem:[#allocation533_spill] sm:$0xff] }
 0x55f   :  { %12096 = vmatprep.subr.bf16.mxu1 %v12619_v27 }
 0x564   :  { %7663 = vmatmul.mubr.f32.vlgmr.msra.gmra.mrb[62].mxu0 %v20579_v17  ;;  %v20618_v17 = vld [vmem:[#allocation525_spill] sm:$0xff] }
 0x565   :  { %7830 = vmatmul.mubr.f32.vlgmr.msra.gmra.mrb[70].mxu1 %v20580_v14  ;;  %12067 = vmatpush3.bf16.xpose.msk.msra.mxu0 %vm17765_vm5, %v12065_v49  ;;  %v12152_v49 = vpack.c.bf16 %v20615_v6, %v20614_v45  ;;  %v20619_v14 = vld [vmem:[#allocation528_spill] sm:$0xff]  ;;  %v20648_v6 = vld [vmem:[#allocation562_spill] sm:$0xff] }
 0x566   :  { %12099 = vmatpush3.bf16.xpose.msk.msra.mxu1 %vm17765_vm5, %v12097_v26  ;;  %12068 = vmatprep.subr.bf16.mxu0 %v12619_v27  ;;  %v12122_v26 = vpack.c.bf16 %v20617_v3, %v20616_v62  ;;  %v12154_v44 = vpack.c.bf16 %v20619_v14, %v20618_v17  ;;  %v20650_v3 = vld [vmem:[#allocation537_spill] sm:$0xff] }
 0x567   :  { %12100 = vmatprep.subr.bf16.mxu1 %v12619_v27  ;;  %11131 = vmatprep.mubr.msk.f32.mxu0 %vm12620_vm6, %v19997_v53  ;;  %v20652_v14 = vld [vmem:[#allocation561_spill] sm:$0xff] }
 0x568   :  { %11150 = vmatprep.mubr.msk.f32.mxu1 %vm12620_vm6, %v19997_v53 }
 0x56d   :  { %12071 = vmatpush3.bf16.xpose.msk.msra.mxu0 %vm17765_vm5, %v12069_v1  ;;  %v20621_v1 = vld [vmem:[#allocation511_spill] sm:$0xff] }
 0x56e   :  { %12103 = vmatpush3.bf16.xpose.msk.msra.mxu1 %vm17765_vm5, %v12101_v48  ;;  %12072 = vmatprep.subr.bf16.mxu0 %v12619_v27  ;;  %v12124_v42 = vpack.c.bf16 %v20621_v1, %v20620_v40  ;;  %v20623_v48 = vld [vmem:[#allocation535_spill] sm:$0xff]  ;;  %v20654_v1 = vld [vmem:[#allocation544_spill] sm:$0xff] }
 0x56f   :  { %12104 = vmatprep.subr.bf16.mxu1 %v12619_v27  ;;  %v12156_v35 = vpack.c.bf16 %v20623_v48, %v20622_v29  ;;  %v20656_v48 = vld [vmem:[#allocation568_spill] sm:$0xff] }
 0x575   :  { %12075 = vmatpush3.bf16.xpose.msk.msra.mxu0 %vm17765_vm5, %v12073_v43 }
 0x576   :  { %12107 = vmatpush3.bf16.xpose.msk.msra.mxu1 %vm17765_vm5, %v12105_v4  ;;  %12076 = vmatprep.subr.bf16.mxu0 %v12619_v27 }
 0x577   :  { %12108 = vmatprep.subr.bf16.mxu1 %v12619_v27 }
 0x57d   :  { %12079 = vmatpush3.bf16.xpose.msk.msra.mxu0 %vm17765_vm5, %v12077_v56  ;;  %v20625_v56 = vld [vmem:[#allocation510_spill] sm:$0xff] }
 0x57e   :  { %12111 = vmatpush3.bf16.xpose.msk.msra.mxu1 %vm17765_vm5, %v12109_v23  ;;  %12113 = vmatprep.subr.bf16.mxu0 %v12112_v2  ;;  %v12126_v20 = vpack.c.bf16 %v20625_v56, %v20624_v11  ;;  %v20627_v23 = vld [vmem:[#allocation534_spill] sm:$0xff] }
 0x57f   :  { %12145 = vmatprep.subr.bf16.mxu1 %v12144_v12  ;;  %v12158_v57 = vpack.c.bf16 %v20627_v23, %v20626_v25  ;;  %v12129_v12 = vpack.c.bf16 %v20629_v38, %v20628_v51  ;;  %v20663_v11 = vld [vmem:[#allocation546_spill] sm:$0xff] }
 0x580   :  { %v20665_v25 = vld [vmem:[#allocation570_spill] sm:$0xff] }
 0x581   :  { %v20668_v38 = vld [vmem:[#allocation574_spill] sm:$0xff] }
 0x584   :  { %11132 = vmatmul.mubr.msk.f32.vlgmr.msra.gmra.mrb[62].mxu0 %vm4564_vm4, %v17611_v55  ;;  %v12120_v55 = vpack.c.bf16 %v20613_v32, %v20612_v10  ;;  %v20646_v32 = vld [vmem:[#allocation538_spill] sm:$0xff] }
 0x585   :  { %11151 = vmatmul.mubr.msk.f32.vlgmr.msra.gmra.mrb[70].mxu1 %vm4564_vm4, %v20605_v58  ;;  %12115 = vmatpush1.bf16.xpose.msra.mxu0 %v12114_v31  ;;  %v20632_v31 = vld [vmem:[#allocation802_spill] sm:$0xff] }
 0x586   :  { %12147 = vmatpush1.bf16.xpose.msra.mxu1 %v12146_v13  ;;  %12117 = vmatprep.subr.bf16.mxu0 %v12116_v59  ;;  %v20635_v13 = vld [vmem:[#allocation500_spill] sm:$0xff] }
 0x587   :  { %12149 = vmatprep.subr.bf16.mxu1 %v12148_v61  ;;  %7996 = vmatprep.mubr.f32.mxu0 %v20606_v63  ;;  %v12133_v5 = vpack.c.bf16 %v20635_v13, %v20634_v52  ;;  %v20637_v59 = vld [vmem:[#allocation524_spill] sm:$0xff]  ;;  %v20639_v61 = vld [vmem:[#allocation506_spill] sm:$0xff]  ;;  %v20640_v63 = vld [vmem:[#allocation527_spill] sm:$0xff] }
 0x588   :  { %8163 = vmatprep.mubr.f32.mxu1 %v20607_v33  ;;  %v12165_v30 = vpack.c.bf16 %v20637_v59, %v20636_v24  ;;  %v12137_v58 = vpack.c.bf16 %v20639_v61, %v20638_v18  ;;  %v20641_v33 = vld [vmem:[#allocation530_spill] sm:$0xff]  ;;  %v20673_v52 = vld [vmem:[#allocation576_spill] sm:$0xff]  ;;  %v20675_v24 = vld [vmem:[#allocation559_spill] sm:$0xff] }
 0x589   :  { %v12169_v41 = vpack.c.bf16 %v20641_v33, %v20640_v63  ;;  %v20677_v18 = vld [vmem:[#allocation583_spill] sm:$0xff] }
 0x58d   :  { %12119 = vmatpush1.bf16.xpose.msra.mxu0 %v12118_v36  ;;  %v20643_v36 = vld [vmem:[#allocation512_spill] sm:$0xff] }
 0x58e   :  { %12151 = vmatpush1.bf16.xpose.msra.mxu1 %v12150_v19  ;;  %12121 = vmatprep.subr.bf16.mxu0 %v12120_v55  ;;  %v12141_v46 = vpack.c.bf16 %v20643_v36, %v20642_v7  ;;  %v20645_v19 = vld [vmem:[#allocation536_spill] sm:$0xff]  ;;  %v20647_v55 = vld [vmem:[#allocation541_spill] sm:$0xff] }
 0x58f   :  { %12153 = vmatprep.subr.bf16.mxu1 %v12152_v49  ;;  %v12173_v10 = vpack.c.bf16 %v20645_v19, %v20644_v16  ;;  %v12176_v45 = vpack.c.bf16 %v20647_v55, %v20646_v32  ;;  %v20649_v49 = vld [vmem:[#allocation565_spill] sm:$0xff]  ;;  %v20679_v16 = vld [vmem:[#allocation558_spill] sm:$0xff] }
 0x590   :  { %v12208_v62 = vpack.c.bf16 %v20649_v49, %v20648_v6  ;;  %v20681_v32 = vld [vmem:[#allocation582_spill] sm:$0xff]  ;;  %v20682_v49 = vld [vmem:[#allocation539_spill] sm:$0xff] }
 0x595   :  { %12123 = vmatpush1.bf16.xpose.msra.mxu0 %v12122_v26  ;;  %v20651_v26 = vld [vmem:[#allocation540_spill] sm:$0xff] }
 0x596   :  { %12155 = vmatpush1.bf16.xpose.msra.mxu1 %v12154_v44  ;;  %12125 = vmatprep.subr.bf16.mxu0 %v12124_v42  ;;  %v12178_v17 = vpack.c.bf16 %v20651_v26, %v20650_v3  ;;  %v20653_v44 = vld [vmem:[#allocation564_spill] sm:$0xff]  ;;  %v20655_v42 = vld [vmem:[#allocation547_spill] sm:$0xff]  ;;  %v20685_v26 = vld [vmem:[#allocation566_spill] sm:$0xff] }
 0x597   :  { %12157 = vmatprep.subr.bf16.mxu1 %v12156_v35  ;;  %v6732_v22 = vpop.f32.mrb[56].mxu0  ;;  %v12210_v40 = vpack.c.bf16 %v20653_v44, %v20652_v14  ;;  %v12180_v29 = vpack.c.bf16 %v20655_v42, %v20654_v1  ;;  %v20657_v35 = vld [vmem:[#allocation571_spill] sm:$0xff]  ;;  %v20689_v1 = vld [vmem:[#allocation548_spill] sm:$0xff] }
 0x598   :  { %v6899_v43 = vpop.f32.mrb[64].mxu1  ;;  %v9933_v21 = vsel %vm9909_vm7, %v6732_v22, 0.0  ;;  %v11019_v47 = vpop.f32.mrb[57].mxu0  ;;  %v12212_v22 = vpack.c.bf16 %v20657_v35, %v20656_v48  ;;  %v20686_v14 = vld [vmem:[#allocation803_spill] sm:$0xff]  ;;  %v20691_v48 = vld [vmem:[#allocation572_spill] sm:$0xff] }
 0x599   :  { %v11038_v4 = vpop.f32.mrb[65].mxu1  ;;  %v9934_v60 = vadd.f32 %v9933_v21, %v18546_v28  ;;  %v9935_v9 = vsel %vm9909_vm7, %v6899_v43, 0.0  ;;  %v20630_v28 = vld [vmem:[#allocation515_spill] sm:$0xff]  ;;  %v20658_v43 = vld [vmem:[#allocation782_spill] sm:$0xff]  ;;  %v20660_v47 = vld [vmem:[#allocation781_spill] sm:$0xff] }
 0x59a   :  { %v12161_v0 = vpack.c.bf16 %v20631_v37, %v20630_v28  ;;  %v20659_v21 = vld [vmem:[#allocation814_spill] sm:$0xff]  ;;  %v20661_v4 = vld [vmem:[#allocation813_spill] sm:$0xff]  ;;  %v20687_v44 = vld [vmem:[#allocation807_spill] sm:$0xff] }
 0x59b   :  { %v18635_v2 = vadd.f32 %v9935_v9, %v9934_v60  ;;  %v20662_v60 = vld [vmem:[#allocation543_spill] sm:$0xff]  ;;  %v20667_v9 = vld [vmem:[#allocation553_spill] sm:$0xff] }
 0x59c   :  { %v12182_v56 = vpack.c.bf16 %v20663_v11, %v20662_v60  ;;  %v20670_v37 = vld [vmem:[#allocation549_spill] sm:$0xff] }
 0x59d   :  { %12127 = vmatpush1.bf16.xpose.msra.mxu0 %v12126_v20  ;;  %v20664_v20 = vld [vmem:[#allocation567_spill] sm:$0xff]  ;;  %v20696_v11 = vld [vmem:[#allocation557_spill] sm:$0xff] }
 0x59e   :  { %12159 = vmatpush1.bf16.xpose.msra.mxu1 %v12158_v57  ;;  %12128 = vmatprep.subr.bf16.mxu0 %v12619_v27  ;;  %v12214_v23 = vpack.c.bf16 %v20665_v25, %v20664_v20  ;;  %v20666_v57 = vld [vmem:[#allocation550_spill] sm:$0xff]  ;;  %v20698_v25 = vld [vmem:[#allocation581_spill] sm:$0xff] }
 0x59f   :  { %12160 = vmatprep.subr.bf16.mxu1 %v12619_v27  ;;  %v12184_v51 = vpack.c.bf16 %v20667_v9, %v20666_v57  ;;  %v20700_v9 = vld [vmem:[#allocation586_spill] sm:$0xff] }
 0x5a4   :  { %7997 = vmatmul.mubr.f32.vlgmr.msra.gmra.mrb[64].mxu0 %v20632_v31 }
 0x5a5   :  { %8164 = vmatmul.mubr.f32.vlgmr.msra.gmra.mrb[72].mxu1 %v20633_v39  ;;  %12131 = vmatpush3.bf16.xpose.msk.msra.mxu0 %vm17765_vm5, %v12129_v12  ;;  %v20669_v12 = vld [vmem:[#allocation577_spill] sm:$0xff] }
 0x5a6   :  { %12163 = vmatpush3.bf16.xpose.msk.msra.mxu1 %vm17765_vm5, %v12161_v0  ;;  %12132 = vmatprep.subr.bf16.mxu0 %v12619_v27  ;;  %v12216_v28 = vpack.c.bf16 %v20669_v12, %v20668_v38  ;;  %v20671_v0 = vld [vmem:[#allocation552_spill] sm:$0xff]  ;;  %v20672_v39 = vld [vmem:[#allocation573_spill] sm:$0xff]  ;;  %v20702_v12 = vld [vmem:[#allocation610_spill] sm:$0xff] }
 0x5a7   :  { %12164 = vmatprep.subr.bf16.mxu1 %v12619_v27  ;;  %11169 = vmatprep.mubr.msk.f32.mxu0 %vm12620_vm6, %v19997_v53  ;;  %v12186_v31 = vpack.c.bf16 %v20671_v0, %v20670_v37  ;;  %v12218_v13 = vpack.c.bf16 %v20673_v52, %v20672_v39  ;;  %v20704_v0 = vld [vmem:[#allocation585_spill] sm:$0xff] }
 0x5a8   :  { %11188 = vmatprep.mubr.msk.f32.mxu1 %vm12620_vm6, %v19997_v53  ;;  %v20706_v52 = vld [vmem:[#allocation609_spill] sm:$0xff] }
 0x5ad   :  { %12135 = vmatpush3.bf16.xpose.msk.msra.mxu0 %vm17765_vm5, %v12133_v5  ;;  %v20674_v5 = vld [vmem:[#allocation556_spill] sm:$0xff] }
 0x5ae   :  { %12167 = vmatpush3.bf16.xpose.msk.msra.mxu1 %vm17765_vm5, %v12165_v30  ;;  %12136 = vmatprep.subr.bf16.mxu0 %v12619_v27  ;;  %v12188_v59 = vpack.c.bf16 %v20675_v24, %v20674_v5  ;;  %v20676_v30 = vld [vmem:[#allocation580_spill] sm:$0xff] }
 0x5af   :  { %12168 = vmatprep.subr.bf16.mxu1 %v12619_v27  ;;  %v12220_v61 = vpack.c.bf16 %v20677_v18, %v20676_v30  ;;  %v20708_v24 = vld [vmem:[#allocation592_spill] sm:$0xff] }
 0x5b0   :  { %v20710_v18 = vld [vmem:[#allocation616_spill] sm:$0xff] }
 0x5b5   :  { %12139 = vmatpush3.bf16.xpose.msk.msra.mxu0 %vm17765_vm5, %v12137_v58 }
 0x5b6   :  { %12171 = vmatpush3.bf16.xpose.msk.msra.mxu1 %vm17765_vm5, %v12169_v41  ;;  %12140 = vmatprep.subr.bf16.mxu0 %v12619_v27 }
 0x5b7   :  { %12172 = vmatprep.subr.bf16.mxu1 %v12619_v27 }
 0x5bd   :  { %12143 = vmatpush3.bf16.xpose.msk.msra.mxu0 %vm17765_vm5, %v12141_v46  ;;  %v20678_v46 = vld [vmem:[#allocation555_spill] sm:$0xff] }
 0x5be   :  { %12175 = vmatpush3.bf16.xpose.msk.msra.mxu1 %vm17765_vm5, %v12173_v10  ;;  %12177 = vmatprep.subr.bf16.mxu0 %v12176_v45  ;;  %v12190_v19 = vpack.c.bf16 %v20679_v16, %v20678_v46  ;;  %v20680_v10 = vld [vmem:[#allocation579_spill] sm:$0xff]  ;;  %v20717_v16 = vld [vmem:[#allocation618_spill] sm:$0xff] }
 0x5bf   :  { %12209 = vmatprep.subr.bf16.mxu1 %v12208_v62  ;;  %v12222_v55 = vpack.c.bf16 %v20681_v32, %v20680_v10  ;;  %v20683_v62 = vld [vmem:[#allocation542_spill] sm:$0xff]  ;;  %v20716_v46 = vld [vmem:[#allocation615_spill] sm:$0xff]  ;;  %v20719_v32 = vld [vmem:[#allocation601_spill] sm:$0xff] }
 0x5c0   :  { %v12193_v3 = vpack.c.bf16 %v20683_v62, %v20682_v49  ;;  %v20718_v10 = vld [vmem:[#allocation598_spill] sm:$0xff]  ;;  %v20721_v49 = vld [vmem:[#allocation625_spill] sm:$0xff] }
 0x5c4   :  { %11170 = vmatmul.mubr.msk.f32.vlgmr.msra.gmra.mrb[64].mxu0 %vm4564_vm4, %v20658_v43  ;;  %v20693_v43 = vld [vmem:[#allocation554_spill] sm:$0xff] }
 0x5c5   :  { %11189 = vmatmul.mubr.msk.f32.vlgmr.msra.gmra.mrb[72].mxu1 %vm4564_vm4, %v20659_v21  ;;  %12179 = vmatpush1.bf16.xpose.msra.mxu0 %v12178_v17 }
 0x5c6   :  { %12211 = vmatpush1.bf16.xpose.msra.mxu1 %v12210_v40  ;;  %12181 = vmatprep.subr.bf16.mxu0 %v12180_v29  ;;  %v20688_v40 = vld [vmem:[#allocation545_spill] sm:$0xff] }
 0x5c7   :  { %12213 = vmatprep.subr.bf16.mxu1 %v12212_v22  ;;  %8330 = vmatprep.mubr.f32.mxu0 %v20660_v47  ;;  %v12197_v42 = vpack.c.bf16 %v20689_v1, %v20688_v40  ;;  %v20690_v29 = vld [vmem:[#allocation569_spill] sm:$0xff]  ;;  %v20692_v22 = vld [vmem:[#allocation551_spill] sm:$0xff]  ;;  %v20728_v1 = vld [vmem:[#allocation628_spill] sm:$0xff] }
 0x5c8   :  { %8497 = vmatprep.mubr.f32.mxu1 %v20661_v4  ;;  %v12229_v35 = vpack.c.bf16 %v20691_v48, %v20690_v29  ;;  %v12201_v21 = vpack.c.bf16 %v20693_v43, %v20692_v22  ;;  %v20694_v47 = vld [vmem:[#allocation575_spill] sm:$0xff]  ;;  %v20695_v4 = vld [vmem:[#allocation578_spill] sm:$0xff] }
 0x5c9   :  { %v12233_v60 = vpack.c.bf16 %v20695_v4, %v20694_v47  ;;  %v20730_v4 = vld [vmem:[#allocation603_spill] sm:$0xff] }
 0x5cd   :  { %12183 = vmatpush1.bf16.xpose.msra.mxu0 %v12182_v56  ;;  %v20697_v56 = vld [vmem:[#allocation560_spill] sm:$0xff] }
 0x5ce   :  { %12215 = vmatpush1.bf16.xpose.msra.mxu1 %v12214_v23  ;;  %12185 = vmatprep.subr.bf16.mxu0 %v12184_v51  ;;  %v12205_v20 = vpack.c.bf16 %v20697_v56, %v20696_v11  ;;  %v20699_v23 = vld [vmem:[#allocation584_spill] sm:$0xff]  ;;  %v20701_v51 = vld [vmem:[#allocation589_spill] sm:$0xff]  ;;  %v20732_v56 = vld [vmem:[#allocation627_spill] sm:$0xff] }
 0x5cf   :  { %12217 = vmatprep.subr.bf16.mxu1 %v12216_v28  ;;  %v12237_v57 = vpack.c.bf16 %v20699_v23, %v20698_v25  ;;  %v12240_v38 = vpack.c.bf16 %v20701_v51, %v20700_v9  ;;  %v20703_v28 = vld [vmem:[#allocation613_spill] sm:$0xff]  ;;  %v20734_v9 = vld [vmem:[#allocation587_spill] sm:$0xff]  ;;  %v20735_v51 = vld [vmem:[#allocation590_spill] sm:$0xff] }
 0x5d0   :  { %v12272_v37 = vpack.c.bf16 %v20703_v28, %v20702_v12  ;;  %v20737_v12 = vld [vmem:[#allocation614_spill] sm:$0xff] }
 0x5d5   :  { %12187 = vmatpush1.bf16.xpose.msra.mxu0 %v12186_v31  ;;  %v20705_v31 = vld [vmem:[#allocation588_spill] sm:$0xff] }
 0x5d6   :  { %12219 = vmatpush1.bf16.xpose.msra.mxu1 %v12218_v13  ;;  %12189 = vmatprep.subr.bf16.mxu0 %v12188_v59  ;;  %v12242_v39 = vpack.c.bf16 %v20705_v31, %v20704_v0  ;;  %v20707_v13 = vld [vmem:[#allocation612_spill] sm:$0xff]  ;;  %v20709_v59 = vld [vmem:[#allocation595_spill] sm:$0xff]  ;;  %v20739_v0 = vld [vmem:[#allocation785_spill] sm:$0xff] }
 0x5d7   :  { %12221 = vmatprep.subr.bf16.mxu1 %v12220_v61  ;;  %v7066_v58 = vpop.f32.mrb[58].mxu0  ;;  %v12274_v5 = vpack.c.bf16 %v20707_v13, %v20706_v52  ;;  %v12244_v30 = vpack.c.bf16 %v20709_v59, %v20708_v24  ;;  %v20711_v61 = vld [vmem:[#allocation619_spill] sm:$0xff]  ;;  %v20740_v31 = vld [vmem:[#allocation593_spill] sm:$0xff] }
 0x5d8   :  { %v7233_v63 = vpop.f32.mrb[66].mxu1  ;;  %v9937_v33 = vsel %vm9909_vm7, %v7066_v58, 0.0  ;;  %v11057_v41 = vpop.f32.mrb[59].mxu0  ;;  %v12276_v58 = vpack.c.bf16 %v20711_v61, %v20710_v18  ;;  %v20742_v13 = vld [vmem:[#allocation617_spill] sm:$0xff]  ;;  %v20744_v59 = vld [vmem:[#allocation599_spill] sm:$0xff] }
 0x5d9   :  { %v11076_v7 = vpop.f32.mrb[67].mxu1  ;;  %v9938_v36 = vadd.f32 %v9937_v33, %v18635_v2  ;;  %v9939_v45 = vsel %vm9909_vm7, %v7233_v63, 0.0  ;;  %v20684_v2 = vld [vmem:[#allocation563_spill] sm:$0xff] }
 0x5da   :  { %v12225_v17 = vpack.c.bf16 %v20685_v26, %v20684_v2  ;;  %v20712_v63 = vld [vmem:[#allocation783_spill] sm:$0xff]  ;;  %v20715_v7 = vld [vmem:[#allocation594_spill] sm:$0xff]  ;;  %v20725_v26 = vld [vmem:[#allocation624_spill] sm:$0xff] }
 0x5db   :  { %v18724_v6 = vadd.f32 %v9939_v45, %v9938_v36  ;;  %v20713_v33 = vld [vmem:[#allocation815_spill] sm:$0xff]  ;;  %v20720_v45 = vld [vmem:[#allocation622_spill] sm:$0xff] }
 0x5dc   :  { %v20714_v41 = vld [vmem:[#allocation591_spill] sm:$0xff]  ;;  %v12280_v62 = vpack.c.bf16 %v20721_v49, %v20720_v45  ;;  %v20755_v45 = vld [vmem:[#allocation661_spill] sm:$0xff] }
 0x5dd   :  { %12191 = vmatpush1.bf16.xpose.msra.mxu0 %v12190_v19  ;;  %v12246_v36 = vpack.c.bf16 %v20715_v7, %v20714_v41  ;;  %v12278_v19 = vpack.c.bf16 %v20717_v16, %v20716_v46  ;;  %v20746_v61 = vld [vmem:[#allocation623_spill] sm:$0xff]  ;;  %v20749_v41 = vld [vmem:[#allocation608_spill] sm:$0xff] }
 0x5de   :  { %12223 = vmatpush1.bf16.xpose.msra.mxu1 %v12222_v55  ;;  %12192 = vmatprep.subr.bf16.mxu0 %v12619_v27  ;;  %v12248_v55 = vpack.c.bf16 %v20719_v32, %v20718_v10  ;;  %v20751_v46 = vld [vmem:[#allocation632_spill] sm:$0xff]  ;;  %v20753_v10 = vld [vmem:[#allocation637_spill] sm:$0xff] }
 0x5df   :  { %12224 = vmatprep.subr.bf16.mxu1 %v12619_v27 }
 0x5e4   :  { %8331 = vmatmul.mubr.f32.vlgmr.msra.gmra.mrb[66].mxu0 %v20686_v14  ;;  %v20726_v14 = vld [vmem:[#allocation604_spill] sm:$0xff] }
 0x5e5   :  { %8498 = vmatmul.mubr.f32.vlgmr.msra.gmra.mrb[74].mxu1 %v20687_v44  ;;  %12195 = vmatpush3.bf16.xpose.msk.msra.mxu0 %vm17765_vm5, %v12193_v3  ;;  %v20722_v3 = vld [vmem:[#allocation597_spill] sm:$0xff]  ;;  %v20727_v44 = vld [vmem:[#allocation607_spill] sm:$0xff] }
 0x5e6   :  { %12227 = vmatpush3.bf16.xpose.msk.msra.mxu1 %vm17765_vm5, %v12225_v17  ;;  %12196 = vmatprep.subr.bf16.mxu0 %v12619_v27  ;;  %v12252_v40 = vpack.c.bf16 %v20727_v44, %v20726_v14  ;;  %v20761_v14 = vld [vmem:[#allocation643_spill] sm:$0xff] }
 0x5e7   :  { %12228 = vmatprep.subr.bf16.mxu1 %v12619_v27  ;;  %11207 = vmatprep.mubr.msk.f32.mxu0 %vm12620_vm6, %v19997_v53 }
 0x5e8   :  { %11226 = vmatprep.mubr.msk.f32.mxu1 %vm12620_vm6, %v19997_v53 }
 0x5ed   :  { %12199 = vmatpush3.bf16.xpose.msk.msra.mxu0 %vm17765_vm5, %v12197_v42  ;;  %v20729_v42 = vld [vmem:[#allocation631_spill] sm:$0xff] }
 0x5ee   :  { %12231 = vmatpush3.bf16.xpose.msk.msra.mxu1 %vm17765_vm5, %v12229_v35  ;;  %12200 = vmatprep.subr.bf16.mxu0 %v12619_v27  ;;  %v12284_v29 = vpack.c.bf16 %v20729_v42, %v20728_v1  ;;  %v20763_v1 = vld [vmem:[#allocation667_spill] sm:$0xff] }
 0x5ef   :  { %12232 = vmatprep.subr.bf16.mxu1 %v12619_v27 }
 0x5f5   :  { %12203 = vmatpush3.bf16.xpose.msk.msra.mxu0 %vm17765_vm5, %v12201_v21 }
 0x5f6   :  { %12235 = vmatpush3.bf16.xpose.msk.msra.mxu1 %vm17765_vm5, %v12233_v60  ;;  %12204 = vmatprep.subr.bf16.mxu0 %v12619_v27  ;;  %v20731_v60 = vld [vmem:[#allocation606_spill] sm:$0xff] }
 0x5f7   :  { %12236 = vmatprep.subr.bf16.mxu1 %v12619_v27  ;;  %v12254_v11 = vpack.c.bf16 %v20731_v60, %v20730_v4  ;;  %v20770_v60 = vld [vmem:[#allocation646_spill] sm:$0xff] }
 0x5fd   :  { %12207 = vmatpush3.bf16.xpose.msk.msra.mxu0 %vm17765_vm5, %v12205_v20  ;;  %v20733_v20 = vld [vmem:[#allocation630_spill] sm:$0xff] }
 0x5fe   :  { %12239 = vmatpush3.bf16.xpose.msk.msra.mxu1 %vm17765_vm5, %v12237_v57  ;;  %12241 = vmatprep.subr.bf16.mxu0 %v12240_v38  ;;  %v12286_v25 = vpack.c.bf16 %v20733_v20, %v20732_v56  ;;  %v12257_v38 = vpack.c.bf16 %v20735_v51, %v20734_v9  ;;  %v20772_v56 = vld [vmem:[#allocation670_spill] sm:$0xff]  ;;  %v20773_v20 = vld [vmem:[#allocation673_spill] sm:$0xff] }
 0x5ff   :  { %12273 = vmatprep.subr.bf16.mxu1 %v12272_v37  ;;  %v20738_v37 = vld [vmem:[#allocation808_spill] sm:$0xff]  ;;  %v20776_v51 = vld [vmem:[#allocation669_spill] sm:$0xff] }
 0x604   :  { %11208 = vmatmul.mubr.msk.f32.vlgmr.msra.gmra.mrb[66].mxu0 %vm4564_vm4, %v20712_v63 }
 0x605   :  { %11227 = vmatmul.mubr.msk.f32.vlgmr.msra.gmra.mrb[74].mxu1 %vm4564_vm4, %v20713_v33  ;;  %12243 = vmatpush1.bf16.xpose.msra.mxu0 %v12242_v39  ;;  %v20741_v39 = vld [vmem:[#allocation596_spill] sm:$0xff]  ;;  %v20748_v33 = vld [vmem:[#allocation605_spill] sm:$0xff] }
 0x606   :  { %12275 = vmatpush1.bf16.xpose.msra.mxu1 %v12274_v5  ;;  %12245 = vmatprep.subr.bf16.mxu0 %v12244_v30  ;;  %v12261_v52 = vpack.c.bf16 %v20741_v39, %v20740_v31  ;;  %v20743_v5 = vld [vmem:[#allocation620_spill] sm:$0xff]  ;;  %v20745_v30 = vld [vmem:[#allocation602_spill] sm:$0xff]  ;;  %v12269_v7 = vpack.c.bf16 %v20749_v41, %v20748_v33  ;;  %v20781_v31 = vld [vmem:[#allocation679_spill] sm:$0xff] }
 0x607   :  { %12277 = vmatprep.subr.bf16.mxu1 %v12276_v58  ;;  %8664 = vmatprep.mubr.f32.mxu0 %v17668_v8  ;;  %v20723_v8 = vld [vmem:[#allocation600_spill] sm:$0xff]  ;;  %v12293_v24 = vpack.c.bf16 %v20743_v5, %v20742_v13  ;;  %v12265_v18 = vpack.c.bf16 %v20745_v30, %v20744_v59  ;;  %v20747_v58 = vld [vmem:[#allocation626_spill] sm:$0xff] }
 0x608   :  { %8831 = vmatprep.mubr.f32.mxu1 %v17687_v34  ;;  %v12250_v2 = vpack.c.bf16 %v20723_v8, %v20722_v3  ;;  %v20724_v34 = vld [vmem:[#allocation621_spill] sm:$0xff]  ;;  %v12297_v63 = vpack.c.bf16 %v20747_v58, %v20746_v61  ;;  %v20757_v3 = vld [vmem:[#allocation636_spill] sm:$0xff]  ;;  %v20783_v61 = vld [vmem:[#allocation654_spill] sm:$0xff] }
 0x609   :  { %v12282_v17 = vpack.c.bf16 %v20725_v26, %v20724_v34  ;;  %v20759_v34 = vld [vmem:[#allocation660_spill] sm:$0xff]  ;;  %v20785_v33 = vld [vmem:[#allocation678_spill] sm:$0xff] }
 0x60d   :  { %12247 = vmatpush1.bf16.xpose.msra.mxu0 %v12246_v36  ;;  %v20750_v36 = vld [vmem:[#allocation629_spill] sm:$0xff] }
 0x60e   :  { %12279 = vmatpush1.bf16.xpose.msra.mxu1 %v12278_v19  ;;  %12249 = vmatprep.subr.bf16.mxu0 %v12248_v55  ;;  %v12301_v16 = vpack.c.bf16 %v20751_v46, %v20750_v36  ;;  %v20752_v19 = vld [vmem:[#allocation634_spill] sm:$0xff]  ;;  %v20786_v46 = vld [vmem:[#allocation635_spill] sm:$0xff] }
 0x60f   :  { %12281 = vmatprep.subr.bf16.mxu1 %v12280_v62  ;;  %v12304_v32 = vpack.c.bf16 %v20753_v10, %v20752_v19  ;;  %v20754_v55 = vld [vmem:[#allocation658_spill] sm:$0xff]  ;;  %v20756_v62 = vld [vmem:[#allocation633_spill] sm:$0xff] }
 0x610   :  { %v12336_v49 = vpack.c.bf16 %v20755_v45, %v20754_v55  ;;  %v12306_v8 = vpack.c.bf16 %v20757_v3, %v20756_v62  ;;  %v20789_v10 = vld [vmem:[#allocation662_spill] sm:$0xff]  ;;  %v20790_v55 = vld [vmem:[#allocation809_spill] sm:$0xff]  ;;  %v20793_v62 = vld [vmem:[#allocation644_spill] sm:$0xff] }
 0x611   :  { %v20791_v45 = vld [vmem:[#allocation786_spill] sm:$0xff] }
 0x615   :  { %12251 = vmatpush1.bf16.xpose.msra.mxu0 %v12250_v2  ;;  %v20758_v2 = vld [vmem:[#allocation657_spill] sm:$0xff] }
 0x616   :  { %12283 = vmatpush1.bf16.xpose.msra.mxu1 %v12282_v17  ;;  %12253 = vmatprep.subr.bf16.mxu0 %v12252_v40  ;;  %v12338_v26 = vpack.c.bf16 %v20759_v34, %v20758_v2  ;;  %v20760_v17 = vld [vmem:[#allocation640_spill] sm:$0xff] }
 0x617   :  { %12285 = vmatprep.subr.bf16.mxu1 %v12284_v29  ;;  %v7400_v48 = vpop.f32.mrb[60].mxu0  ;;  %v12308_v44 = vpack.c.bf16 %v20761_v14, %v20760_v17  ;;  %v20762_v40 = vld [vmem:[#allocation664_spill] sm:$0xff]  ;;  %v20797_v17 = vld [vmem:[#allocation650_spill] sm:$0xff] }
 0x618   :  { %v7567_v35 = vpop.f32.mrb[68].mxu1  ;;  %v9941_v22 = vsel %vm9909_vm7, %v7400_v48, 0.0  ;;  %v11095_v43 = vpop.f32.mrb[61].mxu0  ;;  %v12340_v42 = vpack.c.bf16 %v20763_v1, %v20762_v40  ;;  %v20764_v29 = vld [vmem:[#allocation816_spill] sm:$0xff]  ;;  %v20799_v40 = vld [vmem:[#allocation674_spill] sm:$0xff] }
 0x619   :  { %v11114_v21 = vpop.f32.mrb[69].mxu1  ;;  %v9942_v47 = vadd.f32 %v9941_v22, %v18724_v6  ;;  %v9943_v23 = vsel %vm9909_vm7, %v7567_v35, 0.0  ;;  %v20736_v6 = vld [vmem:[#allocation611_spill] sm:$0xff]  ;;  %v20765_v48 = vld [vmem:[#allocation820_spill] sm:$0xff]  ;;  %v20767_v22 = vld [vmem:[#allocation642_spill] sm:$0xff] }
 0x61a   :  { %v12289_v28 = vpack.c.bf16 %v20737_v12, %v20736_v6  ;;  %v20766_v35 = vld [vmem:[#allocation639_spill] sm:$0xff]  ;;  %v20778_v12 = vld [vmem:[#allocation652_spill] sm:$0xff] }
 0x61b   :  { %v18813_v57 = vadd.f32 %v9943_v23, %v9942_v47  ;;  %v12310_v43 = vpack.c.bf16 %v20767_v22, %v20766_v35  ;;  %v20768_v21 = vld [vmem:[#allocation663_spill] sm:$0xff]  ;;  %v20769_v47 = vld [vmem:[#allocation666_spill] sm:$0xff]  ;;  %v20775_v23 = vld [vmem:[#allocation648_spill] sm:$0xff] }
 0x61c   :  { %v12342_v4 = vpack.c.bf16 %v20769_v47, %v20768_v21  ;;  %v20795_v2 = vld [vmem:[#allocation668_spill] sm:$0xff]  ;;  %v20802_v35 = vld [vmem:[#allocation677_spill] sm:$0xff]  ;;  %v20804_v21 = vld [vmem:[#allocation682_spill] sm:$0xff] }
 0x61d   :  { %12255 = vmatpush1.bf16.xpose.msra.mxu0 %v12254_v11  ;;  %v20771_v11 = vld [vmem:[#allocation649_spill] sm:$0xff]  ;;  %v20803_v22 = vld [vmem:[#allocation680_spill] sm:$0xff] }
 0x61e   :  { %12287 = vmatpush1.bf16.xpose.msra.mxu1 %v12286_v25  ;;  %12256 = vmatprep.subr.bf16.mxu0 %v12619_v27  ;;  %v20774_v25 = vld [vmem:[#allocation645_spill] sm:$0xff] }
 0x61f   :  { %12288 = vmatprep.subr.bf16.mxu1 %v12619_v27  ;;  %v12314_v9 = vpack.c.bf16 %v20775_v23, %v20774_v25  ;;  %v20805_v47 = vld [vmem:[#allocation685_spill] sm:$0xff]  ;;  %v20811_v23 = vld [vmem:[#allocation708_spill] sm:$0xff] }
 0x620   :  { %v20810_v25 = vld [vmem:[#allocation705_spill] sm:$0xff] }
 0x624   :  { %8665 = vmatmul.mubr.f32.vlgmr.msra.gmra.mrb[68].mxu0 %v20738_v37 }
 0x625   :  { %8832 = vmatmul.mubr.f32.vlgmr.msra.gmra.mrb[76].mxu1 %v20739_v0  ;;  %12259 = vmatpush3.bf16.xpose.msk.msra.mxu0 %vm17765_vm5, %v12257_v38  ;;  %v20777_v38 = vld [vmem:[#allocation672_spill] sm:$0xff] }
 0x626   :  { %12291 = vmatpush3.bf16.xpose.msk.msra.mxu1 %vm17765_vm5, %v12289_v28  ;;  %12260 = vmatprep.subr.bf16.mxu0 %v12619_v27  ;;  %v12346_v6 = vpack.c.bf16 %v20777_v38, %v20776_v51  ;;  %v20779_v28 = vld [vmem:[#allocation655_spill] sm:$0xff]  ;;  %v20780_v0 = vld [vmem:[#allocation676_spill] sm:$0xff] }
 0x627   :  { %12292 = vmatprep.subr.bf16.mxu1 %v12619_v27  ;;  %11245 = vmatprep.mubr.msk.f32.mxu0 %vm12620_vm6, %v19997_v53  ;;  %v12316_v37 = vpack.c.bf16 %v20779_v28, %v20778_v12  ;;  %v12348_v39 = vpack.c.bf16 %v20781_v31, %v20780_v0  ;;  %v20812_v51 = vld [vmem:[#allocation688_spill] sm:$0xff]  ;;  %v20813_v38 = vld [vmem:[#allocation691_spill] sm:$0xff]  ;;  %v20816_v0 = vld [vmem:[#allocation817_spill] sm:$0xff] }
 0x628   :  { %11264 = vmatprep.mubr.msk.f32.mxu1 %vm12620_vm6, %v19997_v53  ;;  %v20814_v12 = vld [vmem:[#allocation712_spill] sm:$0xff]  ;;  %v20815_v28 = vld [vmem:[#allocation715_spill] sm:$0xff] }
 0x629   :  { %v20817_v31 = vld [vmem:[#allocation823_spill] sm:$0xff] }
 0x62d   :  { %12263 = vmatpush3.bf16.xpose.msk.msra.mxu0 %vm17765_vm5, %v12261_v52 }
 0x62e   :  { %12295 = vmatpush3.bf16.xpose.msk.msra.mxu1 %vm17765_vm5, %v12293_v24  ;;  %12264 = vmatprep.subr.bf16.mxu0 %v12619_v27 }
 0x62f   :  { %12296 = vmatprep.subr.bf16.mxu1 %v12619_v27 }
 0x635   :  { %12267 = vmatpush3.bf16.xpose.msk.msra.mxu0 %vm17765_vm5, %v12265_v18  ;;  %v20782_v18 = vld [vmem:[#allocation651_spill] sm:$0xff] }
 0x636   :  { %12299 = vmatpush3.bf16.xpose.msk.msra.mxu1 %vm17765_vm5, %v12297_v63  ;;  %12268 = vmatprep.subr.bf16.mxu0 %v12619_v27  ;;  %v12318_v58 = vpack.c.bf16 %v20783_v61, %v20782_v18  ;;  %v20784_v63 = vld [vmem:[#allocation675_spill] sm:$0xff]  ;;  %v20824_v61 = vld [vmem:[#allocation694_spill] sm:$0xff] }
 0x637   :  { %12300 = vmatprep.subr.bf16.mxu1 %v12619_v27  ;;  %v12350_v41 = vpack.c.bf16 %v20785_v33, %v20784_v63  ;;  %v20826_v33 = vld [vmem:[#allocation718_spill] sm:$0xff] }
 0x63d   :  { %12271 = vmatpush3.bf16.xpose.msk.msra.mxu0 %vm17765_vm5, %v12269_v7 }
 0x63e   :  { %12303 = vmatpush3.bf16.xpose.msk.msra.mxu1 %vm17765_vm5, %v12301_v16  ;;  %12305 = vmatprep.subr.bf16.mxu0 %v12304_v32  ;;  %v20787_v16 = vld [vmem:[#allocation638_spill] sm:$0xff] }
 0x63f   :  { %12337 = vmatprep.subr.bf16.mxu1 %v12336_v49  ;;  %v12321_v19 = vpack.c.bf16 %v20787_v16, %v20786_v46  ;;  %v20792_v49 = vld [vmem:[#allocation641_spill] sm:$0xff]  ;;  %v20829_v16 = vld [vmem:[#allocation696_spill] sm:$0xff] }
 0x640   :  { %v12325_v3 = vpack.c.bf16 %v20793_v62, %v20792_v49  ;;  %v20828_v46 = vld [vmem:[#allocation693_spill] sm:$0xff]  ;;  %v20834_v62 = vld [vmem:[#allocation724_spill] sm:$0xff] }
 0x644   :  { %11246 = vmatmul.mubr.msk.f32.vlgmr.msra.gmra.mrb[68].mxu0 %vm4564_vm4, %v17674_v50  ;;  %v12312_v50 = vpack.c.bf16 %v20771_v11, %v20770_v60  ;;  %v20806_v60 = vld [vmem:[#allocation706_spill] sm:$0xff]  ;;  %v20807_v11 = vld [vmem:[#allocation709_spill] sm:$0xff] }
 0x645   :  { %11265 = vmatmul.mubr.msk.f32.vlgmr.msra.gmra.mrb[76].mxu1 %vm4564_vm4, %v17701_v54  ;;  %12307 = vmatpush1.bf16.xpose.msra.mxu0 %v12306_v8  ;;  %v12344_v54 = vpack.c.bf16 %v20773_v20, %v20772_v56  ;;  %v20794_v8 = vld [vmem:[#allocation665_spill] sm:$0xff]  ;;  %v20809_v20 = vld [vmem:[#allocation684_spill] sm:$0xff] }
 0x646   :  { %12339 = vmatpush1.bf16.xpose.msra.mxu1 %v12338_v26  ;;  %12309 = vmatprep.subr.bf16.mxu0 %v12308_v44  ;;  %v12357_v34 = vpack.c.bf16 %v20795_v2, %v20794_v8  ;;  %v20796_v26 = vld [vmem:[#allocation647_spill] sm:$0xff]  ;;  %v20808_v56 = vld [vmem:[#allocation681_spill] sm:$0xff] }
 0x647   :  { %12341 = vmatprep.subr.bf16.mxu1 %v12340_v42  ;;  %8998 = vmatprep.mubr.f32.mxu0 %v20764_v29  ;;  %v12329_v14 = vpack.c.bf16 %v20797_v17, %v20796_v26  ;;  %v20798_v44 = vld [vmem:[#allocation671_spill] sm:$0xff]  ;;  %v20800_v42 = vld [vmem:[#allocation653_spill] sm:$0xff]  ;;  %v20801_v29 = vld [vmem:[#allocation656_spill] sm:$0xff] }
 0x648   :  { %9165 = vmatprep.mubr.f32.mxu1 %v20765_v48  ;;  %v12361_v1 = vpack.c.bf16 %v20799_v40, %v20798_v44  ;;  %v12333_v48 = vpack.c.bf16 %v20801_v29, %v20800_v42  ;;  %v20836_v40 = vld [vmem:[#allocation699_spill] sm:$0xff] }
 0x649   :  { %v20838_v29 = vld [vmem:[#allocation723_spill] sm:$0xff] }
 0x64d   :  { %12311 = vmatpush1.bf16.xpose.msra.mxu0 %v12310_v43  ;;  %v12365_v43 = vpack.c.bf16 %v20803_v22, %v20802_v35 }
 0x64e   :  { %12343 = vmatpush1.bf16.xpose.msra.mxu1 %v12342_v4  ;;  %12313 = vmatprep.subr.bf16.mxu0 %v12312_v50  ;;  %v12368_v4 = vpack.c.bf16 %v20805_v47, %v20804_v21  ;;  %v12400_v50 = vpack.c.bf16 %v20807_v11, %v20806_v60  ;;  %v20840_v21 = vld [vmem:[#allocation683_spill] sm:$0xff]  ;;  %v20841_v47 = vld [vmem:[#allocation686_spill] sm:$0xff] }
 0x64f   :  { %12345 = vmatprep.subr.bf16.mxu1 %v12344_v54  ;;  %v12370_v54 = vpack.c.bf16 %v20809_v20, %v20808_v56  ;;  %v20843_v60 = vld [vmem:[#allocation710_spill] sm:$0xff]  ;;  %v20846_v20 = vld [vmem:[#allocation689_spill] sm:$0xff] }
 0x650   :  { %v20845_v56 = vld [vmem:[#allocation810_spill] sm:$0xff] }
 0x655   :  { %12315 = vmatpush1.bf16.xpose.msra.mxu0 %v12314_v9  ;;  %v12402_v9 = vpack.c.bf16 %v20811_v23, %v20810_v25  ;;  %v20848_v23 = vld [vmem:[#allocation713_spill] sm:$0xff] }
 0x656   :  { %12347 = vmatpush1.bf16.xpose.msra.mxu1 %v12346_v6  ;;  %12317 = vmatprep.subr.bf16.mxu0 %v12316_v37  ;;  %v12372_v6 = vpack.c.bf16 %v20813_v38, %v20812_v51  ;;  %v12404_v37 = vpack.c.bf16 %v20815_v28, %v20814_v12  ;;  %v20850_v38 = vld [vmem:[#allocation695_spill] sm:$0xff] }
 0x657   :  { %12349 = vmatprep.subr.bf16.mxu1 %v12348_v39  ;;  %v7734_v52 = vpop.f32.mrb[62].mxu0  ;;  %v20818_v39 = vld [vmem:[#allocation818_spill] sm:$0xff]  ;;  %v20852_v28 = vld [vmem:[#allocation719_spill] sm:$0xff] }
 0x658   :  { %v7901_v13 = vpop.f32.mrb[70].mxu1  ;;  %v9945_v5 = vsel %vm9909_vm7, %v7734_v52, 0.0  ;;  %v11133_v24 = vpop.f32.mrb[63].mxu0  ;;  %v20819_v52 = vld [vmem:[#allocation824_spill] sm:$0xff] }
 0x659   :  { %v11152_v59 = vpop.f32.mrb[71].mxu1  ;;  %v9946_v30 = vadd.f32 %v9945_v5, %v18813_v57  ;;  %v9947_v7 = vsel %vm9909_vm7, %v7901_v13, 0.0  ;;  %v20788_v57 = vld [vmem:[#allocation659_spill] sm:$0xff]  ;;  %v20821_v5 = vld [vmem:[#allocation690_spill] sm:$0xff] }
 0x65a   :  { %v12353_v32 = vpack.c.bf16 %v20789_v10, %v20788_v57  ;;  %v20820_v13 = vld [vmem:[#allocation687_spill] sm:$0xff]  ;;  %v20830_v57 = vld [vmem:[#allocation717_spill] sm:$0xff]  ;;  %v20831_v10 = vld [vmem:[#allocation720_spill] sm:$0xff] }
 0x65b   :  { %v18902_v36 = vadd.f32 %v9947_v7, %v9946_v30  ;;  %v12374_v24 = vpack.c.bf16 %v20821_v5, %v20820_v13  ;;  %v20822_v59 = vld [vmem:[#allocation711_spill] sm:$0xff]  ;;  %v20823_v30 = vld [vmem:[#allocation714_spill] sm:$0xff]  ;;  %v20856_v13 = vld [vmem:[#allocation725_spill] sm:$0xff] }
 0x65c   :  { %v12406_v18 = vpack.c.bf16 %v20823_v30, %v20822_v59  ;;  %v20857_v5 = vld [vmem:[#allocation728_spill] sm:$0xff]  ;;  %v20858_v59 = vld [vmem:[#allocation730_spill] sm:$0xff]  ;;  %v20859_v30 = vld [vmem:[#allocation733_spill] sm:$0xff] }
 0x65d   :  { %12319 = vmatpush1.bf16.xpose.msra.mxu0 %v12318_v58  ;;  %v20825_v58 = vld [vmem:[#allocation697_spill] sm:$0xff] }
 0x65e   :  { %12351 = vmatpush1.bf16.xpose.msra.mxu1 %v12350_v41  ;;  %12320 = vmatprep.subr.bf16.mxu0 %v12619_v27  ;;  %v12376_v63 = vpack.c.bf16 %v20825_v58, %v20824_v61  ;;  %v20827_v41 = vld [vmem:[#allocation721_spill] sm:$0xff]  ;;  %v20860_v61 = vld [vmem:[#allocation754_spill] sm:$0xff] }
 0x65f   :  { %12352 = vmatprep.subr.bf16.mxu1 %v12619_v27  ;;  %v12408_v7 = vpack.c.bf16 %v20827_v41, %v20826_v33  ;;  %v20861_v58 = vld [vmem:[#allocation757_spill] sm:$0xff]  ;;  %v20863_v41 = vld [vmem:[#allocation732_spill] sm:$0xff] }
 0x660   :  { %v20862_v33 = vld [vmem:[#allocation729_spill] sm:$0xff] }
 0x664   :  { %8999 = vmatmul.mubr.f32.vlgmr.msra.gmra.mrb[70].mxu0 %v20790_v55  ;;  %v20832_v55 = vld [vmem:[#allocation700_spill] sm:$0xff] }
 0x665   :  { %9166 = vmatmul.mubr.f32.vlgmr.msra.gmra.mrb[78].mxu1 %v20791_v45  ;;  %12323 = vmatpush3.bf16.xpose.msk.msra.mxu0 %vm17765_vm5, %v12321_v19  ;;  %v12378_v19 = vpack.c.bf16 %v20829_v16, %v20828_v46  ;;  %v20833_v45 = vld [vmem:[#allocation703_spill] sm:$0xff]  ;;  %v20864_v46 = vld [vmem:[#allocation753_spill] sm:$0xff]  ;;  %v20865_v16 = vld [vmem:[#allocation756_spill] sm:$0xff] }
 0x666   :  { %12355 = vmatpush3.bf16.xpose.msk.msra.mxu1 %vm17765_vm5, %v12353_v32  ;;  %12324 = vmatprep.subr.bf16.mxu0 %v12619_v27  ;;  %v12410_v32 = vpack.c.bf16 %v20831_v10, %v20830_v57  ;;  %v12380_v49 = vpack.c.bf16 %v20833_v45, %v20832_v55  ;;  %v20866_v57 = vld [vmem:[#allocation736_spill] sm:$0xff]  ;;  %v20867_v10 = vld [vmem:[#allocation739_spill] sm:$0xff] }
 0x667   :  { %12356 = vmatprep.subr.bf16.mxu1 %v12619_v27  ;;  %11283 = vmatprep.mubr.msk.f32.mxu0 %vm12620_vm6, %v19997_v53  ;;  %v20868_v55 = vld [vmem:[#allocation760_spill] sm:$0xff]  ;;  %v20869_v45 = vld [vmem:[#allocation763_spill] sm:$0xff] }
 0x668   :  { %11302 = vmatprep.mubr.msk.f32.mxu1 %vm12620_vm6, %v19997_v53 }
 0x66d   :  { %12327 = vmatpush3.bf16.xpose.msk.msra.mxu0 %vm17765_vm5, %v12325_v3  ;;  %v20835_v3 = vld [vmem:[#allocation727_spill] sm:$0xff] }
 0x66e   :  { %12359 = vmatpush3.bf16.xpose.msk.msra.mxu1 %vm17765_vm5, %v12357_v34  ;;  %12328 = vmatprep.subr.bf16.mxu0 %v12619_v27  ;;  %v12412_v8 = vpack.c.bf16 %v20835_v3, %v20834_v62  ;;  %v20870_v62 = vld [vmem:[#allocation821_spill] sm:$0xff]  ;;  %v20871_v3 = vld [vmem:[#allocation826_spill] sm:$0xff] }
 0x66f   :  { %12360 = vmatprep.subr.bf16.mxu1 %v12619_v27 }
 0x675   :  { %12331 = vmatpush3.bf16.xpose.msk.msra.mxu0 %vm17765_vm5, %v12329_v14 }
 0x676   :  { %12363 = vmatpush3.bf16.xpose.msk.msra.mxu1 %vm17765_vm5, %v12361_v1  ;;  %12332 = vmatprep.subr.bf16.mxu0 %v12619_v27  ;;  %v20837_v1 = vld [vmem:[#allocation702_spill] sm:$0xff] }
 0x677   :  { %12364 = vmatprep.subr.bf16.mxu1 %v12619_v27  ;;  %v12382_v42 = vpack.c.bf16 %v20837_v1, %v20836_v40  ;;  %v20878_v1 = vld [vmem:[#allocation742_spill] sm:$0xff] }
 0x67d   :  { %12335 = vmatpush3.bf16.xpose.msk.msra.mxu0 %vm17765_vm5, %v12333_v48  ;;  %v20839_v48 = vld [vmem:[#allocation726_spill] sm:$0xff] }
 0x67e   :  { %12367 = vmatpush3.bf16.xpose.msk.msra.mxu1 %vm17765_vm5, %v12365_v43  ;;  %12369 = vmatprep.subr.bf16.mxu0 %v12368_v4  ;;  %v12414_v35 = vpack.c.bf16 %v20839_v48, %v20838_v29  ;;  %v12385_v4 = vpack.c.bf16 %v20841_v47, %v20840_v21  ;;  %v20880_v48 = vld [vmem:[#allocation766_spill] sm:$0xff]  ;;  %v20882_v21 = vld [vmem:[#allocation741_spill] sm:$0xff]  ;;  %v20883_v47 = vld [vmem:[#allocation744_spill] sm:$0xff] }
 0x67f   :  { %12401 = vmatprep.subr.bf16.mxu1 %v12400_v50  ;;  %v20844_v50 = vld [vmem:[#allocation777_spill] sm:$0xff] }
 0x684   :  { %11284 = vmatmul.mubr.msk.f32.vlgmr.msra.gmra.mrb[70].mxu0 %vm4564_vm4, %v20816_v0 }
 0x685   :  { %11303 = vmatmul.mubr.msk.f32.vlgmr.msra.gmra.mrb[78].mxu1 %vm4564_vm4, %v20817_v31  ;;  %12371 = vmatpush1.bf16.xpose.msra.mxu0 %v12370_v54  ;;  %v20847_v54 = vld [vmem:[#allocation692_spill] sm:$0xff]  ;;  %v20854_v31 = vld [vmem:[#allocation701_spill] sm:$0xff] }
 0x686   :  { %12403 = vmatpush1.bf16.xpose.msra.mxu1 %v12402_v9  ;;  %12373 = vmatprep.subr.bf16.mxu0 %v12372_v6  ;;  %v12389_v25 = vpack.c.bf16 %v20847_v54, %v20846_v20  ;;  %v20849_v9 = vld [vmem:[#allocation716_spill] sm:$0xff]  ;;  %v20851_v6 = vld [vmem:[#allocation698_spill] sm:$0xff] }
 0x687   :  { %12405 = vmatprep.subr.bf16.mxu1 %v12404_v37  ;;  %9332 = vmatprep.mubr.f32.mxu0 %v20818_v39  ;;  %v12421_v51 = vpack.c.bf16 %v20849_v9, %v20848_v23  ;;  %v12393_v12 = vpack.c.bf16 %v20851_v6, %v20850_v38  ;;  %v20853_v37 = vld [vmem:[#allocation722_spill] sm:$0xff]  ;;  %v20855_v39 = vld [vmem:[#allocation704_spill] sm:$0xff] }
 0x688   :  { %9499 = vmatprep.mubr.f32.mxu1 %v20819_v52  ;;  %v12425_v0 = vpack.c.bf16 %v20853_v37, %v20852_v28  ;;  %v12397_v52 = vpack.c.bf16 %v20855_v39, %v20854_v31  ;;  %v20888_v54 = vld [vmem:[#allocation772_spill] sm:$0xff]  ;;  %v20890_v37 = vld [vmem:[#allocation747_spill] sm:$0xff] }
 0x689   :  { %v20892_v39 = vld [vmem:[#allocation771_spill] sm:$0xff] }
 0x68d   :  { %12375 = vmatpush1.bf16.xpose.msra.mxu0 %v12374_v24  ;;  %v12429_v24 = vpack.c.bf16 %v20857_v5, %v20856_v13 }
 0x68e   :  { %12407 = vmatpush1.bf16.xpose.msra.mxu1 %v12406_v18  ;;  %12377 = vmatprep.subr.bf16.mxu0 %v12376_v63  ;;  %v12432_v18 = vpack.c.bf16 %v20859_v30, %v20858_v59  ;;  %v12464_v63 = vpack.c.bf16 %v20861_v58, %v20860_v61  ;;  %v20894_v59 = vld [vmem:[#allocation731_spill] sm:$0xff]  ;;  %v20895_v30 = vld [vmem:[#allocation734_spill] sm:$0xff] }
 0x68f   :  { %12409 = vmatprep.subr.bf16.mxu1 %v12408_v7  ;;  %v12434_v7 = vpack.c.bf16 %v20863_v41, %v20862_v33  ;;  %v20896_v61 = vld [vmem:[#allocation755_spill] sm:$0xff]  ;;  %v20900_v41 = vld [vmem:[#allocation737_spill] sm:$0xff] }
 0x690   :  { %v20899_v33 = vld [vmem:[#allocation811_spill] sm:$0xff] }
 0x695   :  { %12379 = vmatpush1.bf16.xpose.msra.mxu0 %v12378_v19  ;;  %v12466_v19 = vpack.c.bf16 %v20865_v16, %v20864_v46  ;;  %v20902_v16 = vld [vmem:[#allocation761_spill] sm:$0xff] }
 0x696   :  { %12411 = vmatpush1.bf16.xpose.msra.mxu1 %v12410_v32  ;;  %12381 = vmatprep.subr.bf16.mxu0 %v12380_v49  ;;  %v12436_v32 = vpack.c.bf16 %v20867_v10, %v20866_v57  ;;  %v12468_v49 = vpack.c.bf16 %v20869_v45, %v20868_v55  ;;  %v20904_v10 = vld [vmem:[#allocation743_spill] sm:$0xff] }
 0x697   :  { %12413 = vmatprep.subr.bf16.mxu1 %v12412_v8  ;;  %v8068_v2 = vpop.f32.mrb[64].mxu0  ;;  %v20872_v8 = vld [vmem:[#allocation819_spill] sm:$0xff] }
 0x698   :  { %v8235_v34 = vpop.f32.mrb[72].mxu1  ;;  %v9949_v26 = vsel %vm9909_vm7, %v8068_v2, 0.0  ;;  %v11171_v17 = vpop.f32.mrb[65].mxu0  ;;  %v20873_v2 = vld [vmem:[#allocation825_spill] sm:$0xff]  ;;  %v20906_v45 = vld [vmem:[#allocation767_spill] sm:$0xff] }
 0x699   :  { %v11190_v14 = vpop.f32.mrb[73].mxu1  ;;  %v9950_v44 = vadd.f32 %v9949_v26, %v18902_v36  ;;  %v9951_v22 = vsel %vm9909_vm7, %v8235_v34, 0.0  ;;  %v20842_v36 = vld [vmem:[#allocation707_spill] sm:$0xff]  ;;  %v20875_v26 = vld [vmem:[#allocation738_spill] sm:$0xff] }
 0x69a   :  { %v12417_v11 = vpack.c.bf16 %v20843_v60, %v20842_v36  ;;  %v20874_v34 = vld [vmem:[#allocation735_spill] sm:$0xff]  ;;  %v20884_v36 = vld [vmem:[#allocation765_spill] sm:$0xff]  ;;  %v20885_v60 = vld [vmem:[#allocation768_spill] sm:$0xff] }
 0x69b   :  { %v18991_v43 = vadd.f32 %v9951_v22, %v9950_v44  ;;  %v12438_v17 = vpack.c.bf16 %v20875_v26, %v20874_v34  ;;  %v20876_v14 = vld [vmem:[#allocation759_spill] sm:$0xff]  ;;  %v20877_v44 = vld [vmem:[#allocation762_spill] sm:$0xff]  ;;  %v20910_v34 = vld [vmem:[#allocation773_spill] sm:$0xff] }
 0x69c   :  { %v12470_v40 = vpack.c.bf16 %v20877_v44, %v20876_v14  ;;  %v20911_v26 = vld [vmem:[#allocation776_spill] sm:$0xff]  ;;  %v20912_v14 = vld [vmem:[#allocation822_spill] sm:$0xff]  ;;  %v20913_v44 = vld [vmem:[#allocation827_spill] sm:$0xff] }
 0x69d   :  { %12383 = vmatpush1.bf16.xpose.msra.mxu0 %v12382_v42  ;;  %v20879_v42 = vld [vmem:[#allocation745_spill] sm:$0xff] }
 0x69e   :  { %12415 = vmatpush1.bf16.xpose.msra.mxu1 %v12414_v35  ;;  %12384 = vmatprep.subr.bf16.mxu0 %v12619_v27  ;;  %v12440_v29 = vpack.c.bf16 %v20879_v42, %v20878_v1  ;;  %v20881_v35 = vld [vmem:[#allocation769_spill] sm:$0xff] }
 0x69f   :  { %12416 = vmatprep.subr.bf16.mxu1 %v12619_v27  ;;  %v12472_v22 = vpack.c.bf16 %v20881_v35, %v20880_v48 }
 0x6a4   :  { %9333 = vmatmul.mubr.f32.vlgmr.msra.gmra.mrb[72].mxu0 %v20844_v50  ;;  %v20886_v50 = vld [vmem:[#allocation748_spill] sm:$0xff] }
 0x6a5   :  { %9500 = vmatmul.mubr.f32.vlgmr.msra.gmra.mrb[80].mxu1 %v20845_v56  ;;  %12387 = vmatpush3.bf16.xpose.msk.msra.mxu0 %vm17765_vm5, %v12385_v4  ;;  %v12442_v4 = vpack.c.bf16 %v20883_v47, %v20882_v21  ;;  %v20887_v56 = vld [vmem:[#allocation751_spill] sm:$0xff]  ;;  %v9982_v21 = vld [vmem:[%s19194_s5] sm:$0xff]  ;;  %v9983_v47 = vld [vmem:[%s19194_s5 + $0x8] sm:$0xff] }
 0x6a6   :  { %12419 = vmatpush3.bf16.xpose.msk.msra.mxu1 %vm17765_vm5, %v12417_v11  ;;  %12388 = vmatprep.subr.bf16.mxu0 %v12619_v27  ;;  %v12474_v11 = vpack.c.bf16 %v20885_v60, %v20884_v36  ;;  %v12444_v20 = vpack.c.bf16 %v20887_v56, %v20886_v50  ;;  %v9985_v36 = vld [vmem:[%s19194_s5 + $0x18] sm:$0xff]  ;;  %v9986_v56 = vld [vmem:[%s19194_s5 + $0x20] sm:$0xff] }
 0x6a7   :  { %12420 = vmatprep.subr.bf16.mxu1 %v12619_v27  ;;  %11321 = vmatprep.mubr.msk.f32.mxu0 %vm12620_vm6, %v19997_v53 }
 0x6a8   :  { %11340 = vmatprep.mubr.msk.f32.mxu1 %vm12620_vm6, %v19997_v53 }
 0x6ad   :  { %12391 = vmatpush3.bf16.xpose.msk.msra.mxu0 %vm17765_vm5, %v12389_v25  ;;  %v20889_v25 = vld [vmem:[#allocation775_spill] sm:$0xff] }
 0x6ae   :  { %12423 = vmatpush3.bf16.xpose.msk.msra.mxu1 %vm17765_vm5, %v12421_v51  ;;  %12392 = vmatprep.subr.bf16.mxu0 %v12619_v27  ;;  %v12476_v23 = vpack.c.bf16 %v20889_v25, %v20888_v54 }
 0x6af   :  { %12424 = vmatprep.subr.bf16.mxu1 %v12619_v27 }
 0x6b5   :  { %12395 = vmatpush3.bf16.xpose.msk.msra.mxu0 %vm17765_vm5, %v12393_v12 }
 0x6b6   :  { %12427 = vmatpush3.bf16.xpose.msk.msra.mxu1 %vm17765_vm5, %v12425_v0  ;;  %12396 = vmatprep.subr.bf16.mxu0 %v12619_v27  ;;  %v20891_v0 = vld [vmem:[#allocation750_spill] sm:$0xff] }
 0x6b7   :  { %12428 = vmatprep.subr.bf16.mxu1 %v12619_v27  ;;  %v12446_v31 = vpack.c.bf16 %v20891_v0, %v20890_v37 }
 0x6bd   :  { %12399 = vmatpush3.bf16.xpose.msk.msra.mxu0 %vm17765_vm5, %v12397_v52  ;;  %v20893_v52 = vld [vmem:[#allocation774_spill] sm:$0xff] }
 0x6be   :  { %12431 = vmatpush3.bf16.xpose.msk.msra.mxu1 %vm17765_vm5, %v12429_v24  ;;  %12433 = vmatprep.subr.bf16.mxu0 %v12432_v18  ;;  %v12478_v13 = vpack.c.bf16 %v20893_v52, %v20892_v39  ;;  %v12449_v18 = vpack.c.bf16 %v20895_v30, %v20894_v59 }
 0x6bf   :  { %12465 = vmatprep.subr.bf16.mxu1 %v12464_v63  ;;  %v20898_v63 = vld [vmem:[#allocation778_spill] sm:$0xff] }
 0x6c4   :  { %11322 = vmatmul.mubr.msk.f32.vlgmr.msra.gmra.mrb[72].mxu0 %vm4564_vm4, %v20870_v62 }
 0x6c5   :  { %11341 = vmatmul.mubr.msk.f32.vlgmr.msra.gmra.mrb[80].mxu1 %vm4564_vm4, %v20871_v3  ;;  %12435 = vmatpush1.bf16.xpose.msra.mxu0 %v12434_v7  ;;  %v20901_v7 = vld [vmem:[#allocation740_spill] sm:$0xff]  ;;  %v20908_v3 = vld [vmem:[#allocation749_spill] sm:$0xff] }
 0x6c6   :  { %12467 = vmatpush1.bf16.xpose.msra.mxu1 %v12466_v19  ;;  %12437 = vmatprep.subr.bf16.mxu0 %v12436_v32  ;;  %v12453_v46 = vpack.c.bf16 %v20901_v7, %v20900_v41  ;;  %v20903_v19 = vld [vmem:[#allocation764_spill] sm:$0xff]  ;;  %v20905_v32 = vld [vmem:[#allocation746_spill] sm:$0xff] }
 0x6c7   :  { %12469 = vmatprep.subr.bf16.mxu1 %v12468_v49  ;;  %9666 = vmatprep.mubr.f32.mxu0 %v20872_v8  ;;  %v12485_v57 = vpack.c.bf16 %v20903_v19, %v20902_v16  ;;  %v12457_v55 = vpack.c.bf16 %v20905_v32, %v20904_v10  ;;  %v20907_v49 = vld [vmem:[#allocation770_spill] sm:$0xff]  ;;  %v20909_v8 = vld [vmem:[#allocation752_spill] sm:$0xff] }
 0x6c8   :  { %9833 = vmatprep.mubr.f32.mxu1 %v20873_v2  ;;  %v12489_v62 = vpack.c.bf16 %v20907_v49, %v20906_v45  ;;  %v12461_v2 = vpack.c.bf16 %v20909_v8, %v20908_v3  ;;  %v10473_v16 = vld [vmem:[%s19195_s6] ss:$0 sm:$0xff] }
 0x6cd   :  { %12439 = vmatpush1.bf16.xpose.msra.mxu0 %v12438_v17  ;;  %v12493_v17 = vpack.c.bf16 %v20911_v26, %v20910_v34 }
 0x6ce   :  { %12471 = vmatpush1.bf16.xpose.msra.mxu1 %v12470_v40  ;;  %12441 = vmatprep.subr.bf16.mxu0 %v12440_v29 }
 0x6cf   :  { %12473 = vmatprep.subr.bf16.mxu1 %v12472_v22 }
 0x6d5   :  { %12443 = vmatpush1.bf16.xpose.msra.mxu0 %v12442_v4  ;;  %v12497_v4 = vpack.c.bf16 %v9983_v47, %v9982_v21 }
 0x6d6   :  { %12475 = vmatpush1.bf16.xpose.msra.mxu1 %v12474_v11  ;;  %12445 = vmatprep.subr.bf16.mxu0 %v12444_v20  ;;  %v9987_v20 = vld [vmem:[%s19194_s5 + $0x28] sm:$0xff] }
 0x6d7   :  { %12477 = vmatprep.subr.bf16.mxu1 %v12476_v23  ;;  %v8402_v9 = vpop.f32.mrb[66].mxu0 }
 0x6d8   :  { %v8569_v51 = vpop.f32.mrb[74].mxu1  ;;  %v9953_v38 = vsel %vm9909_vm7, %v8402_v9, 0.0  ;;  %v11209_v6 = vpop.f32.mrb[67].mxu0  ;;  %v12503_v9 = vpack.c.bf16 %v9987_v20, %v9986_v56 }
 0x6d9   :  { %v11228_v12 = vpop.f32.mrb[75].mxu1  ;;  %v9954_v28 = vadd.f32 %v9953_v38, %v18991_v43  ;;  %v9955_v5 = vsel %vm9909_vm7, %v8569_v51, 0.0  ;;  %v20897_v43 = vld [vmem:[#allocation758_spill] sm:$0xff] }
 0x6da   :  { %v12481_v58 = vpack.c.bf16 %v20897_v43, %v20896_v61  ;;  %v9988_v12 = vld [vmem:[%s19194_s5 + $0x30] sm:$0xff] }
 0x6db   :  { %v9956_v24 = vadd.f32 %v9955_v5, %v9954_v28  ;;  %v9989_v28 = vld [vmem:[%s19194_s5 + $0x38] sm:$0xff] }
 0x6dc   :  { %v12506_v37 = vpack.c.bf16 %v9989_v28, %v9988_v12 }
 0x6dd   :  { %12447 = vmatpush1.bf16.xpose.msra.mxu0 %v12446_v31 }
 0x6de   :  { %12479 = vmatpush1.bf16.xpose.msra.mxu1 %v12478_v13  ;;  %12448 = vmatprep.subr.bf16.mxu0 %v12619_v27 }
 0x6df   :  { %12480 = vmatprep.subr.bf16.mxu1 %v12619_v27 }
 0x6e4   :  { %9667 = vmatmul.mubr.f32.vlgmr.msra.gmra.mrb[74].mxu0 %v20898_v63 }
 0x6e5   :  { %9834 = vmatmul.mubr.f32.vlgmr.msra.gmra.mrb[82].mxu1 %v20899_v33  ;;  %12451 = vmatpush3.bf16.xpose.msk.msra.mxu0 %vm17765_vm5, %v12449_v18  ;;  %v10472_v33 = vld [vmem:[%s19193_s4] ss:$0 sm:$0xff]  ;;  %s12621_s4 = smov [#allocation4]  }
 0x6e6   :  { %12483 = vmatpush3.bf16.xpose.msk.msra.mxu1 %vm17765_vm5, %v12481_v58  ;;  %12452 = vmatprep.subr.bf16.mxu0 %v12619_v27  ;;  %s10090_s22 = sshll.u32 %s12621_s4, 4  ;;  %s10091_s22 = int_to_ptr.vmem [resolvable:$true] %s10090_s22 }
 0x6e7   :  { %12484 = vmatprep.subr.bf16.mxu1 %v12619_v27  ;;  %11359 = vmatprep.mubr.msk.f32.mxu0 %vm12620_vm6, %v19997_v53  ;;  %s12588_s6 = scalar_lea.vmem %s10091_s22, 32  ;;  %p12593_p1 = scmp.lt.s32.totalorder %s10091_s22, %s10091_s22 }
 0x6e8   :  { %11378 = vmatprep.mubr.msk.f32.mxu1 %vm12620_vm6, %v19997_v53  ;;  %p12589_p0 = scmp.ne.s32.totalorder %s10091_s22, %s12588_s6  ;;  %p12594_p2 = scmp.lt.s32.totalorder %s12588_s6, %s12588_s6 }
 0x6ea   :  { %p12595_p3 = por %p12594_p2, %p12593_p1 }
 0x6ec   :  { %p12596_p4 = pnand %p12595_p3, %p12589_p0 }
 0x6ed   :  { %12455 = vmatpush3.bf16.xpose.msk.msra.mxu0 %vm17765_vm5, %v12453_v46 }
 0x6ee   :  { %12487 = vmatpush3.bf16.xpose.msk.msra.mxu1 %vm17765_vm5, %v12485_v57  ;;  %12456 = vmatprep.subr.bf16.mxu0 %v12619_v27 }
 0x6ef   :  { %12488 = vmatprep.subr.bf16.mxu1 %v12619_v27 }
 0x6f5   :  { %12459 = vmatpush3.bf16.xpose.msk.msra.mxu0 %vm17765_vm5, %v12457_v55 }
 0x6f6   :  { %12491 = vmatpush3.bf16.xpose.msk.msra.mxu1 %vm17765_vm5, %v12489_v62  ;;  %12460 = vmatprep.subr.bf16.mxu0 %v12619_v27 }
 0x6f7   :  { %12492 = vmatprep.subr.bf16.mxu1 %v12619_v27 }
 0x6fd   :  { %12463 = vmatpush3.bf16.xpose.msk.msra.mxu0 %vm17765_vm5, %v12461_v2 }
 0x6fe   :  { %12495 = vmatpush3.bf16.xpose.msk.msra.mxu1 %vm17765_vm5, %v12493_v17  ;;  %12496 = vmatprep.subr.bf16.mxu0 %v12619_v27 }
 0x704   :  { %11360 = vmatmul.mubr.msk.f32.vlgmr.msra.gmra.mrb[74].mxu0 %vm4564_vm4, %v20912_v14 }
 0x705   :  { %11379 = vmatmul.mubr.msk.f32.vlgmr.msra.gmra.mrb[82].mxu1 %vm4564_vm4, %v20913_v44  ;;  %11397 = vmatprep.mubr.msk.f32.mxu0 %vm12620_vm6, %v19997_v53  ;;  %v9984_v53 = vld [vmem:[%s19194_s5 + $0x10] sm:$0xff] }
 0x706   :  { %12498 = vmatpush3.bf16.msra.mxu0 %v12497_v4  ;;  %v12500_v60 = vpack.c.bf16 %v9985_v36, %v9984_v53 }
 0x707   :  { %12499 = vmatprep.subr.bf16.mxu0 %v12619_v27 }
 0x70a   :  { %12501 = vmatpush3.bf16.msra.mxu0 %v12500_v60 }
 0x70b   :  { %12502 = vmatprep.subr.bf16.mxu0 %v12619_v27 }
 0x70e   :  { %12504 = vmatpush3.bf16.msra.mxu0 %v12503_v9 }
 0x70f   :  { %12505 = vmatprep.subr.bf16.mxu0 %v12619_v27 }
 0x712   :  { %12507 = vmatpush3.bf16.msra.mxu0 %v12506_v37 }
 0x717   :  { %v8736_v40 = vpop.f32.mrb[68].mxu0 }
 0x718   :  { %v8903_v1 = vpop.f32.mrb[76].mxu1  ;;  %v9957_v42 = vsel %vm9909_vm7, %v8736_v40, 0.0  ;;  %v11247_v29 = vpop.f32.mrb[69].mxu0 }
 0x719   :  { %v11266_v48 = vpop.f32.mrb[77].mxu1  ;;  %v9958_v35 = vadd.f32 %v9957_v42, %v9956_v24  ;;  %v9959_v15 = vsel %vm9909_vm7, %v8903_v1, 0.0 }
 0x71b   :  { %v9960_v22 = vadd.f32 %v9959_v15, %v9958_v35 }
 0x757   :  { %v9070_v11 = vpop.f32.mrb[70].mxu0 }
 0x758   :  { %v9237_v50 = vpop.f32.mrb[78].mxu1  ;;  %v9961_v54 = vsel %vm9909_vm7, %v9070_v11, 0.0  ;;  %v11285_v25 = vpop.f32.mrb[71].mxu0 }
 0x759   :  { %v11304_v23 = vpop.f32.mrb[79].mxu1  ;;  %v9962_v51 = vadd.f32 %v9961_v54, %v9960_v22  ;;  %v9963_v38 = vsel %vm9909_vm7, %v9237_v50, 0.0 }
 0x75b   :  { %v9964_v6 = vadd.f32 %v9963_v38, %v9962_v51 }
 0x797   :  { %v9404_v0 = vpop.f32.mrb[72].mxu0 }
 0x798   :  { %v9571_v31 = vpop.f32.mrb[80].mxu1  ;;  %v9965_v39 = vsel %vm9909_vm7, %v9404_v0, 0.0  ;;  %v11323_v52 = vpop.f32.mrb[73].mxu0 }
 0x799   :  { %v11342_v13 = vpop.f32.mrb[81].mxu1  ;;  %v9966_v5 = vadd.f32 %v9965_v39, %v9964_v6  ;;  %v9967_v24 = vsel %vm9909_vm7, %v9571_v31, 0.0 }
 0x79b   :  { %v9968_v27 = vadd.f32 %v9967_v24, %v9966_v5 }
 0x7d7   :  { %v9738_v59 = vpop.f32.mrb[74].mxu0 }
 0x7d8   :  { %v9905_v30 = vpop.f32.mrb[82].mxu1  ;;  %v9969_v18 = vsel %vm9909_vm7, %v9738_v59, 0.0  ;;  %v11361_v61 = vpop.f32.mrb[75].mxu0 }
 0x7d9   :  { %v11380_v43 = vpop.f32.mrb[83].mxu1  ;;  %v9970_v58 = vadd.f32 %v9969_v18, %v9968_v27  ;;  %v9971_v63 = vsel %vm9909_vm7, %v9905_v30, 0.0 }
 0x7db   :  { %v9972_v41 = vadd.f32 %v9971_v63, %v9970_v58 }
 0x7dd   :  { %v9980_v7 = vadd.f32 %v10472_v33, %v9972_v41 }
 0x7df   :  { %v9981_v46 = vmax.f32 %v9980_v7, 0.0 }
 0x7e1   :  { %11398 = vmatmul.mubr.msk.f32.vlgmr.msra.gmra.mrb[76].mxu0 %vm9997_vm8, %v9981_v46 }
 0x8b4   :  { %v10067_v19 = vpop.f32.mrb[76].mxu0 }
 0x8b5   :  { %v10068_v57 = vadd.f32 %v10473_v16, %v10067_v19  ;;  %v11399_v10 = vpop.f32.mrb[77].mxu0 }
 0x8b7   :  { %v10072_v32 = vsel %vm10071_vm9, %v10068_v57, -inf }
 0x8b8   :  { %10073 = vmax.xlane.f32.xlu0 %v10072_v32 }
 0x945   :  { %v10074_v55 = vpop.xlane.xlu0 %10073 }
 0x946   :  { %v10075_v45 = vsub.f32 %v10068_v57, %v10074_v55 }
 0x948   :  { %v10076_v49 = vmul.f32 1.442695, %v10075_v45 }
 0x94a   :  { %12584 = vpow2.f32 %v10076_v49 }
 0x954   :  { %v12585_v62 = vpop.eup %12584 }
 0x955   :  { %v10078_v3 = vsel %vm10071_vm9, %v12585_v62, 0.0 }
 0x956   :  { %10079 = vadd.xlane.f32.xlu0 %v10078_v3 }
 0x9e3   :  { %v10080_v8 = vpop.xlane.xlu0 %10079 }
 0x9e4   :  { %12586 = vrcp.f32 %v10080_v8 }
 0x9ee   :  { %v12587_v2 = vpop.eup %12586 }
 0x9ef   :  { %v10082_v34 = vmul.f32 %v12587_v2, %v12585_v62 }
 0x9f1   :  { %10083 = vst.msk [vmem:[#allocation4] sm:$0x3] %vm10071_vm9, %v10082_v34 }
 0x9f2   :  { %12599 = shalt.err (!%p12596_p4)
}
 0x9f3   :  { %s12600_s25 = scalar_lea.hbm %s19196_s7, 32 }
 0x9f4   :  { %p12601_p5 = scmp.ne.s32.totalorder %s19196_s7, %s12600_s25  ;;  %p12604_p6 = scmp.lt.u32.totalorder %s12600_s25, %s19196_s7 }
 0x9f6   :  { %p12606_p7 = pnand %p12604_p6, %p12601_p5 }
 0x9f8   :  { %12609 = shalt.err (!%p12606_p7)
}
 0x9f9   :  { %10093 = dma.vmem_to_hbm [thread:$0]  %s10091_s22, 32, %s19196_s7, [#allocation5]  }
 0x9fa   :  { %12612 = dma.done.wait [#allocation5], 32  }
 0x9fb   :  { %12613 = vsyncadd [#allocation5], 4294967264 }
 0x9fc   :  { %10097 = vsyncpa [#allocation5], 1 }
 0x9fd   :  { %10098 = vsyncmov [#allocation3] }
 0xa00   :  { %s10099_s30 = vpop.sfrf %10098 }
 0xa01   :  { %p10475_p8 = scmp.ne.s32.totalorder %s10099_s30, 0 }
 0xa03   :  { %10103 = shalt.err (%p10475_p8)  }

</bundles_post_ra>
